<compile_context>
chip_gen: v6e
topology: v6e:2x2x1
jax: 0.10.0
libtpu: 0.0.40
codegen_flags: <defaults>
</compile_context>

<pallas_src>
import functools

import jax
import jax.numpy as jnp
from jax import lax
from jax.experimental import pallas as pl
from jax.experimental.pallas import tpu as pltpu

LANES = 128


# ----------------------------- Pallas kernels ------------------------------ #

def _conv_relu_pool_kernel(p_ref, w_ref, b_ref, o_ref):
    """im2col conv as GEMM + bias + ReLU + fused 2x2 maxpool.

    p_ref is (4, tm, K): 4 quadrant row-blocks (one per 2x2 pool tap); the
    maxpool is an elementwise max over the 4 per-quadrant GEMM results.
    """
    w = w_ref[...]                                           # (K, 128)
    b = b_ref[...]                                           # (1, 128)

    def tap(q):
        y = jnp.dot(p_ref[q], w, preferred_element_type=jnp.float32) + b
        return jnp.maximum(y, 0.0)

    o = jnp.maximum(jnp.maximum(tap(0), tap(1)), jnp.maximum(tap(2), tap(3)))
    o_ref[...] = o.astype(o_ref.dtype)


def _conv2_mlp_kernel(p_ref, w2_ref, b2_ref, fw1_ref, fb1_ref,
                      fw2_ref, fb2_ref, fw3_ref, fb3_ref, o_ref, *, nb, ntap):
    """conv2+ReLU+pool, flatten, fc1+ReLU, fc2+ReLU, fc3 — fully fused.

    Conv2 patch rows are ordered (tap, n) with nb (a multiple of 8) rows per
    tap, so the flatten is ntap vreg-aligned static row slices concatenated
    along lanes; the NCHW flatten permutation is already folded into fw1.
    """
    w2 = w2_ref[...]                                         # (54, 128)
    b2 = b2_ref[...]                                         # (1, 128)

    def tap(q):
        y = jnp.dot(p_ref[q], w2, preferred_element_type=jnp.float32) + b2
        return jnp.maximum(y, 0.0)

    # conv2 + bias + ReLU + fused 2x2 maxpool over the 4 quadrant blocks.
    a2 = jnp.maximum(jnp.maximum(tap(0), tap(1)),
                     jnp.maximum(tap(2), tap(3)))            # (ntap*nb, 128)

    # Flatten to (nb, ntap*128): 8-aligned static slices + lane concat only.
    x1 = jnp.concatenate([a2[t * nb:(t + 1) * nb, :] for t in range(ntap)],
                         axis=1)                             # (nb, ntap*128)

    h = jnp.dot(x1, fw1_ref[...], preferred_element_type=jnp.float32) + fb1_ref[...]
    h = jnp.maximum(h, 0.0)
    h = jnp.dot(h, fw2_ref[...], preferred_element_type=jnp.float32) + fb2_ref[...]
    h = jnp.maximum(h, 0.0)
    o = jnp.dot(h, fw3_ref[...], preferred_element_type=jnp.float32) + fb3_ref[...]
    o_ref[...] = o.astype(o_ref.dtype)


# ------------------------------- wrappers ----------------------------------- #

def conv_relu_pool(patches, w, b):
    """relu(conv(x)) + 2x2/2 maxpool on quadrant-stacked im2col patches.

    patches: (4, m, K); output (m, 128).  Gridded over pooled-row blocks and
    marked "parallel" so v7x can split it across its two TensorCores.
    """
    _, m, kk = patches.shape
    c = w.shape[1]
    grid_m = 2 if m % 16 == 0 else 1
    tm = m // grid_m
    return pl.pallas_call(
        _conv_relu_pool_kernel,
        out_shape=jax.ShapeDtypeStruct((m, c), jnp.float32),
        grid=(grid_m,),
        in_specs=[pl.BlockSpec((4, tm, kk), lambda i: (0, i, 0)),
                  pl.BlockSpec((kk, c), lambda i: (0, 0)),
                  pl.BlockSpec((1, c), lambda i: (0, 0))],
        out_specs=pl.BlockSpec((tm, c), lambda i: (i, 0)),
        compiler_params=pltpu.CompilerParams(
            dimension_semantics=("parallel",)),
    )(patches, w, b)


def conv2_mlp(p2, kp, nb):
    """Fused conv2+pool+MLP.  Single full-array VMEM block (no grid needed)."""
    ntap = p2.shape[1] // nb
    kern = functools.partial(_conv2_mlp_kernel, nb=nb, ntap=ntap)
    return pl.pallas_call(
        kern,
        out_shape=jax.ShapeDtypeStruct((nb, LANES), jnp.float32),
    )(p2, kp["w2"], kp["b2"], kp["fw1"], kp["fb1"],
      kp["fw2"], kp["fb2"], kp["fw3"], kp["fb3"])


# ------------------------------- JAX glue ---------------------------------- #

def _im2col_pool_quads(x_nhwc, k, *, p_major):
    """Valid kxk conv patches, quadrant-stacked for a fused 2x2/2 maxpool.

    Returns (4, rows, k*k*C); block q=(di,dj) holds the conv patch at spatial
    (2*ho+di, 2*wo+dj) for pooled output (ho, wo).  Patch columns are ordered
    (i, j, c), matching the packed conv weight rows.  Rows within a block are
    (n, ho, wo) if not p_major else (ho, wo, n) — the latter makes the fused
    fc1 flatten a set of 8-aligned row slices.
    """
    n, h, w, c = x_nhwc.shape
    hc, wc = h - k + 1, w - k + 1
    hp, wp = hc // 2, wc // 2
    cols = [x_nhwc[:, i:i + hc, j:j + wc, :] for i in range(k) for j in range(k)]
    p = jnp.concatenate(cols, axis=-1)                        # (n, hc, wc, kkC)
    quads = []
    for di in (0, 1):
        for dj in (0, 1):
            q = p[:, di:2 * hp:2, dj:2 * wp:2, :]             # (n, hp, wp, kkC)
            if p_major:
                q = jnp.transpose(q, (1, 2, 0, 3))            # (hp, wp, n, kkC)
            quads.append(q.reshape(n * hp * wp, k * k * c))
    return jnp.stack(quads, axis=0)


def init_params(key):
    """Raw LeNet parameters in (unpadded) GEMM-friendly layout."""
    ks = jax.random.split(key, 10)

    def conv_w(k, co, ci, kk):
        # PyTorch Conv2d weight (co, ci, kh, kw) -> GEMM layout (kh*kw*ci, co)
        # with row order (i, j, c), matching the im2col patch columns.
        w = 0.1 * jax.random.normal(k, (co, ci, kk, kk), jnp.float32)
        return jnp.transpose(w, (2, 3, 1, 0)).reshape(kk * kk * ci, co)

    def fc_w(k, fin, fout):
        # PyTorch Linear weight is (fout, fin); stored transposed for x @ W.
        return 0.1 * jax.random.normal(k, (fin, fout), jnp.float32)

    vec = lambda k, c: 0.1 * jax.random.normal(k, (c,), jnp.float32)

    return dict(
        w1=conv_w(ks[0], 6, 1, 5), b1=vec(ks[1], 6),
        w2=conv_w(ks[2], 16, 6, 3), b2=vec(ks[3], 16),
        fw1=fc_w(ks[4], 16 * 6 * 6, 120), fb1=vec(ks[5], 120),
        fw2=fc_w(ks[6], 120, 84), fb2=vec(ks[7], 84),
        fw3=fc_w(ks[8], 84, 10), fb3=vec(ks[9], 10),
    )


def pack_params(p):
    """One-time packing for the kernels: zero-pad every feature dim to 128
    lanes (so padded output lanes stay exactly 0 through bias+ReLU), store
    biases as (1, 128), and fold the PyTorch NCHW flatten permutation into
    fc1's rows (new row index = tap*128 + channel, tap = h*6 + w)."""
    pc = lambda w: jnp.pad(w, ((0, 0), (0, LANES - w.shape[1])))
    pb = lambda b: jnp.pad(b, (0, LANES - b.shape[0])).reshape(1, LANES)

    fw1 = p["fw1"].reshape(16, 36, 120)             # [c, tap, f] (NCHW flatten)
    fw1 = jnp.transpose(fw1, (1, 0, 2))             # [tap, c, f]
    fw1 = jnp.pad(fw1, ((0, 0), (0, LANES - 16), (0, LANES - 120)))
    fw1 = fw1.reshape(36 * LANES, LANES)            # row = tap*128 + c

    fw2 = jnp.pad(p["fw2"], ((0, LANES - 120), (0, LANES - 84)))
    fw3 = jnp.pad(p["fw3"], ((0, LANES - 84), (0, LANES - 10)))

    return dict(
        w1=pc(p["w1"]), b1=pb(p["b1"]),
        w2=pc(p["w2"]), b2=pb(p["b2"]),
        fw1=fw1, fb1=pb(p["fb1"]),
        fw2=fw2, fb2=pb(p["fb2"]),
        fw3=fw3, fb3=pb(p["fb3"]),
    )


def lenet_forward(x_nchw, kp):
    n = x_nchw.shape[0]
    nb = -(-n // 8) * 8                            # sublane-align the batch
    x = jnp.transpose(x_nchw, (0, 2, 3, 1))        # NHWC
    x = jnp.pad(x, ((0, nb - n), (0, 0), (0, 0), (0, 0)))

    # x = max_pool2d(relu(conv1(x)), 2)                 -- Pallas kernel 1
    p1 = _im2col_pool_quads(x, 5, p_major=False)          # (4, nb*196, 25)
    a1 = conv_relu_pool(p1, kp["w1"], kp["b1"])           # (nb*196, 128)

    # conv2 im2col glue (real 6 channels only; rows (tap, n) per quadrant)
    a1 = a1.reshape(nb, 14, 14, LANES)[..., :6]
    p2 = _im2col_pool_quads(a1, 3, p_major=True)          # (4, nb*36, 54)

    # max_pool2d(relu(conv2)) + flatten + fc1/fc2/fc3    -- Pallas kernel 2
    out = conv2_mlp(p2, kp, nb)                           # (nb, 128)
    return out[:n, :10]


# --------------------------- pure-JAX reference ----------------------------- #

def _lenet_ref(x_nchw, p):
    hp = lax.Precision.HIGHEST
    x = jnp.transpose(x_nchw, (0, 2, 3, 1))
    pool = lambda y: y.reshape(y.shape[0], y.shape[1] // 2, 2,
                               y.shape[2] // 2, 2, y.shape[3]).max(axis=(2, 4))
    conv = lambda y, w: lax.conv_general_dilated(
        y, w, (1, 1), "VALID", dimension_numbers=("NHWC", "HWIO", "NHWC"),
        precision=hp)
    y = pool(jnp.maximum(conv(x, p["w1"].reshape(5, 5, 1, 6)) + p["b1"], 0.0))
    y = pool(jnp.maximum(conv(y, p["w2"].reshape(3, 3, 6, 16)) + p["b2"], 0.0))
    y = jnp.transpose(y, (0, 3, 1, 2)).reshape(y.shape[0], -1)   # NCHW flatten
    y = jnp.maximum(jnp.dot(y, p["fw1"], precision=hp) + p["fb1"], 0.0)
    y = jnp.maximum(jnp.dot(y, p["fw2"], precision=hp) + p["fb2"], 0.0)
    return jnp.dot(y, p["fw3"], precision=hp) + p["fb3"]


if __name__ == "__main__":
    key = jax.random.PRNGKey(0)
    k_x, k_p = jax.random.split(key)

    # fc1 = Linear(16*6*6, 120) implies 1-channel 32x32 inputs (classic LeNet).
    N = 2
    x = jax.random.normal(k_x, (N, 1, 32, 32), jnp.float32)
    raw = init_params(k_p)
    packed = pack_params(raw)        # one-time weight padding / permutation

    fwd = jax.jit(lenet_forward)
    out = fwd(x, packed)
    jax.block_until_ready(out)

    assert out.shape == (N, 10), out.shape
    ref = _lenet_ref(x, raw)
    err = float(jnp.max(jnp.abs(out - ref)))
    # Tightened from 5e-2; covers the MXU's default (non-HIGHEST) f32 matmul
    # precision while still catching any layout/permutation bug (those show
    # up as O(0.1-1) errors).
    assert jnp.allclose(out, ref, atol=2e-2, rtol=2e-2), err
    print("KERNEL_OK")
</pallas_src>

<mosaic_0001>
module attributes {stable_mosaic.version = 11 : i64} {
  func.func @_conv_relu_pool_kernel(%arg0: i32, %arg1: memref<4x784x25xf32, #tpu.memory_space<vmem>>, %arg2: memref<25x128xf32, #tpu.memory_space<vmem>>, %arg3: memref<1x128xf32, #tpu.memory_space<vmem>>, %arg4: memref<784x128xf32, #tpu.memory_space<vmem>>) attributes {dimension_semantics = [#tpu.dimension_semantics<parallel>], iteration_bounds = array<i64: 2>, scalar_prefetch = 0 : i64, scratch_operands = 0 : i64, tpu.core_type = #tpu.core_type<tc>, window_params = [{transform_indices = @transform_0, window_bounds = array<i64: 4, 784, 25>}, {pipeline_mode = #tpu.pipeline_mode<synchronous>, transform_indices = @transform_1, window_bounds = array<i64: 25, 128>}, {pipeline_mode = #tpu.pipeline_mode<synchronous>, transform_indices = @transform_2, window_bounds = array<i64: 1, 128>}, {transform_indices = @transform_3, window_bounds = array<i64: 784, 128>}]} {
    %c0 = arith.constant 0 : index
    %c0_0 = arith.constant 0 : index
    %0 = vector.load %arg2[%c0, %c0_0] : memref<25x128xf32, #tpu.memory_space<vmem>>, vector<25x128xf32>
    %c0_1 = arith.constant 0 : index
    %c0_2 = arith.constant 0 : index
    %1 = vector.load %arg3[%c0_1, %c0_2] : memref<1x128xf32, #tpu.memory_space<vmem>>, vector<1x128xf32>
    %c0_3 = arith.constant 0 : index
    %c0_4 = arith.constant 0 : index
    %c0_5 = arith.constant 0 : index
    %2 = vector.load %arg1[%c0_3, %c0_4, %c0_5] : memref<4x784x25xf32, #tpu.memory_space<vmem>>, vector<1x784x25xf32>
    %3 = vector.shape_cast %2 : vector<1x784x25xf32> to vector<784x25xf32>
    %cst = arith.constant dense<0.000000e+00> : vector<784x128xf32>
    %4 = tpu.matmul %3, %0, %cst {dimension_numbers = #tpu.dot_dimension_numbers<[1], [0], [0], [1], [0, 0, 1, 1], [], []>} : vector<784x25xf32>, vector<25x128xf32>, vector<784x128xf32> -> vector<784x128xf32>
    %5 = vector.broadcast %1 : vector<1x128xf32> to vector<784x128xf32>
    %6 = arith.addf %4, %5 : vector<784x128xf32>
    %cst_6 = arith.constant 0.000000e+00 : f32
    %7 = vector.broadcast %cst_6 : f32 to vector<784x128xf32>
    %8 = arith.maximumf %6, %7 : vector<784x128xf32>
    %c1 = arith.constant 1 : index
    %c0_7 = arith.constant 0 : index
    %c0_8 = arith.constant 0 : index
    %9 = vector.load %arg1[%c1, %c0_7, %c0_8] : memref<4x784x25xf32, #tpu.memory_space<vmem>>, vector<1x784x25xf32>
    %10 = vector.shape_cast %9 : vector<1x784x25xf32> to vector<784x25xf32>
    %cst_9 = arith.constant dense<0.000000e+00> : vector<784x128xf32>
    %11 = tpu.matmul %10, %0, %cst_9 {dimension_numbers = #tpu.dot_dimension_numbers<[1], [0], [0], [1], [0, 0, 1, 1], [], []>} : vector<784x25xf32>, vector<25x128xf32>, vector<784x128xf32> -> vector<784x128xf32>
    %12 = vector.broadcast %1 : vector<1x128xf32> to vector<784x128xf32>
    %13 = arith.addf %11, %12 : vector<784x128xf32>
    %cst_10 = arith.constant 0.000000e+00 : f32
    %14 = vector.broadcast %cst_10 : f32 to vector<784x128xf32>
    %15 = arith.maximumf %13, %14 : vector<784x128xf32>
    %16 = arith.maximumf %8, %15 : vector<784x128xf32>
    %c2 = arith.constant 2 : index
    %c0_11 = arith.constant 0 : index
    %c0_12 = arith.constant 0 : index
    %17 = vector.load %arg1[%c2, %c0_11, %c0_12] : memref<4x784x25xf32, #tpu.memory_space<vmem>>, vector<1x784x25xf32>
    %18 = vector.shape_cast %17 : vector<1x784x25xf32> to vector<784x25xf32>
    %cst_13 = arith.constant dense<0.000000e+00> : vector<784x128xf32>
    %19 = tpu.matmul %18, %0, %cst_13 {dimension_numbers = #tpu.dot_dimension_numbers<[1], [0], [0], [1], [0, 0, 1, 1], [], []>} : vector<784x25xf32>, vector<25x128xf32>, vector<784x128xf32> -> vector<784x128xf32>
    %20 = vector.broadcast %1 : vector<1x128xf32> to vector<784x128xf32>
    %21 = arith.addf %19, %20 : vector<784x128xf32>
    %cst_14 = arith.constant 0.000000e+00 : f32
    %22 = vector.broadcast %cst_14 : f32 to vector<784x128xf32>
    %23 = arith.maximumf %21, %22 : vector<784x128xf32>
    %c3 = arith.constant 3 : index
    %c0_15 = arith.constant 0 : index
    %c0_16 = arith.constant 0 : index
    %24 = vector.load %arg1[%c3, %c0_15, %c0_16] : memref<4x784x25xf32, #tpu.memory_space<vmem>>, vector<1x784x25xf32>
    %25 = vector.shape_cast %24 : vector<1x784x25xf32> to vector<784x25xf32>
    %cst_17 = arith.constant dense<0.000000e+00> : vector<784x128xf32>
    %26 = tpu.matmul %25, %0, %cst_17 {dimension_numbers = #tpu.dot_dimension_numbers<[1], [0], [0], [1], [0, 0, 1, 1], [], []>} : vector<784x25xf32>, vector<25x128xf32>, vector<784x128xf32> -> vector<784x128xf32>
    %27 = vector.broadcast %1 : vector<1x128xf32> to vector<784x128xf32>
    %28 = arith.addf %26, %27 : vector<784x128xf32>
    %cst_18 = arith.constant 0.000000e+00 : f32
    %29 = vector.broadcast %cst_18 : f32 to vector<784x128xf32>
    %30 = arith.maximumf %28, %29 : vector<784x128xf32>
    %31 = arith.maximumf %23, %30 : vector<784x128xf32>
    %32 = arith.maximumf %16, %31 : vector<784x128xf32>
    %c0_19 = arith.constant 0 : index
    %c0_20 = arith.constant 0 : index
    %33 = vector.load %arg4[%c0_19, %c0_20] : memref<784x128xf32, #tpu.memory_space<vmem>>, vector<784x128xf32>
    tpu.vector_store %arg4[%c0_19, %c0_20], %32 {strides = array<i32>} : memref<784x128xf32, #tpu.memory_space<vmem>>, vector<784x128xf32>,
    return
  }
  func.func @transform_0(%arg0: i32) -> (i32, i32, i32) {
    %c0_i32 = arith.constant 0 : i32
    %c0_i32_0 = arith.constant 0 : i32
    %c0_i32_1 = arith.constant 0 : i32
    return %c0_i32, %arg0, %c0_i32_0 : i32, i32, i32
  }
  func.func @transform_1(%arg0: i32) -> (i32, i32) {
    %c0_i32 = arith.constant 0 : i32
    %c0_i32_0 = arith.constant 0 : i32
    %c0_i32_1 = arith.constant 0 : i32
    return %c0_i32, %c0_i32_0 : i32, i32
  }
  func.func @transform_2(%arg0: i32) -> (i32, i32) {
    %c0_i32 = arith.constant 0 : i32
    %c0_i32_0 = arith.constant 0 : i32
    %c0_i32_1 = arith.constant 0 : i32
    return %c0_i32, %c0_i32_0 : i32, i32
  }
  func.func @transform_3(%arg0: i32) -> (i32, i32) {
    %c0_i32 = arith.constant 0 : i32
    %c0_i32_0 = arith.constant 0 : i32
    return %arg0, %c0_i32 : i32, i32
  }
}

module attributes {stable_mosaic.version = 11 : i64} {
  func.func @_conv2_mlp_kernel(%arg0: memref<4x288x54xf32, #tpu.memory_space<vmem>>, %arg1: memref<54x128xf32, #tpu.memory_space<vmem>>, %arg2: memref<1x128xf32, #tpu.memory_space<vmem>>, %arg3: memref<4608x128xf32, #tpu.memory_space<vmem>>, %arg4: memref<1x128xf32, #tpu.memory_space<vmem>>, %arg5: memref<128x128xf32, #tpu.memory_space<vmem>>, %arg6: memref<1x128xf32, #tpu.memory_space<vmem>>, %arg7: memref<128x128xf32, #tpu.memory_space<vmem>>, %arg8: memref<1x128xf32, #tpu.memory_space<vmem>>, %arg9: memref<8x128xf32, #tpu.memory_space<vmem>>) attributes {dimension_semantics = [], scalar_prefetch = 0 : i64, scratch_operands = 0 : i64, tpu.core_type = #tpu.core_type<tc>} {
    %c0 = arith.constant 0 : index
    %c0_0 = arith.constant 0 : index
    %0 = vector.load %arg1[%c0, %c0_0] : memref<54x128xf32, #tpu.memory_space<vmem>>, vector<54x128xf32>
    %c0_1 = arith.constant 0 : index
    %c0_2 = arith.constant 0 : index
    %1 = vector.load %arg2[%c0_1, %c0_2] : memref<1x128xf32, #tpu.memory_space<vmem>>, vector<1x128xf32>
    %c0_3 = arith.constant 0 : index
    %c0_4 = arith.constant 0 : index
    %c0_5 = arith.constant 0 : index
    %2 = vector.load %arg0[%c0_3, %c0_4, %c0_5] : memref<4x288x54xf32, #tpu.memory_space<vmem>>, vector<1x288x54xf32>
    %3 = vector.shape_cast %2 : vector<1x288x54xf32> to vector<288x54xf32>
    %cst = arith.constant dense<0.000000e+00> : vector<288x128xf32>
    %4 = tpu.matmul %3, %0, %cst {dimension_numbers = #tpu.dot_dimension_numbers<[1], [0], [0], [1], [0, 0, 1, 1], [], []>} : vector<288x54xf32>, vector<54x128xf32>, vector<288x128xf32> -> vector<288x128xf32>
    %5 = vector.broadcast %1 : vector<1x128xf32> to vector<288x128xf32>
    %6 = arith.addf %4, %5 : vector<288x128xf32>
    %cst_6 = arith.constant 0.000000e+00 : f32
    %7 = vector.broadcast %cst_6 : f32 to vector<288x128xf32>
    %8 = arith.maximumf %6, %7 : vector<288x128xf32>
    %c1 = arith.constant 1 : index
    %c0_7 = arith.constant 0 : index
    %c0_8 = arith.constant 0 : index
    %9 = vector.load %arg0[%c1, %c0_7, %c0_8] : memref<4x288x54xf32, #tpu.memory_space<vmem>>, vector<1x288x54xf32>
    %10 = vector.shape_cast %9 : vector<1x288x54xf32> to vector<288x54xf32>
    %cst_9 = arith.constant dense<0.000000e+00> : vector<288x128xf32>
    %11 = tpu.matmul %10, %0, %cst_9 {dimension_numbers = #tpu.dot_dimension_numbers<[1], [0], [0], [1], [0, 0, 1, 1], [], []>} : vector<288x54xf32>, vector<54x128xf32>, vector<288x128xf32> -> vector<288x128xf32>
    %12 = vector.broadcast %1 : vector<1x128xf32> to vector<288x128xf32>
    %13 = arith.addf %11, %12 : vector<288x128xf32>
    %cst_10 = arith.constant 0.000000e+00 : f32
    %14 = vector.broadcast %cst_10 : f32 to vector<288x128xf32>
    %15 = arith.maximumf %13, %14 : vector<288x128xf32>
    %16 = arith.maximumf %8, %15 : vector<288x128xf32>
    %c2 = arith.constant 2 : index
    %c0_11 = arith.constant 0 : index
    %c0_12 = arith.constant 0 : index
    %17 = vector.load %arg0[%c2, %c0_11, %c0_12] : memref<4x288x54xf32, #tpu.memory_space<vmem>>, vector<1x288x54xf32>
    %18 = vector.shape_cast %17 : vector<1x288x54xf32> to vector<288x54xf32>
    %cst_13 = arith.constant dense<0.000000e+00> : vector<288x128xf32>
    %19 = tpu.matmul %18, %0, %cst_13 {dimension_numbers = #tpu.dot_dimension_numbers<[1], [0], [0], [1], [0, 0, 1, 1], [], []>} : vector<288x54xf32>, vector<54x128xf32>, vector<288x128xf32> -> vector<288x128xf32>
    %20 = vector.broadcast %1 : vector<1x128xf32> to vector<288x128xf32>
    %21 = arith.addf %19, %20 : vector<288x128xf32>
    %cst_14 = arith.constant 0.000000e+00 : f32
    %22 = vector.broadcast %cst_14 : f32 to vector<288x128xf32>
    %23 = arith.maximumf %21, %22 : vector<288x128xf32>
    %c3 = arith.constant 3 : index
    %c0_15 = arith.constant 0 : index
    %c0_16 = arith.constant 0 : index
    %24 = vector.load %arg0[%c3, %c0_15, %c0_16] : memref<4x288x54xf32, #tpu.memory_space<vmem>>, vector<1x288x54xf32>
    %25 = vector.shape_cast %24 : vector<1x288x54xf32> to vector<288x54xf32>
    %cst_17 = arith.constant dense<0.000000e+00> : vector<288x128xf32>
    %26 = tpu.matmul %25, %0, %cst_17 {dimension_numbers = #tpu.dot_dimension_numbers<[1], [0], [0], [1], [0, 0, 1, 1], [], []>} : vector<288x54xf32>, vector<54x128xf32>, vector<288x128xf32> -> vector<288x128xf32>
    %27 = vector.broadcast %1 : vector<1x128xf32> to vector<288x128xf32>
    %28 = arith.addf %26, %27 : vector<288x128xf32>
    %cst_18 = arith.constant 0.000000e+00 : f32
    %29 = vector.broadcast %cst_18 : f32 to vector<288x128xf32>
    %30 = arith.maximumf %28, %29 : vector<288x128xf32>
    %31 = arith.maximumf %23, %30 : vector<288x128xf32>
    %32 = arith.maximumf %16, %31 : vector<288x128xf32>
    %33 = vector.extract_strided_slice %32 {offsets = [0, 0], sizes = [8, 128], strides = [1, 1]} : vector<288x128xf32> to vector<8x128xf32>
    %34 = vector.extract_strided_slice %32 {offsets = [8, 0], sizes = [8, 128], strides = [1, 1]} : vector<288x128xf32> to vector<8x128xf32>
    %35 = vector.extract_strided_slice %32 {offsets = [16, 0], sizes = [8, 128], strides = [1, 1]} : vector<288x128xf32> to vector<8x128xf32>
    %36 = vector.extract_strided_slice %32 {offsets = [24, 0], sizes = [8, 128], strides = [1, 1]} : vector<288x128xf32> to vector<8x128xf32>
    %37 = vector.extract_strided_slice %32 {offsets = [32, 0], sizes = [8, 128], strides = [1, 1]} : vector<288x128xf32> to vector<8x128xf32>
    %38 = vector.extract_strided_slice %32 {offsets = [40, 0], sizes = [8, 128], strides = [1, 1]} : vector<288x128xf32> to vector<8x128xf32>
    %39 = vector.extract_strided_slice %32 {offsets = [48, 0], sizes = [8, 128], strides = [1, 1]} : vector<288x128xf32> to vector<8x128xf32>
    %40 = vector.extract_strided_slice %32 {offsets = [56, 0], sizes = [8, 128], strides = [1, 1]} : vector<288x128xf32> to vector<8x128xf32>
    %41 = vector.extract_strided_slice %32 {offsets = [64, 0], sizes = [8, 128], strides = [1, 1]} : vector<288x128xf32> to vector<8x128xf32>
    %42 = vector.extract_strided_slice %32 {offsets = [72, 0], sizes = [8, 128], strides = [1, 1]} : vector<288x128xf32> to vector<8x128xf32>
    %43 = vector.extract_strided_slice %32 {offsets = [80, 0], sizes = [8, 128], strides = [1, 1]} : vector<288x128xf32> to vector<8x128xf32>
    %44 = vector.extract_strided_slice %32 {offsets = [88, 0], sizes = [8, 128], strides = [1, 1]} : vector<288x128xf32> to vector<8x128xf32>
    %45 = vector.extract_strided_slice %32 {offsets = [96, 0], sizes = [8, 128], strides = [1, 1]} : vector<288x128xf32> to vector<8x128xf32>
    %46 = vector.extract_strided_slice %32 {offsets = [104, 0], sizes = [8, 128], strides = [1, 1]} : vector<288x128xf32> to vector<8x128xf32>
    %47 = vector.extract_strided_slice %32 {offsets = [112, 0], sizes = [8, 128], strides = [1, 1]} : vector<288x128xf32> to vector<8x128xf32>
    %48 = vector.extract_strided_slice %32 {offsets = [120, 0], sizes = [8, 128], strides = [1, 1]} : vector<288x128xf32> to vector<8x128xf32>
    %49 = vector.extract_strided_slice %32 {offsets = [128, 0], sizes = [8, 128], strides = [1, 1]} : vector<288x128xf32> to vector<8x128xf32>
    %50 = vector.extract_strided_slice %32 {offsets = [136, 0], sizes = [8, 128], strides = [1, 1]} : vector<288x128xf32> to vector<8x128xf32>
    %51 = vector.extract_strided_slice %32 {offsets = [144, 0], sizes = [8, 128], strides = [1, 1]} : vector<288x128xf32> to vector<8x128xf32>
    %52 = vector.extract_strided_slice %32 {offsets = [152, 0], sizes = [8, 128], strides = [1, 1]} : vector<288x128xf32> to vector<8x128xf32>
    %53 = vector.extract_strided_slice %32 {offsets = [160, 0], sizes = [8, 128], strides = [1, 1]} : vector<288x128xf32> to vector<8x128xf32>
    %54 = vector.extract_strided_slice %32 {offsets = [168, 0], sizes = [8, 128], strides = [1, 1]} : vector<288x128xf32> to vector<8x128xf32>
    %55 = vector.extract_strided_slice %32 {offsets = [176, 0], sizes = [8, 128], strides = [1, 1]} : vector<288x128xf32> to vector<8x128xf32>
    %56 = vector.extract_strided_slice %32 {offsets = [184, 0], sizes = [8, 128], strides = [1, 1]} : vector<288x128xf32> to vector<8x128xf32>
    %57 = vector.extract_strided_slice %32 {offsets = [192, 0], sizes = [8, 128], strides = [1, 1]} : vector<288x128xf32> to vector<8x128xf32>
    %58 = vector.extract_strided_slice %32 {offsets = [200, 0], sizes = [8, 128], strides = [1, 1]} : vector<288x128xf32> to vector<8x128xf32>
    %59 = vector.extract_strided_slice %32 {offsets = [208, 0], sizes = [8, 128], strides = [1, 1]} : vector<288x128xf32> to vector<8x128xf32>
    %60 = vector.extract_strided_slice %32 {offsets = [216, 0], sizes = [8, 128], strides = [1, 1]} : vector<288x128xf32> to vector<8x128xf32>
    %61 = vector.extract_strided_slice %32 {offsets = [224, 0], sizes = [8, 128], strides = [1, 1]} : vector<288x128xf32> to vector<8x128xf32>
    %62 = vector.extract_strided_slice %32 {offsets = [232, 0], sizes = [8, 128], strides = [1, 1]} : vector<288x128xf32> to vector<8x128xf32>
    %63 = vector.extract_strided_slice %32 {offsets = [240, 0], sizes = [8, 128], strides = [1, 1]} : vector<288x128xf32> to vector<8x128xf32>
    %64 = vector.extract_strided_slice %32 {offsets = [248, 0], sizes = [8, 128], strides = [1, 1]} : vector<288x128xf32> to vector<8x128xf32>
    %65 = vector.extract_strided_slice %32 {offsets = [256, 0], sizes = [8, 128], strides = [1, 1]} : vector<288x128xf32> to vector<8x128xf32>
    %66 = vector.extract_strided_slice %32 {offsets = [264, 0], sizes = [8, 128], strides = [1, 1]} : vector<288x128xf32> to vector<8x128xf32>
    %67 = vector.extract_strided_slice %32 {offsets = [272, 0], sizes = [8, 128], strides = [1, 1]} : vector<288x128xf32> to vector<8x128xf32>
    %68 = vector.extract_strided_slice %32 {offsets = [280, 0], sizes = [8, 128], strides = [1, 1]} : vector<288x128xf32> to vector<8x128xf32>
    %69 = tpu.concatenate %33, %34, %35, %36, %37, %38, %39, %40, %41, %42, %43, %44, %45, %46, %47, %48 in 1 : vector<8x128xf32>, vector<8x128xf32>, vector<8x128xf32>, vector<8x128xf32>, vector<8x128xf32>, vector<8x128xf32>, vector<8x128xf32>, vector<8x128xf32>, vector<8x128xf32>, vector<8x128xf32>, vector<8x128xf32>, vector<8x128xf32>, vector<8x128xf32>, vector<8x128xf32>, vector<8x128xf32>, vector<8x128xf32> -> vector<8x2048xf32>
    %70 = tpu.concatenate %49, %50, %51, %52, %53, %54, %55, %56, %57, %58, %59, %60, %61, %62, %63, %64 in 1 : vector<8x128xf32>, vector<8x128xf32>, vector<8x128xf32>, vector<8x128xf32>, vector<8x128xf32>, vector<8x128xf32>, vector<8x128xf32>, vector<8x128xf32>, vector<8x128xf32>, vector<8x128xf32>, vector<8x128xf32>, vector<8x128xf32>, vector<8x128xf32>, vector<8x128xf32>, vector<8x128xf32>, vector<8x128xf32> -> vector<8x2048xf32>
    %71 = tpu.concatenate %65, %66, %67, %68 in 1 : vector<8x128xf32>, vector<8x128xf32>, vector<8x128xf32>, vector<8x128xf32> -> vector<8x512xf32>
    %72 = tpu.concatenate %69, %70, %71 in 1 : vector<8x2048xf32>, vector<8x2048xf32>, vector<8x512xf32> -> vector<8x4608xf32>
    %c0_19 = arith.constant 0 : index
    %c0_20 = arith.constant 0 : index
    %73 = vector.load %arg3[%c0_19, %c0_20] : memref<4608x128xf32, #tpu.memory_space<vmem>>, vector<4608x128xf32>
    %cst_21 = arith.constant dense<0.000000e+00> : vector<8x128xf32>
    %74 = tpu.matmul %72, %73, %cst_21 {dimension_numbers = #tpu.dot_dimension_numbers<[1], [0], [0], [1], [0, 0, 1, 1], [], []>} : vector<8x4608xf32>, vector<4608x128xf32>, vector<8x128xf32> -> vector<8x128xf32>
    %c0_22 = arith.constant 0 : index
    %c0_23 = arith.constant 0 : index
    %75 = vector.load %arg4[%c0_22, %c0_23] : memref<1x128xf32, #tpu.memory_space<vmem>>, vector<1x128xf32>
    %76 = vector.broadcast %75 : vector<1x128xf32> to vector<8x128xf32>
    %77 = arith.addf %74, %76 : vector<8x128xf32>
    %cst_24 = arith.constant 0.000000e+00 : f32
    %78 = vector.broadcast %cst_24 : f32 to vector<8x128xf32>
    %79 = arith.maximumf %77, %78 : vector<8x128xf32>
    %c0_25 = arith.constant 0 : index
    %c0_26 = arith.constant 0 : index
    %80 = vector.load %arg5[%c0_25, %c0_26] : memref<128x128xf32, #tpu.memory_space<vmem>>, vector<128x128xf32>
    %cst_27 = arith.constant dense<0.000000e+00> : vector<8x128xf32>
    %81 = tpu.matmul %79, %80, %cst_27 {dimension_numbers = #tpu.dot_dimension_numbers<[1], [0], [0], [1], [0, 0, 1, 1], [], []>} : vector<8x128xf32>, vector<128x128xf32>, vector<8x128xf32> -> vector<8x128xf32>
    %c0_28 = arith.constant 0 : index
    %c0_29 = arith.constant 0 : index
    %82 = vector.load %arg6[%c0_28, %c0_29] : memref<1x128xf32, #tpu.memory_space<vmem>>, vector<1x128xf32>
    %83 = vector.broadcast %82 : vector<1x128xf32> to vector<8x128xf32>
    %84 = arith.addf %81, %83 : vector<8x128xf32>
    %cst_30 = arith.constant 0.000000e+00 : f32
    %85 = vector.broadcast %cst_30 : f32 to vector<8x128xf32>
    %86 = arith.maximumf %84, %85 : vector<8x128xf32>
    %c0_31 = arith.constant 0 : index
    %c0_32 = arith.constant 0 : index
    %87 = vector.load %arg7[%c0_31, %c0_32] : memref<128x128xf32, #tpu.memory_space<vmem>>, vector<128x128xf32>
    %cst_33 = arith.constant dense<0.000000e+00> : vector<8x128xf32>
    %88 = tpu.matmul %86, %87, %cst_33 {dimension_numbers = #tpu.dot_dimension_numbers<[1], [0], [0], [1], [0, 0, 1, 1], [], []>} : vector<8x128xf32>, vector<128x128xf32>, vector<8x128xf32> -> vector<8x128xf32>
    %c0_34 = arith.constant 0 : index
    %c0_35 = arith.constant 0 : index
    %89 = vector.load %arg8[%c0_34, %c0_35] : memref<1x128xf32, #tpu.memory_space<vmem>>, vector<1x128xf32>
    %90 = vector.broadcast %89 : vector<1x128xf32> to vector<8x128xf32>
    %91 = arith.addf %88, %90 : vector<8x128xf32>
    %c0_36 = arith.constant 0 : index
    %c0_37 = arith.constant 0 : index
    %92 = vector.load %arg9[%c0_36, %c0_37] : memref<8x128xf32, #tpu.memory_space<vmem>>, vector<8x128xf32>
    tpu.vector_store %arg9[%c0_36, %c0_37], %91 {strides = array<i32>} : memref<8x128xf32, #tpu.memory_space<vmem>>, vector<8x128xf32>,
    return
  }
}

</mosaic_0001>

<bundles_post_ra>
// kernel: lenet_forward.2
= control target key start
LH: loop header
LB: loop body
LE: loop exit
PB: predicated region body
PF: predicated region fallthrough
CT: control target
= control target key end

     0   :  { %s8228_s12 = smov 0   ;;  %s8230_s13 = smov 0   ;;  %s10696_s0 = inlined_call_operand.vmem [shape: f32[4,1568,25], index: 0, kind: input, shape index: {}]   ;;  %s10697_s1 = inlined_call_operand.vmem [shape: f32[25,128], index: 1, kind: input, shape index: {}]   ;;  %s10698_s2 = inlined_call_operand.vmem [shape: f32[1,128], index: 2, kind: input, shape index: {}]   ;;  %s10699_s3 = inlined_call_operand.vmem [shape: f32[1568,128], index: 3, kind: output, shape index: {}]  }
   0x1   :  { %s8232_s14 = smov 0  }
   0x2 LB: > { %s6426_s15 = sadd.s32 4294967295, %s8206_s14   ;;  %s8245_s16 = sadd.s32 1, %s8206_s14   ;;  %s8206_s14 = sphi %s8232_s14, %s10810_s14   ;;  %s8202_s13 = sphi %s8230_s13, %s10809_s13   ;;  %s8198_s12 = sphi %s8228_s12, %s10808_s12  }
   0x3   : > { %s17_s17 = ssub.s32 %s8206_s14, %s8245_s16  ;;  %s20_s18 = sadd.s32 1, %s8202_s13 }
   0x4   : > { %p18_p0 = scmp.eq.s32.totalorder %s17_s17, 0  ;;  %p27_p1 = scmp.ne.s32.totalorder %s8202_s13, %s8198_s12 }
   0x5   : > { %p28_p2 = scmp.eq.s32.totalorder %s8206_s14, 0  ;;  %p6429_p4 = scmp.ge.s32.totalorder %s8206_s14, 2 }
   0x6   : > { %s8254_s19 = scalar_select %p18_p0, %s8202_s13, %s20_s18  }
   0x7   : > { %p29_p3 = por %p28_p2, %p27_p1  ;;  %127 = sbr.rel (%p6429_p4) target bundleno = 213 (0xd5), region = 24 }
   0xc   : > { %130 = sbr.rel (!%p29_p3) target bundleno = 213 (0xd5), region = 28  ;;  %s132_s20 = sand.u32 (%p29_p3), 1, %s8202_s13  }
   0xd   : > { %s7126_s21 = smul.u32 (%p29_p3), 784, %s8206_s14 }
   0xe   : > { %s8155_s22 = smul.u32 (%p29_p3), 3136, %s132_s20 }
   0xf   : > { %s8262_s25 = scalar_lea.vmem (%p29_p3), %s10696_s0, %s7126_s21 }
  0x10   : > { %v948_v0 = vld [vmem:[%s8262_s25] sm:$0xff] (%p29_p3)  ;;  %v950_v1 = vld [vmem:[%s8262_s25 + $0x8] sm:$0xff] (%p29_p3)  ;;  %v952_v2 = vld [vmem:[%s8262_s25 + $0x10] sm:$0xff] (%p29_p3)  ;;  %s8267_s26 = scalar_lea.vmem (%p29_p3), [#allocation2], %s8155_s22 }
  0x11   : > { %949 = vst [vmem:[%s8267_s26] sm:$0xff] %v948_v0  ;;  %951 = vst [vmem:[%s8267_s26 + $0x8] sm:$0xff] %v950_v1  ;;  %v954_v3 = vld [vmem:[%s8262_s25 + $0x18] sm:$0xff]  ;;  %v956_v4 = vld [vmem:[%s8262_s25 + $0x20] sm:$0xff] }
  0x12   : > { %953 = vst [vmem:[%s8267_s26 + $0x10] sm:$0xff] %v952_v2  ;;  %v958_v5 = vld [vmem:[%s8262_s25 + $0x28] sm:$0xff]  ;;  %955 = vst [vmem:[%s8267_s26 + $0x18] sm:$0xff] %v954_v3  ;;  %v960_v6 = vld [vmem:[%s8262_s25 + $0x30] sm:$0xff] }
  0x13   : > { %957 = vst [vmem:[%s8267_s26 + $0x20] sm:$0xff] %v956_v4  ;;  %959 = vst [vmem:[%s8267_s26 + $0x28] sm:$0xff] %v958_v5  ;;  %v962_v7 = vld [vmem:[%s8262_s25 + $0x38] sm:$0xff]  ;;  %v964_v8 = vld [vmem:[%s8262_s25 + $0x40] sm:$0xff] }
  0x14   : > { %961 = vst [vmem:[%s8267_s26 + $0x30] sm:$0xff] %v960_v6  ;;  %963 = vst [vmem:[%s8267_s26 + $0x38] sm:$0xff] %v962_v7  ;;  %v966_v9 = vld [vmem:[%s8262_s25 + $0x48] sm:$0xff]  ;;  %v968_v10 = vld [vmem:[%s8262_s25 + $0x50] sm:$0xff] }
  0x15   : > { %965 = vst [vmem:[%s8267_s26 + $0x40] sm:$0xff] %v964_v8  ;;  %v970_v11 = vld [vmem:[%s8262_s25 + $0x58] sm:$0xff]  ;;  %967 = vst [vmem:[%s8267_s26 + $0x48] sm:$0xff] %v966_v9  ;;  %v972_v12 = vld [vmem:[%s8262_s25 + $0x60] sm:$0xff] }
  0x16   : > { %969 = vst [vmem:[%s8267_s26 + $0x50] sm:$0xff] %v968_v10  ;;  %971 = vst [vmem:[%s8267_s26 + $0x58] sm:$0xff] %v970_v11  ;;  %v974_v13 = vld [vmem:[%s8262_s25 + $0x68] sm:$0xff]  ;;  %v976_v14 = vld [vmem:[%s8262_s25 + $0x70] sm:$0xff] }
  0x17   : > { %973 = vst [vmem:[%s8267_s26 + $0x60] sm:$0xff] %v972_v12  ;;  %975 = vst [vmem:[%s8267_s26 + $0x68] sm:$0xff] %v974_v13  ;;  %v978_v15 = vld [vmem:[%s8262_s25 + $0x78] sm:$0xff]  ;;  %v980_v16 = vld [vmem:[%s8262_s25 + $0x80] sm:$0xff] }
  0x18   : > { %977 = vst [vmem:[%s8267_s26 + $0x70] sm:$0xff] %v976_v14  ;;  %v982_v17 = vld [vmem:[%s8262_s25 + $0x88] sm:$0xff]  ;;  %979 = vst [vmem:[%s8267_s26 + $0x78] sm:$0xff] %v978_v15  ;;  %v984_v18 = vld [vmem:[%s8262_s25 + $0x90] sm:$0xff] }
  0x19   : > { %981 = vst [vmem:[%s8267_s26 + $0x80] sm:$0xff] %v980_v16  ;;  %983 = vst [vmem:[%s8267_s26 + $0x88] sm:$0xff] %v982_v17  ;;  %v986_v19 = vld [vmem:[%s8262_s25 + $0x98] sm:$0xff]  ;;  %v988_v20 = vld [vmem:[%s8262_s25 + $0xa0] sm:$0xff] }
  0x1a   : > { %985 = vst [vmem:[%s8267_s26 + $0x90] sm:$0xff] %v984_v18  ;;  %987 = vst [vmem:[%s8267_s26 + $0x98] sm:$0xff] %v986_v19  ;;  %v990_v21 = vld [vmem:[%s8262_s25 + $0xa8] sm:$0xff]  ;;  %v992_v22 = vld [vmem:[%s8262_s25 + $0xb0] sm:$0xff] }
  0x1b   : > { %989 = vst [vmem:[%s8267_s26 + $0xa0] sm:$0xff] %v988_v20  ;;  %v994_v23 = vld [vmem:[%s8262_s25 + $0xb8] sm:$0xff]  ;;  %991 = vst [vmem:[%s8267_s26 + $0xa8] sm:$0xff] %v990_v21  ;;  %v996_v24 = vld [vmem:[%s8262_s25 + $0xc0] sm:$0xff] }
  0x1c   : > { %993 = vst [vmem:[%s8267_s26 + $0xb0] sm:$0xff] %v992_v22  ;;  %995 = vst [vmem:[%s8267_s26 + $0xb8] sm:$0xff] %v994_v23  ;;  %v998_v25 = vld [vmem:[%s8262_s25 + $0xc8] sm:$0xff]  ;;  %v1000_v26 = vld [vmem:[%s8262_s25 + $0xd0] sm:$0xff] }
  0x1d   : > { %997 = vst [vmem:[%s8267_s26 + $0xc0] sm:$0xff] %v996_v24  ;;  %999 = vst [vmem:[%s8267_s26 + $0xc8] sm:$0xff] %v998_v25  ;;  %v1002_v27 = vld [vmem:[%s8262_s25 + $0xd8] sm:$0xff]  ;;  %v1004_v28 = vld [vmem:[%s8262_s25 + $0xe0] sm:$0xff] }
  0x1e   : > { %1001 = vst [vmem:[%s8267_s26 + $0xd0] sm:$0xff] %v1000_v26  ;;  %v1006_v29 = vld [vmem:[%s8262_s25 + $0xe8] sm:$0xff]  ;;  %1003 = vst [vmem:[%s8267_s26 + $0xd8] sm:$0xff] %v1002_v27  ;;  %v1008_v30 = vld [vmem:[%s8262_s25 + $0xf0] sm:$0xff] }
  0x1f   : > { %1005 = vst [vmem:[%s8267_s26 + $0xe0] sm:$0xff] %v1004_v28  ;;  %1007 = vst [vmem:[%s8267_s26 + $0xe8] sm:$0xff] %v1006_v29  ;;  %v1010_v31 = vld [vmem:[%s8262_s25 + $0xf8] sm:$0xff]  ;;  %v1012_v32 = vld [vmem:[%s8262_s25 + $0x100] sm:$0xff] }
  0x20   : > { %1009 = vst [vmem:[%s8267_s26 + $0xf0] sm:$0xff] %v1008_v30  ;;  %1011 = vst [vmem:[%s8267_s26 + $0xf8] sm:$0xff] %v1010_v31  ;;  %v1014_v33 = vld [vmem:[%s8262_s25 + $0x108] sm:$0xff]  ;;  %v1016_v34 = vld [vmem:[%s8262_s25 + $0x110] sm:$0xff] }
  0x21   : > { %1013 = vst [vmem:[%s8267_s26 + $0x100] sm:$0xff] %v1012_v32  ;;  %v1018_v35 = vld [vmem:[%s8262_s25 + $0x118] sm:$0xff]  ;;  %1015 = vst [vmem:[%s8267_s26 + $0x108] sm:$0xff] %v1014_v33  ;;  %v1020_v36 = vld [vmem:[%s8262_s25 + $0x120] sm:$0xff] }
  0x22   : > { %1017 = vst [vmem:[%s8267_s26 + $0x110] sm:$0xff] %v1016_v34  ;;  %1019 = vst [vmem:[%s8267_s26 + $0x118] sm:$0xff] %v1018_v35  ;;  %v1022_v37 = vld [vmem:[%s8262_s25 + $0x128] sm:$0xff]  ;;  %v1024_v38 = vld [vmem:[%s8262_s25 + $0x130] sm:$0xff] }
  0x23   : > { %1021 = vst [vmem:[%s8267_s26 + $0x120] sm:$0xff] %v1020_v36  ;;  %1023 = vst [vmem:[%s8267_s26 + $0x128] sm:$0xff] %v1022_v37  ;;  %v1026_v39 = vld [vmem:[%s8262_s25 + $0x138] sm:$0xff]  ;;  %v1028_v40 = vld [vmem:[%s8262_s25 + $0x140] sm:$0xff] }
  0x24   : > { %1025 = vst [vmem:[%s8267_s26 + $0x130] sm:$0xff] %v1024_v38  ;;  %v1030_v41 = vld [vmem:[%s8262_s25 + $0x148] sm:$0xff]  ;;  %1027 = vst [vmem:[%s8267_s26 + $0x138] sm:$0xff] %v1026_v39  ;;  %v1032_v42 = vld [vmem:[%s8262_s25 + $0x150] sm:$0xff] }
  0x25   : > { %1029 = vst [vmem:[%s8267_s26 + $0x140] sm:$0xff] %v1028_v40  ;;  %1031 = vst [vmem:[%s8267_s26 + $0x148] sm:$0xff] %v1030_v41  ;;  %v1034_v43 = vld [vmem:[%s8262_s25 + $0x158] sm:$0xff]  ;;  %v1036_v44 = vld [vmem:[%s8262_s25 + $0x160] sm:$0xff] }
  0x26   : > { %1033 = vst [vmem:[%s8267_s26 + $0x150] sm:$0xff] %v1032_v42  ;;  %1035 = vst [vmem:[%s8267_s26 + $0x158] sm:$0xff] %v1034_v43  ;;  %v1038_v45 = vld [vmem:[%s8262_s25 + $0x168] sm:$0xff]  ;;  %v1040_v46 = vld [vmem:[%s8262_s25 + $0x170] sm:$0xff] }
  0x27   : > { %1037 = vst [vmem:[%s8267_s26 + $0x160] sm:$0xff] %v1036_v44  ;;  %v1042_v47 = vld [vmem:[%s8262_s25 + $0x178] sm:$0xff]  ;;  %1039 = vst [vmem:[%s8267_s26 + $0x168] sm:$0xff] %v1038_v45  ;;  %v1044_v48 = vld [vmem:[%s8262_s25 + $0x180] sm:$0xff] }
  0x28   : > { %1041 = vst [vmem:[%s8267_s26 + $0x170] sm:$0xff] %v1040_v46  ;;  %1043 = vst [vmem:[%s8267_s26 + $0x178] sm:$0xff] %v1042_v47  ;;  %v1046_v49 = vld [vmem:[%s8262_s25 + $0x188] sm:$0xff]  ;;  %v1048_v50 = vld [vmem:[%s8262_s25 + $0x190] sm:$0xff] }
  0x29   : > { %1045 = vst [vmem:[%s8267_s26 + $0x180] sm:$0xff] %v1044_v48  ;;  %1047 = vst [vmem:[%s8267_s26 + $0x188] sm:$0xff] %v1046_v49  ;;  %v1050_v51 = vld [vmem:[%s8262_s25 + $0x198] sm:$0xff]  ;;  %v1052_v52 = vld [vmem:[%s8262_s25 + $0x1a0] sm:$0xff] }
  0x2a   : > { %1049 = vst [vmem:[%s8267_s26 + $0x190] sm:$0xff] %v1048_v50  ;;  %v1054_v53 = vld [vmem:[%s8262_s25 + $0x1a8] sm:$0xff]  ;;  %1051 = vst [vmem:[%s8267_s26 + $0x198] sm:$0xff] %v1050_v51  ;;  %v1056_v54 = vld [vmem:[%s8262_s25 + $0x1b0] sm:$0xff] }
  0x2b   : > { %1053 = vst [vmem:[%s8267_s26 + $0x1a0] sm:$0xff] %v1052_v52  ;;  %1055 = vst [vmem:[%s8267_s26 + $0x1a8] sm:$0xff] %v1054_v53  ;;  %v1058_v55 = vld [vmem:[%s8262_s25 + $0x1b8] sm:$0xff]  ;;  %v1060_v56 = vld [vmem:[%s8262_s25 + $0x1c0] sm:$0xff] }
  0x2c   : > { %1057 = vst [vmem:[%s8267_s26 + $0x1b0] sm:$0xff] %v1056_v54  ;;  %1059 = vst [vmem:[%s8267_s26 + $0x1b8] sm:$0xff] %v1058_v55  ;;  %v1062_v57 = vld [vmem:[%s8262_s25 + $0x1c8] sm:$0xff]  ;;  %v1064_v58 = vld [vmem:[%s8262_s25 + $0x1d0] sm:$0xff] }
  0x2d   : > { %1061 = vst [vmem:[%s8267_s26 + $0x1c0] sm:$0xff] %v1060_v56  ;;  %v1066_v59 = vld [vmem:[%s8262_s25 + $0x1d8] sm:$0xff]  ;;  %1063 = vst [vmem:[%s8267_s26 + $0x1c8] sm:$0xff] %v1062_v57  ;;  %v1068_v60 = vld [vmem:[%s8262_s25 + $0x1e0] sm:$0xff] }
  0x2e   : > { %1065 = vst [vmem:[%s8267_s26 + $0x1d0] sm:$0xff] %v1064_v58  ;;  %1067 = vst [vmem:[%s8267_s26 + $0x1d8] sm:$0xff] %v1066_v59  ;;  %v1070_v61 = vld [vmem:[%s8262_s25 + $0x1e8] sm:$0xff]  ;;  %v1072_v62 = vld [vmem:[%s8262_s25 + $0x1f0] sm:$0xff] }
  0x2f   : > { %1069 = vst [vmem:[%s8267_s26 + $0x1e0] sm:$0xff] %v1068_v60  ;;  %1071 = vst [vmem:[%s8267_s26 + $0x1e8] sm:$0xff] %v1070_v61  ;;  %v1074_v63 = vld [vmem:[%s8262_s25 + $0x1f8] sm:$0xff]  ;;  %v1076_v0 = vld [vmem:[%s8262_s25 + $0x200] sm:$0xff] }
  0x30   : > { %1073 = vst [vmem:[%s8267_s26 + $0x1f0] sm:$0xff] %v1072_v62  ;;  %v1078_v1 = vld [vmem:[%s8262_s25 + $0x208] sm:$0xff]  ;;  %1075 = vst [vmem:[%s8267_s26 + $0x1f8] sm:$0xff] %v1074_v63  ;;  %v1080_v2 = vld [vmem:[%s8262_s25 + $0x210] sm:$0xff] }
  0x31   : > { %1077 = vst [vmem:[%s8267_s26 + $0x200] sm:$0xff] %v1076_v0  ;;  %1079 = vst [vmem:[%s8267_s26 + $0x208] sm:$0xff] %v1078_v1  ;;  %v1082_v3 = vld [vmem:[%s8262_s25 + $0x218] sm:$0xff]  ;;  %v1084_v4 = vld [vmem:[%s8262_s25 + $0x220] sm:$0xff] }
  0x32   : > { %1081 = vst [vmem:[%s8267_s26 + $0x210] sm:$0xff] %v1080_v2  ;;  %1083 = vst [vmem:[%s8267_s26 + $0x218] sm:$0xff] %v1082_v3  ;;  %v1086_v5 = vld [vmem:[%s8262_s25 + $0x228] sm:$0xff]  ;;  %v1088_v6 = vld [vmem:[%s8262_s25 + $0x230] sm:$0xff] }
  0x33   : > { %1085 = vst [vmem:[%s8267_s26 + $0x220] sm:$0xff] %v1084_v4  ;;  %v1090_v7 = vld [vmem:[%s8262_s25 + $0x238] sm:$0xff]  ;;  %1087 = vst [vmem:[%s8267_s26 + $0x228] sm:$0xff] %v1086_v5  ;;  %v1092_v8 = vld [vmem:[%s8262_s25 + $0x240] sm:$0xff] }
  0x34   : > { %1089 = vst [vmem:[%s8267_s26 + $0x230] sm:$0xff] %v1088_v6  ;;  %1091 = vst [vmem:[%s8267_s26 + $0x238] sm:$0xff] %v1090_v7  ;;  %v1094_v9 = vld [vmem:[%s8262_s25 + $0x248] sm:$0xff]  ;;  %v1096_v10 = vld [vmem:[%s8262_s25 + $0x250] sm:$0xff] }
  0x35   : > { %1093 = vst [vmem:[%s8267_s26 + $0x240] sm:$0xff] %v1092_v8  ;;  %1095 = vst [vmem:[%s8267_s26 + $0x248] sm:$0xff] %v1094_v9  ;;  %v1098_v11 = vld [vmem:[%s8262_s25 + $0x258] sm:$0xff]  ;;  %v1100_v12 = vld [vmem:[%s8262_s25 + $0x260] sm:$0xff] }
  0x36   : > { %1097 = vst [vmem:[%s8267_s26 + $0x250] sm:$0xff] %v1096_v10  ;;  %v1102_v13 = vld [vmem:[%s8262_s25 + $0x268] sm:$0xff]  ;;  %1099 = vst [vmem:[%s8267_s26 + $0x258] sm:$0xff] %v1098_v11  ;;  %v1104_v14 = vld [vmem:[%s8262_s25 + $0x270] sm:$0xff] }
  0x37   : > { %1101 = vst [vmem:[%s8267_s26 + $0x260] sm:$0xff] %v1100_v12  ;;  %1103 = vst [vmem:[%s8267_s26 + $0x268] sm:$0xff] %v1102_v13  ;;  %v1106_v15 = vld [vmem:[%s8262_s25 + $0x278] sm:$0xff]  ;;  %v1108_v16 = vld [vmem:[%s8262_s25 + $0x280] sm:$0xff] }
  0x38   : > { %1105 = vst [vmem:[%s8267_s26 + $0x270] sm:$0xff] %v1104_v14  ;;  %1107 = vst [vmem:[%s8267_s26 + $0x278] sm:$0xff] %v1106_v15  ;;  %v1110_v17 = vld [vmem:[%s8262_s25 + $0x288] sm:$0xff]  ;;  %v1112_v18 = vld [vmem:[%s8262_s25 + $0x290] sm:$0xff] }
  0x39   : > { %1109 = vst [vmem:[%s8267_s26 + $0x280] sm:$0xff] %v1108_v16  ;;  %v1114_v19 = vld [vmem:[%s8262_s25 + $0x298] sm:$0xff]  ;;  %1111 = vst [vmem:[%s8267_s26 + $0x288] sm:$0xff] %v1110_v17  ;;  %v1116_v20 = vld [vmem:[%s8262_s25 + $0x2a0] sm:$0xff] }
  0x3a   : > { %1113 = vst [vmem:[%s8267_s26 + $0x290] sm:$0xff] %v1112_v18  ;;  %1115 = vst [vmem:[%s8267_s26 + $0x298] sm:$0xff] %v1114_v19  ;;  %v1118_v21 = vld [vmem:[%s8262_s25 + $0x2a8] sm:$0xff]  ;;  %v1120_v22 = vld [vmem:[%s8262_s25 + $0x2b0] sm:$0xff] }
  0x3b   : > { %1117 = vst [vmem:[%s8267_s26 + $0x2a0] sm:$0xff] %v1116_v20  ;;  %1119 = vst [vmem:[%s8267_s26 + $0x2a8] sm:$0xff] %v1118_v21  ;;  %v1122_v23 = vld [vmem:[%s8262_s25 + $0x2b8] sm:$0xff]  ;;  %v1124_v24 = vld [vmem:[%s8262_s25 + $0x2c0] sm:$0xff] }
  0x3c   : > { %1121 = vst [vmem:[%s8267_s26 + $0x2b0] sm:$0xff] %v1120_v22  ;;  %v1126_v25 = vld [vmem:[%s8262_s25 + $0x2c8] sm:$0xff]  ;;  %1123 = vst [vmem:[%s8267_s26 + $0x2b8] sm:$0xff] %v1122_v23  ;;  %v1128_v26 = vld [vmem:[%s8262_s25 + $0x2d0] sm:$0xff] }
  0x3d   : > { %1125 = vst [vmem:[%s8267_s26 + $0x2c0] sm:$0xff] %v1124_v24  ;;  %1127 = vst [vmem:[%s8267_s26 + $0x2c8] sm:$0xff] %v1126_v25  ;;  %v1130_v27 = vld [vmem:[%s8262_s25 + $0x2d8] sm:$0xff]  ;;  %v1132_v28 = vld [vmem:[%s8262_s25 + $0x2e0] sm:$0xff] }
  0x3e   : > { %1129 = vst [vmem:[%s8267_s26 + $0x2d0] sm:$0xff] %v1128_v26  ;;  %1131 = vst [vmem:[%s8267_s26 + $0x2d8] sm:$0xff] %v1130_v27  ;;  %v1134_v29 = vld [vmem:[%s8262_s25 + $0x2e8] sm:$0xff]  ;;  %v1136_v30 = vld [vmem:[%s8262_s25 + $0x2f0] sm:$0xff] }
  0x3f   : > { %1133 = vst [vmem:[%s8267_s26 + $0x2e0] sm:$0xff] %v1132_v28  ;;  %v1138_v31 = vld [vmem:[%s8262_s25 + $0x2f8] sm:$0xff]  ;;  %1135 = vst [vmem:[%s8267_s26 + $0x2e8] sm:$0xff] %v1134_v29  ;;  %v1140_v32 = vld [vmem:[%s8262_s25 + $0x300] sm:$0xff] }
  0x40   : > { %1137 = vst [vmem:[%s8267_s26 + $0x2f0] sm:$0xff] %v1136_v30  ;;  %1139 = vst [vmem:[%s8267_s26 + $0x2f8] sm:$0xff] %v1138_v31  ;;  %v1142_v33 = vld [vmem:[%s8262_s25 + $0x308] sm:$0xff]  ;;  %v1144_v34 = vld [vmem:[%s8262_s25 + $0x620] sm:$0xff] }
  0x41   : > { %1141 = vst [vmem:[%s8267_s26 + $0x300] sm:$0xff] %v1140_v32  ;;  %1143 = vst [vmem:[%s8267_s26 + $0x308] sm:$0xff] %v1142_v33  ;;  %v1146_v35 = vld [vmem:[%s8262_s25 + $0x628] sm:$0xff]  ;;  %v1148_v36 = vld [vmem:[%s8262_s25 + $0x630] sm:$0xff] }
  0x42   : > { %1145 = vst [vmem:[%s8267_s26 + $0x310] sm:$0xff] %v1144_v34  ;;  %v1150_v37 = vld [vmem:[%s8262_s25 + $0x638] sm:$0xff]  ;;  %1147 = vst [vmem:[%s8267_s26 + $0x318] sm:$0xff] %v1146_v35  ;;  %v1152_v38 = vld [vmem:[%s8262_s25 + $0x640] sm:$0xff] }
  0x43   : > { %1149 = vst [vmem:[%s8267_s26 + $0x320] sm:$0xff] %v1148_v36  ;;  %1151 = vst [vmem:[%s8267_s26 + $0x328] sm:$0xff] %v1150_v37  ;;  %v1154_v39 = vld [vmem:[%s8262_s25 + $0x648] sm:$0xff]  ;;  %v1156_v40 = vld [vmem:[%s8262_s25 + $0x650] sm:$0xff] }
  0x44   : > { %1153 = vst [vmem:[%s8267_s26 + $0x330] sm:$0xff] %v1152_v38  ;;  %1155 = vst [vmem:[%s8267_s26 + $0x338] sm:$0xff] %v1154_v39  ;;  %v1158_v41 = vld [vmem:[%s8262_s25 + $0x658] sm:$0xff]  ;;  %v1160_v42 = vld [vmem:[%s8262_s25 + $0x660] sm:$0xff] }
  0x45   : > { %1157 = vst [vmem:[%s8267_s26 + $0x340] sm:$0xff] %v1156_v40  ;;  %v1162_v43 = vld [vmem:[%s8262_s25 + $0x668] sm:$0xff]  ;;  %1159 = vst [vmem:[%s8267_s26 + $0x348] sm:$0xff] %v1158_v41  ;;  %v1164_v44 = vld [vmem:[%s8262_s25 + $0x670] sm:$0xff] }
  0x46   : > { %1161 = vst [vmem:[%s8267_s26 + $0x350] sm:$0xff] %v1160_v42  ;;  %1163 = vst [vmem:[%s8267_s26 + $0x358] sm:$0xff] %v1162_v43  ;;  %v1166_v45 = vld [vmem:[%s8262_s25 + $0x678] sm:$0xff]  ;;  %v1168_v46 = vld [vmem:[%s8262_s25 + $0x680] sm:$0xff] }
  0x47   : > { %1165 = vst [vmem:[%s8267_s26 + $0x360] sm:$0xff] %v1164_v44  ;;  %1167 = vst [vmem:[%s8267_s26 + $0x368] sm:$0xff] %v1166_v45  ;;  %v1170_v47 = vld [vmem:[%s8262_s25 + $0x688] sm:$0xff]  ;;  %v1172_v48 = vld [vmem:[%s8262_s25 + $0x690] sm:$0xff] }
  0x48   : > { %1169 = vst [vmem:[%s8267_s26 + $0x370] sm:$0xff] %v1168_v46  ;;  %v1174_v49 = vld [vmem:[%s8262_s25 + $0x698] sm:$0xff]  ;;  %1171 = vst [vmem:[%s8267_s26 + $0x378] sm:$0xff] %v1170_v47  ;;  %v1176_v50 = vld [vmem:[%s8262_s25 + $0x6a0] sm:$0xff] }
  0x49   : > { %1173 = vst [vmem:[%s8267_s26 + $0x380] sm:$0xff] %v1172_v48  ;;  %1175 = vst [vmem:[%s8267_s26 + $0x388] sm:$0xff] %v1174_v49  ;;  %v1178_v51 = vld [vmem:[%s8262_s25 + $0x6a8] sm:$0xff]  ;;  %v1180_v52 = vld [vmem:[%s8262_s25 + $0x6b0] sm:$0xff] }
  0x4a   : > { %1177 = vst [vmem:[%s8267_s26 + $0x390] sm:$0xff] %v1176_v50  ;;  %1179 = vst [vmem:[%s8267_s26 + $0x398] sm:$0xff] %v1178_v51  ;;  %v1182_v53 = vld [vmem:[%s8262_s25 + $0x6b8] sm:$0xff]  ;;  %v1184_v54 = vld [vmem:[%s8262_s25 + $0x6c0] sm:$0xff] }
  0x4b   : > { %1181 = vst [vmem:[%s8267_s26 + $0x3a0] sm:$0xff] %v1180_v52  ;;  %v1186_v55 = vld [vmem:[%s8262_s25 + $0x6c8] sm:$0xff]  ;;  %1183 = vst [vmem:[%s8267_s26 + $0x3a8] sm:$0xff] %v1182_v53  ;;  %v1188_v56 = vld [vmem:[%s8262_s25 + $0x6d0] sm:$0xff] }
  0x4c   : > { %1185 = vst [vmem:[%s8267_s26 + $0x3b0] sm:$0xff] %v1184_v54  ;;  %1187 = vst [vmem:[%s8267_s26 + $0x3b8] sm:$0xff] %v1186_v55  ;;  %v1190_v57 = vld [vmem:[%s8262_s25 + $0x6d8] sm:$0xff]  ;;  %v1192_v58 = vld [vmem:[%s8262_s25 + $0x6e0] sm:$0xff] }
  0x4d   : > { %1189 = vst [vmem:[%s8267_s26 + $0x3c0] sm:$0xff] %v1188_v56  ;;  %1191 = vst [vmem:[%s8267_s26 + $0x3c8] sm:$0xff] %v1190_v57  ;;  %v1194_v59 = vld [vmem:[%s8262_s25 + $0x6e8] sm:$0xff]  ;;  %v1196_v60 = vld [vmem:[%s8262_s25 + $0x6f0] sm:$0xff] }
  0x4e   : > { %1193 = vst [vmem:[%s8267_s26 + $0x3d0] sm:$0xff] %v1192_v58  ;;  %v1198_v61 = vld [vmem:[%s8262_s25 + $0x6f8] sm:$0xff]  ;;  %1195 = vst [vmem:[%s8267_s26 + $0x3d8] sm:$0xff] %v1194_v59  ;;  %v1200_v62 = vld [vmem:[%s8262_s25 + $0x700] sm:$0xff] }
  0x4f   : > { %1197 = vst [vmem:[%s8267_s26 + $0x3e0] sm:$0xff] %v1196_v60  ;;  %1199 = vst [vmem:[%s8267_s26 + $0x3e8] sm:$0xff] %v1198_v61  ;;  %v1202_v63 = vld [vmem:[%s8262_s25 + $0x708] sm:$0xff]  ;;  %v1204_v0 = vld [vmem:[%s8262_s25 + $0x710] sm:$0xff] }
  0x50   : > { %1201 = vst [vmem:[%s8267_s26 + $0x3f0] sm:$0xff] %v1200_v62  ;;  %1203 = vst [vmem:[%s8267_s26 + $0x3f8] sm:$0xff] %v1202_v63  ;;  %v1206_v1 = vld [vmem:[%s8262_s25 + $0x718] sm:$0xff]  ;;  %v1208_v2 = vld [vmem:[%s8262_s25 + $0x720] sm:$0xff] }
  0x51   : > { %1205 = vst [vmem:[%s8267_s26 + $0x400] sm:$0xff] %v1204_v0  ;;  %v1210_v3 = vld [vmem:[%s8262_s25 + $0x728] sm:$0xff]  ;;  %1207 = vst [vmem:[%s8267_s26 + $0x408] sm:$0xff] %v1206_v1  ;;  %v1212_v4 = vld [vmem:[%s8262_s25 + $0x730] sm:$0xff] }
  0x52   : > { %1209 = vst [vmem:[%s8267_s26 + $0x410] sm:$0xff] %v1208_v2  ;;  %1211 = vst [vmem:[%s8267_s26 + $0x418] sm:$0xff] %v1210_v3  ;;  %v1214_v5 = vld [vmem:[%s8262_s25 + $0x738] sm:$0xff]  ;;  %v1216_v6 = vld [vmem:[%s8262_s25 + $0x740] sm:$0xff] }
  0x53   : > { %1213 = vst [vmem:[%s8267_s26 + $0x420] sm:$0xff] %v1212_v4  ;;  %1215 = vst [vmem:[%s8267_s26 + $0x428] sm:$0xff] %v1214_v5  ;;  %v1218_v7 = vld [vmem:[%s8262_s25 + $0x748] sm:$0xff]  ;;  %v1220_v8 = vld [vmem:[%s8262_s25 + $0x750] sm:$0xff] }
  0x54   : > { %1217 = vst [vmem:[%s8267_s26 + $0x430] sm:$0xff] %v1216_v6  ;;  %v1222_v9 = vld [vmem:[%s8262_s25 + $0x758] sm:$0xff]  ;;  %1219 = vst [vmem:[%s8267_s26 + $0x438] sm:$0xff] %v1218_v7  ;;  %v1224_v10 = vld [vmem:[%s8262_s25 + $0x760] sm:$0xff] }
  0x55   : > { %1221 = vst [vmem:[%s8267_s26 + $0x440] sm:$0xff] %v1220_v8  ;;  %1223 = vst [vmem:[%s8267_s26 + $0x448] sm:$0xff] %v1222_v9  ;;  %v1226_v11 = vld [vmem:[%s8262_s25 + $0x768] sm:$0xff]  ;;  %v1228_v12 = vld [vmem:[%s8262_s25 + $0x770] sm:$0xff] }
  0x56   : > { %1225 = vst [vmem:[%s8267_s26 + $0x450] sm:$0xff] %v1224_v10  ;;  %1227 = vst [vmem:[%s8267_s26 + $0x458] sm:$0xff] %v1226_v11  ;;  %v1230_v13 = vld [vmem:[%s8262_s25 + $0x778] sm:$0xff]  ;;  %v1232_v14 = vld [vmem:[%s8262_s25 + $0x780] sm:$0xff] }
  0x57   : > { %1229 = vst [vmem:[%s8267_s26 + $0x460] sm:$0xff] %v1228_v12  ;;  %v1234_v15 = vld [vmem:[%s8262_s25 + $0x788] sm:$0xff]  ;;  %1231 = vst [vmem:[%s8267_s26 + $0x468] sm:$0xff] %v1230_v13  ;;  %v1236_v16 = vld [vmem:[%s8262_s25 + $0x790] sm:$0xff] }
  0x58   : > { %1233 = vst [vmem:[%s8267_s26 + $0x470] sm:$0xff] %v1232_v14  ;;  %1235 = vst [vmem:[%s8267_s26 + $0x478] sm:$0xff] %v1234_v15  ;;  %v1238_v17 = vld [vmem:[%s8262_s25 + $0x798] sm:$0xff]  ;;  %v1240_v18 = vld [vmem:[%s8262_s25 + $0x7a0] sm:$0xff] }
  0x59   : > { %1237 = vst [vmem:[%s8267_s26 + $0x480] sm:$0xff] %v1236_v16  ;;  %1239 = vst [vmem:[%s8267_s26 + $0x488] sm:$0xff] %v1238_v17  ;;  %v1242_v19 = vld [vmem:[%s8262_s25 + $0x7a8] sm:$0xff]  ;;  %v1244_v20 = vld [vmem:[%s8262_s25 + $0x7b0] sm:$0xff] }
  0x5a   : > { %1241 = vst [vmem:[%s8267_s26 + $0x490] sm:$0xff] %v1240_v18  ;;  %v1246_v21 = vld [vmem:[%s8262_s25 + $0x7b8] sm:$0xff]  ;;  %1243 = vst [vmem:[%s8267_s26 + $0x498] sm:$0xff] %v1242_v19  ;;  %v1248_v22 = vld [vmem:[%s8262_s25 + $0x7c0] sm:$0xff] }
  0x5b   : > { %1245 = vst [vmem:[%s8267_s26 + $0x4a0] sm:$0xff] %v1244_v20  ;;  %1247 = vst [vmem:[%s8267_s26 + $0x4a8] sm:$0xff] %v1246_v21  ;;  %v1250_v23 = vld [vmem:[%s8262_s25 + $0x7c8] sm:$0xff]  ;;  %v1252_v24 = vld [vmem:[%s8262_s25 + $0x7d0] sm:$0xff] }
  0x5c   : > { %1249 = vst [vmem:[%s8267_s26 + $0x4b0] sm:$0xff] %v1248_v22  ;;  %1251 = vst [vmem:[%s8267_s26 + $0x4b8] sm:$0xff] %v1250_v23  ;;  %v1254_v25 = vld [vmem:[%s8262_s25 + $0x7d8] sm:$0xff]  ;;  %v1256_v26 = vld [vmem:[%s8262_s25 + $0x7e0] sm:$0xff] }
  0x5d   : > { %1253 = vst [vmem:[%s8267_s26 + $0x4c0] sm:$0xff] %v1252_v24  ;;  %v1258_v27 = vld [vmem:[%s8262_s25 + $0x7e8] sm:$0xff]  ;;  %1255 = vst [vmem:[%s8267_s26 + $0x4c8] sm:$0xff] %v1254_v25  ;;  %v1260_v28 = vld [vmem:[%s8262_s25 + $0x7f0] sm:$0xff] }
  0x5e   : > { %1257 = vst [vmem:[%s8267_s26 + $0x4d0] sm:$0xff] %v1256_v26  ;;  %1259 = vst [vmem:[%s8267_s26 + $0x4d8] sm:$0xff] %v1258_v27  ;;  %v1262_v29 = vld [vmem:[%s8262_s25 + $0x7f8] sm:$0xff]  ;;  %v1264_v30 = vld [vmem:[%s8262_s25 + $0x800] sm:$0xff] }
  0x5f   : > { %1261 = vst [vmem:[%s8267_s26 + $0x4e0] sm:$0xff] %v1260_v28  ;;  %1263 = vst [vmem:[%s8267_s26 + $0x4e8] sm:$0xff] %v1262_v29  ;;  %v1266_v31 = vld [vmem:[%s8262_s25 + $0x808] sm:$0xff]  ;;  %v1268_v32 = vld [vmem:[%s8262_s25 + $0x810] sm:$0xff] }
  0x60   : > { %1265 = vst [vmem:[%s8267_s26 + $0x4f0] sm:$0xff] %v1264_v30  ;;  %v1270_v33 = vld [vmem:[%s8262_s25 + $0x818] sm:$0xff]  ;;  %1267 = vst [vmem:[%s8267_s26 + $0x4f8] sm:$0xff] %v1266_v31  ;;  %v1272_v34 = vld [vmem:[%s8262_s25 + $0x820] sm:$0xff] }
  0x61   : > { %1269 = vst [vmem:[%s8267_s26 + $0x500] sm:$0xff] %v1268_v32  ;;  %1271 = vst [vmem:[%s8267_s26 + $0x508] sm:$0xff] %v1270_v33  ;;  %v1274_v35 = vld [vmem:[%s8262_s25 + $0x828] sm:$0xff]  ;;  %v1276_v36 = vld [vmem:[%s8262_s25 + $0x830] sm:$0xff] }
  0x62   : > { %1273 = vst [vmem:[%s8267_s26 + $0x510] sm:$0xff] %v1272_v34  ;;  %1275 = vst [vmem:[%s8267_s26 + $0x518] sm:$0xff] %v1274_v35  ;;  %v1278_v37 = vld [vmem:[%s8262_s25 + $0x838] sm:$0xff]  ;;  %v1280_v38 = vld [vmem:[%s8262_s25 + $0x840] sm:$0xff] }
  0x63   : > { %1277 = vst [vmem:[%s8267_s26 + $0x520] sm:$0xff] %v1276_v36  ;;  %v1282_v39 = vld [vmem:[%s8262_s25 + $0x848] sm:$0xff]  ;;  %1279 = vst [vmem:[%s8267_s26 + $0x528] sm:$0xff] %v1278_v37  ;;  %v1284_v40 = vld [vmem:[%s8262_s25 + $0x850] sm:$0xff] }
  0x64   : > { %1281 = vst [vmem:[%s8267_s26 + $0x530] sm:$0xff] %v1280_v38  ;;  %1283 = vst [vmem:[%s8267_s26 + $0x538] sm:$0xff] %v1282_v39  ;;  %v1286_v41 = vld [vmem:[%s8262_s25 + $0x858] sm:$0xff]  ;;  %v1288_v42 = vld [vmem:[%s8262_s25 + $0x860] sm:$0xff] }
  0x65   : > { %1285 = vst [vmem:[%s8267_s26 + $0x540] sm:$0xff] %v1284_v40  ;;  %1287 = vst [vmem:[%s8267_s26 + $0x548] sm:$0xff] %v1286_v41  ;;  %v1290_v43 = vld [vmem:[%s8262_s25 + $0x868] sm:$0xff]  ;;  %v1292_v44 = vld [vmem:[%s8262_s25 + $0x870] sm:$0xff] }
  0x66   : > { %1289 = vst [vmem:[%s8267_s26 + $0x550] sm:$0xff] %v1288_v42  ;;  %v1294_v45 = vld [vmem:[%s8262_s25 + $0x878] sm:$0xff]  ;;  %1291 = vst [vmem:[%s8267_s26 + $0x558] sm:$0xff] %v1290_v43  ;;  %v1296_v46 = vld [vmem:[%s8262_s25 + $0x880] sm:$0xff] }
  0x67   : > { %1293 = vst [vmem:[%s8267_s26 + $0x560] sm:$0xff] %v1292_v44  ;;  %1295 = vst [vmem:[%s8267_s26 + $0x568] sm:$0xff] %v1294_v45  ;;  %v1298_v47 = vld [vmem:[%s8262_s25 + $0x888] sm:$0xff]  ;;  %v1300_v48 = vld [vmem:[%s8262_s25 + $0x890] sm:$0xff] }
  0x68   : > { %1297 = vst [vmem:[%s8267_s26 + $0x570] sm:$0xff] %v1296_v46  ;;  %1299 = vst [vmem:[%s8267_s26 + $0x578] sm:$0xff] %v1298_v47  ;;  %v1302_v49 = vld [vmem:[%s8262_s25 + $0x898] sm:$0xff]  ;;  %v1304_v50 = vld [vmem:[%s8262_s25 + $0x8a0] sm:$0xff] }
  0x69   : > { %1301 = vst [vmem:[%s8267_s26 + $0x580] sm:$0xff] %v1300_v48  ;;  %v1306_v51 = vld [vmem:[%s8262_s25 + $0x8a8] sm:$0xff]  ;;  %1303 = vst [vmem:[%s8267_s26 + $0x588] sm:$0xff] %v1302_v49  ;;  %v1308_v52 = vld [vmem:[%s8262_s25 + $0x8b0] sm:$0xff] }
  0x6a   : > { %1305 = vst [vmem:[%s8267_s26 + $0x590] sm:$0xff] %v1304_v50  ;;  %1307 = vst [vmem:[%s8267_s26 + $0x598] sm:$0xff] %v1306_v51  ;;  %v1310_v53 = vld [vmem:[%s8262_s25 + $0x8b8] sm:$0xff]  ;;  %v1312_v54 = vld [vmem:[%s8262_s25 + $0x8c0] sm:$0xff] }
  0x6b   : > { %1309 = vst [vmem:[%s8267_s26 + $0x5a0] sm:$0xff] %v1308_v52  ;;  %1311 = vst [vmem:[%s8267_s26 + $0x5a8] sm:$0xff] %v1310_v53  ;;  %v1314_v55 = vld [vmem:[%s8262_s25 + $0x8c8] sm:$0xff]  ;;  %v1316_v56 = vld [vmem:[%s8262_s25 + $0x8d0] sm:$0xff] }
  0x6c   : > { %1313 = vst [vmem:[%s8267_s26 + $0x5b0] sm:$0xff] %v1312_v54  ;;  %v1318_v57 = vld [vmem:[%s8262_s25 + $0x8d8] sm:$0xff]  ;;  %1315 = vst [vmem:[%s8267_s26 + $0x5b8] sm:$0xff] %v1314_v55  ;;  %v1320_v58 = vld [vmem:[%s8262_s25 + $0x8e0] sm:$0xff] }
  0x6d   : > { %1317 = vst [vmem:[%s8267_s26 + $0x5c0] sm:$0xff] %v1316_v56  ;;  %1319 = vst [vmem:[%s8267_s26 + $0x5c8] sm:$0xff] %v1318_v57  ;;  %v1322_v59 = vld [vmem:[%s8262_s25 + $0x8e8] sm:$0xff]  ;;  %v1324_v60 = vld [vmem:[%s8262_s25 + $0x8f0] sm:$0xff] }
  0x6e   : > { %1321 = vst [vmem:[%s8267_s26 + $0x5d0] sm:$0xff] %v1320_v58  ;;  %1323 = vst [vmem:[%s8267_s26 + $0x5d8] sm:$0xff] %v1322_v59  ;;  %v1326_v61 = vld [vmem:[%s8262_s25 + $0x8f8] sm:$0xff]  ;;  %v1328_v62 = vld [vmem:[%s8262_s25 + $0x900] sm:$0xff] }
  0x6f   : > { %1325 = vst [vmem:[%s8267_s26 + $0x5e0] sm:$0xff] %v1324_v60  ;;  %v1330_v63 = vld [vmem:[%s8262_s25 + $0x908] sm:$0xff]  ;;  %1327 = vst [vmem:[%s8267_s26 + $0x5e8] sm:$0xff] %v1326_v61  ;;  %v1332_v0 = vld [vmem:[%s8262_s25 + $0x910] sm:$0xff] }
  0x70   : > { %1329 = vst [vmem:[%s8267_s26 + $0x5f0] sm:$0xff] %v1328_v62  ;;  %1331 = vst [vmem:[%s8267_s26 + $0x5f8] sm:$0xff] %v1330_v63  ;;  %v1334_v1 = vld [vmem:[%s8262_s25 + $0x918] sm:$0xff]  ;;  %v1336_v2 = vld [vmem:[%s8262_s25 + $0x920] sm:$0xff] }
  0x71   : > { %1333 = vst [vmem:[%s8267_s26 + $0x600] sm:$0xff] %v1332_v0  ;;  %1335 = vst [vmem:[%s8267_s26 + $0x608] sm:$0xff] %v1334_v1  ;;  %v1338_v3 = vld [vmem:[%s8262_s25 + $0x928] sm:$0xff]  ;;  %v1340_v4 = vld [vmem:[%s8262_s25 + $0xc40] sm:$0xff] }
  0x72   : > { %1337 = vst [vmem:[%s8267_s26 + $0x610] sm:$0xff] %v1336_v2  ;;  %v1342_v5 = vld [vmem:[%s8262_s25 + $0xc48] sm:$0xff]  ;;  %1339 = vst [vmem:[%s8267_s26 + $0x618] sm:$0xff] %v1338_v3  ;;  %v1344_v6 = vld [vmem:[%s8262_s25 + $0xc50] sm:$0xff] }
  0x73   : > { %1341 = vst [vmem:[%s8267_s26 + $0x620] sm:$0xff] %v1340_v4  ;;  %1343 = vst [vmem:[%s8267_s26 + $0x628] sm:$0xff] %v1342_v5  ;;  %v1346_v7 = vld [vmem:[%s8262_s25 + $0xc58] sm:$0xff]  ;;  %v1348_v8 = vld [vmem:[%s8262_s25 + $0xc60] sm:$0xff] }
  0x74   : > { %1345 = vst [vmem:[%s8267_s26 + $0x630] sm:$0xff] %v1344_v6  ;;  %1347 = vst [vmem:[%s8267_s26 + $0x638] sm:$0xff] %v1346_v7  ;;  %v1350_v9 = vld [vmem:[%s8262_s25 + $0xc68] sm:$0xff]  ;;  %v1352_v10 = vld [vmem:[%s8262_s25 + $0xc70] sm:$0xff] }
  0x75   : > { %1349 = vst [vmem:[%s8267_s26 + $0x640] sm:$0xff] %v1348_v8  ;;  %v1354_v11 = vld [vmem:[%s8262_s25 + $0xc78] sm:$0xff]  ;;  %1351 = vst [vmem:[%s8267_s26 + $0x648] sm:$0xff] %v1350_v9  ;;  %v1356_v12 = vld [vmem:[%s8262_s25 + $0xc80] sm:$0xff] }
  0x76   : > { %1353 = vst [vmem:[%s8267_s26 + $0x650] sm:$0xff] %v1352_v10  ;;  %1355 = vst [vmem:[%s8267_s26 + $0x658] sm:$0xff] %v1354_v11  ;;  %v1358_v13 = vld [vmem:[%s8262_s25 + $0xc88] sm:$0xff]  ;;  %v1360_v14 = vld [vmem:[%s8262_s25 + $0xc90] sm:$0xff] }
  0x77   : > { %1357 = vst [vmem:[%s8267_s26 + $0x660] sm:$0xff] %v1356_v12  ;;  %1359 = vst [vmem:[%s8267_s26 + $0x668] sm:$0xff] %v1358_v13  ;;  %v1362_v15 = vld [vmem:[%s8262_s25 + $0xc98] sm:$0xff]  ;;  %v1364_v16 = vld [vmem:[%s8262_s25 + $0xca0] sm:$0xff] }
  0x78   : > { %1361 = vst [vmem:[%s8267_s26 + $0x670] sm:$0xff] %v1360_v14  ;;  %v1366_v17 = vld [vmem:[%s8262_s25 + $0xca8] sm:$0xff]  ;;  %1363 = vst [vmem:[%s8267_s26 + $0x678] sm:$0xff] %v1362_v15  ;;  %v1368_v18 = vld [vmem:[%s8262_s25 + $0xcb0] sm:$0xff] }
  0x79   : > { %1365 = vst [vmem:[%s8267_s26 + $0x680] sm:$0xff] %v1364_v16  ;;  %1367 = vst [vmem:[%s8267_s26 + $0x688] sm:$0xff] %v1366_v17  ;;  %v1370_v19 = vld [vmem:[%s8262_s25 + $0xcb8] sm:$0xff]  ;;  %v1372_v20 = vld [vmem:[%s8262_s25 + $0xcc0] sm:$0xff] }
  0x7a   : > { %1369 = vst [vmem:[%s8267_s26 + $0x690] sm:$0xff] %v1368_v18  ;;  %1371 = vst [vmem:[%s8267_s26 + $0x698] sm:$0xff] %v1370_v19  ;;  %v1374_v21 = vld [vmem:[%s8262_s25 + $0xcc8] sm:$0xff]  ;;  %v1376_v22 = vld [vmem:[%s8262_s25 + $0xcd0] sm:$0xff] }
  0x7b   : > { %1373 = vst [vmem:[%s8267_s26 + $0x6a0] sm:$0xff] %v1372_v20  ;;  %v1378_v23 = vld [vmem:[%s8262_s25 + $0xcd8] sm:$0xff]  ;;  %1375 = vst [vmem:[%s8267_s26 + $0x6a8] sm:$0xff] %v1374_v21  ;;  %v1380_v24 = vld [vmem:[%s8262_s25 + $0xce0] sm:$0xff] }
  0x7c   : > { %1377 = vst [vmem:[%s8267_s26 + $0x6b0] sm:$0xff] %v1376_v22  ;;  %1379 = vst [vmem:[%s8267_s26 + $0x6b8] sm:$0xff] %v1378_v23  ;;  %v1382_v25 = vld [vmem:[%s8262_s25 + $0xce8] sm:$0xff]  ;;  %v1384_v26 = vld [vmem:[%s8262_s25 + $0xcf0] sm:$0xff] }
  0x7d   : > { %1381 = vst [vmem:[%s8267_s26 + $0x6c0] sm:$0xff] %v1380_v24  ;;  %1383 = vst [vmem:[%s8267_s26 + $0x6c8] sm:$0xff] %v1382_v25  ;;  %v1386_v27 = vld [vmem:[%s8262_s25 + $0xcf8] sm:$0xff]  ;;  %v1388_v28 = vld [vmem:[%s8262_s25 + $0xd00] sm:$0xff] }
  0x7e   : > { %1385 = vst [vmem:[%s8267_s26 + $0x6d0] sm:$0xff] %v1384_v26  ;;  %v1390_v29 = vld [vmem:[%s8262_s25 + $0xd08] sm:$0xff]  ;;  %1387 = vst [vmem:[%s8267_s26 + $0x6d8] sm:$0xff] %v1386_v27  ;;  %v1392_v30 = vld [vmem:[%s8262_s25 + $0xd10] sm:$0xff] }
  0x7f   : > { %1389 = vst [vmem:[%s8267_s26 + $0x6e0] sm:$0xff] %v1388_v28  ;;  %1391 = vst [vmem:[%s8267_s26 + $0x6e8] sm:$0xff] %v1390_v29  ;;  %v1394_v31 = vld [vmem:[%s8262_s25 + $0xd18] sm:$0xff]  ;;  %v1396_v32 = vld [vmem:[%s8262_s25 + $0xd20] sm:$0xff] }
  0x80   : > { %1393 = vst [vmem:[%s8267_s26 + $0x6f0] sm:$0xff] %v1392_v30  ;;  %1395 = vst [vmem:[%s8267_s26 + $0x6f8] sm:$0xff] %v1394_v31  ;;  %v1398_v33 = vld [vmem:[%s8262_s25 + $0xd28] sm:$0xff]  ;;  %v1400_v34 = vld [vmem:[%s8262_s25 + $0xd30] sm:$0xff] }
  0x81   : > { %1397 = vst [vmem:[%s8267_s26 + $0x700] sm:$0xff] %v1396_v32  ;;  %v1402_v35 = vld [vmem:[%s8262_s25 + $0xd38] sm:$0xff]  ;;  %1399 = vst [vmem:[%s8267_s26 + $0x708] sm:$0xff] %v1398_v33  ;;  %v1404_v36 = vld [vmem:[%s8262_s25 + $0xd40] sm:$0xff] }
  0x82   : > { %1401 = vst [vmem:[%s8267_s26 + $0x710] sm:$0xff] %v1400_v34  ;;  %1403 = vst [vmem:[%s8267_s26 + $0x718] sm:$0xff] %v1402_v35  ;;  %v1406_v37 = vld [vmem:[%s8262_s25 + $0xd48] sm:$0xff]  ;;  %v1408_v38 = vld [vmem:[%s8262_s25 + $0xd50] sm:$0xff] }
  0x83   : > { %1405 = vst [vmem:[%s8267_s26 + $0x720] sm:$0xff] %v1404_v36  ;;  %1407 = vst [vmem:[%s8267_s26 + $0x728] sm:$0xff] %v1406_v37  ;;  %v1410_v39 = vld [vmem:[%s8262_s25 + $0xd58] sm:$0xff]  ;;  %v1412_v40 = vld [vmem:[%s8262_s25 + $0xd60] sm:$0xff] }
  0x84   : > { %1409 = vst [vmem:[%s8267_s26 + $0x730] sm:$0xff] %v1408_v38  ;;  %v1414_v41 = vld [vmem:[%s8262_s25 + $0xd68] sm:$0xff]  ;;  %1411 = vst [vmem:[%s8267_s26 + $0x738] sm:$0xff] %v1410_v39  ;;  %v1416_v42 = vld [vmem:[%s8262_s25 + $0xd70] sm:$0xff] }
  0x85   : > { %1413 = vst [vmem:[%s8267_s26 + $0x740] sm:$0xff] %v1412_v40  ;;  %1415 = vst [vmem:[%s8267_s26 + $0x748] sm:$0xff] %v1414_v41  ;;  %v1418_v43 = vld [vmem:[%s8262_s25 + $0xd78] sm:$0xff]  ;;  %v1420_v44 = vld [vmem:[%s8262_s25 + $0xd80] sm:$0xff] }
  0x86   : > { %1417 = vst [vmem:[%s8267_s26 + $0x750] sm:$0xff] %v1416_v42  ;;  %1419 = vst [vmem:[%s8267_s26 + $0x758] sm:$0xff] %v1418_v43  ;;  %v1422_v45 = vld [vmem:[%s8262_s25 + $0xd88] sm:$0xff]  ;;  %v1424_v46 = vld [vmem:[%s8262_s25 + $0xd90] sm:$0xff] }
  0x87   : > { %1421 = vst [vmem:[%s8267_s26 + $0x760] sm:$0xff] %v1420_v44  ;;  %v1426_v47 = vld [vmem:[%s8262_s25 + $0xd98] sm:$0xff]  ;;  %1423 = vst [vmem:[%s8267_s26 + $0x768] sm:$0xff] %v1422_v45  ;;  %v1428_v48 = vld [vmem:[%s8262_s25 + $0xda0] sm:$0xff] }
  0x88   : > { %1425 = vst [vmem:[%s8267_s26 + $0x770] sm:$0xff] %v1424_v46  ;;  %1427 = vst [vmem:[%s8267_s26 + $0x778] sm:$0xff] %v1426_v47  ;;  %v1430_v49 = vld [vmem:[%s8262_s25 + $0xda8] sm:$0xff]  ;;  %v1432_v50 = vld [vmem:[%s8262_s25 + $0xdb0] sm:$0xff] }
  0x89   : > { %1429 = vst [vmem:[%s8267_s26 + $0x780] sm:$0xff] %v1428_v48  ;;  %1431 = vst [vmem:[%s8267_s26 + $0x788] sm:$0xff] %v1430_v49  ;;  %v1434_v51 = vld [vmem:[%s8262_s25 + $0xdb8] sm:$0xff]  ;;  %v1436_v52 = vld [vmem:[%s8262_s25 + $0xdc0] sm:$0xff] }
  0x8a   : > { %1433 = vst [vmem:[%s8267_s26 + $0x790] sm:$0xff] %v1432_v50  ;;  %v1438_v53 = vld [vmem:[%s8262_s25 + $0xdc8] sm:$0xff]  ;;  %1435 = vst [vmem:[%s8267_s26 + $0x798] sm:$0xff] %v1434_v51  ;;  %v1440_v54 = vld [vmem:[%s8262_s25 + $0xdd0] sm:$0xff] }
  0x8b   : > { %1437 = vst [vmem:[%s8267_s26 + $0x7a0] sm:$0xff] %v1436_v52  ;;  %1439 = vst [vmem:[%s8267_s26 + $0x7a8] sm:$0xff] %v1438_v53  ;;  %v1442_v55 = vld [vmem:[%s8262_s25 + $0xdd8] sm:$0xff]  ;;  %v1444_v56 = vld [vmem:[%s8262_s25 + $0xde0] sm:$0xff] }
  0x8c   : > { %1441 = vst [vmem:[%s8267_s26 + $0x7b0] sm:$0xff] %v1440_v54  ;;  %1443 = vst [vmem:[%s8267_s26 + $0x7b8] sm:$0xff] %v1442_v55  ;;  %v1446_v57 = vld [vmem:[%s8262_s25 + $0xde8] sm:$0xff]  ;;  %v1448_v58 = vld [vmem:[%s8262_s25 + $0xdf0] sm:$0xff] }
  0x8d   : > { %1445 = vst [vmem:[%s8267_s26 + $0x7c0] sm:$0xff] %v1444_v56  ;;  %v1450_v59 = vld [vmem:[%s8262_s25 + $0xdf8] sm:$0xff]  ;;  %1447 = vst [vmem:[%s8267_s26 + $0x7c8] sm:$0xff] %v1446_v57  ;;  %v1452_v60 = vld [vmem:[%s8262_s25 + $0xe00] sm:$0xff] }
  0x8e   : > { %1449 = vst [vmem:[%s8267_s26 + $0x7d0] sm:$0xff] %v1448_v58  ;;  %1451 = vst [vmem:[%s8267_s26 + $0x7d8] sm:$0xff] %v1450_v59  ;;  %v1454_v61 = vld [vmem:[%s8262_s25 + $0xe08] sm:$0xff]  ;;  %v1456_v62 = vld [vmem:[%s8262_s25 + $0xe10] sm:$0xff] }
  0x8f   : > { %1453 = vst [vmem:[%s8267_s26 + $0x7e0] sm:$0xff] %v1452_v60  ;;  %1455 = vst [vmem:[%s8267_s26 + $0x7e8] sm:$0xff] %v1454_v61  ;;  %v1458_v63 = vld [vmem:[%s8262_s25 + $0xe18] sm:$0xff]  ;;  %v1460_v0 = vld [vmem:[%s8262_s25 + $0xe20] sm:$0xff] }
  0x90   : > { %1457 = vst [vmem:[%s8267_s26 + $0x7f0] sm:$0xff] %v1456_v62  ;;  %v1462_v1 = vld [vmem:[%s8262_s25 + $0xe28] sm:$0xff]  ;;  %1459 = vst [vmem:[%s8267_s26 + $0x7f8] sm:$0xff] %v1458_v63  ;;  %v1464_v2 = vld [vmem:[%s8262_s25 + $0xe30] sm:$0xff] }
  0x91   : > { %1461 = vst [vmem:[%s8267_s26 + $0x800] sm:$0xff] %v1460_v0  ;;  %1463 = vst [vmem:[%s8267_s26 + $0x808] sm:$0xff] %v1462_v1  ;;  %v1466_v3 = vld [vmem:[%s8262_s25 + $0xe38] sm:$0xff]  ;;  %v1468_v4 = vld [vmem:[%s8262_s25 + $0xe40] sm:$0xff] }
  0x92   : > { %1465 = vst [vmem:[%s8267_s26 + $0x810] sm:$0xff] %v1464_v2  ;;  %1467 = vst [vmem:[%s8267_s26 + $0x818] sm:$0xff] %v1466_v3  ;;  %v1470_v5 = vld [vmem:[%s8262_s25 + $0xe48] sm:$0xff]  ;;  %v1472_v6 = vld [vmem:[%s8262_s25 + $0xe50] sm:$0xff] }
  0x93   : > { %1469 = vst [vmem:[%s8267_s26 + $0x820] sm:$0xff] %v1468_v4  ;;  %v1474_v7 = vld [vmem:[%s8262_s25 + $0xe58] sm:$0xff]  ;;  %1471 = vst [vmem:[%s8267_s26 + $0x828] sm:$0xff] %v1470_v5  ;;  %v1476_v8 = vld [vmem:[%s8262_s25 + $0xe60] sm:$0xff] }
  0x94   : > { %1473 = vst [vmem:[%s8267_s26 + $0x830] sm:$0xff] %v1472_v6  ;;  %1475 = vst [vmem:[%s8267_s26 + $0x838] sm:$0xff] %v1474_v7  ;;  %v1478_v9 = vld [vmem:[%s8262_s25 + $0xe68] sm:$0xff]  ;;  %v1480_v10 = vld [vmem:[%s8262_s25 + $0xe70] sm:$0xff] }
  0x95   : > { %1477 = vst [vmem:[%s8267_s26 + $0x840] sm:$0xff] %v1476_v8  ;;  %1479 = vst [vmem:[%s8267_s26 + $0x848] sm:$0xff] %v1478_v9  ;;  %v1482_v11 = vld [vmem:[%s8262_s25 + $0xe78] sm:$0xff]  ;;  %v1484_v12 = vld [vmem:[%s8262_s25 + $0xe80] sm:$0xff] }
  0x96   : > { %1481 = vst [vmem:[%s8267_s26 + $0x850] sm:$0xff] %v1480_v10  ;;  %v1486_v13 = vld [vmem:[%s8262_s25 + $0xe88] sm:$0xff]  ;;  %1483 = vst [vmem:[%s8267_s26 + $0x858] sm:$0xff] %v1482_v11  ;;  %v1488_v14 = vld [vmem:[%s8262_s25 + $0xe90] sm:$0xff] }
  0x97   : > { %1485 = vst [vmem:[%s8267_s26 + $0x860] sm:$0xff] %v1484_v12  ;;  %1487 = vst [vmem:[%s8267_s26 + $0x868] sm:$0xff] %v1486_v13  ;;  %v1490_v15 = vld [vmem:[%s8262_s25 + $0xe98] sm:$0xff]  ;;  %v1492_v16 = vld [vmem:[%s8262_s25 + $0xea0] sm:$0xff] }
  0x98   : > { %1489 = vst [vmem:[%s8267_s26 + $0x870] sm:$0xff] %v1488_v14  ;;  %1491 = vst [vmem:[%s8267_s26 + $0x878] sm:$0xff] %v1490_v15  ;;  %v1494_v17 = vld [vmem:[%s8262_s25 + $0xea8] sm:$0xff]  ;;  %v1496_v18 = vld [vmem:[%s8262_s25 + $0xeb0] sm:$0xff] }
  0x99   : > { %1493 = vst [vmem:[%s8267_s26 + $0x880] sm:$0xff] %v1492_v16  ;;  %v1498_v19 = vld [vmem:[%s8262_s25 + $0xeb8] sm:$0xff]  ;;  %1495 = vst [vmem:[%s8267_s26 + $0x888] sm:$0xff] %v1494_v17  ;;  %v1500_v20 = vld [vmem:[%s8262_s25 + $0xec0] sm:$0xff] }
  0x9a   : > { %1497 = vst [vmem:[%s8267_s26 + $0x890] sm:$0xff] %v1496_v18  ;;  %1499 = vst [vmem:[%s8267_s26 + $0x898] sm:$0xff] %v1498_v19  ;;  %v1502_v21 = vld [vmem:[%s8262_s25 + $0xec8] sm:$0xff]  ;;  %v1504_v22 = vld [vmem:[%s8262_s25 + $0xed0] sm:$0xff] }
  0x9b   : > { %1501 = vst [vmem:[%s8267_s26 + $0x8a0] sm:$0xff] %v1500_v20  ;;  %1503 = vst [vmem:[%s8267_s26 + $0x8a8] sm:$0xff] %v1502_v21  ;;  %v1506_v23 = vld [vmem:[%s8262_s25 + $0xed8] sm:$0xff]  ;;  %v1508_v24 = vld [vmem:[%s8262_s25 + $0xee0] sm:$0xff] }
  0x9c   : > { %1505 = vst [vmem:[%s8267_s26 + $0x8b0] sm:$0xff] %v1504_v22  ;;  %v1510_v25 = vld [vmem:[%s8262_s25 + $0xee8] sm:$0xff]  ;;  %1507 = vst [vmem:[%s8267_s26 + $0x8b8] sm:$0xff] %v1506_v23  ;;  %v1512_v26 = vld [vmem:[%s8262_s25 + $0xef0] sm:$0xff] }
  0x9d   : > { %1509 = vst [vmem:[%s8267_s26 + $0x8c0] sm:$0xff] %v1508_v24  ;;  %1511 = vst [vmem:[%s8267_s26 + $0x8c8] sm:$0xff] %v1510_v25  ;;  %v1514_v27 = vld [vmem:[%s8262_s25 + $0xef8] sm:$0xff]  ;;  %v1516_v28 = vld [vmem:[%s8262_s25 + $0xf00] sm:$0xff] }
  0x9e   : > { %1513 = vst [vmem:[%s8267_s26 + $0x8d0] sm:$0xff] %v1512_v26  ;;  %1515 = vst [vmem:[%s8267_s26 + $0x8d8] sm:$0xff] %v1514_v27  ;;  %v1518_v29 = vld [vmem:[%s8262_s25 + $0xf08] sm:$0xff]  ;;  %v1520_v30 = vld [vmem:[%s8262_s25 + $0xf10] sm:$0xff] }
  0x9f   : > { %1517 = vst [vmem:[%s8267_s26 + $0x8e0] sm:$0xff] %v1516_v28  ;;  %v1522_v31 = vld [vmem:[%s8262_s25 + $0xf18] sm:$0xff]  ;;  %1519 = vst [vmem:[%s8267_s26 + $0x8e8] sm:$0xff] %v1518_v29  ;;  %v1524_v32 = vld [vmem:[%s8262_s25 + $0xf20] sm:$0xff] }
  0xa0   : > { %1521 = vst [vmem:[%s8267_s26 + $0x8f0] sm:$0xff] %v1520_v30  ;;  %1523 = vst [vmem:[%s8267_s26 + $0x8f8] sm:$0xff] %v1522_v31  ;;  %v1526_v33 = vld [vmem:[%s8262_s25 + $0xf28] sm:$0xff]  ;;  %v1528_v34 = vld [vmem:[%s8262_s25 + $0xf30] sm:$0xff] }
  0xa1   : > { %1525 = vst [vmem:[%s8267_s26 + $0x900] sm:$0xff] %v1524_v32  ;;  %1527 = vst [vmem:[%s8267_s26 + $0x908] sm:$0xff] %v1526_v33  ;;  %v1530_v35 = vld [vmem:[%s8262_s25 + $0xf38] sm:$0xff]  ;;  %v1532_v36 = vld [vmem:[%s8262_s25 + $0xf40] sm:$0xff] }
  0xa2   : > { %1529 = vst [vmem:[%s8267_s26 + $0x910] sm:$0xff] %v1528_v34  ;;  %v1534_v37 = vld [vmem:[%s8262_s25 + $0xf48] sm:$0xff]  ;;  %1531 = vst [vmem:[%s8267_s26 + $0x918] sm:$0xff] %v1530_v35  ;;  %v1536_v38 = vld [vmem:[%s8262_s25 + $0x1260] sm:$0xff] }
  0xa3   : > { %1533 = vst [vmem:[%s8267_s26 + $0x920] sm:$0xff] %v1532_v36  ;;  %1535 = vst [vmem:[%s8267_s26 + $0x928] sm:$0xff] %v1534_v37  ;;  %v1538_v39 = vld [vmem:[%s8262_s25 + $0x1268] sm:$0xff]  ;;  %v1540_v40 = vld [vmem:[%s8262_s25 + $0x1270] sm:$0xff] }
  0xa4   : > { %1537 = vst [vmem:[%s8267_s26 + $0x930] sm:$0xff] %v1536_v38  ;;  %1539 = vst [vmem:[%s8267_s26 + $0x938] sm:$0xff] %v1538_v39  ;;  %v1542_v41 = vld [vmem:[%s8262_s25 + $0x1278] sm:$0xff]  ;;  %v1544_v42 = vld [vmem:[%s8262_s25 + $0x1280] sm:$0xff] }
  0xa5   : > { %1541 = vst [vmem:[%s8267_s26 + $0x940] sm:$0xff] %v1540_v40  ;;  %v1546_v43 = vld [vmem:[%s8262_s25 + $0x1288] sm:$0xff]  ;;  %1543 = vst [vmem:[%s8267_s26 + $0x948] sm:$0xff] %v1542_v41  ;;  %v1548_v44 = vld [vmem:[%s8262_s25 + $0x1290] sm:$0xff] }
  0xa6   : > { %1545 = vst [vmem:[%s8267_s26 + $0x950] sm:$0xff] %v1544_v42  ;;  %1547 = vst [vmem:[%s8267_s26 + $0x958] sm:$0xff] %v1546_v43  ;;  %v1550_v45 = vld [vmem:[%s8262_s25 + $0x1298] sm:$0xff]  ;;  %v1552_v46 = vld [vmem:[%s8262_s25 + $0x12a0] sm:$0xff] }
  0xa7   : > { %1549 = vst [vmem:[%s8267_s26 + $0x960] sm:$0xff] %v1548_v44  ;;  %1551 = vst [vmem:[%s8267_s26 + $0x968] sm:$0xff] %v1550_v45  ;;  %v1554_v47 = vld [vmem:[%s8262_s25 + $0x12a8] sm:$0xff]  ;;  %v1556_v48 = vld [vmem:[%s8262_s25 + $0x12b0] sm:$0xff] }
  0xa8   : > { %1553 = vst [vmem:[%s8267_s26 + $0x970] sm:$0xff] %v1552_v46  ;;  %v1558_v49 = vld [vmem:[%s8262_s25 + $0x12b8] sm:$0xff]  ;;  %1555 = vst [vmem:[%s8267_s26 + $0x978] sm:$0xff] %v1554_v47  ;;  %v1560_v50 = vld [vmem:[%s8262_s25 + $0x12c0] sm:$0xff] }
  0xa9   : > { %1557 = vst [vmem:[%s8267_s26 + $0x980] sm:$0xff] %v1556_v48  ;;  %1559 = vst [vmem:[%s8267_s26 + $0x988] sm:$0xff] %v1558_v49  ;;  %v1562_v51 = vld [vmem:[%s8262_s25 + $0x12c8] sm:$0xff]  ;;  %v1564_v52 = vld [vmem:[%s8262_s25 + $0x12d0] sm:$0xff] }
  0xaa   : > { %1561 = vst [vmem:[%s8267_s26 + $0x990] sm:$0xff] %v1560_v50  ;;  %1563 = vst [vmem:[%s8267_s26 + $0x998] sm:$0xff] %v1562_v51  ;;  %v1566_v53 = vld [vmem:[%s8262_s25 + $0x12d8] sm:$0xff]  ;;  %v1568_v54 = vld [vmem:[%s8262_s25 + $0x12e0] sm:$0xff] }
  0xab   : > { %1565 = vst [vmem:[%s8267_s26 + $0x9a0] sm:$0xff] %v1564_v52  ;;  %v1570_v55 = vld [vmem:[%s8262_s25 + $0x12e8] sm:$0xff]  ;;  %1567 = vst [vmem:[%s8267_s26 + $0x9a8] sm:$0xff] %v1566_v53  ;;  %v1572_v56 = vld [vmem:[%s8262_s25 + $0x12f0] sm:$0xff] }
  0xac   : > { %1569 = vst [vmem:[%s8267_s26 + $0x9b0] sm:$0xff] %v1568_v54  ;;  %1571 = vst [vmem:[%s8267_s26 + $0x9b8] sm:$0xff] %v1570_v55  ;;  %v1574_v57 = vld [vmem:[%s8262_s25 + $0x12f8] sm:$0xff]  ;;  %v1576_v58 = vld [vmem:[%s8262_s25 + $0x1300] sm:$0xff] }
  0xad   : > { %1573 = vst [vmem:[%s8267_s26 + $0x9c0] sm:$0xff] %v1572_v56  ;;  %1575 = vst [vmem:[%s8267_s26 + $0x9c8] sm:$0xff] %v1574_v57  ;;  %v1578_v59 = vld [vmem:[%s8262_s25 + $0x1308] sm:$0xff]  ;;  %v1580_v60 = vld [vmem:[%s8262_s25 + $0x1310] sm:$0xff] }
  0xae   : > { %1577 = vst [vmem:[%s8267_s26 + $0x9d0] sm:$0xff] %v1576_v58  ;;  %v1582_v61 = vld [vmem:[%s8262_s25 + $0x1318] sm:$0xff]  ;;  %1579 = vst [vmem:[%s8267_s26 + $0x9d8] sm:$0xff] %v1578_v59  ;;  %v1584_v62 = vld [vmem:[%s8262_s25 + $0x1320] sm:$0xff] }
  0xaf   : > { %1581 = vst [vmem:[%s8267_s26 + $0x9e0] sm:$0xff] %v1580_v60  ;;  %1583 = vst [vmem:[%s8267_s26 + $0x9e8] sm:$0xff] %v1582_v61  ;;  %v1586_v63 = vld [vmem:[%s8262_s25 + $0x1328] sm:$0xff]  ;;  %v1588_v0 = vld [vmem:[%s8262_s25 + $0x1330] sm:$0xff] }
  0xb0   : > { %1585 = vst [vmem:[%s8267_s26 + $0x9f0] sm:$0xff] %v1584_v62  ;;  %1587 = vst [vmem:[%s8267_s26 + $0x9f8] sm:$0xff] %v1586_v63  ;;  %v1590_v1 = vld [vmem:[%s8262_s25 + $0x1338] sm:$0xff]  ;;  %v1592_v2 = vld [vmem:[%s8262_s25 + $0x1340] sm:$0xff] }
  0xb1   : > { %1589 = vst [vmem:[%s8267_s26 + $0xa00] sm:$0xff] %v1588_v0  ;;  %v1594_v3 = vld [vmem:[%s8262_s25 + $0x1348] sm:$0xff]  ;;  %1591 = vst [vmem:[%s8267_s26 + $0xa08] sm:$0xff] %v1590_v1  ;;  %v1596_v4 = vld [vmem:[%s8262_s25 + $0x1350] sm:$0xff] }
  0xb2   : > { %1593 = vst [vmem:[%s8267_s26 + $0xa10] sm:$0xff] %v1592_v2  ;;  %1595 = vst [vmem:[%s8267_s26 + $0xa18] sm:$0xff] %v1594_v3  ;;  %v1598_v5 = vld [vmem:[%s8262_s25 + $0x1358] sm:$0xff]  ;;  %v1600_v6 = vld [vmem:[%s8262_s25 + $0x1360] sm:$0xff] }
  0xb3   : > { %1597 = vst [vmem:[%s8267_s26 + $0xa20] sm:$0xff] %v1596_v4  ;;  %1599 = vst [vmem:[%s8267_s26 + $0xa28] sm:$0xff] %v1598_v5  ;;  %v1602_v7 = vld [vmem:[%s8262_s25 + $0x1368] sm:$0xff]  ;;  %v1604_v8 = vld [vmem:[%s8262_s25 + $0x1370] sm:$0xff] }
  0xb4   : > { %1601 = vst [vmem:[%s8267_s26 + $0xa30] sm:$0xff] %v1600_v6  ;;  %v1606_v9 = vld [vmem:[%s8262_s25 + $0x1378] sm:$0xff]  ;;  %1603 = vst [vmem:[%s8267_s26 + $0xa38] sm:$0xff] %v1602_v7  ;;  %v1608_v10 = vld [vmem:[%s8262_s25 + $0x1380] sm:$0xff] }
  0xb5   : > { %1605 = vst [vmem:[%s8267_s26 + $0xa40] sm:$0xff] %v1604_v8  ;;  %1607 = vst [vmem:[%s8267_s26 + $0xa48] sm:$0xff] %v1606_v9  ;;  %v1610_v11 = vld [vmem:[%s8262_s25 + $0x1388] sm:$0xff]  ;;  %v1612_v12 = vld [vmem:[%s8262_s25 + $0x1390] sm:$0xff] }
  0xb6   : > { %1609 = vst [vmem:[%s8267_s26 + $0xa50] sm:$0xff] %v1608_v10  ;;  %1611 = vst [vmem:[%s8267_s26 + $0xa58] sm:$0xff] %v1610_v11  ;;  %v1614_v13 = vld [vmem:[%s8262_s25 + $0x1398] sm:$0xff]  ;;  %v1616_v14 = vld [vmem:[%s8262_s25 + $0x13a0] sm:$0xff] }
  0xb7   : > { %1613 = vst [vmem:[%s8267_s26 + $0xa60] sm:$0xff] %v1612_v12  ;;  %v1618_v15 = vld [vmem:[%s8262_s25 + $0x13a8] sm:$0xff]  ;;  %1615 = vst [vmem:[%s8267_s26 + $0xa68] sm:$0xff] %v1614_v13  ;;  %v1620_v16 = vld [vmem:[%s8262_s25 + $0x13b0] sm:$0xff] }
  0xb8   : > { %1617 = vst [vmem:[%s8267_s26 + $0xa70] sm:$0xff] %v1616_v14  ;;  %1619 = vst [vmem:[%s8267_s26 + $0xa78] sm:$0xff] %v1618_v15  ;;  %v1622_v17 = vld [vmem:[%s8262_s25 + $0x13b8] sm:$0xff]  ;;  %v1624_v18 = vld [vmem:[%s8262_s25 + $0x13c0] sm:$0xff] }
  0xb9   : > { %1621 = vst [vmem:[%s8267_s26 + $0xa80] sm:$0xff] %v1620_v16  ;;  %1623 = vst [vmem:[%s8267_s26 + $0xa88] sm:$0xff] %v1622_v17  ;;  %v1626_v19 = vld [vmem:[%s8262_s25 + $0x13c8] sm:$0xff]  ;;  %v1628_v20 = vld [vmem:[%s8262_s25 + $0x13d0] sm:$0xff] }
  0xba   : > { %1625 = vst [vmem:[%s8267_s26 + $0xa90] sm:$0xff] %v1624_v18  ;;  %v1630_v21 = vld [vmem:[%s8262_s25 + $0x13d8] sm:$0xff]  ;;  %1627 = vst [vmem:[%s8267_s26 + $0xa98] sm:$0xff] %v1626_v19  ;;  %v1632_v22 = vld [vmem:[%s8262_s25 + $0x13e0] sm:$0xff] }
  0xbb   : > { %1629 = vst [vmem:[%s8267_s26 + $0xaa0] sm:$0xff] %v1628_v20  ;;  %1631 = vst [vmem:[%s8267_s26 + $0xaa8] sm:$0xff] %v1630_v21  ;;  %v1634_v23 = vld [vmem:[%s8262_s25 + $0x13e8] sm:$0xff]  ;;  %v1636_v24 = vld [vmem:[%s8262_s25 + $0x13f0] sm:$0xff] }
  0xbc   : > { %1633 = vst [vmem:[%s8267_s26 + $0xab0] sm:$0xff] %v1632_v22  ;;  %1635 = vst [vmem:[%s8267_s26 + $0xab8] sm:$0xff] %v1634_v23  ;;  %v1638_v25 = vld [vmem:[%s8262_s25 + $0x13f8] sm:$0xff]  ;;  %v1640_v26 = vld [vmem:[%s8262_s25 + $0x1400] sm:$0xff] }
  0xbd   : > { %1637 = vst [vmem:[%s8267_s26 + $0xac0] sm:$0xff] %v1636_v24  ;;  %v1642_v27 = vld [vmem:[%s8262_s25 + $0x1408] sm:$0xff]  ;;  %1639 = vst [vmem:[%s8267_s26 + $0xac8] sm:$0xff] %v1638_v25  ;;  %v1644_v28 = vld [vmem:[%s8262_s25 + $0x1410] sm:$0xff] }
  0xbe   : > { %1641 = vst [vmem:[%s8267_s26 + $0xad0] sm:$0xff] %v1640_v26  ;;  %1643 = vst [vmem:[%s8267_s26 + $0xad8] sm:$0xff] %v1642_v27  ;;  %v1646_v29 = vld [vmem:[%s8262_s25 + $0x1418] sm:$0xff]  ;;  %v1648_v30 = vld [vmem:[%s8262_s25 + $0x1420] sm:$0xff] }
  0xbf   : > { %1645 = vst [vmem:[%s8267_s26 + $0xae0] sm:$0xff] %v1644_v28  ;;  %1647 = vst [vmem:[%s8267_s26 + $0xae8] sm:$0xff] %v1646_v29  ;;  %v1650_v31 = vld [vmem:[%s8262_s25 + $0x1428] sm:$0xff]  ;;  %v1652_v32 = vld [vmem:[%s8262_s25 + $0x1430] sm:$0xff] }
  0xc0   : > { %1649 = vst [vmem:[%s8267_s26 + $0xaf0] sm:$0xff] %v1648_v30  ;;  %v1654_v33 = vld [vmem:[%s8262_s25 + $0x1438] sm:$0xff]  ;;  %1651 = vst [vmem:[%s8267_s26 + $0xaf8] sm:$0xff] %v1650_v31  ;;  %v1656_v34 = vld [vmem:[%s8262_s25 + $0x1440] sm:$0xff] }
  0xc1   : > { %1653 = vst [vmem:[%s8267_s26 + $0xb00] sm:$0xff] %v1652_v32  ;;  %1655 = vst [vmem:[%s8267_s26 + $0xb08] sm:$0xff] %v1654_v33  ;;  %v1658_v35 = vld [vmem:[%s8262_s25 + $0x1448] sm:$0xff]  ;;  %v1660_v36 = vld [vmem:[%s8262_s25 + $0x1450] sm:$0xff] }
  0xc2   : > { %1657 = vst [vmem:[%s8267_s26 + $0xb10] sm:$0xff] %v1656_v34  ;;  %1659 = vst [vmem:[%s8267_s26 + $0xb18] sm:$0xff] %v1658_v35  ;;  %v1662_v37 = vld [vmem:[%s8262_s25 + $0x1458] sm:$0xff]  ;;  %v1664_v38 = vld [vmem:[%s8262_s25 + $0x1460] sm:$0xff] }
  0xc3   : > { %1661 = vst [vmem:[%s8267_s26 + $0xb20] sm:$0xff] %v1660_v36  ;;  %v1666_v39 = vld [vmem:[%s8262_s25 + $0x1468] sm:$0xff]  ;;  %1663 = vst [vmem:[%s8267_s26 + $0xb28] sm:$0xff] %v1662_v37  ;;  %v1668_v40 = vld [vmem:[%s8262_s25 + $0x1470] sm:$0xff] }
  0xc4   : > { %1665 = vst [vmem:[%s8267_s26 + $0xb30] sm:$0xff] %v1664_v38  ;;  %1667 = vst [vmem:[%s8267_s26 + $0xb38] sm:$0xff] %v1666_v39  ;;  %v1670_v41 = vld [vmem:[%s8262_s25 + $0x1478] sm:$0xff]  ;;  %v1672_v42 = vld [vmem:[%s8262_s25 + $0x1480] sm:$0xff] }
  0xc5   : > { %1669 = vst [vmem:[%s8267_s26 + $0xb40] sm:$0xff] %v1668_v40  ;;  %1671 = vst [vmem:[%s8267_s26 + $0xb48] sm:$0xff] %v1670_v41  ;;  %v1674_v43 = vld [vmem:[%s8262_s25 + $0x1488] sm:$0xff]  ;;  %v1676_v44 = vld [vmem:[%s8262_s25 + $0x1490] sm:$0xff] }
  0xc6   : > { %1673 = vst [vmem:[%s8267_s26 + $0xb50] sm:$0xff] %v1672_v42  ;;  %v1678_v45 = vld [vmem:[%s8262_s25 + $0x1498] sm:$0xff]  ;;  %1675 = vst [vmem:[%s8267_s26 + $0xb58] sm:$0xff] %v1674_v43  ;;  %v1680_v46 = vld [vmem:[%s8262_s25 + $0x14a0] sm:$0xff] }
  0xc7   : > { %1677 = vst [vmem:[%s8267_s26 + $0xb60] sm:$0xff] %v1676_v44  ;;  %1679 = vst [vmem:[%s8267_s26 + $0xb68] sm:$0xff] %v1678_v45  ;;  %v1682_v47 = vld [vmem:[%s8262_s25 + $0x14a8] sm:$0xff]  ;;  %v1684_v48 = vld [vmem:[%s8262_s25 + $0x14b0] sm:$0xff] }
  0xc8   : > { %1681 = vst [vmem:[%s8267_s26 + $0xb70] sm:$0xff] %v1680_v46  ;;  %1683 = vst [vmem:[%s8267_s26 + $0xb78] sm:$0xff] %v1682_v47  ;;  %v1686_v49 = vld [vmem:[%s8262_s25 + $0x14b8] sm:$0xff]  ;;  %v1688_v50 = vld [vmem:[%s8262_s25 + $0x14c0] sm:$0xff] }
  0xc9   : > { %1685 = vst [vmem:[%s8267_s26 + $0xb80] sm:$0xff] %v1684_v48  ;;  %v1690_v51 = vld [vmem:[%s8262_s25 + $0x14c8] sm:$0xff]  ;;  %1687 = vst [vmem:[%s8267_s26 + $0xb88] sm:$0xff] %v1686_v49  ;;  %v1692_v52 = vld [vmem:[%s8262_s25 + $0x14d0] sm:$0xff] }
  0xca   : > { %1689 = vst [vmem:[%s8267_s26 + $0xb90] sm:$0xff] %v1688_v50  ;;  %1691 = vst [vmem:[%s8267_s26 + $0xb98] sm:$0xff] %v1690_v51  ;;  %v1694_v53 = vld [vmem:[%s8262_s25 + $0x14d8] sm:$0xff]  ;;  %v1696_v54 = vld [vmem:[%s8262_s25 + $0x14e0] sm:$0xff] }
  0xcb   : > { %1693 = vst [vmem:[%s8267_s26 + $0xba0] sm:$0xff] %v1692_v52  ;;  %1695 = vst [vmem:[%s8267_s26 + $0xba8] sm:$0xff] %v1694_v53  ;;  %v1698_v55 = vld [vmem:[%s8262_s25 + $0x14e8] sm:$0xff]  ;;  %v1700_v56 = vld [vmem:[%s8262_s25 + $0x14f0] sm:$0xff] }
  0xcc   : > { %1697 = vst [vmem:[%s8267_s26 + $0xbb0] sm:$0xff] %v1696_v54  ;;  %v1702_v57 = vld [vmem:[%s8262_s25 + $0x14f8] sm:$0xff]  ;;  %1699 = vst [vmem:[%s8267_s26 + $0xbb8] sm:$0xff] %v1698_v55  ;;  %v1704_v58 = vld [vmem:[%s8262_s25 + $0x1500] sm:$0xff] }
  0xcd   : > { %1701 = vst [vmem:[%s8267_s26 + $0xbc0] sm:$0xff] %v1700_v56  ;;  %1703 = vst [vmem:[%s8267_s26 + $0xbc8] sm:$0xff] %v1702_v57  ;;  %v1706_v59 = vld [vmem:[%s8262_s25 + $0x1508] sm:$0xff]  ;;  %v1708_v60 = vld [vmem:[%s8262_s25 + $0x1510] sm:$0xff] }
  0xce   : > { %1705 = vst [vmem:[%s8267_s26 + $0xbd0] sm:$0xff] %v1704_v58  ;;  %1707 = vst [vmem:[%s8267_s26 + $0xbd8] sm:$0xff] %v1706_v59  ;;  %v1710_v61 = vld [vmem:[%s8262_s25 + $0x1518] sm:$0xff]  ;;  %v1712_v62 = vld [vmem:[%s8262_s25 + $0x1520] sm:$0xff] }
  0xcf   : > { %1709 = vst [vmem:[%s8267_s26 + $0xbe0] sm:$0xff] %v1708_v60  ;;  %v1714_v63 = vld [vmem:[%s8262_s25 + $0x1528] sm:$0xff]  ;;  %1711 = vst [vmem:[%s8267_s26 + $0xbe8] sm:$0xff] %v1710_v61  ;;  %v1716_v0 = vld [vmem:[%s8262_s25 + $0x1530] sm:$0xff] }
  0xd0   : > { %1713 = vst [vmem:[%s8267_s26 + $0xbf0] sm:$0xff] %v1712_v62  ;;  %1715 = vst [vmem:[%s8267_s26 + $0xbf8] sm:$0xff] %v1714_v63  ;;  %v1718_v1 = vld [vmem:[%s8262_s25 + $0x1538] sm:$0xff]  ;;  %v1720_v2 = vld [vmem:[%s8262_s25 + $0x1540] sm:$0xff] }
  0xd1   : > { %1717 = vst [vmem:[%s8267_s26 + $0xc00] sm:$0xff] %v1716_v0  ;;  %1719 = vst [vmem:[%s8267_s26 + $0xc08] sm:$0xff] %v1718_v1  ;;  %v1722_v3 = vld [vmem:[%s8262_s25 + $0x1548] sm:$0xff]  ;;  %v1724_v4 = vld [vmem:[%s8262_s25 + $0x1550] sm:$0xff] }
  0xd2   : > { %1721 = vst [vmem:[%s8267_s26 + $0xc10] sm:$0xff] %v1720_v2  ;;  %v1726_v5 = vld [vmem:[%s8262_s25 + $0x1558] sm:$0xff]  ;;  %1723 = vst [vmem:[%s8267_s26 + $0xc18] sm:$0xff] %v1722_v3  ;;  %v1728_v6 = vld [vmem:[%s8262_s25 + $0x1560] sm:$0xff] }
  0xd3   : > { %1725 = vst [vmem:[%s8267_s26 + $0xc20] sm:$0xff] %v1724_v4  ;;  %1727 = vst [vmem:[%s8267_s26 + $0xc28] sm:$0xff] %v1726_v5  ;;  %v1730_v7 = vld [vmem:[%s8262_s25 + $0x1568] sm:$0xff] }
  0xd4   : > { %1729 = vst [vmem:[%s8267_s26 + $0xc30] sm:$0xff] %v1728_v6  ;;  %1731 = vst [vmem:[%s8267_s26 + $0xc38] sm:$0xff] %v1730_v7 }
  0xd5 PF: > { %p6431_p5 = scmp.ge.s32.totalorder %s8206_s14, 1  ;;  %p1736_p6 = scmp.lt.s32.totalorder %s8206_s14, 3 }
  0xd7   : > { %p1737_p7 = pnand %p6431_p5, %p1736_p6 }
  0xd9   : > { %1740 = sbr.rel (%p1737_p7) target bundleno = 824 (0x338), region = 66 }
  0xde   : > { %v1776_v8 = vld [vmem:[%s10697_s1 + $0x18] sm:$0x1]  ;;  %vm2177_vm0 = vcmask 1040384   ;;  %v1775_v9 = vld [vmem:[%s10697_s1 + $0x10] sm:$0xff]  ;;  %s1743_s4 = sand.u32 1, %s8198_s12   ;;  %v1774_v10 = vld [vmem:[%s10697_s1 + $0x8] sm:$0xff] }
  0xdf   : > { %7535 = vmatprep.subr.msk.mxu0 %vm2177_vm0, %v1776_v8  ;;  %7690 = vmatprep.subr.msk.mxu1 %vm2177_vm0, %v1776_v8  ;;  %s8156_s5 = smul.u32 3136, %s1743_s4  ;;  %v9069_v11 = vld [vmem:[%s10697_s1] sm:$0xff]  ;;  %vm1882_vm1 = vcmask 203776  }
  0xe0   : > { %7536 = vmatpush3.msk.msra.mxu0 %vm2177_vm0, %v1776_v8  ;;  %7691 = vmatpush3.msk.msra.mxu1 %vm2177_vm0, %v1776_v8  ;;  %s10244_s22 = smul.u32 98, %s6426_s15 }
  0xe1   : > { %7537 = vmatprep.subr.mxu0 %v1775_v9  ;;  %7692 = vmatprep.subr.mxu1 %v1775_v9  ;;  %s9071_s10 = scalar_lea.vmem [#allocation2], %s8156_s5 }
  0xe2   : > { %7538 = vmatpush3.msra.mxu0 %v1775_v9  ;;  %7693 = vmatpush3.msra.mxu1 %v1775_v9  ;;  %v1778_v12 = vld [vmem:[%s9071_s10] sm:$0xff]  ;;  %v6533_v13 = vld [vmem:[%s9071_s10 + $0x310] sm:$0xff]  ;;  %v1779_v14 = vld [vmem:[%s9071_s10 + $0x8] sm:$0xff]  ;;  %p1768_p8 = scmp.lt.s32.totalorder %s10244_s22, 195 }
  0xe3   : > { %7539 = vmatprep.subr.mxu0 %v1774_v10  ;;  %7694 = vmatprep.subr.mxu1 %v1774_v10  ;;  %v6534_v15 = vld [vmem:[%s9071_s10 + $0x318] sm:$0xff]  ;;  %v1780_v16 = vld [vmem:[%s9071_s10 + $0x10] sm:$0xff]  ;;  %v6535_v17 = vld [vmem:[%s9071_s10 + $0x320] sm:$0xff] }
  0xe4   : > { %7540 = vmatpush3.msra.mxu0 %v1774_v10  ;;  %7695 = vmatpush3.msra.mxu1 %v1774_v10  ;;  %v1781_v18 = vld [vmem:[%s9071_s10 + $0x18] sm:$0xff]  ;;  %v6536_v19 = vld [vmem:[%s9071_s10 + $0x328] sm:$0xff]  ;;  %v1782_v20 = vld [vmem:[%s9071_s10 + $0x20] sm:$0xff]  ;;  %s10812_s22 = smov (!%p1768_p8, %s10244_s22), 195 }
  0xe5   : > { %7541 = vmatprep.subr.mxu0 %v9069_v11  ;;  %7696 = vmatprep.subr.mxu1 %v9069_v11  ;;  %v6537_v21 = vld [vmem:[%s9071_s10 + $0x330] sm:$0xff]  ;;  %v1783_v22 = vld [vmem:[%s9071_s10 + $0x28] sm:$0xff]  ;;  %v6538_v23 = vld [vmem:[%s9071_s10 + $0x338] sm:$0xff]  ;;  %s6432_s14 = sshll.u32 %s10812_s22, 3 }
  0xe6   : > { %7542 = vmatpush3.msra.mxu0 %v9069_v11  ;;  %7543 = vmatprep.mubr.msk.f32.mxu0 %vm1882_vm1, %v1778_v12  ;;  %v1784_v24 = vld [vmem:[%s9071_s10 + $0x30] sm:$0xff]  ;;  %v6539_v25 = vld [vmem:[%s9071_s10 + $0x340] sm:$0xff]  ;;  %v1785_v26 = vld [vmem:[%s9071_s10 + $0x38] sm:$0xff]  ;;  %s10293_s24 = scalar_lea.vmem %s10699_s3, %s6432_s14 }
  0xe7   : > { %7697 = vmatpush3.msra.mxu1 %v9069_v11  ;;  %7698 = vmatprep.mubr.msk.f32.mxu1 %vm1882_vm1, %v6533_v13  ;;  %v6540_v27 = vld [vmem:[%s9071_s10 + $0x348] sm:$0xff]  ;;  %v1786_v28 = vld [vmem:[%s9071_s10 + $0x40] sm:$0xff]  ;;  %v6541_v29 = vld [vmem:[%s9071_s10 + $0x350] sm:$0xff] }
  0xe8   : > { %7544 = vmatmul.mubr.msk.f32.vlgmr.msra.gmra.mxu0 %vm1882_vm1, %v1779_v14  ;;  %7699 = vmatmul.mubr.msk.f32.vlgmr.msra.gmra.mxu1 %vm1882_vm1, %v6534_v15  ;;  %v1787_v30 = vld [vmem:[%s9071_s10 + $0x48] sm:$0xff]  ;;  %v6542_v31 = vld [vmem:[%s9071_s10 + $0x358] sm:$0xff]  ;;  %v1788_v32 = vld [vmem:[%s9071_s10 + $0x50] sm:$0xff] }
  0xe9   : > { %7845 = vmatprep.subr.msk.mxu0 %vm2177_vm0, %v1776_v8  ;;  %8000 = vmatprep.subr.msk.mxu1 %vm2177_vm0, %v1776_v8  ;;  %v6543_v33 = vld [vmem:[%s9071_s10 + $0x360] sm:$0xff]  ;;  %v1789_v34 = vld [vmem:[%s9071_s10 + $0x58] sm:$0xff]  ;;  %v6544_v35 = vld [vmem:[%s9071_s10 + $0x368] sm:$0xff] }
  0xea   : > { %7846 = vmatpush3.msk.msra.mxu0 %vm2177_vm0, %v1776_v8  ;;  %8001 = vmatpush3.msk.msra.mxu1 %vm2177_vm0, %v1776_v8  ;;  %v1790_v36 = vld [vmem:[%s9071_s10 + $0x60] sm:$0xff]  ;;  %v6545_v37 = vld [vmem:[%s9071_s10 + $0x370] sm:$0xff]  ;;  %v1791_v38 = vld [vmem:[%s9071_s10 + $0x68] sm:$0xff] }
  0xeb   : > { %7546 = vmatprep.mubr.msk.f32.mxu0 %vm1882_vm1, %v1780_v16  ;;  %7701 = vmatprep.mubr.msk.f32.mxu1 %vm1882_vm1, %v6535_v17  ;;  %v6546_v39 = vld [vmem:[%s9071_s10 + $0x378] sm:$0xff]  ;;  %v1792_v40 = vld [vmem:[%s9071_s10 + $0x70] sm:$0xff]  ;;  %v6547_v41 = vld [vmem:[%s9071_s10 + $0x380] sm:$0xff] }
  0xec   : > { %7547 = vmatmul.mubr.msk.f32.gmra.mxu0 %vm1882_vm1, %v1781_v18  ;;  %7702 = vmatmul.mubr.msk.f32.gmra.mxu1 %vm1882_vm1, %v6536_v19  ;;  %v1793_v42 = vld [vmem:[%s9071_s10 + $0x78] sm:$0xff]  ;;  %v6548_v43 = vld [vmem:[%s9071_s10 + $0x388] sm:$0xff]  ;;  %v1794_v44 = vld [vmem:[%s9071_s10 + $0x80] sm:$0xff] }
  0xed   : > { %7549 = vmatprep.mubr.msk.f32.mxu0 %vm1882_vm1, %v1782_v20  ;;  %7704 = vmatprep.mubr.msk.f32.mxu1 %vm1882_vm1, %v6537_v21  ;;  %v6549_v45 = vld [vmem:[%s9071_s10 + $0x390] sm:$0xff]  ;;  %v1795_v46 = vld [vmem:[%s9071_s10 + $0x88] sm:$0xff]  ;;  %v6550_v47 = vld [vmem:[%s9071_s10 + $0x398] sm:$0xff] }
  0xee   : > { %7847 = vmatprep.subr.mxu0 %v1775_v9  ;;  %8002 = vmatprep.subr.mxu1 %v1775_v9  ;;  %v1796_v48 = vld [vmem:[%s9071_s10 + $0x90] sm:$0xff]  ;;  %v6551_v49 = vld [vmem:[%s9071_s10 + $0x3a0] sm:$0xff]  ;;  %v1797_v50 = vld [vmem:[%s9071_s10 + $0x98] sm:$0xff] }
  0xef   : > { %7848 = vmatpush3.msra.mxu0 %v1775_v9  ;;  %8003 = vmatpush3.msra.mxu1 %v1775_v9  ;;  %v6552_v51 = vld [vmem:[%s9071_s10 + $0x3a8] sm:$0xff]  ;;  %v1798_v52 = vld [vmem:[%s9071_s10 + $0xa0] sm:$0xff]  ;;  %v6553_v53 = vld [vmem:[%s9071_s10 + $0x3b0] sm:$0xff] }
  0xf0   : > { %7550 = vmatmul.mubr.msk.f32.gmra.mxu0 %vm1882_vm1, %v1783_v22  ;;  %7705 = vmatmul.mubr.msk.f32.gmra.mxu1 %vm1882_vm1, %v6538_v23  ;;  %v1799_v54 = vld [vmem:[%s9071_s10 + $0xa8] sm:$0xff]  ;;  %v6554_v55 = vld [vmem:[%s9071_s10 + $0x3b8] sm:$0xff]  ;;  %v1800_v56 = vld [vmem:[%s9071_s10 + $0xb0] sm:$0xff] }
  0xf1   : > { %7552 = vmatprep.mubr.msk.f32.mxu0 %vm1882_vm1, %v1784_v24  ;;  %7707 = vmatprep.mubr.msk.f32.mxu1 %vm1882_vm1, %v6539_v25  ;;  %v6555_v57 = vld [vmem:[%s9071_s10 + $0x3c0] sm:$0xff]  ;;  %v1801_v58 = vld [vmem:[%s9071_s10 + $0xb8] sm:$0xff]  ;;  %v6556_v59 = vld [vmem:[%s9071_s10 + $0x3c8] sm:$0xff] }
  0xf2   : > { %7849 = vmatprep.subr.mxu0 %v1774_v10  ;;  %8004 = vmatprep.subr.mxu1 %v1774_v10  ;;  %v1802_v60 = vld [vmem:[%s9071_s10 + $0xc0] sm:$0xff]  ;;  %v6557_v61 = vld [vmem:[%s9071_s10 + $0x3d0] sm:$0xff]  ;;  %v1803_v62 = vld [vmem:[%s9071_s10 + $0xc8] sm:$0xff] }
  0xf3   : > { %7850 = vmatpush3.msra.mxu0 %v1774_v10  ;;  %8005 = vmatpush3.msra.mxu1 %v1774_v10  ;;  %v6558_v63 = vld [vmem:[%s9071_s10 + $0x3d8] sm:$0xff]  ;;  %v1804_v0 = vld [vmem:[%s9071_s10 + $0xd0] sm:$0xff]  ;;  %v6559_v1 = vld [vmem:[%s9071_s10 + $0x3e0] sm:$0xff] }
  0xf4   : > { %7553 = vmatmul.mubr.msk.f32.gmra.mxu0 %vm1882_vm1, %v1785_v26  ;;  %7708 = vmatmul.mubr.msk.f32.gmra.mxu1 %vm1882_vm1, %v6540_v27  ;;  %v1805_v2 = vld [vmem:[%s9071_s10 + $0xd8] sm:$0xff]  ;;  %v6560_v3 = vld [vmem:[%s9071_s10 + $0x3e8] sm:$0xff]  ;;  %v1806_v4 = vld [vmem:[%s9071_s10 + $0xe0] sm:$0xff] }
  0xf5   : > { %7555 = vmatprep.mubr.msk.f32.mxu0 %vm1882_vm1, %v1786_v28  ;;  %7710 = vmatprep.mubr.msk.f32.mxu1 %vm1882_vm1, %v6541_v29  ;;  %v6561_v5 = vld [vmem:[%s9071_s10 + $0x3f0] sm:$0xff]  ;;  %v1807_v6 = vld [vmem:[%s9071_s10 + $0xe8] sm:$0xff]  ;;  %v6562_v7 = vld [vmem:[%s9071_s10 + $0x3f8] sm:$0xff] }
  0xf6   : > { %7851 = vmatprep.subr.mxu0 %v9069_v11  ;;  %8006 = vmatprep.subr.mxu1 %v9069_v11  ;;  %v1808_v8 = vld [vmem:[%s9071_s10 + $0xf0] sm:$0xff]  ;;  %v6563_v9 = vld [vmem:[%s9071_s10 + $0x400] sm:$0xff]  ;;  %v1809_v10 = vld [vmem:[%s9071_s10 + $0xf8] sm:$0xff] }
  0xf7   : > { %7852 = vmatpush3.msra.mxu0 %v9069_v11  ;;  %8007 = vmatpush3.msra.mxu1 %v9069_v11  ;;  %v6564_v11 = vld [vmem:[%s9071_s10 + $0x408] sm:$0xff]  ;;  %v1810_v12 = vld [vmem:[%s9071_s10 + $0x100] sm:$0xff]  ;;  %v6565_v13 = vld [vmem:[%s9071_s10 + $0x410] sm:$0xff] }
  0xf8   : > { %7556 = vmatmul.mubr.msk.f32.gmra.mxu0 %vm1882_vm1, %v1787_v30  ;;  %7711 = vmatmul.mubr.msk.f32.gmra.mxu1 %vm1882_vm1, %v6542_v31  ;;  %v1811_v14 = vld [vmem:[%s9071_s10 + $0x108] sm:$0xff]  ;;  %v6566_v15 = vld [vmem:[%s9071_s10 + $0x418] sm:$0xff]  ;;  %v1812_v16 = vld [vmem:[%s9071_s10 + $0x110] sm:$0xff] }
  0xf9   : > { %7558 = vmatprep.mubr.msk.f32.mxu0 %vm1882_vm1, %v1788_v32  ;;  %7713 = vmatprep.mubr.msk.f32.mxu1 %vm1882_vm1, %v6543_v33  ;;  %v6567_v17 = vld [vmem:[%s9071_s10 + $0x420] sm:$0xff]  ;;  %v1813_v18 = vld [vmem:[%s9071_s10 + $0x118] sm:$0xff]  ;;  %v6568_v19 = vld [vmem:[%s9071_s10 + $0x428] sm:$0xff] }
  0xfa   : > { %v1814_v20 = vld [vmem:[%s9071_s10 + $0x120] sm:$0xff]  ;;  %v6569_v21 = vld [vmem:[%s9071_s10 + $0x430] sm:$0xff]  ;;  %v1815_v22 = vld [vmem:[%s9071_s10 + $0x128] sm:$0xff] }
  0xfb   : > { %v6570_v23 = vld [vmem:[%s9071_s10 + $0x438] sm:$0xff]  ;;  %v1816_v24 = vld [vmem:[%s9071_s10 + $0x130] sm:$0xff]  ;;  %v6571_v25 = vld [vmem:[%s9071_s10 + $0x440] sm:$0xff] }
  0xfc   : > { %7559 = vmatmul.mubr.msk.f32.gmra.mxu0 %vm1882_vm1, %v1789_v34  ;;  %7714 = vmatmul.mubr.msk.f32.gmra.mxu1 %vm1882_vm1, %v6544_v35  ;;  %v1817_v26 = vld [vmem:[%s9071_s10 + $0x138] sm:$0xff]  ;;  %v6572_v27 = vld [vmem:[%s9071_s10 + $0x448] sm:$0xff]  ;;  %v1818_v28 = vld [vmem:[%s9071_s10 + $0x140] sm:$0xff] }
  0xfd   : > { %7561 = vmatprep.mubr.msk.f32.mxu0 %vm1882_vm1, %v1790_v36  ;;  %7716 = vmatprep.mubr.msk.f32.mxu1 %vm1882_vm1, %v6545_v37  ;;  %v6573_v29 = vld [vmem:[%s9071_s10 + $0x450] sm:$0xff]  ;;  %v1819_v30 = vld [vmem:[%s9071_s10 + $0x148] sm:$0xff]  ;;  %v6574_v31 = vld [vmem:[%s9071_s10 + $0x458] sm:$0xff] }
  0xfe   : > { %v1820_v32 = vld [vmem:[%s9071_s10 + $0x150] sm:$0xff]  ;;  %v6575_v33 = vld [vmem:[%s9071_s10 + $0x460] sm:$0xff]  ;;  %v1821_v34 = vld [vmem:[%s9071_s10 + $0x158] sm:$0xff] }
  0xff   : > { %v6576_v35 = vld [vmem:[%s9071_s10 + $0x468] sm:$0xff]  ;;  %v1822_v36 = vld [vmem:[%s9071_s10 + $0x160] sm:$0xff]  ;;  %v6577_v37 = vld [vmem:[%s9071_s10 + $0x470] sm:$0xff] }
 0x100   : > { %7562 = vmatmul.mubr.msk.f32.gmra.mxu0 %vm1882_vm1, %v1791_v38  ;;  %7717 = vmatmul.mubr.msk.f32.gmra.mxu1 %vm1882_vm1, %v6546_v39  ;;  %v1823_v38 = vld [vmem:[%s9071_s10 + $0x168] sm:$0xff]  ;;  %v6578_v39 = vld [vmem:[%s9071_s10 + $0x478] sm:$0xff] }
 0x101   : > { %7564 = vmatprep.mubr.msk.f32.mxu0 %vm1882_vm1, %v1792_v40  ;;  %7719 = vmatprep.mubr.msk.f32.mxu1 %vm1882_vm1, %v6547_v41  ;;  %v1824_v40 = vld [vmem:[%s9071_s10 + $0x170] sm:$0xff]  ;;  %v6579_v41 = vld [vmem:[%s9071_s10 + $0x480] sm:$0xff] }
 0x104   : > { %7565 = vmatmul.mubr.msk.f32.gmra.mxu0 %vm1882_vm1, %v1793_v42  ;;  %7720 = vmatmul.mubr.msk.f32.gmra.mxu1 %vm1882_vm1, %v6548_v43  ;;  %v1825_v42 = vld [vmem:[%s9071_s10 + $0x178] sm:$0xff]  ;;  %v6580_v43 = vld [vmem:[%s9071_s10 + $0x488] sm:$0xff] }
 0x105   : > { %7567 = vmatprep.mubr.msk.f32.mxu0 %vm1882_vm1, %v1794_v44  ;;  %7722 = vmatprep.mubr.msk.f32.mxu1 %vm1882_vm1, %v6549_v45  ;;  %v1826_v44 = vld [vmem:[%s9071_s10 + $0x180] sm:$0xff]  ;;  %v6581_v45 = vld [vmem:[%s9071_s10 + $0x490] sm:$0xff] }
 0x108   : > { %7568 = vmatmul.mubr.msk.f32.gmra.mxu0 %vm1882_vm1, %v1795_v46  ;;  %7723 = vmatmul.mubr.msk.f32.gmra.mxu1 %vm1882_vm1, %v6550_v47  ;;  %v1827_v46 = vld [vmem:[%s9071_s10 + $0x188] sm:$0xff]  ;;  %v6582_v47 = vld [vmem:[%s9071_s10 + $0x498] sm:$0xff] }
 0x109   : > { %7570 = vmatprep.mubr.msk.f32.mxu0 %vm1882_vm1, %v1796_v48  ;;  %7725 = vmatprep.mubr.msk.f32.mxu1 %vm1882_vm1, %v6551_v49  ;;  %v1828_v48 = vld [vmem:[%s9071_s10 + $0x190] sm:$0xff]  ;;  %v6583_v49 = vld [vmem:[%s9071_s10 + $0x4a0] sm:$0xff] }
 0x10c   : > { %7571 = vmatmul.mubr.msk.f32.gmra.mxu0 %vm1882_vm1, %v1797_v50  ;;  %7726 = vmatmul.mubr.msk.f32.gmra.mxu1 %vm1882_vm1, %v6552_v51  ;;  %v1829_v50 = vld [vmem:[%s9071_s10 + $0x198] sm:$0xff]  ;;  %v6584_v51 = vld [vmem:[%s9071_s10 + $0x4a8] sm:$0xff] }
 0x10d   : > { %7573 = vmatprep.mubr.msk.f32.mxu0 %vm1882_vm1, %v1798_v52  ;;  %7728 = vmatprep.mubr.msk.f32.mxu1 %vm1882_vm1, %v6553_v53  ;;  %v1830_v52 = vld [vmem:[%s9071_s10 + $0x1a0] sm:$0xff]  ;;  %v6585_v53 = vld [vmem:[%s9071_s10 + $0x4b0] sm:$0xff] }
 0x110   : > { %7574 = vmatmul.mubr.msk.f32.gmra.mxu0 %vm1882_vm1, %v1799_v54  ;;  %7729 = vmatmul.mubr.msk.f32.gmra.mxu1 %vm1882_vm1, %v6554_v55  ;;  %v1831_v54 = vld [vmem:[%s9071_s10 + $0x1a8] sm:$0xff]  ;;  %v6586_v55 = vld [vmem:[%s9071_s10 + $0x4b8] sm:$0xff] }
 0x111   : > { %7576 = vmatprep.mubr.msk.f32.mxu0 %vm1882_vm1, %v1800_v56  ;;  %7731 = vmatprep.mubr.msk.f32.mxu1 %vm1882_vm1, %v6555_v57  ;;  %v1832_v56 = vld [vmem:[%s9071_s10 + $0x1b0] sm:$0xff]  ;;  %v6587_v57 = vld [vmem:[%s9071_s10 + $0x4c0] sm:$0xff] }
 0x114   : > { %7577 = vmatmul.mubr.msk.f32.gmra.mxu0 %vm1882_vm1, %v1801_v58  ;;  %7732 = vmatmul.mubr.msk.f32.gmra.mxu1 %vm1882_vm1, %v6556_v59  ;;  %v1833_v58 = vld [vmem:[%s9071_s10 + $0x1b8] sm:$0xff]  ;;  %v6588_v59 = vld [vmem:[%s9071_s10 + $0x4c8] sm:$0xff] }
 0x115   : > { %7579 = vmatprep.mubr.msk.f32.mxu0 %vm1882_vm1, %v1802_v60  ;;  %7734 = vmatprep.mubr.msk.f32.mxu1 %vm1882_vm1, %v6557_v61  ;;  %v1834_v60 = vld [vmem:[%s9071_s10 + $0x1c0] sm:$0xff]  ;;  %v6589_v61 = vld [vmem:[%s9071_s10 + $0x4d0] sm:$0xff] }
 0x118   : > { %7580 = vmatmul.mubr.msk.f32.gmra.mxu0 %vm1882_vm1, %v1803_v62  ;;  %7735 = vmatmul.mubr.msk.f32.gmra.mxu1 %vm1882_vm1, %v6558_v63  ;;  %v1835_v62 = vld [vmem:[%s9071_s10 + $0x1c8] sm:$0xff]  ;;  %v6590_v63 = vld [vmem:[%s9071_s10 + $0x4d8] sm:$0xff] }
 0x119   : > { %7582 = vmatprep.mubr.msk.f32.mxu0 %vm1882_vm1, %v1804_v0  ;;  %7737 = vmatprep.mubr.msk.f32.mxu1 %vm1882_vm1, %v6559_v1  ;;  %v1836_v0 = vld [vmem:[%s9071_s10 + $0x1d0] sm:$0xff]  ;;  %v6591_v1 = vld [vmem:[%s9071_s10 + $0x4e0] sm:$0xff] }
 0x11c   : > { %7583 = vmatmul.mubr.msk.f32.gmra.mxu0 %vm1882_vm1, %v1805_v2  ;;  %7738 = vmatmul.mubr.msk.f32.gmra.mxu1 %vm1882_vm1, %v6560_v3  ;;  %v1837_v2 = vld [vmem:[%s9071_s10 + $0x1d8] sm:$0xff]  ;;  %v6592_v3 = vld [vmem:[%s9071_s10 + $0x4e8] sm:$0xff] }
 0x11d   : > { %7585 = vmatprep.mubr.msk.f32.mxu0 %vm1882_vm1, %v1806_v4  ;;  %7740 = vmatprep.mubr.msk.f32.mxu1 %vm1882_vm1, %v6561_v5  ;;  %v1838_v4 = vld [vmem:[%s9071_s10 + $0x1e0] sm:$0xff]  ;;  %v6593_v5 = vld [vmem:[%s9071_s10 + $0x4f0] sm:$0xff] }
 0x120   : > { %7586 = vmatmul.mubr.msk.f32.gmra.mxu0 %vm1882_vm1, %v1807_v6  ;;  %7741 = vmatmul.mubr.msk.f32.gmra.mxu1 %vm1882_vm1, %v6562_v7  ;;  %v1839_v6 = vld [vmem:[%s9071_s10 + $0x1e8] sm:$0xff]  ;;  %v6594_v7 = vld [vmem:[%s9071_s10 + $0x4f8] sm:$0xff] }
 0x121   : > { %7588 = vmatprep.mubr.msk.f32.mxu0 %vm1882_vm1, %v1808_v8  ;;  %7743 = vmatprep.mubr.msk.f32.mxu1 %vm1882_vm1, %v6563_v9  ;;  %v1840_v8 = vld [vmem:[%s9071_s10 + $0x1f0] sm:$0xff]  ;;  %v6595_v9 = vld [vmem:[%s9071_s10 + $0x500] sm:$0xff] }
 0x124   : > { %7589 = vmatmul.mubr.msk.f32.gmra.mxu0 %vm1882_vm1, %v1809_v10  ;;  %7744 = vmatmul.mubr.msk.f32.gmra.mxu1 %vm1882_vm1, %v6564_v11  ;;  %v1841_v10 = vld [vmem:[%s9071_s10 + $0x1f8] sm:$0xff]  ;;  %v6596_v11 = vld [vmem:[%s9071_s10 + $0x508] sm:$0xff] }
 0x125   : > { %7591 = vmatprep.mubr.msk.f32.mxu0 %vm1882_vm1, %v1810_v12  ;;  %7746 = vmatprep.mubr.msk.f32.mxu1 %vm1882_vm1, %v6565_v13  ;;  %v1842_v12 = vld [vmem:[%s9071_s10 + $0x200] sm:$0xff]  ;;  %v6597_v13 = vld [vmem:[%s9071_s10 + $0x510] sm:$0xff] }
 0x128   : > { %7592 = vmatmul.mubr.msk.f32.gmra.mxu0 %vm1882_vm1, %v1811_v14  ;;  %7747 = vmatmul.mubr.msk.f32.gmra.mxu1 %vm1882_vm1, %v6566_v15  ;;  %v1843_v14 = vld [vmem:[%s9071_s10 + $0x208] sm:$0xff]  ;;  %v6598_v15 = vld [vmem:[%s9071_s10 + $0x518] sm:$0xff] }
 0x129   : > { %7594 = vmatprep.mubr.msk.f32.mxu0 %vm1882_vm1, %v1812_v16  ;;  %7749 = vmatprep.mubr.msk.f32.mxu1 %vm1882_vm1, %v6567_v17  ;;  %v1844_v16 = vld [vmem:[%s9071_s10 + $0x210] sm:$0xff]  ;;  %v6599_v17 = vld [vmem:[%s9071_s10 + $0x520] sm:$0xff] }
 0x12c   : > { %7595 = vmatmul.mubr.msk.f32.gmra.mxu0 %vm1882_vm1, %v1813_v18  ;;  %7750 = vmatmul.mubr.msk.f32.gmra.mxu1 %vm1882_vm1, %v6568_v19  ;;  %v1845_v18 = vld [vmem:[%s9071_s10 + $0x218] sm:$0xff]  ;;  %v6600_v19 = vld [vmem:[%s9071_s10 + $0x528] sm:$0xff] }
 0x12d   : > { %7597 = vmatprep.mubr.msk.f32.mxu0 %vm1882_vm1, %v1814_v20  ;;  %7752 = vmatprep.mubr.msk.f32.mxu1 %vm1882_vm1, %v6569_v21  ;;  %v1846_v20 = vld [vmem:[%s9071_s10 + $0x220] sm:$0xff]  ;;  %v6601_v21 = vld [vmem:[%s9071_s10 + $0x530] sm:$0xff] }
 0x130   : > { %7598 = vmatmul.mubr.msk.f32.gmra.mxu0 %vm1882_vm1, %v1815_v22  ;;  %7753 = vmatmul.mubr.msk.f32.gmra.mxu1 %vm1882_vm1, %v6570_v23  ;;  %v1847_v22 = vld [vmem:[%s9071_s10 + $0x228] sm:$0xff]  ;;  %v6602_v23 = vld [vmem:[%s9071_s10 + $0x538] sm:$0xff] }
 0x131   : > { %7600 = vmatprep.mubr.msk.f32.mxu0 %vm1882_vm1, %v1816_v24  ;;  %7755 = vmatprep.mubr.msk.f32.mxu1 %vm1882_vm1, %v6571_v25  ;;  %v1848_v24 = vld [vmem:[%s9071_s10 + $0x230] sm:$0xff]  ;;  %v6603_v25 = vld [vmem:[%s9071_s10 + $0x540] sm:$0xff] }
 0x134   : > { %7601 = vmatmul.mubr.msk.f32.gmra.mxu0 %vm1882_vm1, %v1817_v26  ;;  %7756 = vmatmul.mubr.msk.f32.gmra.mxu1 %vm1882_vm1, %v6572_v27  ;;  %v1849_v26 = vld [vmem:[%s9071_s10 + $0x238] sm:$0xff]  ;;  %v6604_v27 = vld [vmem:[%s9071_s10 + $0x548] sm:$0xff] }
 0x135   : > { %7603 = vmatprep.mubr.msk.f32.mxu0 %vm1882_vm1, %v1818_v28  ;;  %7758 = vmatprep.mubr.msk.f32.mxu1 %vm1882_vm1, %v6573_v29  ;;  %v1850_v28 = vld [vmem:[%s9071_s10 + $0x240] sm:$0xff]  ;;  %v6605_v29 = vld [vmem:[%s9071_s10 + $0x550] sm:$0xff] }
 0x138   : > { %7604 = vmatmul.mubr.msk.f32.gmra.mxu0 %vm1882_vm1, %v1819_v30  ;;  %7759 = vmatmul.mubr.msk.f32.gmra.mxu1 %vm1882_vm1, %v6574_v31  ;;  %v1851_v30 = vld [vmem:[%s9071_s10 + $0x248] sm:$0xff]  ;;  %v6606_v31 = vld [vmem:[%s9071_s10 + $0x558] sm:$0xff] }
 0x139   : > { %7606 = vmatprep.mubr.msk.f32.mxu0 %vm1882_vm1, %v1820_v32  ;;  %7761 = vmatprep.mubr.msk.f32.mxu1 %vm1882_vm1, %v6575_v33  ;;  %v1852_v32 = vld [vmem:[%s9071_s10 + $0x250] sm:$0xff]  ;;  %v6607_v33 = vld [vmem:[%s9071_s10 + $0x560] sm:$0xff] }
 0x13c   : > { %7607 = vmatmul.mubr.msk.f32.gmra.mxu0 %vm1882_vm1, %v1821_v34  ;;  %7762 = vmatmul.mubr.msk.f32.gmra.mxu1 %vm1882_vm1, %v6576_v35  ;;  %v1853_v34 = vld [vmem:[%s9071_s10 + $0x258] sm:$0xff]  ;;  %v6608_v35 = vld [vmem:[%s9071_s10 + $0x568] sm:$0xff] }
 0x13d   : > { %7609 = vmatprep.mubr.msk.f32.mxu0 %vm1882_vm1, %v1822_v36  ;;  %7764 = vmatprep.mubr.msk.f32.mxu1 %vm1882_vm1, %v6577_v37  ;;  %v1854_v36 = vld [vmem:[%s9071_s10 + $0x260] sm:$0xff]  ;;  %v6609_v37 = vld [vmem:[%s9071_s10 + $0x570] sm:$0xff] }
 0x140   : > { %7610 = vmatmul.mubr.msk.f32.gmra.mxu0 %vm1882_vm1, %v1823_v38  ;;  %7765 = vmatmul.mubr.msk.f32.gmra.mxu1 %vm1882_vm1, %v6578_v39  ;;  %v1855_v38 = vld [vmem:[%s9071_s10 + $0x268] sm:$0xff]  ;;  %v6610_v39 = vld [vmem:[%s9071_s10 + $0x578] sm:$0xff] }
 0x141   : > { %7612 = vmatprep.mubr.msk.f32.mxu0 %vm1882_vm1, %v1824_v40  ;;  %7767 = vmatprep.mubr.msk.f32.mxu1 %vm1882_vm1, %v6579_v41  ;;  %v1856_v40 = vld [vmem:[%s9071_s10 + $0x270] sm:$0xff]  ;;  %v6611_v41 = vld [vmem:[%s9071_s10 + $0x580] sm:$0xff] }
 0x144   : > { %7613 = vmatmul.mubr.msk.f32.gmra.mxu0 %vm1882_vm1, %v1825_v42  ;;  %7768 = vmatmul.mubr.msk.f32.gmra.mxu1 %vm1882_vm1, %v6580_v43  ;;  %v1857_v42 = vld [vmem:[%s9071_s10 + $0x278] sm:$0xff]  ;;  %v6612_v43 = vld [vmem:[%s9071_s10 + $0x588] sm:$0xff] }
 0x145   : > { %7615 = vmatprep.mubr.msk.f32.mxu0 %vm1882_vm1, %v1826_v44  ;;  %7770 = vmatprep.mubr.msk.f32.mxu1 %vm1882_vm1, %v6581_v45  ;;  %v1858_v44 = vld [vmem:[%s9071_s10 + $0x280] sm:$0xff]  ;;  %v6613_v45 = vld [vmem:[%s9071_s10 + $0x590] sm:$0xff] }
 0x148   : > { %7616 = vmatmul.mubr.msk.f32.gmra.mxu0 %vm1882_vm1, %v1827_v46  ;;  %7771 = vmatmul.mubr.msk.f32.gmra.mxu1 %vm1882_vm1, %v6582_v47  ;;  %v1859_v46 = vld [vmem:[%s9071_s10 + $0x288] sm:$0xff]  ;;  %v6614_v47 = vld [vmem:[%s9071_s10 + $0x598] sm:$0xff] }
 0x149   : > { %7618 = vmatprep.mubr.msk.f32.mxu0 %vm1882_vm1, %v1828_v48  ;;  %7773 = vmatprep.mubr.msk.f32.mxu1 %vm1882_vm1, %v6583_v49  ;;  %v1860_v48 = vld [vmem:[%s9071_s10 + $0x290] sm:$0xff]  ;;  %v6615_v49 = vld [vmem:[%s9071_s10 + $0x5a0] sm:$0xff] }
 0x14c   : > { %7619 = vmatmul.mubr.msk.f32.gmra.mxu0 %vm1882_vm1, %v1829_v50  ;;  %7774 = vmatmul.mubr.msk.f32.gmra.mxu1 %vm1882_vm1, %v6584_v51  ;;  %v1861_v50 = vld [vmem:[%s9071_s10 + $0x298] sm:$0xff]  ;;  %v6616_v51 = vld [vmem:[%s9071_s10 + $0x5a8] sm:$0xff] }
 0x14d   : > { %7621 = vmatprep.mubr.msk.f32.mxu0 %vm1882_vm1, %v1830_v52  ;;  %7776 = vmatprep.mubr.msk.f32.mxu1 %vm1882_vm1, %v6585_v53  ;;  %v1862_v52 = vld [vmem:[%s9071_s10 + $0x2a0] sm:$0xff]  ;;  %v6617_v53 = vld [vmem:[%s9071_s10 + $0x5b0] sm:$0xff] }
 0x150   : > { %7622 = vmatmul.mubr.msk.f32.gmra.mxu0 %vm1882_vm1, %v1831_v54  ;;  %7777 = vmatmul.mubr.msk.f32.gmra.mxu1 %vm1882_vm1, %v6586_v55  ;;  %v1863_v54 = vld [vmem:[%s9071_s10 + $0x2a8] sm:$0xff]  ;;  %v6618_v55 = vld [vmem:[%s9071_s10 + $0x5b8] sm:$0xff] }
 0x151   : > { %7624 = vmatprep.mubr.msk.f32.mxu0 %vm1882_vm1, %v1832_v56  ;;  %7779 = vmatprep.mubr.msk.f32.mxu1 %vm1882_vm1, %v6587_v57  ;;  %v1864_v56 = vld [vmem:[%s9071_s10 + $0x2b0] sm:$0xff]  ;;  %v6619_v57 = vld [vmem:[%s9071_s10 + $0x5c0] sm:$0xff] }
 0x154   : > { %7625 = vmatmul.mubr.msk.f32.gmra.mxu0 %vm1882_vm1, %v1833_v58  ;;  %7780 = vmatmul.mubr.msk.f32.gmra.mxu1 %vm1882_vm1, %v6588_v59  ;;  %v1865_v58 = vld [vmem:[%s9071_s10 + $0x2b8] sm:$0xff]  ;;  %v6620_v59 = vld [vmem:[%s9071_s10 + $0x5c8] sm:$0xff] }
 0x155   : > { %7627 = vmatprep.mubr.msk.f32.mxu0 %vm1882_vm1, %v1834_v60  ;;  %7782 = vmatprep.mubr.msk.f32.mxu1 %vm1882_vm1, %v6589_v61  ;;  %v1866_v60 = vld [vmem:[%s9071_s10 + $0x2c0] sm:$0xff]  ;;  %v6621_v61 = vld [vmem:[%s9071_s10 + $0x5d0] sm:$0xff] }
 0x158   : > { %7628 = vmatmul.mubr.msk.f32.gmra.mxu0 %vm1882_vm1, %v1835_v62  ;;  %7783 = vmatmul.mubr.msk.f32.gmra.mxu1 %vm1882_vm1, %v6590_v63  ;;  %v1867_v62 = vld [vmem:[%s9071_s10 + $0x2c8] sm:$0xff]  ;;  %v6622_v63 = vld [vmem:[%s9071_s10 + $0x5d8] sm:$0xff] }
 0x159   : > { %7630 = vmatprep.mubr.msk.f32.mxu0 %vm1882_vm1, %v1836_v0  ;;  %7785 = vmatprep.mubr.msk.f32.mxu1 %vm1882_vm1, %v6591_v1  ;;  %v1868_v0 = vld [vmem:[%s9071_s10 + $0x2d0] sm:$0xff]  ;;  %v6623_v1 = vld [vmem:[%s9071_s10 + $0x5e0] sm:$0xff] }
 0x15c   : > { %7631 = vmatmul.mubr.msk.f32.gmra.mxu0 %vm1882_vm1, %v1837_v2  ;;  %7786 = vmatmul.mubr.msk.f32.gmra.mxu1 %vm1882_vm1, %v6592_v3  ;;  %v1869_v2 = vld [vmem:[%s9071_s10 + $0x2d8] sm:$0xff]  ;;  %v6624_v3 = vld [vmem:[%s9071_s10 + $0x5e8] sm:$0xff] }
 0x15d   : > { %7633 = vmatprep.mubr.msk.f32.mxu0 %vm1882_vm1, %v1838_v4  ;;  %7788 = vmatprep.mubr.msk.f32.mxu1 %vm1882_vm1, %v6593_v5  ;;  %v1870_v4 = vld [vmem:[%s9071_s10 + $0x2e0] sm:$0xff]  ;;  %v6625_v5 = vld [vmem:[%s9071_s10 + $0x5f0] sm:$0xff] }
 0x160   : > { %7634 = vmatmul.mubr.msk.f32.gmra.mxu0 %vm1882_vm1, %v1839_v6  ;;  %7789 = vmatmul.mubr.msk.f32.gmra.mxu1 %vm1882_vm1, %v6594_v7  ;;  %v1871_v6 = vld [vmem:[%s9071_s10 + $0x2e8] sm:$0xff]  ;;  %v6626_v7 = vld [vmem:[%s9071_s10 + $0x5f8] sm:$0xff] }
 0x161   : > { %7636 = vmatprep.mubr.msk.f32.mxu0 %vm1882_vm1, %v1840_v8  ;;  %7791 = vmatprep.mubr.msk.f32.mxu1 %vm1882_vm1, %v6595_v9  ;;  %v1872_v8 = vld [vmem:[%s9071_s10 + $0x2f0] sm:$0xff]  ;;  %v6627_v9 = vld [vmem:[%s9071_s10 + $0x600] sm:$0xff] }
 0x164   : > { %7637 = vmatmul.mubr.msk.f32.gmra.mxu0 %vm1882_vm1, %v1841_v10  ;;  %7792 = vmatmul.mubr.msk.f32.gmra.mxu1 %vm1882_vm1, %v6596_v11  ;;  %v1873_v10 = vld [vmem:[%s9071_s10 + $0x2f8] sm:$0xff]  ;;  %v6628_v11 = vld [vmem:[%s9071_s10 + $0x608] sm:$0xff] }
 0x165   : > { %7639 = vmatprep.mubr.msk.f32.mxu0 %vm1882_vm1, %v1842_v12  ;;  %7794 = vmatprep.mubr.msk.f32.mxu1 %vm1882_vm1, %v6597_v13  ;;  %v1874_v12 = vld [vmem:[%s9071_s10 + $0x300] sm:$0xff]  ;;  %v6629_v13 = vld [vmem:[%s9071_s10 + $0x610] sm:$0xff] }
 0x168   : > { %7640 = vmatmul.mubr.msk.f32.gmra.mxu0 %vm1882_vm1, %v1843_v14  ;;  %7795 = vmatmul.mubr.msk.f32.gmra.mxu1 %vm1882_vm1, %v6598_v15  ;;  %v1875_v14 = vld [vmem:[%s9071_s10 + $0x308] sm:$0xff]  ;;  %v6630_v15 = vld [vmem:[%s9071_s10 + $0x618] sm:$0xff] }
 0x169   : > { %7642 = vmatprep.mubr.msk.f32.mxu0 %vm1882_vm1, %v1844_v16  ;;  %7797 = vmatprep.mubr.msk.f32.mxu1 %vm1882_vm1, %v6599_v17  ;;  %v9478_v16 = vld [vmem:[%s10698_s2] ss:$0 sm:$0xff] }
 0x16a   : > { %v6730_v17 = vld [vmem:[%s9071_s10 + $0x620] sm:$0xff] }
 0x16c   : > { %7643 = vmatmul.mubr.msk.f32.gmra.mxu0 %vm1882_vm1, %v1845_v18  ;;  %7798 = vmatmul.mubr.msk.f32.gmra.mxu1 %vm1882_vm1, %v6600_v19  ;;  %v6927_v18 = vld [vmem:[%s9071_s10 + $0x930] sm:$0xff] }
 0x16d   : > { %7645 = vmatprep.mubr.msk.f32.mxu0 %vm1882_vm1, %v1846_v20  ;;  %7800 = vmatprep.mubr.msk.f32.mxu1 %vm1882_vm1, %v6601_v21 }
 0x170   : > { %7646 = vmatmul.mubr.msk.f32.gmra.mxu0 %vm1882_vm1, %v1847_v22  ;;  %7801 = vmatmul.mubr.msk.f32.gmra.mxu1 %vm1882_vm1, %v6602_v23  ;;  %v6731_v23 = vld [vmem:[%s9071_s10 + $0x628] sm:$0xff] }
 0x171   : > { %7648 = vmatprep.mubr.msk.f32.mxu0 %vm1882_vm1, %v1848_v24  ;;  %7803 = vmatprep.mubr.msk.f32.mxu1 %vm1882_vm1, %v6603_v25  ;;  %v6928_v24 = vld [vmem:[%s9071_s10 + $0x938] sm:$0xff] }
 0x174   : > { %7649 = vmatmul.mubr.msk.f32.gmra.mxu0 %vm1882_vm1, %v1849_v26  ;;  %7804 = vmatmul.mubr.msk.f32.gmra.mxu1 %vm1882_vm1, %v6604_v27  ;;  %v6732_v27 = vld [vmem:[%s9071_s10 + $0x630] sm:$0xff] }
 0x175   : > { %7651 = vmatprep.mubr.msk.f32.mxu0 %vm1882_vm1, %v1850_v28  ;;  %7806 = vmatprep.mubr.msk.f32.mxu1 %vm1882_vm1, %v6605_v29  ;;  %v6929_v28 = vld [vmem:[%s9071_s10 + $0x940] sm:$0xff] }
 0x178   : > { %7652 = vmatmul.mubr.msk.f32.gmra.mxu0 %vm1882_vm1, %v1851_v30  ;;  %7807 = vmatmul.mubr.msk.f32.gmra.mxu1 %vm1882_vm1, %v6606_v31 }
 0x179   : > { %7654 = vmatprep.mubr.msk.f32.mxu0 %vm1882_vm1, %v1852_v32  ;;  %7809 = vmatprep.mubr.msk.f32.mxu1 %vm1882_vm1, %v6607_v33 }
 0x17c   : > { %7655 = vmatmul.mubr.msk.f32.gmra.mxu0 %vm1882_vm1, %v1853_v34  ;;  %7810 = vmatmul.mubr.msk.f32.gmra.mxu1 %vm1882_vm1, %v6608_v35 }
 0x17d   : > { %7657 = vmatprep.mubr.msk.f32.mxu0 %vm1882_vm1, %v1854_v36  ;;  %7812 = vmatprep.mubr.msk.f32.mxu1 %vm1882_vm1, %v6609_v37 }
 0x180   : > { %7658 = vmatmul.mubr.msk.f32.gmra.mxu0 %vm1882_vm1, %v1855_v38  ;;  %7813 = vmatmul.mubr.msk.f32.gmra.mxu1 %vm1882_vm1, %v6610_v39  ;;  %v6733_v39 = vld [vmem:[%s9071_s10 + $0x638] sm:$0xff] }
 0x181   : > { %7660 = vmatprep.mubr.msk.f32.mxu0 %vm1882_vm1, %v1856_v40  ;;  %7815 = vmatprep.mubr.msk.f32.mxu1 %vm1882_vm1, %v6611_v41  ;;  %v6930_v40 = vld [vmem:[%s9071_s10 + $0x948] sm:$0xff] }
 0x184   : > { %7661 = vmatmul.mubr.msk.f32.gmra.mxu0 %vm1882_vm1, %v1857_v42  ;;  %7816 = vmatmul.mubr.msk.f32.gmra.mxu1 %vm1882_vm1, %v6612_v43 }
 0x185   : > { %7663 = vmatprep.mubr.msk.f32.mxu0 %vm1882_vm1, %v1858_v44  ;;  %7818 = vmatprep.mubr.msk.f32.mxu1 %vm1882_vm1, %v6613_v45  ;;  %v6734_v44 = vld [vmem:[%s9071_s10 + $0x640] sm:$0xff]  ;;  %v6931_v45 = vld [vmem:[%s9071_s10 + $0x950] sm:$0xff] }
 0x188   : > { %7664 = vmatmul.mubr.msk.f32.gmra.mxu0 %vm1882_vm1, %v1859_v46  ;;  %7819 = vmatmul.mubr.msk.f32.gmra.mxu1 %vm1882_vm1, %v6614_v47 }
 0x189   : > { %7666 = vmatprep.mubr.msk.f32.mxu0 %vm1882_vm1, %v1860_v48  ;;  %7821 = vmatprep.mubr.msk.f32.mxu1 %vm1882_vm1, %v6615_v49 }
 0x18c   : > { %7667 = vmatmul.mubr.msk.f32.gmra.mxu0 %vm1882_vm1, %v1861_v50  ;;  %7822 = vmatmul.mubr.msk.f32.gmra.mxu1 %vm1882_vm1, %v6616_v51 }
 0x18d   : > { %7669 = vmatprep.mubr.msk.f32.mxu0 %vm1882_vm1, %v1862_v52  ;;  %7824 = vmatprep.mubr.msk.f32.mxu1 %vm1882_vm1, %v6617_v53 }
 0x190   : > { %7670 = vmatmul.mubr.msk.f32.gmra.mxu0 %vm1882_vm1, %v1863_v54  ;;  %7825 = vmatmul.mubr.msk.f32.gmra.mxu1 %vm1882_vm1, %v6618_v55 }
 0x191   : > { %7672 = vmatprep.mubr.msk.f32.mxu0 %vm1882_vm1, %v1864_v56  ;;  %7827 = vmatprep.mubr.msk.f32.mxu1 %vm1882_vm1, %v6619_v57  ;;  %v6735_v57 = vld [vmem:[%s9071_s10 + $0x648] sm:$0xff] }
 0x194   : > { %7673 = vmatmul.mubr.msk.f32.gmra.mxu0 %vm1882_vm1, %v1865_v58  ;;  %7828 = vmatmul.mubr.msk.f32.gmra.mxu1 %vm1882_vm1, %v6620_v59  ;;  %v6932_v58 = vld [vmem:[%s9071_s10 + $0x958] sm:$0xff] }
 0x195   : > { %7675 = vmatprep.mubr.msk.f32.mxu0 %vm1882_vm1, %v1866_v60  ;;  %7830 = vmatprep.mubr.msk.f32.mxu1 %vm1882_vm1, %v6621_v61 }
 0x198   : > { %7676 = vmatmul.mubr.msk.f32.gmra.mxu0 %vm1882_vm1, %v1867_v62  ;;  %7831 = vmatmul.mubr.msk.f32.gmra.mxu1 %vm1882_vm1, %v6622_v63  ;;  %v6736_v62 = vld [vmem:[%s9071_s10 + $0x650] sm:$0xff]  ;;  %v6933_v63 = vld [vmem:[%s9071_s10 + $0x960] sm:$0xff] }
 0x199   : > { %7678 = vmatprep.mubr.msk.f32.mxu0 %vm1882_vm1, %v1868_v0  ;;  %7833 = vmatprep.mubr.msk.f32.mxu1 %vm1882_vm1, %v6623_v1 }
 0x19c   : > { %7679 = vmatmul.mubr.msk.f32.gmra.mxu0 %vm1882_vm1, %v1869_v2  ;;  %7834 = vmatmul.mubr.msk.f32.gmra.mxu1 %vm1882_vm1, %v6624_v3 }
 0x19d   : > { %7681 = vmatprep.mubr.msk.f32.mxu0 %vm1882_vm1, %v1870_v4  ;;  %7836 = vmatprep.mubr.msk.f32.mxu1 %vm1882_vm1, %v6625_v5 }
 0x1a0   : > { %7682 = vmatmul.mubr.msk.f32.gmra.mxu0 %vm1882_vm1, %v1871_v6  ;;  %7837 = vmatmul.mubr.msk.f32.gmra.mxu1 %vm1882_vm1, %v6626_v7 }
 0x1a1   : > { %7684 = vmatprep.mubr.msk.f32.mxu0 %vm1882_vm1, %v1872_v8  ;;  %7839 = vmatprep.mubr.msk.f32.mxu1 %vm1882_vm1, %v6627_v9 }
 0x1a4   : > { %7685 = vmatmul.mubr.msk.f32.gmra.mxu0 %vm1882_vm1, %v1873_v10  ;;  %7840 = vmatmul.mubr.msk.f32.gmra.mxu1 %vm1882_vm1, %v6628_v11  ;;  %v6737_v11 = vld [vmem:[%s9071_s10 + $0x658] sm:$0xff] }
 0x1a5   : > { %7687 = vmatprep.mubr.msk.f32.mxu0 %vm1882_vm1, %v1874_v12  ;;  %7842 = vmatprep.mubr.msk.f32.mxu1 %vm1882_vm1, %v6629_v13  ;;  %v6934_v12 = vld [vmem:[%s9071_s10 + $0x968] sm:$0xff] }
 0x1a8   : > { %v7545_v19 = vpop.f32.mrf.mxu0  ;;  %7688 = vmatmul.mubr.msk.f32.gmra.mxu0 %vm1882_vm1, %v1875_v14  ;;  %v7700_v20 = vpop.f32.mrf.mxu1  ;;  %7843 = vmatmul.mubr.msk.f32.gmra.mxu1 %vm1882_vm1, %v6630_v15 }
 0x1a9   : > { %v2253_v21 = vadd.f32 %v7545_v19, %v9478_v16  ;;  %v3299_v22 = vadd.f32 %v7700_v20, %v9478_v16  ;;  %7853 = vmatprep.mubr.msk.f32.mxu0 %vm1882_vm1, %v6730_v17  ;;  %8008 = vmatprep.mubr.msk.f32.mxu1 %vm1882_vm1, %v6927_v18  ;;  %v6738_v17 = vld [vmem:[%s9071_s10 + $0x660] sm:$0xff]  ;;  %v6935_v18 = vld [vmem:[%s9071_s10 + $0x970] sm:$0xff] }
 0x1aa   : > { %v2247_v25 = vpop.f32.mrf.mxu0  ;;  %v3293_v26 = vpop.f32.mrf.mxu1 }
 0x1ab   : > { %v2737_v29 = vmax.f32 %v2253_v21, 0.0  ;;  %v3783_v30 = vmax.f32 %v3299_v22, 0.0  ;;  %v2248_v31 = vadd.f32 %v9478_v16, %v2247_v25  ;;  %v3294_v32 = vadd.f32 %v9478_v16, %v3293_v26 }
 0x1ac   : > { %v7548_v33 = vpop.f32.mrf.mxu0  ;;  %v7703_v34 = vpop.f32.mrf.mxu1  ;;  %7854 = vmatmul.mubr.msk.f32.vlgmr.msra.gmra.mxu0 %vm1882_vm1, %v6731_v23  ;;  %8009 = vmatmul.mubr.msk.f32.vlgmr.msra.gmra.mxu1 %vm1882_vm1, %v6928_v24 }
 0x1ad   : > { %v9496_v35 = vmax.f32 %v2737_v29, %v3783_v30  ;;  %v2736_v36 = vmax.f32 %v2248_v31, 0.0  ;;  %v3782_v37 = vmax.f32 %v3294_v32, 0.0  ;;  %v2263_v38 = vadd.f32 %v7548_v33, %v9478_v16  ;;  %7856 = vmatprep.mubr.msk.f32.mxu0 %vm1882_vm1, %v6732_v27  ;;  %8011 = vmatprep.mubr.msk.f32.mxu1 %vm1882_vm1, %v6929_v28  ;;  %v6739_v30 = vld [vmem:[%s9071_s10 + $0x668] sm:$0xff]  ;;  %v6936_v31 = vld [vmem:[%s9071_s10 + $0x978] sm:$0xff] }
 0x1ae   : > { %v3309_v41 = vadd.f32 %v7703_v34, %v9478_v16  ;;  %v2257_v42 = vpop.f32.mrf.mxu0  ;;  %v3303_v43 = vpop.f32.mrf.mxu1 }
 0x1af   : > { %v9506_v46 = vmax.f32 %v2736_v36, %v3782_v37  ;;  %v2739_v47 = vmax.f32 %v2263_v38, 0.0  ;;  %v2258_v48 = vadd.f32 %v9478_v16, %v2257_v42  ;;  %v3304_v49 = vadd.f32 %v9478_v16, %v3303_v43  ;;  %v6740_v36 = vld [vmem:[%s9071_s10 + $0x670] sm:$0xff]  ;;  %v6937_v37 = vld [vmem:[%s9071_s10 + $0x980] sm:$0xff] }
 0x1b0   : > { %v3785_v50 = vmax.f32 %v3309_v41, 0.0  ;;  %v7551_v51 = vpop.f32.mrf.mxu0  ;;  %v7706_v52 = vpop.f32.mrf.mxu1  ;;  %7857 = vmatmul.mubr.msk.f32.gmra.mxu0 %vm1882_vm1, %v6733_v39  ;;  %8012 = vmatmul.mubr.msk.f32.gmra.mxu1 %vm1882_vm1, %v6930_v40 }
 0x1b1   : > { %v2738_v53 = vmax.f32 %v2258_v48, 0.0  ;;  %v3784_v54 = vmax.f32 %v3304_v49, 0.0  ;;  %v2273_v55 = vadd.f32 %v7551_v51, %v9478_v16  ;;  %v3319_v56 = vadd.f32 %v7706_v52, %v9478_v16  ;;  %7859 = vmatprep.mubr.msk.f32.mxu0 %vm1882_vm1, %v6734_v44  ;;  %8014 = vmatprep.mubr.msk.f32.mxu1 %vm1882_vm1, %v6931_v45  ;;  %v6938_v51 = vld [vmem:[%s9071_s10 + $0x988] sm:$0xff] }
 0x1b2   : > { %v9518_v59 = vmax.f32 %v2739_v47, %v3785_v50  ;;  %v2267_v60 = vpop.f32.mrf.mxu0  ;;  %v3313_v61 = vpop.f32.mrf.mxu1  ;;  %v6741_v50 = vld [vmem:[%s9071_s10 + $0x678] sm:$0xff] }
 0x1b3   : > { %v9522_v0 = vmax.f32 %v2738_v53, %v3784_v54  ;;  %v2741_v1 = vmax.f32 %v2273_v55, 0.0  ;;  %v3787_v2 = vmax.f32 %v3319_v56, 0.0  ;;  %v2268_v3 = vadd.f32 %v9478_v16, %v2267_v60  ;;  %v6742_v55 = vld [vmem:[%s9071_s10 + $0x680] sm:$0xff]  ;;  %v6939_v56 = vld [vmem:[%s9071_s10 + $0x990] sm:$0xff] }
 0x1b4   : > { %v3314_v4 = vadd.f32 %v9478_v16, %v3313_v61  ;;  %v7554_v5 = vpop.f32.mrf.mxu0  ;;  %v7709_v6 = vpop.f32.mrf.mxu1  ;;  %7860 = vmatmul.mubr.msk.f32.gmra.mxu0 %vm1882_vm1, %v6735_v57  ;;  %8015 = vmatmul.mubr.msk.f32.gmra.mxu1 %vm1882_vm1, %v6932_v58 }
 0x1b5   : > { %v9528_v7 = vmax.f32 %v2741_v1, %v3787_v2  ;;  %v2740_v8 = vmax.f32 %v2268_v3, 0.0  ;;  %v2283_v9 = vadd.f32 %v7554_v5, %v9478_v16  ;;  %v3329_v10 = vadd.f32 %v7709_v6, %v9478_v16  ;;  %7862 = vmatprep.mubr.msk.f32.mxu0 %vm1882_vm1, %v6736_v62  ;;  %8017 = vmatprep.mubr.msk.f32.mxu1 %vm1882_vm1, %v6933_v63  ;;  %v6743_v6 = vld [vmem:[%s9071_s10 + $0x688] sm:$0xff] }
 0x1b6   : > { %v3786_v13 = vmax.f32 %v3314_v4, 0.0  ;;  %v2277_v14 = vpop.f32.mrf.mxu0  ;;  %v3323_v15 = vpop.f32.mrf.mxu1 }
 0x1b7   : > { %v2743_v19 = vmax.f32 %v2283_v9, 0.0  ;;  %v3789_v20 = vmax.f32 %v3329_v10, 0.0  ;;  %v2278_v21 = vadd.f32 %v9478_v16, %v2277_v14  ;;  %v3324_v22 = vadd.f32 %v9478_v16, %v3323_v15 }
 0x1b8   : > { %v9540_v23 = vmax.f32 %v2740_v8, %v3786_v13  ;;  %v7557_v24 = vpop.f32.mrf.mxu0  ;;  %v7712_v25 = vpop.f32.mrf.mxu1  ;;  %7863 = vmatmul.mubr.msk.f32.gmra.mxu0 %vm1882_vm1, %v6737_v11  ;;  %8018 = vmatmul.mubr.msk.f32.gmra.mxu1 %vm1882_vm1, %v6934_v12  ;;  %v6940_v8 = vld [vmem:[%s9071_s10 + $0x998] sm:$0xff]  ;;  %v6744_v12 = vld [vmem:[%s9071_s10 + $0x690] sm:$0xff]  ;;  %v6941_v13 = vld [vmem:[%s9071_s10 + $0x9a0] sm:$0xff] }
 0x1b9   : > { %v9544_v26 = vmax.f32 %v2743_v19, %v3789_v20  ;;  %v2742_v27 = vmax.f32 %v2278_v21, 0.0  ;;  %v3788_v28 = vmax.f32 %v3324_v22, 0.0  ;;  %v2293_v29 = vadd.f32 %v7557_v24, %v9478_v16  ;;  %7865 = vmatprep.mubr.msk.f32.mxu0 %vm1882_vm1, %v6738_v17  ;;  %8020 = vmatprep.mubr.msk.f32.mxu1 %vm1882_vm1, %v6935_v18 }
 0x1ba   : > { %v3339_v32 = vadd.f32 %v7712_v25, %v9478_v16  ;;  %v2287_v33 = vpop.f32.mrf.mxu0  ;;  %v3333_v34 = vpop.f32.mrf.mxu1 }
 0x1bb   : > { %v9554_v38 = vmax.f32 %v2742_v27, %v3788_v28  ;;  %v2745_v39 = vmax.f32 %v2293_v29, 0.0  ;;  %v2288_v40 = vadd.f32 %v9478_v16, %v2287_v33  ;;  %v3334_v41 = vadd.f32 %v9478_v16, %v3333_v34  ;;  %v6745_v28 = vld [vmem:[%s9071_s10 + $0x698] sm:$0xff]  ;;  %v6942_v29 = vld [vmem:[%s9071_s10 + $0x9a8] sm:$0xff]  ;;  %v6746_v33 = vld [vmem:[%s9071_s10 + $0x6a0] sm:$0xff] }
 0x1bc   : > { %v3791_v42 = vmax.f32 %v3339_v32, 0.0  ;;  %v7560_v43 = vpop.f32.mrf.mxu0  ;;  %v7715_v44 = vpop.f32.mrf.mxu1  ;;  %7866 = vmatmul.mubr.msk.f32.gmra.mxu0 %vm1882_vm1, %v6739_v30  ;;  %8021 = vmatmul.mubr.msk.f32.gmra.mxu1 %vm1882_vm1, %v6936_v31  ;;  %v6943_v34 = vld [vmem:[%s9071_s10 + $0x9b0] sm:$0xff] }
 0x1bd   : > { %v2744_v45 = vmax.f32 %v2288_v40, 0.0  ;;  %v3790_v47 = vmax.f32 %v3334_v41, 0.0  ;;  %v2303_v48 = vadd.f32 %v7560_v43, %v9478_v16  ;;  %v3349_v49 = vadd.f32 %v7715_v44, %v9478_v16  ;;  %7868 = vmatprep.mubr.msk.f32.mxu0 %vm1882_vm1, %v6740_v36  ;;  %8023 = vmatprep.mubr.msk.f32.mxu1 %vm1882_vm1, %v6937_v37 }
 0x1be   : > { %v9566_v52 = vmax.f32 %v2745_v39, %v3791_v42  ;;  %v2297_v53 = vpop.f32.mrf.mxu0  ;;  %v3343_v54 = vpop.f32.mrf.mxu1 }
 0x1bf   : > { %v9570_v57 = vmax.f32 %v2744_v45, %v3790_v47  ;;  %v2747_v58 = vmax.f32 %v2303_v48, 0.0  ;;  %v3793_v60 = vmax.f32 %v3349_v49, 0.0  ;;  %v2298_v61 = vadd.f32 %v9478_v16, %v2297_v53  ;;  %v6747_v49 = vld [vmem:[%s9071_s10 + $0x6a8] sm:$0xff] }
 0x1c0   : > { %v3344_v62 = vadd.f32 %v9478_v16, %v3343_v54  ;;  %v7563_v63 = vpop.f32.mrf.mxu0  ;;  %v7718_v1 = vpop.f32.mrf.mxu1  ;;  %7869 = vmatmul.mubr.msk.f32.gmra.mxu0 %vm1882_vm1, %v6741_v50  ;;  %8024 = vmatmul.mubr.msk.f32.gmra.mxu1 %vm1882_vm1, %v6938_v51  ;;  %v6944_v50 = vld [vmem:[%s9071_s10 + $0x9b8] sm:$0xff] }
 0x1c1   : > { %v9576_v2 = vmax.f32 %v2747_v58, %v3793_v60  ;;  %v2746_v3 = vmax.f32 %v2298_v61, 0.0  ;;  %v2313_v4 = vadd.f32 %v7563_v63, %v9478_v16  ;;  %v3359_v5 = vadd.f32 %v7718_v1, %v9478_v16  ;;  %7871 = vmatprep.mubr.msk.f32.mxu0 %vm1882_vm1, %v6742_v55  ;;  %8026 = vmatprep.mubr.msk.f32.mxu1 %vm1882_vm1, %v6939_v56  ;;  %v6748_v55 = vld [vmem:[%s9071_s10 + $0x6b0] sm:$0xff]  ;;  %v6945_v56 = vld [vmem:[%s9071_s10 + $0x9c0] sm:$0xff] }
 0x1c2   : > { %v3792_v9 = vmax.f32 %v3344_v62, 0.0  ;;  %v2307_v10 = vpop.f32.mrf.mxu0  ;;  %v3353_v11 = vpop.f32.mrf.mxu1 }
 0x1c3   : > { %v2749_v14 = vmax.f32 %v2313_v4, 0.0  ;;  %v3795_v15 = vmax.f32 %v3359_v5, 0.0  ;;  %v2308_v17 = vadd.f32 %v9478_v16, %v2307_v10  ;;  %v3354_v18 = vadd.f32 %v9478_v16, %v3353_v11  ;;  %v6946_v10 = vld [vmem:[%s9071_s10 + $0x9c8] sm:$0xff] }
 0x1c4   : > { %v9588_v19 = vmax.f32 %v2746_v3, %v3792_v9  ;;  %v7566_v20 = vpop.f32.mrf.mxu0  ;;  %v7721_v21 = vpop.f32.mrf.mxu1  ;;  %7872 = vmatmul.mubr.msk.f32.gmra.mxu0 %vm1882_vm1, %v6743_v6  ;;  %8027 = vmatmul.mubr.msk.f32.gmra.mxu1 %vm1882_vm1, %v6940_v8  ;;  %v6749_v9 = vld [vmem:[%s9071_s10 + $0x6b8] sm:$0xff] }
 0x1c5   : > { %v9592_v22 = vmax.f32 %v2749_v14, %v3795_v15  ;;  %v2748_v24 = vmax.f32 %v2308_v17, 0.0  ;;  %v3794_v25 = vmax.f32 %v3354_v18, 0.0  ;;  %v2323_v27 = vadd.f32 %v7566_v20, %v9478_v16  ;;  %7874 = vmatprep.mubr.msk.f32.mxu0 %vm1882_vm1, %v6744_v12  ;;  %8029 = vmatprep.mubr.msk.f32.mxu1 %vm1882_vm1, %v6941_v13  ;;  %v6750_v14 = vld [vmem:[%s9071_s10 + $0x6c0] sm:$0xff]  ;;  %v6947_v15 = vld [vmem:[%s9071_s10 + $0x9d0] sm:$0xff] }
 0x1c6   : > { %v3369_v30 = vadd.f32 %v7721_v21, %v9478_v16  ;;  %v2317_v31 = vpop.f32.mrf.mxu0  ;;  %v3363_v32 = vpop.f32.mrf.mxu1 }
 0x1c7   : > { %v9602_v36 = vmax.f32 %v2748_v24, %v3794_v25  ;;  %v2751_v37 = vmax.f32 %v2323_v27, 0.0  ;;  %v2318_v39 = vadd.f32 %v9478_v16, %v2317_v31  ;;  %v3364_v40 = vadd.f32 %v9478_v16, %v3363_v32  ;;  %v6751_v32 = vld [vmem:[%s9071_s10 + $0x6c8] sm:$0xff] }
 0x1c8   : > { %v3797_v41 = vmax.f32 %v3369_v30, 0.0  ;;  %v7569_v42 = vpop.f32.mrf.mxu0  ;;  %v7724_v43 = vpop.f32.mrf.mxu1  ;;  %7875 = vmatmul.mubr.msk.f32.gmra.mxu0 %vm1882_vm1, %v6745_v28  ;;  %8030 = vmatmul.mubr.msk.f32.gmra.mxu1 %vm1882_vm1, %v6942_v29 }
 0x1c9   : > { %v2750_v44 = vmax.f32 %v2318_v39, 0.0  ;;  %v3796_v45 = vmax.f32 %v3364_v40, 0.0  ;;  %v2333_v47 = vadd.f32 %v7569_v42, %v9478_v16  ;;  %v3379_v48 = vadd.f32 %v7724_v43, %v9478_v16  ;;  %7877 = vmatprep.mubr.msk.f32.mxu0 %vm1882_vm1, %v6746_v33  ;;  %8032 = vmatprep.mubr.msk.f32.mxu1 %vm1882_vm1, %v6943_v34  ;;  %v6948_v33 = vld [vmem:[%s9071_s10 + $0x9d8] sm:$0xff]  ;;  %v6752_v40 = vld [vmem:[%s9071_s10 + $0x6d0] sm:$0xff] }
 0x1ca   : > { %v9614_v51 = vmax.f32 %v2751_v37, %v3797_v41  ;;  %v2327_v53 = vpop.f32.mrf.mxu0  ;;  %v3373_v54 = vpop.f32.mrf.mxu1  ;;  %v6949_v41 = vld [vmem:[%s9071_s10 + $0x9e0] sm:$0xff] }
 0x1cb   : > { %v9618_v58 = vmax.f32 %v2750_v44, %v3796_v45  ;;  %v2753_v60 = vmax.f32 %v2333_v47, 0.0  ;;  %v3799_v61 = vmax.f32 %v3379_v48, 0.0  ;;  %v2328_v62 = vadd.f32 %v9478_v16, %v2327_v53 }
 0x1cc   : > { %v3374_v63 = vadd.f32 %v9478_v16, %v3373_v54  ;;  %v7572_v1 = vpop.f32.mrf.mxu0  ;;  %v7727_v3 = vpop.f32.mrf.mxu1  ;;  %7878 = vmatmul.mubr.msk.f32.gmra.mxu0 %vm1882_vm1, %v6747_v49  ;;  %8033 = vmatmul.mubr.msk.f32.gmra.mxu1 %vm1882_vm1, %v6944_v50 }
 0x1cd   : > { %v9624_v4 = vmax.f32 %v2753_v60, %v3799_v61  ;;  %v2752_v5 = vmax.f32 %v2328_v62, 0.0  ;;  %v2343_v6 = vadd.f32 %v7572_v1, %v9478_v16  ;;  %v3389_v8 = vadd.f32 %v7727_v3, %v9478_v16  ;;  %7880 = vmatprep.mubr.msk.f32.mxu0 %vm1882_vm1, %v6748_v55  ;;  %8035 = vmatprep.mubr.msk.f32.mxu1 %vm1882_vm1, %v6945_v56  ;;  %v6753_v56 = vld [vmem:[%s9071_s10 + $0x6d8] sm:$0xff]  ;;  %v6950_v60 = vld [vmem:[%s9071_s10 + $0x9e8] sm:$0xff]  ;;  %v6754_v1 = vld [vmem:[%s9071_s10 + $0x6e0] sm:$0xff] }
 0x1ce   : > { %v3798_v11 = vmax.f32 %v3374_v63, 0.0  ;;  %v2337_v12 = vpop.f32.mrf.mxu0  ;;  %v3383_v13 = vpop.f32.mrf.mxu1  ;;  %v6951_v3 = vld [vmem:[%s9071_s10 + $0x9f0] sm:$0xff] }
 0x1cf   : > { %v2755_v17 = vmax.f32 %v2343_v6, 0.0  ;;  %v3801_v18 = vmax.f32 %v3389_v8, 0.0  ;;  %v2338_v20 = vadd.f32 %v9478_v16, %v2337_v12  ;;  %v3384_v21 = vadd.f32 %v9478_v16, %v3383_v13 }
 0x1d0   : > { %v9636_v24 = vmax.f32 %v2752_v5, %v3798_v11  ;;  %v7575_v25 = vpop.f32.mrf.mxu0  ;;  %v7730_v27 = vpop.f32.mrf.mxu1  ;;  %7881 = vmatmul.mubr.msk.f32.gmra.mxu0 %vm1882_vm1, %v6749_v9  ;;  %8036 = vmatmul.mubr.msk.f32.gmra.mxu1 %vm1882_vm1, %v6946_v10 }
 0x1d1   : > { %v9640_v28 = vmax.f32 %v2755_v17, %v3801_v18  ;;  %v2754_v29 = vmax.f32 %v2338_v20, 0.0  ;;  %v3800_v30 = vmax.f32 %v3384_v21, 0.0  ;;  %v2353_v31 = vadd.f32 %v7575_v25, %v9478_v16  ;;  %7883 = vmatprep.mubr.msk.f32.mxu0 %vm1882_vm1, %v6750_v14  ;;  %8038 = vmatprep.mubr.msk.f32.mxu1 %vm1882_vm1, %v6947_v15  ;;  %v6755_v18 = vld [vmem:[%s9071_s10 + $0x6e8] sm:$0xff]  ;;  %v6952_v20 = vld [vmem:[%s9071_s10 + $0x9f8] sm:$0xff] }
 0x1d2   : > { %v3399_v34 = vadd.f32 %v7730_v27, %v9478_v16  ;;  %v2347_v37 = vpop.f32.mrf.mxu0  ;;  %v3393_v39 = vpop.f32.mrf.mxu1 }
 0x1d3   : > { %v9650_v42 = vmax.f32 %v2754_v29, %v3800_v30  ;;  %v2757_v43 = vmax.f32 %v2353_v31, 0.0  ;;  %v2348_v44 = vadd.f32 %v9478_v16, %v2347_v37  ;;  %v3394_v45 = vadd.f32 %v9478_v16, %v3393_v39  ;;  %v6756_v29 = vld [vmem:[%s9071_s10 + $0x6f0] sm:$0xff]  ;;  %v6953_v30 = vld [vmem:[%s9071_s10 + $0xa00] sm:$0xff] }
 0x1d4   : > { %v3803_v47 = vmax.f32 %v3399_v34, 0.0  ;;  %v7578_v48 = vpop.f32.mrf.mxu0  ;;  %v7733_v49 = vpop.f32.mrf.mxu1  ;;  %7884 = vmatmul.mubr.msk.f32.gmra.mxu0 %vm1882_vm1, %v6751_v32  ;;  %8039 = vmatmul.mubr.msk.f32.gmra.mxu1 %vm1882_vm1, %v6948_v33 }
 0x1d5   : > { %v2756_v50 = vmax.f32 %v2348_v44, 0.0  ;;  %v3802_v53 = vmax.f32 %v3394_v45, 0.0  ;;  %v2363_v54 = vadd.f32 %v7578_v48, %v9478_v16  ;;  %v3409_v55 = vadd.f32 %v7733_v49, %v9478_v16  ;;  %7886 = vmatprep.mubr.msk.f32.mxu0 %vm1882_vm1, %v6752_v40  ;;  %8041 = vmatprep.mubr.msk.f32.mxu1 %vm1882_vm1, %v6949_v41  ;;  %v6954_v48 = vld [vmem:[%s9071_s10 + $0xa08] sm:$0xff] }
 0x1d6   : > { %v9662_v61 = vmax.f32 %v2757_v43, %v3803_v47  ;;  %v2357_v62 = vpop.f32.mrf.mxu0  ;;  %v3403_v63 = vpop.f32.mrf.mxu1  ;;  %v6757_v47 = vld [vmem:[%s9071_s10 + $0x6f8] sm:$0xff] }
 0x1d7   : > { %v9666_v5 = vmax.f32 %v2756_v50, %v3802_v53  ;;  %v2759_v6 = vmax.f32 %v2363_v54, 0.0  ;;  %v3805_v8 = vmax.f32 %v3409_v55, 0.0  ;;  %v2358_v9 = vadd.f32 %v9478_v16, %v2357_v62  ;;  %v6758_v54 = vld [vmem:[%s9071_s10 + $0x700] sm:$0xff]  ;;  %v6955_v55 = vld [vmem:[%s9071_s10 + $0xa10] sm:$0xff] }
 0x1d8   : > { %v3404_v10 = vadd.f32 %v9478_v16, %v3403_v63  ;;  %v7581_v11 = vpop.f32.mrf.mxu0  ;;  %v7736_v12 = vpop.f32.mrf.mxu1  ;;  %7887 = vmatmul.mubr.msk.f32.gmra.mxu0 %vm1882_vm1, %v6753_v56  ;;  %8042 = vmatmul.mubr.msk.f32.gmra.mxu1 %vm1882_vm1, %v6950_v60 }
 0x1d9   : > { %v9672_v13 = vmax.f32 %v2759_v6, %v3805_v8  ;;  %v2758_v14 = vmax.f32 %v2358_v9, 0.0  ;;  %v2373_v15 = vadd.f32 %v7581_v11, %v9478_v16  ;;  %v3419_v17 = vadd.f32 %v7736_v12, %v9478_v16  ;;  %7889 = vmatprep.mubr.msk.f32.mxu0 %vm1882_vm1, %v6754_v1  ;;  %8044 = vmatprep.mubr.msk.f32.mxu1 %vm1882_vm1, %v6951_v3  ;;  %v6759_v12 = vld [vmem:[%s9071_s10 + $0x708] sm:$0xff] }
 0x1da   : > { %v3804_v21 = vmax.f32 %v3404_v10, 0.0  ;;  %v2367_v25 = vpop.f32.mrf.mxu0  ;;  %v3413_v27 = vpop.f32.mrf.mxu1 }
 0x1db   : > { %v2761_v31 = vmax.f32 %v2373_v15, 0.0  ;;  %v3807_v32 = vmax.f32 %v3419_v17, 0.0  ;;  %v2368_v33 = vadd.f32 %v9478_v16, %v2367_v25  ;;  %v3414_v34 = vadd.f32 %v9478_v16, %v3413_v27 }
 0x1dc   : > { %v9684_v37 = vmax.f32 %v2758_v14, %v3804_v21  ;;  %v7584_v39 = vpop.f32.mrf.mxu0  ;;  %v7739_v40 = vpop.f32.mrf.mxu1  ;;  %7890 = vmatmul.mubr.msk.f32.gmra.mxu0 %vm1882_vm1, %v6755_v18  ;;  %8045 = vmatmul.mubr.msk.f32.gmra.mxu1 %vm1882_vm1, %v6952_v20  ;;  %v6956_v14 = vld [vmem:[%s9071_s10 + $0xa18] sm:$0xff]  ;;  %v6760_v20 = vld [vmem:[%s9071_s10 + $0x710] sm:$0xff]  ;;  %v6957_v21 = vld [vmem:[%s9071_s10 + $0xa20] sm:$0xff] }
 0x1dd   : > { %v9688_v41 = vmax.f32 %v2761_v31, %v3807_v32  ;;  %v2760_v43 = vmax.f32 %v2368_v33, 0.0  ;;  %v3806_v44 = vmax.f32 %v3414_v34, 0.0  ;;  %v2383_v45 = vadd.f32 %v7584_v39, %v9478_v16  ;;  %7892 = vmatprep.mubr.msk.f32.mxu0 %vm1882_vm1, %v6756_v29  ;;  %8047 = vmatprep.mubr.msk.f32.mxu1 %vm1882_vm1, %v6953_v30 }
 0x1de   : > { %v3429_v49 = vadd.f32 %v7739_v40, %v9478_v16  ;;  %v2377_v50 = vpop.f32.mrf.mxu0  ;;  %v3423_v53 = vpop.f32.mrf.mxu1 }
 0x1df   : > { %v9698_v56 = vmax.f32 %v2760_v43, %v3806_v44  ;;  %v2763_v60 = vmax.f32 %v2383_v45, 0.0  ;;  %v2378_v62 = vadd.f32 %v9478_v16, %v2377_v50  ;;  %v3424_v63 = vadd.f32 %v9478_v16, %v3423_v53  ;;  %v6761_v44 = vld [vmem:[%s9071_s10 + $0x718] sm:$0xff]  ;;  %v6958_v45 = vld [vmem:[%s9071_s10 + $0xa28] sm:$0xff]  ;;  %v6762_v50 = vld [vmem:[%s9071_s10 + $0x720] sm:$0xff] }
 0x1e0   : > { %v3809_v1 = vmax.f32 %v3429_v49, 0.0  ;;  %v7587_v3 = vpop.f32.mrf.mxu0  ;;  %v7742_v6 = vpop.f32.mrf.mxu1  ;;  %7893 = vmatmul.mubr.msk.f32.gmra.mxu0 %vm1882_vm1, %v6757_v47  ;;  %8048 = vmatmul.mubr.msk.f32.gmra.mxu1 %vm1882_vm1, %v6954_v48  ;;  %v6959_v53 = vld [vmem:[%s9071_s10 + $0xa30] sm:$0xff] }
 0x1e1   : > { %v2762_v8 = vmax.f32 %v2378_v62, 0.0  ;;  %v3808_v9 = vmax.f32 %v3424_v63, 0.0  ;;  %v2393_v10 = vadd.f32 %v7587_v3, %v9478_v16  ;;  %v3439_v11 = vadd.f32 %v7742_v6, %v9478_v16  ;;  %7895 = vmatprep.mubr.msk.f32.mxu0 %vm1882_vm1, %v6758_v54  ;;  %8050 = vmatprep.mubr.msk.f32.mxu1 %vm1882_vm1, %v6955_v55 }
 0x1e2   : > { %v9710_v15 = vmax.f32 %v2763_v60, %v3809_v1  ;;  %v2387_v17 = vpop.f32.mrf.mxu0  ;;  %v3433_v18 = vpop.f32.mrf.mxu1 }
 0x1e3   : > { %v9714_v25 = vmax.f32 %v2762_v8, %v3808_v9  ;;  %v2765_v27 = vmax.f32 %v2393_v10, 0.0  ;;  %v3811_v29 = vmax.f32 %v3439_v11, 0.0  ;;  %v2388_v30 = vadd.f32 %v9478_v16, %v2387_v17  ;;  %v6763_v11 = vld [vmem:[%s9071_s10 + $0x728] sm:$0xff] }
 0x1e4   : > { %v3434_v31 = vadd.f32 %v9478_v16, %v3433_v18  ;;  %v7590_v32 = vpop.f32.mrf.mxu0  ;;  %v7745_v33 = vpop.f32.mrf.mxu1  ;;  %7896 = vmatmul.mubr.msk.f32.gmra.mxu0 %vm1882_vm1, %v6759_v12  ;;  %8051 = vmatmul.mubr.msk.f32.gmra.mxu1 %vm1882_vm1, %v6956_v14  ;;  %v6960_v12 = vld [vmem:[%s9071_s10 + $0xa38] sm:$0xff] }
 0x1e5   : > { %v9720_v34 = vmax.f32 %v2765_v27, %v3811_v29  ;;  %v2764_v39 = vmax.f32 %v2388_v30, 0.0  ;;  %v2403_v40 = vadd.f32 %v7590_v32, %v9478_v16  ;;  %v3449_v43 = vadd.f32 %v7745_v33, %v9478_v16  ;;  %7898 = vmatprep.mubr.msk.f32.mxu0 %vm1882_vm1, %v6760_v20  ;;  %8053 = vmatprep.mubr.msk.f32.mxu1 %vm1882_vm1, %v6957_v21  ;;  %v6764_v20 = vld [vmem:[%s9071_s10 + $0x730] sm:$0xff]  ;;  %v6961_v21 = vld [vmem:[%s9071_s10 + $0xa40] sm:$0xff] }
 0x1e6   : > { %v3810_v47 = vmax.f32 %v3434_v31, 0.0  ;;  %v2397_v48 = vpop.f32.mrf.mxu0  ;;  %v3443_v49 = vpop.f32.mrf.mxu1 }
 0x1e7   : > { %v2767_v54 = vmax.f32 %v2403_v40, 0.0  ;;  %v3813_v55 = vmax.f32 %v3449_v43, 0.0  ;;  %v2398_v60 = vadd.f32 %v9478_v16, %v2397_v48  ;;  %v3444_v62 = vadd.f32 %v9478_v16, %v3443_v49  ;;  %v6962_v48 = vld [vmem:[%s9071_s10 + $0xa48] sm:$0xff] }
 0x1e8   : > { %v9732_v63 = vmax.f32 %v2764_v39, %v3810_v47  ;;  %v7593_v1 = vpop.f32.mrf.mxu0  ;;  %v7748_v3 = vpop.f32.mrf.mxu1  ;;  %7899 = vmatmul.mubr.msk.f32.gmra.mxu0 %vm1882_vm1, %v6761_v44  ;;  %8054 = vmatmul.mubr.msk.f32.gmra.mxu1 %vm1882_vm1, %v6958_v45  ;;  %v6765_v47 = vld [vmem:[%s9071_s10 + $0x738] sm:$0xff] }
 0x1e9   : > { %v9736_v6 = vmax.f32 %v2767_v54, %v3813_v55  ;;  %v2766_v8 = vmax.f32 %v2398_v60, 0.0  ;;  %v3812_v9 = vmax.f32 %v3444_v62, 0.0  ;;  %v2413_v10 = vadd.f32 %v7593_v1, %v9478_v16  ;;  %7901 = vmatprep.mubr.msk.f32.mxu0 %vm1882_vm1, %v6762_v50  ;;  %8056 = vmatprep.mubr.msk.f32.mxu1 %vm1882_vm1, %v6959_v53  ;;  %v6766_v54 = vld [vmem:[%s9071_s10 + $0x740] sm:$0xff]  ;;  %v6963_v55 = vld [vmem:[%s9071_s10 + $0xa50] sm:$0xff] }
 0x1ea   : > { %v3459_v14 = vadd.f32 %v7748_v3, %v9478_v16  ;;  %v2407_v17 = vpop.f32.mrf.mxu0  ;;  %v3453_v18 = vpop.f32.mrf.mxu1 }
 0x1eb   : > { %v9746_v27 = vmax.f32 %v2766_v8, %v3812_v9  ;;  %v2769_v29 = vmax.f32 %v2413_v10, 0.0  ;;  %v2408_v30 = vadd.f32 %v9478_v16, %v2407_v17  ;;  %v3454_v31 = vadd.f32 %v9478_v16, %v3453_v18  ;;  %v6767_v18 = vld [vmem:[%s9071_s10 + $0x748] sm:$0xff] }
 0x1ec   : > { %v3815_v32 = vmax.f32 %v3459_v14, 0.0  ;;  %v7596_v33 = vpop.f32.mrf.mxu0  ;;  %v7751_v39 = vpop.f32.mrf.mxu1  ;;  %7902 = vmatmul.mubr.msk.f32.gmra.mxu0 %vm1882_vm1, %v6763_v11  ;;  %8057 = vmatmul.mubr.msk.f32.gmra.mxu1 %vm1882_vm1, %v6960_v12 }
 0x1ed   : > { %v2768_v40 = vmax.f32 %v2408_v30, 0.0  ;;  %v3814_v43 = vmax.f32 %v3454_v31, 0.0  ;;  %v2423_v44 = vadd.f32 %v7596_v33, %v9478_v16  ;;  %v3469_v45 = vadd.f32 %v7751_v39, %v9478_v16  ;;  %7904 = vmatprep.mubr.msk.f32.mxu0 %vm1882_vm1, %v6764_v20  ;;  %8059 = vmatprep.mubr.msk.f32.mxu1 %vm1882_vm1, %v6961_v21  ;;  %v6964_v20 = vld [vmem:[%s9071_s10 + $0xa58] sm:$0xff]  ;;  %v6768_v31 = vld [vmem:[%s9071_s10 + $0x750] sm:$0xff] }
 0x1ee   : > { %v9758_v49 = vmax.f32 %v2769_v29, %v3815_v32  ;;  %v2417_v50 = vpop.f32.mrf.mxu0  ;;  %v3463_v53 = vpop.f32.mrf.mxu1  ;;  %v6965_v32 = vld [vmem:[%s9071_s10 + $0xa60] sm:$0xff] }
 0x1ef   : > { %v9762_v60 = vmax.f32 %v2768_v40, %v3814_v43  ;;  %v2771_v62 = vmax.f32 %v2423_v44, 0.0  ;;  %v3817_v1 = vmax.f32 %v3469_v45, 0.0  ;;  %v2418_v3 = vadd.f32 %v9478_v16, %v2417_v50 }
 0x1f0   : > { %v3464_v8 = vadd.f32 %v9478_v16, %v3463_v53  ;;  %v7599_v9 = vpop.f32.mrf.mxu0  ;;  %v7754_v10 = vpop.f32.mrf.mxu1  ;;  %7905 = vmatmul.mubr.msk.f32.gmra.mxu0 %vm1882_vm1, %v6765_v47  ;;  %8060 = vmatmul.mubr.msk.f32.gmra.mxu1 %vm1882_vm1, %v6962_v48 }
 0x1f1   : > { %v9768_v11 = vmax.f32 %v2771_v62, %v3817_v1  ;;  %v2770_v12 = vmax.f32 %v2418_v3, 0.0  ;;  %v2433_v14 = vadd.f32 %v7599_v9, %v9478_v16  ;;  %v3479_v17 = vadd.f32 %v7754_v10, %v9478_v16  ;;  %7907 = vmatprep.mubr.msk.f32.mxu0 %vm1882_vm1, %v6766_v54  ;;  %8062 = vmatprep.mubr.msk.f32.mxu1 %vm1882_vm1, %v6963_v55  ;;  %v6769_v55 = vld [vmem:[%s9071_s10 + $0x758] sm:$0xff]  ;;  %v6966_v62 = vld [vmem:[%s9071_s10 + $0xa68] sm:$0xff]  ;;  %v6770_v9 = vld [vmem:[%s9071_s10 + $0x760] sm:$0xff] }
 0x1f2   : > { %v3816_v21 = vmax.f32 %v3464_v8, 0.0  ;;  %v2427_v29 = vpop.f32.mrf.mxu0  ;;  %v3473_v30 = vpop.f32.mrf.mxu1  ;;  %v6967_v10 = vld [vmem:[%s9071_s10 + $0xa70] sm:$0xff] }
 0x1f3   : > { %v2773_v33 = vmax.f32 %v2433_v14, 0.0  ;;  %v3819_v39 = vmax.f32 %v3479_v17, 0.0  ;;  %v2428_v40 = vadd.f32 %v9478_v16, %v2427_v29  ;;  %v3474_v43 = vadd.f32 %v9478_v16, %v3473_v30 }
 0x1f4   : > { %v9780_v44 = vmax.f32 %v2770_v12, %v3816_v21  ;;  %v7602_v45 = vpop.f32.mrf.mxu0  ;;  %v7757_v47 = vpop.f32.mrf.mxu1  ;;  %7908 = vmatmul.mubr.msk.f32.gmra.mxu0 %vm1882_vm1, %v6767_v18  ;;  %8063 = vmatmul.mubr.msk.f32.gmra.mxu1 %vm1882_vm1, %v6964_v20 }
 0x1f5   : > { %v9784_v48 = vmax.f32 %v2773_v33, %v3819_v39  ;;  %v2772_v50 = vmax.f32 %v2428_v40, 0.0  ;;  %v3818_v53 = vmax.f32 %v3474_v43, 0.0  ;;  %v2443_v54 = vadd.f32 %v7602_v45, %v9478_v16  ;;  %7910 = vmatprep.mubr.msk.f32.mxu0 %vm1882_vm1, %v6768_v31  ;;  %8065 = vmatprep.mubr.msk.f32.mxu1 %vm1882_vm1, %v6965_v32  ;;  %v6771_v39 = vld [vmem:[%s9071_s10 + $0x768] sm:$0xff]  ;;  %v6968_v40 = vld [vmem:[%s9071_s10 + $0xa78] sm:$0xff] }
 0x1f6   : > { %v3489_v1 = vadd.f32 %v7757_v47, %v9478_v16  ;;  %v2437_v3 = vpop.f32.mrf.mxu0  ;;  %v3483_v8 = vpop.f32.mrf.mxu1 }
 0x1f7   : > { %v9794_v12 = vmax.f32 %v2772_v50, %v3818_v53  ;;  %v2775_v14 = vmax.f32 %v2443_v54, 0.0  ;;  %v2438_v17 = vadd.f32 %v9478_v16, %v2437_v3  ;;  %v3484_v18 = vadd.f32 %v9478_v16, %v3483_v8  ;;  %v6772_v50 = vld [vmem:[%s9071_s10 + $0x770] sm:$0xff]  ;;  %v6969_v53 = vld [vmem:[%s9071_s10 + $0xa80] sm:$0xff] }
 0x1f8   : > { %v3821_v20 = vmax.f32 %v3489_v1, 0.0  ;;  %v7605_v21 = vpop.f32.mrf.mxu0  ;;  %v7760_v29 = vpop.f32.mrf.mxu1  ;;  %7911 = vmatmul.mubr.msk.f32.gmra.mxu0 %vm1882_vm1, %v6769_v55  ;;  %8066 = vmatmul.mubr.msk.f32.gmra.mxu1 %vm1882_vm1, %v6966_v62 }
 0x1f9   : > { %v2774_v30 = vmax.f32 %v2438_v17, 0.0  ;;  %v3820_v31 = vmax.f32 %v3484_v18, 0.0  ;;  %v2453_v32 = vadd.f32 %v7605_v21, %v9478_v16  ;;  %v3499_v33 = vadd.f32 %v7760_v29, %v9478_v16  ;;  %7913 = vmatprep.mubr.msk.f32.mxu0 %vm1882_vm1, %v6770_v9  ;;  %8068 = vmatprep.mubr.msk.f32.mxu1 %vm1882_vm1, %v6967_v10  ;;  %v6970_v21 = vld [vmem:[%s9071_s10 + $0xa88] sm:$0xff] }
 0x1fa   : > { %v9806_v43 = vmax.f32 %v2775_v14, %v3821_v20  ;;  %v2447_v45 = vpop.f32.mrf.mxu0  ;;  %v3493_v47 = vpop.f32.mrf.mxu1  ;;  %v6773_v20 = vld [vmem:[%s9071_s10 + $0x778] sm:$0xff] }
 0x1fb   : > { %v9810_v54 = vmax.f32 %v2774_v30, %v3820_v31  ;;  %v2777_v55 = vmax.f32 %v2453_v32, 0.0  ;;  %v3823_v62 = vmax.f32 %v3499_v33, 0.0  ;;  %v2448_v1 = vadd.f32 %v9478_v16, %v2447_v45  ;;  %v6774_v32 = vld [vmem:[%s9071_s10 + $0x780] sm:$0xff]  ;;  %v6971_v33 = vld [vmem:[%s9071_s10 + $0xa90] sm:$0xff] }
 0x1fc   : > { %v3494_v3 = vadd.f32 %v9478_v16, %v3493_v47  ;;  %v7608_v8 = vpop.f32.mrf.mxu0  ;;  %v7763_v9 = vpop.f32.mrf.mxu1  ;;  %7914 = vmatmul.mubr.msk.f32.gmra.mxu0 %vm1882_vm1, %v6771_v39  ;;  %8069 = vmatmul.mubr.msk.f32.gmra.mxu1 %vm1882_vm1, %v6968_v40 }
 0x1fd   : > { %v9816_v10 = vmax.f32 %v2777_v55, %v3823_v62  ;;  %v2776_v14 = vmax.f32 %v2448_v1, 0.0  ;;  %v2463_v17 = vadd.f32 %v7608_v8, %v9478_v16  ;;  %v3509_v18 = vadd.f32 %v7763_v9, %v9478_v16  ;;  %7916 = vmatprep.mubr.msk.f32.mxu0 %vm1882_vm1, %v6772_v50  ;;  %8071 = vmatprep.mubr.msk.f32.mxu1 %vm1882_vm1, %v6969_v53  ;;  %v6775_v9 = vld [vmem:[%s9071_s10 + $0x788] sm:$0xff] }
 0x1fe   : > { %v3822_v29 = vmax.f32 %v3494_v3, 0.0  ;;  %v2457_v30 = vpop.f32.mrf.mxu0  ;;  %v3503_v31 = vpop.f32.mrf.mxu1 }
 0x1ff   : > { %v2779_v39 = vmax.f32 %v2463_v17, 0.0  ;;  %v3825_v40 = vmax.f32 %v3509_v18, 0.0  ;;  %v2458_v45 = vadd.f32 %v9478_v16, %v2457_v30  ;;  %v3504_v47 = vadd.f32 %v9478_v16, %v3503_v31  ;;  %v6776_v30 = vld [vmem:[%s9071_s10 + $0x790] sm:$0xff] }
 0x200   : > { %v9828_v55 = vmax.f32 %v2776_v14, %v3822_v29  ;;  %v7611_v50 = vpop.f32.mrf.mxu0  ;;  %v7766_v53 = vpop.f32.mrf.mxu1  ;;  %7917 = vmatmul.mubr.msk.f32.gmra.mxu0 %vm1882_vm1, %v6773_v20  ;;  %8072 = vmatmul.mubr.msk.f32.gmra.mxu1 %vm1882_vm1, %v6970_v21  ;;  %v6972_v14 = vld [vmem:[%s9071_s10 + $0xa98] sm:$0xff]  ;;  %v6973_v20 = vld [vmem:[%s9071_s10 + $0xaa0] sm:$0xff] }
 0x201   : > { %v9832_v62 = vmax.f32 %v2779_v39, %v3825_v40  ;;  %v2778_v1 = vmax.f32 %v2458_v45, 0.0  ;;  %v3824_v3 = vmax.f32 %v3504_v47, 0.0  ;;  %v2473_v8 = vadd.f32 %v7611_v50, %v9478_v16  ;;  %7919 = vmatprep.mubr.msk.f32.mxu0 %vm1882_vm1, %v6774_v32  ;;  %8074 = vmatprep.mubr.msk.f32.mxu1 %vm1882_vm1, %v6971_v33 }
 0x202   : > { %v3519_v17 = vadd.f32 %v7766_v53, %v9478_v16  ;;  %v2467_v18 = vpop.f32.mrf.mxu0  ;;  %v3513_v29 = vpop.f32.mrf.mxu1 }
 0x203   : > { %v9842_v31 = vmax.f32 %v2778_v1, %v3824_v3  ;;  %v2781_v21 = vmax.f32 %v2473_v8, 0.0  ;;  %v2468_v39 = vadd.f32 %v9478_v16, %v2467_v18  ;;  %v3514_v40 = vadd.f32 %v9478_v16, %v3513_v29  ;;  %v9852_v1 = vld [vmem:[%s10698_s2] ss:$0 sm:$0xff]  ;;  %v6777_v8 = vld [vmem:[%s9071_s10 + $0x798] sm:$0xff] }
 0x204   : > { %v3827_v32 = vmax.f32 %v3519_v17, 0.0  ;;  %v7614_v45 = vpop.f32.mrf.mxu0  ;;  %v7769_v33 = vpop.f32.mrf.mxu1  ;;  %7920 = vmatmul.mubr.msk.f32.gmra.mxu0 %vm1882_vm1, %v6775_v9  ;;  %8075 = vmatmul.mubr.msk.f32.gmra.mxu1 %vm1882_vm1, %v6972_v14  ;;  %v6974_v17 = vld [vmem:[%s9071_s10 + $0xaa8] sm:$0xff]  ;;  %v6778_v29 = vld [vmem:[%s9071_s10 + $0x7a0] sm:$0xff] }
 0x205   : > { %10700 = vst [vmem:[#allocation3_spill] sm:$0xff] %v9842_v31  ;;  %v2780_v47 = vmax.f32 %v2468_v39, 0.0  ;;  %v3826_v50 = vmax.f32 %v3514_v40, 0.0  ;;  %v2483_v53 = vadd.f32 %v7614_v45, %v9478_v16  ;;  %v3529_v3 = vadd.f32 %v9852_v1, %v7769_v33  ;;  %7922 = vmatprep.mubr.msk.f32.mxu0 %vm1882_vm1, %v6776_v30  ;;  %8077 = vmatprep.mubr.msk.f32.mxu1 %vm1882_vm1, %v6973_v20  ;;  %v6975_v39 = vld [vmem:[%s9071_s10 + $0xab0] sm:$0xff] }
 0x206   : > { %v9859_v9 = vmax.f32 %v2781_v21, %v3827_v32  ;;  %v2477_v14 = vpop.f32.mrf.mxu0  ;;  %v3523_v18 = vpop.f32.mrf.mxu1 }
 0x207   : > { %v9863_v16 = vmax.f32 %v2780_v47, %v3826_v50  ;;  %v2783_v40 = vmax.f32 %v2483_v53, 0.0  ;;  %v3829_v45 = vmax.f32 %v3529_v3, 0.0  ;;  %v2478_v33 = vadd.f32 %v9852_v1, %v2477_v14  ;;  %v6779_v53 = vld [vmem:[%s9071_s10 + $0x7a8] sm:$0xff]  ;;  %v6976_v3 = vld [vmem:[%s9071_s10 + $0xab8] sm:$0xff] }
 0x208   : > { %10701 = vst [vmem:[#allocation4_spill] sm:$0xff] %v9859_v9  ;;  %v3524_v30 = vadd.f32 %v9852_v1, %v3523_v18  ;;  %v7617_v20 = vpop.f32.mrf.mxu0  ;;  %v7772_v31 = vpop.f32.mrf.mxu1  ;;  %7923 = vmatmul.mubr.msk.f32.gmra.mxu0 %vm1882_vm1, %v6777_v8  ;;  %8078 = vmatmul.mubr.msk.f32.gmra.mxu1 %vm1882_vm1, %v6974_v17  ;;  %v6780_v9 = vld [vmem:[%s9071_s10 + $0x7b0] sm:$0xff]  ;;  %v6977_v8 = vld [vmem:[%s9071_s10 + $0xac0] sm:$0xff] }
 0x209   : > { %10702 = vst [vmem:[#allocation5_spill] sm:$0xff] %v9863_v16  ;;  %v9869_v21 = vmax.f32 %v2783_v40, %v3829_v45  ;;  %v2782_v32 = vmax.f32 %v2478_v33, 0.0  ;;  %v2493_v47 = vadd.f32 %v9852_v1, %v7617_v20  ;;  %v3539_v50 = vadd.f32 %v9852_v1, %v7772_v31  ;;  %7925 = vmatprep.mubr.msk.f32.mxu0 %vm1882_vm1, %v6778_v29 }
 0x20a   : > { %8080 = vmatprep.mubr.msk.f32.mxu1 %vm1882_vm1, %v6975_v39  ;;  %v3828_v14 = vmax.f32 %v3524_v30, 0.0  ;;  %v2487_v18 = vpop.f32.mrf.mxu0  ;;  %v3533_v16 = vpop.f32.mrf.mxu1 }
 0x20b   : > { %10703 = vst [vmem:[#allocation6_spill] sm:$0xff] %v9869_v21  ;;  %v2785_v17 = vmax.f32 %v2493_v47, 0.0  ;;  %v3831_v40 = vmax.f32 %v3539_v50, 0.0  ;;  %v2488_v45 = vadd.f32 %v9852_v1, %v2487_v18  ;;  %v3534_v33 = vadd.f32 %v9852_v1, %v3533_v16  ;;  %v6781_v16 = vld [vmem:[%s9071_s10 + $0x7b8] sm:$0xff]  ;;  %v6782_v21 = vld [vmem:[%s9071_s10 + $0x7c0] sm:$0xff] }
 0x20c   : > { %v9881_v31 = vmax.f32 %v2782_v32, %v3828_v14  ;;  %v7620_v29 = vpop.f32.mrf.mxu0  ;;  %v7775_v39 = vpop.f32.mrf.mxu1  ;;  %7926 = vmatmul.mubr.msk.f32.gmra.mxu0 %vm1882_vm1, %v6779_v53  ;;  %8081 = vmatmul.mubr.msk.f32.gmra.mxu1 %vm1882_vm1, %v6976_v3  ;;  %v6978_v32 = vld [vmem:[%s9071_s10 + $0xac8] sm:$0xff]  ;;  %v6979_v53 = vld [vmem:[%s9071_s10 + $0xad0] sm:$0xff] }
 0x20d   : > { %v9885_v30 = vmax.f32 %v2785_v17, %v3831_v40  ;;  %v2784_v20 = vmax.f32 %v2488_v45, 0.0  ;;  %v3830_v47 = vmax.f32 %v3534_v33, 0.0  ;;  %v2503_v50 = vadd.f32 %v9852_v1, %v7620_v29  ;;  %7928 = vmatprep.mubr.msk.f32.mxu0 %vm1882_vm1, %v6780_v9  ;;  %8083 = vmatprep.mubr.msk.f32.mxu1 %vm1882_vm1, %v6977_v8 }
 0x20e   : > { %10704 = vst [vmem:[#allocation7_spill] sm:$0xff] %v9881_v31  ;;  %v3549_v14 = vadd.f32 %v9852_v1, %v7775_v39  ;;  %v2497_v18 = vpop.f32.mrf.mxu0  ;;  %v3543_v31 = vpop.f32.mrf.mxu1 }
 0x20f   : > { %10705 = vst [vmem:[#allocation8_spill] sm:$0xff] %v9885_v30  ;;  %v9895_v3 = vmax.f32 %v2784_v20, %v3830_v47  ;;  %v2787_v17 = vmax.f32 %v2503_v50, 0.0  ;;  %v2498_v40 = vadd.f32 %v9852_v1, %v2497_v18  ;;  %v3544_v45 = vadd.f32 %v9852_v1, %v3543_v31  ;;  %v6783_v31 = vld [vmem:[%s9071_s10 + $0x7c8] sm:$0xff]  ;;  %v6980_v50 = vld [vmem:[%s9071_s10 + $0xad8] sm:$0xff]  ;;  %v6784_v30 = vld [vmem:[%s9071_s10 + $0x7d0] sm:$0xff] }
 0x210   : > { %v3833_v9 = vmax.f32 %v3549_v14, 0.0  ;;  %v7623_v8 = vpop.f32.mrf.mxu0  ;;  %v7778_v33 = vpop.f32.mrf.mxu1  ;;  %7929 = vmatmul.mubr.msk.f32.gmra.mxu0 %vm1882_vm1, %v6781_v16  ;;  %8084 = vmatmul.mubr.msk.f32.gmra.mxu1 %vm1882_vm1, %v6978_v32  ;;  %v6981_v16 = vld [vmem:[%s9071_s10 + $0xae0] sm:$0xff] }
 0x211   : > { %10706 = vst [vmem:[#allocation9_spill] sm:$0xff] %v9895_v3  ;;  %v2786_v29 = vmax.f32 %v2498_v40, 0.0  ;;  %v3832_v39 = vmax.f32 %v3544_v45, 0.0  ;;  %v2513_v20 = vadd.f32 %v9852_v1, %v7623_v8  ;;  %v3559_v47 = vadd.f32 %v9852_v1, %v7778_v33  ;;  %7931 = vmatprep.mubr.msk.f32.mxu0 %vm1882_vm1, %v6782_v21  ;;  %8086 = vmatprep.mubr.msk.f32.mxu1 %vm1882_vm1, %v6979_v53 }
 0x212   : > { %v9907_v14 = vmax.f32 %v2787_v17, %v3833_v9  ;;  %v2507_v18 = vpop.f32.mrf.mxu0  ;;  %v3553_v3 = vpop.f32.mrf.mxu1 }
 0x213   : > { %v9911_v32 = vmax.f32 %v2786_v29, %v3832_v39  ;;  %v2789_v40 = vmax.f32 %v2513_v20, 0.0  ;;  %v3835_v45 = vmax.f32 %v3559_v47, 0.0  ;;  %v2508_v8 = vadd.f32 %v9852_v1, %v2507_v18  ;;  %v6982_v20 = vld [vmem:[%s9071_s10 + $0xae8] sm:$0xff] }
 0x214   : > { %10707 = vst [vmem:[#allocation10_spill] sm:$0xff] %v9907_v14  ;;  %v3554_v21 = vadd.f32 %v9852_v1, %v3553_v3  ;;  %v7626_v53 = vpop.f32.mrf.mxu0  ;;  %v7781_v33 = vpop.f32.mrf.mxu1  ;;  %7932 = vmatmul.mubr.msk.f32.gmra.mxu0 %vm1882_vm1, %v6783_v31  ;;  %8087 = vmatmul.mubr.msk.f32.gmra.mxu1 %vm1882_vm1, %v6980_v50  ;;  %v6785_v3 = vld [vmem:[%s9071_s10 + $0x7d8] sm:$0xff]  ;;  %v6786_v14 = vld [vmem:[%s9071_s10 + $0x7e0] sm:$0xff]  ;;  %v6983_v31 = vld [vmem:[%s9071_s10 + $0xaf0] sm:$0xff] }
 0x215   : > { %10708 = vst [vmem:[#allocation11_spill] sm:$0xff] %v9911_v32  ;;  %v9917_v17 = vmax.f32 %v2789_v40, %v3835_v45  ;;  %v2788_v9 = vmax.f32 %v2508_v8, 0.0  ;;  %v2523_v29 = vadd.f32 %v9852_v1, %v7626_v53  ;;  %v3569_v39 = vadd.f32 %v9852_v1, %v7781_v33  ;;  %7934 = vmatprep.mubr.msk.f32.mxu0 %vm1882_vm1, %v6784_v30 }
 0x216   : > { %8089 = vmatprep.mubr.msk.f32.mxu1 %vm1882_vm1, %v6981_v16  ;;  %v3834_v47 = vmax.f32 %v3554_v21, 0.0  ;;  %v2517_v18 = vpop.f32.mrf.mxu0  ;;  %v3563_v32 = vpop.f32.mrf.mxu1 }
 0x217   : > { %10709 = vst [vmem:[#allocation12_spill] sm:$0xff] %v9917_v17  ;;  %v2791_v50 = vmax.f32 %v2523_v29, 0.0  ;;  %v3837_v40 = vmax.f32 %v3569_v39, 0.0  ;;  %v2518_v45 = vadd.f32 %v9852_v1, %v2517_v18  ;;  %v3564_v8 = vadd.f32 %v9852_v1, %v3563_v32  ;;  %v6787_v32 = vld [vmem:[%s9071_s10 + $0x7e8] sm:$0xff]  ;;  %v6788_v17 = vld [vmem:[%s9071_s10 + $0x7f0] sm:$0xff] }
 0x218   : > { %v9929_v53 = vmax.f32 %v2788_v9, %v3834_v47  ;;  %v7629_v30 = vpop.f32.mrf.mxu0  ;;  %v7784_v16 = vpop.f32.mrf.mxu1  ;;  %7935 = vmatmul.mubr.msk.f32.gmra.mxu0 %vm1882_vm1, %v6785_v3  ;;  %8090 = vmatmul.mubr.msk.f32.gmra.mxu1 %vm1882_vm1, %v6982_v20  ;;  %v6984_v9 = vld [vmem:[%s9071_s10 + $0xaf8] sm:$0xff]  ;;  %v6985_v3 = vld [vmem:[%s9071_s10 + $0xb00] sm:$0xff] }
 0x219   : > { %v9933_v21 = vmax.f32 %v2791_v50, %v3837_v40  ;;  %v2790_v33 = vmax.f32 %v2518_v45, 0.0  ;;  %v3836_v29 = vmax.f32 %v3564_v8, 0.0  ;;  %v2533_v39 = vadd.f32 %v9852_v1, %v7629_v30  ;;  %7937 = vmatprep.mubr.msk.f32.mxu0 %vm1882_vm1, %v6786_v14  ;;  %8092 = vmatprep.mubr.msk.f32.mxu1 %vm1882_vm1, %v6983_v31 }
 0x21a   : > { %10710 = vst [vmem:[#allocation13_spill] sm:$0xff] %v9929_v53  ;;  %v3579_v47 = vadd.f32 %v9852_v1, %v7784_v16  ;;  %v2527_v18 = vpop.f32.mrf.mxu0  ;;  %v3573_v53 = vpop.f32.mrf.mxu1 }
 0x21b   : > { %10711 = vst [vmem:[#allocation14_spill] sm:$0xff] %v9933_v21  ;;  %v9943_v20 = vmax.f32 %v2790_v33, %v3836_v29  ;;  %v2793_v50 = vmax.f32 %v2533_v39, 0.0  ;;  %v2528_v40 = vadd.f32 %v9852_v1, %v2527_v18  ;;  %v3574_v45 = vadd.f32 %v9852_v1, %v3573_v53  ;;  %v6789_v53 = vld [vmem:[%s9071_s10 + $0x7f8] sm:$0xff]  ;;  %v6986_v39 = vld [vmem:[%s9071_s10 + $0xb08] sm:$0xff]  ;;  %v6790_v21 = vld [vmem:[%s9071_s10 + $0x800] sm:$0xff] }
 0x21c   : > { %v3839_v14 = vmax.f32 %v3579_v47, 0.0  ;;  %v7632_v31 = vpop.f32.mrf.mxu0  ;;  %v7787_v8 = vpop.f32.mrf.mxu1  ;;  %7938 = vmatmul.mubr.msk.f32.gmra.mxu0 %vm1882_vm1, %v6787_v32  ;;  %8093 = vmatmul.mubr.msk.f32.gmra.mxu1 %vm1882_vm1, %v6984_v9  ;;  %v6987_v32 = vld [vmem:[%s9071_s10 + $0xb10] sm:$0xff] }
 0x21d   : > { %10712 = vst [vmem:[#allocation15_spill] sm:$0xff] %v9943_v20  ;;  %v2792_v30 = vmax.f32 %v2528_v40, 0.0  ;;  %v3838_v16 = vmax.f32 %v3574_v45, 0.0  ;;  %v2543_v33 = vadd.f32 %v9852_v1, %v7632_v31  ;;  %v3589_v29 = vadd.f32 %v9852_v1, %v7787_v8  ;;  %7940 = vmatprep.mubr.msk.f32.mxu0 %vm1882_vm1, %v6788_v17  ;;  %8095 = vmatprep.mubr.msk.f32.mxu1 %vm1882_vm1, %v6985_v3 }
 0x21e   : > { %v9955_v47 = vmax.f32 %v2793_v50, %v3839_v14  ;;  %v2537_v18 = vpop.f32.mrf.mxu0  ;;  %v3583_v20 = vpop.f32.mrf.mxu1 }
 0x21f   : > { %v9959_v9 = vmax.f32 %v2792_v30, %v3838_v16  ;;  %v2795_v40 = vmax.f32 %v2543_v33, 0.0  ;;  %v3841_v45 = vmax.f32 %v3589_v29, 0.0  ;;  %v2538_v31 = vadd.f32 %v9852_v1, %v2537_v18  ;;  %v6988_v33 = vld [vmem:[%s9071_s10 + $0xb18] sm:$0xff] }
 0x220   : > { %10713 = vst [vmem:[#allocation16_spill] sm:$0xff] %v9955_v47  ;;  %v3584_v17 = vadd.f32 %v9852_v1, %v3583_v20  ;;  %v7635_v3 = vpop.f32.mrf.mxu0  ;;  %v7790_v8 = vpop.f32.mrf.mxu1  ;;  %7941 = vmatmul.mubr.msk.f32.gmra.mxu0 %vm1882_vm1, %v6789_v53  ;;  %8096 = vmatmul.mubr.msk.f32.gmra.mxu1 %vm1882_vm1, %v6986_v39  ;;  %v6791_v20 = vld [vmem:[%s9071_s10 + $0x808] sm:$0xff]  ;;  %v6792_v47 = vld [vmem:[%s9071_s10 + $0x810] sm:$0xff]  ;;  %v6989_v53 = vld [vmem:[%s9071_s10 + $0xb20] sm:$0xff] }
 0x221   : > { %10714 = vst [vmem:[#allocation17_spill] sm:$0xff] %v9959_v9  ;;  %v9965_v50 = vmax.f32 %v2795_v40, %v3841_v45  ;;  %v2794_v14 = vmax.f32 %v2538_v31, 0.0  ;;  %v2553_v30 = vadd.f32 %v9852_v1, %v7635_v3  ;;  %v3599_v16 = vadd.f32 %v9852_v1, %v7790_v8  ;;  %7943 = vmatprep.mubr.msk.f32.mxu0 %vm1882_vm1, %v6790_v21 }
 0x222   : > { %8098 = vmatprep.mubr.msk.f32.mxu1 %vm1882_vm1, %v6987_v32  ;;  %v3840_v29 = vmax.f32 %v3584_v17, 0.0  ;;  %v2547_v18 = vpop.f32.mrf.mxu0  ;;  %v3593_v9 = vpop.f32.mrf.mxu1 }
 0x223   : > { %10715 = vst [vmem:[#allocation18_spill] sm:$0xff] %v9965_v50  ;;  %v2797_v39 = vmax.f32 %v2553_v30, 0.0  ;;  %v3843_v40 = vmax.f32 %v3599_v16, 0.0  ;;  %v2548_v45 = vadd.f32 %v9852_v1, %v2547_v18  ;;  %v3594_v31 = vadd.f32 %v9852_v1, %v3593_v9  ;;  %v6793_v9 = vld [vmem:[%s9071_s10 + $0x818] sm:$0xff]  ;;  %v6794_v50 = vld [vmem:[%s9071_s10 + $0x820] sm:$0xff] }
 0x224   : > { %v9977_v3 = vmax.f32 %v2794_v14, %v3840_v29  ;;  %v7638_v21 = vpop.f32.mrf.mxu0  ;;  %v7793_v32 = vpop.f32.mrf.mxu1  ;;  %7944 = vmatmul.mubr.msk.f32.gmra.mxu0 %vm1882_vm1, %v6791_v20  ;;  %8099 = vmatmul.mubr.msk.f32.gmra.mxu1 %vm1882_vm1, %v6988_v33  ;;  %v6990_v14 = vld [vmem:[%s9071_s10 + $0xb28] sm:$0xff]  ;;  %v6991_v20 = vld [vmem:[%s9071_s10 + $0xb30] sm:$0xff] }
 0x225   : > { %v9981_v17 = vmax.f32 %v2797_v39, %v3843_v40  ;;  %v2796_v8 = vmax.f32 %v2548_v45, 0.0  ;;  %v3842_v30 = vmax.f32 %v3594_v31, 0.0  ;;  %v2563_v16 = vadd.f32 %v9852_v1, %v7638_v21  ;;  %7946 = vmatprep.mubr.msk.f32.mxu0 %vm1882_vm1, %v6792_v47  ;;  %8101 = vmatprep.mubr.msk.f32.mxu1 %vm1882_vm1, %v6989_v53 }
 0x226   : > { %10716 = vst [vmem:[#allocation19_spill] sm:$0xff] %v9977_v3  ;;  %v3609_v29 = vadd.f32 %v9852_v1, %v7793_v32  ;;  %v2557_v18 = vpop.f32.mrf.mxu0  ;;  %v3603_v3 = vpop.f32.mrf.mxu1 }
 0x227   : > { %10717 = vst [vmem:[#allocation20_spill] sm:$0xff] %v9981_v17  ;;  %v9991_v33 = vmax.f32 %v2796_v8, %v3842_v30  ;;  %v2799_v39 = vmax.f32 %v2563_v16, 0.0  ;;  %v2558_v40 = vadd.f32 %v9852_v1, %v2557_v18  ;;  %v3604_v45 = vadd.f32 %v9852_v1, %v3603_v3  ;;  %v6795_v3 = vld [vmem:[%s9071_s10 + $0x828] sm:$0xff]  ;;  %v6992_v16 = vld [vmem:[%s9071_s10 + $0xb38] sm:$0xff]  ;;  %v6796_v17 = vld [vmem:[%s9071_s10 + $0x830] sm:$0xff] }
 0x228   : > { %v3845_v47 = vmax.f32 %v3609_v29, 0.0  ;;  %v7641_v53 = vpop.f32.mrf.mxu0  ;;  %v7796_v31 = vpop.f32.mrf.mxu1  ;;  %7947 = vmatmul.mubr.msk.f32.gmra.mxu0 %vm1882_vm1, %v6793_v9  ;;  %8102 = vmatmul.mubr.msk.f32.gmra.mxu1 %vm1882_vm1, %v6990_v14  ;;  %v6993_v9 = vld [vmem:[%s9071_s10 + $0xb40] sm:$0xff] }
 0x229   : > { %10718 = vst [vmem:[#allocation21_spill] sm:$0xff] %v9991_v33  ;;  %v2798_v21 = vmax.f32 %v2558_v40, 0.0  ;;  %v3844_v32 = vmax.f32 %v3604_v45, 0.0  ;;  %v2573_v8 = vadd.f32 %v9852_v1, %v7641_v53  ;;  %v3619_v30 = vadd.f32 %v9852_v1, %v7796_v31  ;;  %7949 = vmatprep.mubr.msk.f32.mxu0 %vm1882_vm1, %v6794_v50  ;;  %8104 = vmatprep.mubr.msk.f32.mxu1 %vm1882_vm1, %v6991_v20 }
 0x22a   : > { %v10003_v29 = vmax.f32 %v2799_v39, %v3845_v47  ;;  %v2567_v18 = vpop.f32.mrf.mxu0  ;;  %v3613_v33 = vpop.f32.mrf.mxu1 }
 0x22b   : > { %v10007_v14 = vmax.f32 %v2798_v21, %v3844_v32  ;;  %v2801_v40 = vmax.f32 %v2573_v8, 0.0  ;;  %v3847_v45 = vmax.f32 %v3619_v30, 0.0  ;;  %v2568_v53 = vadd.f32 %v9852_v1, %v2567_v18  ;;  %v6994_v8 = vld [vmem:[%s9071_s10 + $0xb48] sm:$0xff] }
 0x22c   : > { %10719 = vst [vmem:[#allocation22_spill] sm:$0xff] %v10003_v29  ;;  %v3614_v50 = vadd.f32 %v9852_v1, %v3613_v33  ;;  %v7644_v20 = vpop.f32.mrf.mxu0  ;;  %v7799_v31 = vpop.f32.mrf.mxu1  ;;  %7950 = vmatmul.mubr.msk.f32.gmra.mxu0 %vm1882_vm1, %v6795_v3  ;;  %8105 = vmatmul.mubr.msk.f32.gmra.mxu1 %vm1882_vm1, %v6992_v16  ;;  %v6797_v33 = vld [vmem:[%s9071_s10 + $0x838] sm:$0xff]  ;;  %v6798_v29 = vld [vmem:[%s9071_s10 + $0x840] sm:$0xff]  ;;  %v6995_v3 = vld [vmem:[%s9071_s10 + $0xb50] sm:$0xff] }
 0x22d   : > { %10720 = vst [vmem:[#allocation23_spill] sm:$0xff] %v10007_v14  ;;  %v10013_v39 = vmax.f32 %v2801_v40, %v3847_v45  ;;  %v2800_v47 = vmax.f32 %v2568_v53, 0.0  ;;  %v2583_v21 = vadd.f32 %v9852_v1, %v7644_v20  ;;  %v3629_v32 = vadd.f32 %v9852_v1, %v7799_v31  ;;  %7952 = vmatprep.mubr.msk.f32.mxu0 %vm1882_vm1, %v6796_v17 }
 0x22e   : > { %8107 = vmatprep.mubr.msk.f32.mxu1 %vm1882_vm1, %v6993_v9  ;;  %v3846_v30 = vmax.f32 %v3614_v50, 0.0  ;;  %v2577_v18 = vpop.f32.mrf.mxu0  ;;  %v3623_v14 = vpop.f32.mrf.mxu1 }
 0x22f   : > { %10721 = vst [vmem:[#allocation24_spill] sm:$0xff] %v10013_v39  ;;  %v2803_v16 = vmax.f32 %v2583_v21, 0.0  ;;  %v3849_v40 = vmax.f32 %v3629_v32, 0.0  ;;  %v2578_v45 = vadd.f32 %v9852_v1, %v2577_v18  ;;  %v3624_v53 = vadd.f32 %v9852_v1, %v3623_v14  ;;  %v6799_v14 = vld [vmem:[%s9071_s10 + $0x848] sm:$0xff]  ;;  %v6800_v39 = vld [vmem:[%s9071_s10 + $0x850] sm:$0xff] }
 0x230   : > { %v10025_v20 = vmax.f32 %v2800_v47, %v3846_v30  ;;  %v7647_v17 = vpop.f32.mrf.mxu0  ;;  %v7802_v9 = vpop.f32.mrf.mxu1  ;;  %7953 = vmatmul.mubr.msk.f32.gmra.mxu0 %vm1882_vm1, %v6797_v33  ;;  %8108 = vmatmul.mubr.msk.f32.gmra.mxu1 %vm1882_vm1, %v6994_v8  ;;  %v6996_v47 = vld [vmem:[%s9071_s10 + $0xb58] sm:$0xff]  ;;  %v6997_v33 = vld [vmem:[%s9071_s10 + $0xb60] sm:$0xff] }
 0x231   : > { %v10029_v50 = vmax.f32 %v2803_v16, %v3849_v40  ;;  %v2802_v31 = vmax.f32 %v2578_v45, 0.0  ;;  %v3848_v21 = vmax.f32 %v3624_v53, 0.0  ;;  %v2593_v32 = vadd.f32 %v9852_v1, %v7647_v17  ;;  %7955 = vmatprep.mubr.msk.f32.mxu0 %vm1882_vm1, %v6798_v29  ;;  %8110 = vmatprep.mubr.msk.f32.mxu1 %vm1882_vm1, %v6995_v3 }
 0x232   : > { %10722 = vst [vmem:[#allocation25_spill] sm:$0xff] %v10025_v20  ;;  %v3639_v30 = vadd.f32 %v9852_v1, %v7802_v9  ;;  %v2587_v18 = vpop.f32.mrf.mxu0  ;;  %v3633_v20 = vpop.f32.mrf.mxu1 }
 0x233   : > { %10723 = vst [vmem:[#allocation26_spill] sm:$0xff] %v10029_v50  ;;  %v10039_v8 = vmax.f32 %v2802_v31, %v3848_v21  ;;  %v2805_v16 = vmax.f32 %v2593_v32, 0.0  ;;  %v2588_v40 = vadd.f32 %v9852_v1, %v2587_v18  ;;  %v3634_v45 = vadd.f32 %v9852_v1, %v3633_v20  ;;  %v6801_v20 = vld [vmem:[%s9071_s10 + $0x858] sm:$0xff]  ;;  %v6998_v32 = vld [vmem:[%s9071_s10 + $0xb68] sm:$0xff]  ;;  %v6802_v50 = vld [vmem:[%s9071_s10 + $0x860] sm:$0xff] }
 0x234   : > { %v3851_v29 = vmax.f32 %v3639_v30, 0.0  ;;  %v7650_v3 = vpop.f32.mrf.mxu0  ;;  %v7805_v53 = vpop.f32.mrf.mxu1  ;;  %7956 = vmatmul.mubr.msk.f32.gmra.mxu0 %vm1882_vm1, %v6799_v14  ;;  %8111 = vmatmul.mubr.msk.f32.gmra.mxu1 %vm1882_vm1, %v6996_v47  ;;  %v6999_v14 = vld [vmem:[%s9071_s10 + $0xb70] sm:$0xff] }
 0x235   : > { %10724 = vst [vmem:[#allocation27_spill] sm:$0xff] %v10039_v8  ;;  %v2804_v17 = vmax.f32 %v2588_v40, 0.0  ;;  %v3850_v9 = vmax.f32 %v3634_v45, 0.0  ;;  %v2603_v31 = vadd.f32 %v9852_v1, %v7650_v3  ;;  %v3649_v21 = vadd.f32 %v9852_v1, %v7805_v53  ;;  %7958 = vmatprep.mubr.msk.f32.mxu0 %vm1882_vm1, %v6800_v39  ;;  %8113 = vmatprep.mubr.msk.f32.mxu1 %vm1882_vm1, %v6997_v33 }
 0x236   : > { %v10051_v30 = vmax.f32 %v2805_v16, %v3851_v29  ;;  %v2597_v18 = vpop.f32.mrf.mxu0  ;;  %v3643_v8 = vpop.f32.mrf.mxu1 }
 0x237   : > { %v10055_v47 = vmax.f32 %v2804_v17, %v3850_v9  ;;  %v2807_v40 = vmax.f32 %v2603_v31, 0.0  ;;  %v3853_v45 = vmax.f32 %v3649_v21, 0.0  ;;  %v2598_v3 = vadd.f32 %v9852_v1, %v2597_v18  ;;  %v7000_v31 = vld [vmem:[%s9071_s10 + $0xb78] sm:$0xff] }
 0x238   : > { %10725 = vst [vmem:[#allocation28_spill] sm:$0xff] %v10051_v30  ;;  %v3644_v39 = vadd.f32 %v9852_v1, %v3643_v8  ;;  %v7653_v33 = vpop.f32.mrf.mxu0  ;;  %v7808_v53 = vpop.f32.mrf.mxu1  ;;  %7959 = vmatmul.mubr.msk.f32.gmra.mxu0 %vm1882_vm1, %v6801_v20  ;;  %8114 = vmatmul.mubr.msk.f32.gmra.mxu1 %vm1882_vm1, %v6998_v32  ;;  %v6803_v8 = vld [vmem:[%s9071_s10 + $0x868] sm:$0xff]  ;;  %v6804_v30 = vld [vmem:[%s9071_s10 + $0x870] sm:$0xff]  ;;  %v7001_v20 = vld [vmem:[%s9071_s10 + $0xb80] sm:$0xff] }
 0x239   : > { %10726 = vst [vmem:[#allocation29_spill] sm:$0xff] %v10055_v47  ;;  %v10061_v16 = vmax.f32 %v2807_v40, %v3853_v45  ;;  %v2806_v29 = vmax.f32 %v2598_v3, 0.0  ;;  %v2613_v17 = vadd.f32 %v9852_v1, %v7653_v33  ;;  %v3659_v9 = vadd.f32 %v9852_v1, %v7808_v53  ;;  %7961 = vmatprep.mubr.msk.f32.mxu0 %vm1882_vm1, %v6802_v50 }
 0x23a   : > { %8116 = vmatprep.mubr.msk.f32.mxu1 %vm1882_vm1, %v6999_v14  ;;  %v3852_v21 = vmax.f32 %v3644_v39, 0.0  ;;  %v2607_v18 = vpop.f32.mrf.mxu0  ;;  %v3653_v47 = vpop.f32.mrf.mxu1 }
 0x23b   : > { %10727 = vst [vmem:[#allocation30_spill] sm:$0xff] %v10061_v16  ;;  %v2809_v32 = vmax.f32 %v2613_v17, 0.0  ;;  %v3855_v40 = vmax.f32 %v3659_v9, 0.0  ;;  %v2608_v45 = vadd.f32 %v9852_v1, %v2607_v18  ;;  %v3654_v3 = vadd.f32 %v9852_v1, %v3653_v47  ;;  %v6805_v47 = vld [vmem:[%s9071_s10 + $0x878] sm:$0xff]  ;;  %v6806_v16 = vld [vmem:[%s9071_s10 + $0x880] sm:$0xff] }
 0x23c   : > { %v10073_v33 = vmax.f32 %v2806_v29, %v3852_v21  ;;  %v7656_v50 = vpop.f32.mrf.mxu0  ;;  %v7811_v14 = vpop.f32.mrf.mxu1  ;;  %7962 = vmatmul.mubr.msk.f32.gmra.mxu0 %vm1882_vm1, %v6803_v8  ;;  %8117 = vmatmul.mubr.msk.f32.gmra.mxu1 %vm1882_vm1, %v7000_v31  ;;  %v7002_v29 = vld [vmem:[%s9071_s10 + $0xb88] sm:$0xff]  ;;  %v7003_v8 = vld [vmem:[%s9071_s10 + $0xb90] sm:$0xff] }
 0x23d   : > { %v10077_v39 = vmax.f32 %v2809_v32, %v3855_v40  ;;  %v2808_v53 = vmax.f32 %v2608_v45, 0.0  ;;  %v3854_v17 = vmax.f32 %v3654_v3, 0.0  ;;  %v2623_v9 = vadd.f32 %v9852_v1, %v7656_v50  ;;  %7964 = vmatprep.mubr.msk.f32.mxu0 %vm1882_vm1, %v6804_v30  ;;  %8119 = vmatprep.mubr.msk.f32.mxu1 %vm1882_vm1, %v7001_v20 }
 0x23e   : > { %10728 = vst [vmem:[#allocation31_spill] sm:$0xff] %v10073_v33  ;;  %v3669_v21 = vadd.f32 %v9852_v1, %v7811_v14  ;;  %v2617_v18 = vpop.f32.mrf.mxu0  ;;  %v3663_v33 = vpop.f32.mrf.mxu1 }
 0x23f   : > { %10729 = vst [vmem:[#allocation32_spill] sm:$0xff] %v10077_v39  ;;  %v10087_v31 = vmax.f32 %v2808_v53, %v3854_v17  ;;  %v2811_v32 = vmax.f32 %v2623_v9, 0.0  ;;  %v2618_v40 = vadd.f32 %v9852_v1, %v2617_v18  ;;  %v3664_v45 = vadd.f32 %v9852_v1, %v3663_v33  ;;  %v6807_v33 = vld [vmem:[%s9071_s10 + $0x888] sm:$0xff]  ;;  %v7004_v9 = vld [vmem:[%s9071_s10 + $0xb98] sm:$0xff]  ;;  %v6808_v39 = vld [vmem:[%s9071_s10 + $0x890] sm:$0xff] }
 0x240   : > { %v3857_v30 = vmax.f32 %v3669_v21, 0.0  ;;  %v7659_v20 = vpop.f32.mrf.mxu0  ;;  %v7814_v3 = vpop.f32.mrf.mxu1  ;;  %7965 = vmatmul.mubr.msk.f32.gmra.mxu0 %vm1882_vm1, %v6805_v47  ;;  %8120 = vmatmul.mubr.msk.f32.gmra.mxu1 %vm1882_vm1, %v7002_v29  ;;  %v7005_v47 = vld [vmem:[%s9071_s10 + $0xba0] sm:$0xff] }
 0x241   : > { %10730 = vst [vmem:[#allocation33_spill] sm:$0xff] %v10087_v31  ;;  %v2810_v50 = vmax.f32 %v2618_v40, 0.0  ;;  %v3856_v14 = vmax.f32 %v3664_v45, 0.0  ;;  %v2633_v53 = vadd.f32 %v9852_v1, %v7659_v20  ;;  %v3679_v17 = vadd.f32 %v9852_v1, %v7814_v3  ;;  %7967 = vmatprep.mubr.msk.f32.mxu0 %vm1882_vm1, %v6806_v16  ;;  %8122 = vmatprep.mubr.msk.f32.mxu1 %vm1882_vm1, %v7003_v8 }
 0x242   : > { %v10099_v21 = vmax.f32 %v2811_v32, %v3857_v30  ;;  %v2627_v18 = vpop.f32.mrf.mxu0  ;;  %v3673_v31 = vpop.f32.mrf.mxu1 }
 0x243   : > { %v10103_v29 = vmax.f32 %v2810_v50, %v3856_v14  ;;  %v2813_v40 = vmax.f32 %v2633_v53, 0.0  ;;  %v3859_v45 = vmax.f32 %v3679_v17, 0.0  ;;  %v2628_v20 = vadd.f32 %v9852_v1, %v2627_v18  ;;  %v7006_v53 = vld [vmem:[%s9071_s10 + $0xba8] sm:$0xff] }
 0x244   : > { %10731 = vst [vmem:[#allocation34_spill] sm:$0xff] %v10099_v21  ;;  %v3674_v16 = vadd.f32 %v9852_v1, %v3673_v31  ;;  %v7662_v8 = vpop.f32.mrf.mxu0  ;;  %v7817_v3 = vpop.f32.mrf.mxu1  ;;  %7968 = vmatmul.mubr.msk.f32.gmra.mxu0 %vm1882_vm1, %v6807_v33  ;;  %8123 = vmatmul.mubr.msk.f32.gmra.mxu1 %vm1882_vm1, %v7004_v9  ;;  %v6809_v31 = vld [vmem:[%s9071_s10 + $0x898] sm:$0xff]  ;;  %v6810_v21 = vld [vmem:[%s9071_s10 + $0x8a0] sm:$0xff]  ;;  %v7007_v33 = vld [vmem:[%s9071_s10 + $0xbb0] sm:$0xff] }
 0x245   : > { %10732 = vst [vmem:[#allocation35_spill] sm:$0xff] %v10103_v29  ;;  %v10109_v32 = vmax.f32 %v2813_v40, %v3859_v45  ;;  %v2812_v30 = vmax.f32 %v2628_v20, 0.0  ;;  %v2643_v50 = vadd.f32 %v9852_v1, %v7662_v8  ;;  %v3689_v14 = vadd.f32 %v9852_v1, %v7817_v3  ;;  %7970 = vmatprep.mubr.msk.f32.mxu0 %vm1882_vm1, %v6808_v39 }
 0x246   : > { %8125 = vmatprep.mubr.msk.f32.mxu1 %vm1882_vm1, %v7005_v47  ;;  %v3858_v17 = vmax.f32 %v3674_v16, 0.0  ;;  %v2637_v18 = vpop.f32.mrf.mxu0  ;;  %v3683_v29 = vpop.f32.mrf.mxu1 }
 0x247   : > { %10733 = vst [vmem:[#allocation36_spill] sm:$0xff] %v10109_v32  ;;  %v2815_v9 = vmax.f32 %v2643_v50, 0.0  ;;  %v3861_v40 = vmax.f32 %v3689_v14, 0.0  ;;  %v2638_v45 = vadd.f32 %v9852_v1, %v2637_v18  ;;  %v3684_v20 = vadd.f32 %v9852_v1, %v3683_v29  ;;  %v6811_v29 = vld [vmem:[%s9071_s10 + $0x8a8] sm:$0xff]  ;;  %v6812_v32 = vld [vmem:[%s9071_s10 + $0x8b0] sm:$0xff] }
 0x248   : > { %v10121_v8 = vmax.f32 %v2812_v30, %v3858_v17  ;;  %v7665_v39 = vpop.f32.mrf.mxu0  ;;  %v7820_v47 = vpop.f32.mrf.mxu1  ;;  %7971 = vmatmul.mubr.msk.f32.gmra.mxu0 %vm1882_vm1, %v6809_v31  ;;  %8126 = vmatmul.mubr.msk.f32.gmra.mxu1 %vm1882_vm1, %v7006_v53  ;;  %v7008_v30 = vld [vmem:[%s9071_s10 + $0xbb8] sm:$0xff]  ;;  %v7009_v31 = vld [vmem:[%s9071_s10 + $0xbc0] sm:$0xff] }
 0x249   : > { %v10125_v16 = vmax.f32 %v2815_v9, %v3861_v40  ;;  %v2814_v3 = vmax.f32 %v2638_v45, 0.0  ;;  %v3860_v50 = vmax.f32 %v3684_v20, 0.0  ;;  %v2653_v14 = vadd.f32 %v9852_v1, %v7665_v39  ;;  %7973 = vmatprep.mubr.msk.f32.mxu0 %vm1882_vm1, %v6810_v21  ;;  %8128 = vmatprep.mubr.msk.f32.mxu1 %vm1882_vm1, %v7007_v33 }
 0x24a   : > { %10734 = vst [vmem:[#allocation37_spill] sm:$0xff] %v10121_v8  ;;  %v3699_v17 = vadd.f32 %v9852_v1, %v7820_v47  ;;  %v2647_v18 = vpop.f32.mrf.mxu0  ;;  %v3693_v8 = vpop.f32.mrf.mxu1 }
 0x24b   : > { %10735 = vst [vmem:[#allocation38_spill] sm:$0xff] %v10125_v16  ;;  %v10135_v53 = vmax.f32 %v2814_v3, %v3860_v50  ;;  %v2817_v9 = vmax.f32 %v2653_v14, 0.0  ;;  %v2648_v40 = vadd.f32 %v9852_v1, %v2647_v18  ;;  %v3694_v45 = vadd.f32 %v9852_v1, %v3693_v8  ;;  %v6813_v8 = vld [vmem:[%s9071_s10 + $0x8b8] sm:$0xff]  ;;  %v7010_v14 = vld [vmem:[%s9071_s10 + $0xbc8] sm:$0xff]  ;;  %v6814_v16 = vld [vmem:[%s9071_s10 + $0x8c0] sm:$0xff] }
 0x24c   : > { %v3863_v21 = vmax.f32 %v3699_v17, 0.0  ;;  %v7668_v33 = vpop.f32.mrf.mxu0  ;;  %v7823_v20 = vpop.f32.mrf.mxu1  ;;  %7974 = vmatmul.mubr.msk.f32.gmra.mxu0 %vm1882_vm1, %v6811_v29  ;;  %8129 = vmatmul.mubr.msk.f32.gmra.mxu1 %vm1882_vm1, %v7008_v30  ;;  %v7011_v29 = vld [vmem:[%s9071_s10 + $0xbd0] sm:$0xff] }
 0x24d   : > { %10736 = vst [vmem:[#allocation39_spill] sm:$0xff] %v10135_v53  ;;  %v2816_v39 = vmax.f32 %v2648_v40, 0.0  ;;  %v3862_v47 = vmax.f32 %v3694_v45, 0.0  ;;  %v2663_v3 = vadd.f32 %v9852_v1, %v7668_v33  ;;  %v3709_v50 = vadd.f32 %v9852_v1, %v7823_v20  ;;  %7976 = vmatprep.mubr.msk.f32.mxu0 %vm1882_vm1, %v6812_v32  ;;  %8131 = vmatprep.mubr.msk.f32.mxu1 %vm1882_vm1, %v7009_v31 }
 0x24e   : > { %v10147_v17 = vmax.f32 %v2817_v9, %v3863_v21  ;;  %v2657_v18 = vpop.f32.mrf.mxu0  ;;  %v3703_v53 = vpop.f32.mrf.mxu1 }
 0x24f   : > { %v10151_v30 = vmax.f32 %v2816_v39, %v3862_v47  ;;  %v2819_v40 = vmax.f32 %v2663_v3, 0.0  ;;  %v3865_v45 = vmax.f32 %v3709_v50, 0.0  ;;  %v2658_v33 = vadd.f32 %v9852_v1, %v2657_v18  ;;  %v7012_v3 = vld [vmem:[%s9071_s10 + $0xbd8] sm:$0xff] }
 0x250   : > { %10737 = vst [vmem:[#allocation40_spill] sm:$0xff] %v10147_v17  ;;  %v3704_v32 = vadd.f32 %v9852_v1, %v3703_v53  ;;  %v7671_v31 = vpop.f32.mrf.mxu0  ;;  %v7826_v20 = vpop.f32.mrf.mxu1  ;;  %7977 = vmatmul.mubr.msk.f32.gmra.mxu0 %vm1882_vm1, %v6813_v8  ;;  %8132 = vmatmul.mubr.msk.f32.gmra.mxu1 %vm1882_vm1, %v7010_v14  ;;  %v6815_v53 = vld [vmem:[%s9071_s10 + $0x8c8] sm:$0xff]  ;;  %v6816_v17 = vld [vmem:[%s9071_s10 + $0x8d0] sm:$0xff]  ;;  %v7013_v8 = vld [vmem:[%s9071_s10 + $0xbe0] sm:$0xff] }
 0x251   : > { %10738 = vst [vmem:[#allocation41_spill] sm:$0xff] %v10151_v30  ;;  %v10157_v9 = vmax.f32 %v2819_v40, %v3865_v45  ;;  %v2818_v21 = vmax.f32 %v2658_v33, 0.0  ;;  %v2673_v39 = vadd.f32 %v9852_v1, %v7671_v31  ;;  %v3719_v47 = vadd.f32 %v9852_v1, %v7826_v20  ;;  %7979 = vmatprep.mubr.msk.f32.mxu0 %vm1882_vm1, %v6814_v16 }
 0x252   : > { %8134 = vmatprep.mubr.msk.f32.mxu1 %vm1882_vm1, %v7011_v29  ;;  %v3864_v50 = vmax.f32 %v3704_v32, 0.0  ;;  %v2667_v18 = vpop.f32.mrf.mxu0  ;;  %v3713_v30 = vpop.f32.mrf.mxu1 }
 0x253   : > { %10739 = vst [vmem:[#allocation42_spill] sm:$0xff] %v10157_v9  ;;  %v2821_v14 = vmax.f32 %v2673_v39, 0.0  ;;  %v3867_v40 = vmax.f32 %v3719_v47, 0.0  ;;  %v2668_v45 = vadd.f32 %v9852_v1, %v2667_v18  ;;  %v3714_v33 = vadd.f32 %v9852_v1, %v3713_v30  ;;  %v6817_v30 = vld [vmem:[%s9071_s10 + $0x8d8] sm:$0xff]  ;;  %v6818_v9 = vld [vmem:[%s9071_s10 + $0x8e0] sm:$0xff] }
 0x254   : > { %v10169_v31 = vmax.f32 %v2818_v21, %v3864_v50  ;;  %v7674_v16 = vpop.f32.mrf.mxu0  ;;  %v7829_v29 = vpop.f32.mrf.mxu1  ;;  %7980 = vmatmul.mubr.msk.f32.gmra.mxu0 %vm1882_vm1, %v6815_v53  ;;  %8135 = vmatmul.mubr.msk.f32.gmra.mxu1 %vm1882_vm1, %v7012_v3  ;;  %v7014_v21 = vld [vmem:[%s9071_s10 + $0xbe8] sm:$0xff]  ;;  %v7015_v53 = vld [vmem:[%s9071_s10 + $0xbf0] sm:$0xff] }
 0x255   : > { %v10173_v32 = vmax.f32 %v2821_v14, %v3867_v40  ;;  %v2820_v20 = vmax.f32 %v2668_v45, 0.0  ;;  %v3866_v39 = vmax.f32 %v3714_v33, 0.0  ;;  %v2683_v47 = vadd.f32 %v9852_v1, %v7674_v16  ;;  %7982 = vmatprep.mubr.msk.f32.mxu0 %vm1882_vm1, %v6816_v17  ;;  %8137 = vmatprep.mubr.msk.f32.mxu1 %vm1882_vm1, %v7013_v8 }
 0x256   : > { %10740 = vst [vmem:[#allocation43_spill] sm:$0xff] %v10169_v31  ;;  %v3729_v50 = vadd.f32 %v9852_v1, %v7829_v29  ;;  %v2677_v18 = vpop.f32.mrf.mxu0  ;;  %v3723_v31 = vpop.f32.mrf.mxu1 }
 0x257   : > { %10741 = vst [vmem:[#allocation44_spill] sm:$0xff] %v10173_v32  ;;  %v10183_v3 = vmax.f32 %v2820_v20, %v3866_v39  ;;  %v2823_v14 = vmax.f32 %v2683_v47, 0.0  ;;  %v2678_v40 = vadd.f32 %v9852_v1, %v2677_v18  ;;  %v3724_v45 = vadd.f32 %v9852_v1, %v3723_v31  ;;  %v6819_v31 = vld [vmem:[%s9071_s10 + $0x8e8] sm:$0xff]  ;;  %v7016_v47 = vld [vmem:[%s9071_s10 + $0xbf8] sm:$0xff]  ;;  %v6820_v32 = vld [vmem:[%s9071_s10 + $0x8f0] sm:$0xff] }
 0x258   : > { %v3869_v17 = vmax.f32 %v3729_v50, 0.0  ;;  %v7677_v8 = vpop.f32.mrf.mxu0  ;;  %v7832_v33 = vpop.f32.mrf.mxu1  ;;  %7983 = vmatmul.mubr.msk.f32.gmra.mxu0 %vm1882_vm1, %v6817_v30  ;;  %8138 = vmatmul.mubr.msk.f32.gmra.mxu1 %vm1882_vm1, %v7014_v21  ;;  %v7017_v30 = vld [vmem:[%s9071_s10 + $0xc00] sm:$0xff] }
 0x259   : > { %10742 = vst [vmem:[#allocation45_spill] sm:$0xff] %v10183_v3  ;;  %v2822_v16 = vmax.f32 %v2678_v40, 0.0  ;;  %v3868_v29 = vmax.f32 %v3724_v45, 0.0  ;;  %v2693_v20 = vadd.f32 %v9852_v1, %v7677_v8  ;;  %v3739_v39 = vadd.f32 %v9852_v1, %v7832_v33  ;;  %7985 = vmatprep.mubr.msk.f32.mxu0 %vm1882_vm1, %v6818_v9  ;;  %8140 = vmatprep.mubr.msk.f32.mxu1 %vm1882_vm1, %v7015_v53 }
 0x25a   : > { %v10195_v50 = vmax.f32 %v2823_v14, %v3869_v17  ;;  %v2687_v18 = vpop.f32.mrf.mxu0  ;;  %v3733_v3 = vpop.f32.mrf.mxu1 }
 0x25b   : > { %v10199_v21 = vmax.f32 %v2822_v16, %v3868_v29  ;;  %v2825_v40 = vmax.f32 %v2693_v20, 0.0  ;;  %v3871_v45 = vmax.f32 %v3739_v39, 0.0  ;;  %v2688_v8 = vadd.f32 %v9852_v1, %v2687_v18  ;;  %v7018_v20 = vld [vmem:[%s9071_s10 + $0xc08] sm:$0xff] }
 0x25c   : > { %10743 = vst [vmem:[#allocation46_spill] sm:$0xff] %v10195_v50  ;;  %v3734_v9 = vadd.f32 %v9852_v1, %v3733_v3  ;;  %v7680_v53 = vpop.f32.mrf.mxu0  ;;  %v7835_v33 = vpop.f32.mrf.mxu1  ;;  %7986 = vmatmul.mubr.msk.f32.gmra.mxu0 %vm1882_vm1, %v6819_v31  ;;  %8141 = vmatmul.mubr.msk.f32.gmra.mxu1 %vm1882_vm1, %v7016_v47  ;;  %v6821_v3 = vld [vmem:[%s9071_s10 + $0x8f8] sm:$0xff]  ;;  %v6822_v50 = vld [vmem:[%s9071_s10 + $0x900] sm:$0xff]  ;;  %v7019_v31 = vld [vmem:[%s9071_s10 + $0xc10] sm:$0xff] }
 0x25d   : > { %10744 = vst [vmem:[#allocation47_spill] sm:$0xff] %v10199_v21  ;;  %v10205_v14 = vmax.f32 %v2825_v40, %v3871_v45  ;;  %v2824_v17 = vmax.f32 %v2688_v8, 0.0  ;;  %v2703_v16 = vadd.f32 %v9852_v1, %v7680_v53  ;;  %v3749_v29 = vadd.f32 %v9852_v1, %v7835_v33  ;;  %7988 = vmatprep.mubr.msk.f32.mxu0 %vm1882_vm1, %v6820_v32 }
 0x25e   : > { %8143 = vmatprep.mubr.msk.f32.mxu1 %vm1882_vm1, %v7017_v30  ;;  %v3870_v39 = vmax.f32 %v3734_v9, 0.0  ;;  %v2697_v18 = vpop.f32.mrf.mxu0  ;;  %v3743_v21 = vpop.f32.mrf.mxu1 }
 0x25f   : > { %10745 = vst [vmem:[#allocation48_spill] sm:$0xff] %v10205_v14  ;;  %v2827_v47 = vmax.f32 %v2703_v16, 0.0  ;;  %v3873_v40 = vmax.f32 %v3749_v29, 0.0  ;;  %v2698_v45 = vadd.f32 %v9852_v1, %v2697_v18  ;;  %v3744_v8 = vadd.f32 %v9852_v1, %v3743_v21  ;;  %v6823_v21 = vld [vmem:[%s9071_s10 + $0x908] sm:$0xff]  ;;  %v7021_v14 = vld [vmem:[%s9071_s10 + $0xc20] sm:$0xff] }
 0x260   : > { %v10217_v53 = vmax.f32 %v2824_v17, %v3870_v39  ;;  %v7683_v32 = vpop.f32.mrf.mxu0  ;;  %v7838_v30 = vpop.f32.mrf.mxu1  ;;  %7989 = vmatmul.mubr.msk.f32.gmra.mxu0 %vm1882_vm1, %v6821_v3  ;;  %8144 = vmatmul.mubr.msk.f32.gmra.mxu1 %vm1882_vm1, %v7018_v20  ;;  %v7020_v17 = vld [vmem:[%s9071_s10 + $0xc18] sm:$0xff]  ;;  %v6824_v3 = vld [vmem:[%s9071_s10 + $0x910] sm:$0xff] }
 0x261   : > { %v10221_v9 = vmax.f32 %v2827_v47, %v3873_v40  ;;  %v2826_v33 = vmax.f32 %v2698_v45, 0.0  ;;  %v3872_v16 = vmax.f32 %v3744_v8, 0.0  ;;  %v2713_v29 = vadd.f32 %v9852_v1, %v7683_v32  ;;  %7991 = vmatprep.mubr.msk.f32.mxu0 %vm1882_vm1, %v6822_v50  ;;  %8146 = vmatprep.mubr.msk.f32.mxu1 %vm1882_vm1, %v7019_v31  ;;  %v10236_v40 = vld [vmem:[%s10698_s2] ss:$0 sm:$0xff] }
 0x262   : > { %10746 = vst [vmem:[#allocation49_spill] sm:$0xff] %v10217_v53  ;;  %v3759_v39 = vadd.f32 %v9852_v1, %v7838_v30  ;;  %v2707_v18 = vpop.f32.mrf.mxu0  ;;  %v3753_v53 = vpop.f32.mrf.mxu1 }
 0x263   : > { %10747 = vst [vmem:[#allocation50_spill] sm:$0xff] %v10221_v9  ;;  %v10231_v20 = vmax.f32 %v2826_v33, %v3872_v16  ;;  %v2829_v47 = vmax.f32 %v2713_v29, 0.0  ;;  %v2708_v50 = vadd.f32 %v10236_v40, %v2707_v18  ;;  %v3754_v31 = vadd.f32 %v10236_v40, %v3753_v53  ;;  %v6825_v53 = vld [vmem:[%s9071_s10 + $0x918] sm:$0xff]  ;;  %v7022_v29 = vld [vmem:[%s9071_s10 + $0xc28] sm:$0xff]  ;;  %v6826_v18 = vld [vmem:[%s9071_s10 + $0x920] sm:$0xff] }
 0x264   : > { %v3875_v45 = vmax.f32 %v3759_v39, 0.0  ;;  %v7686_v1 = vpop.f32.mrf.mxu0  ;;  %v7841_v8 = vpop.f32.mrf.mxu1  ;;  %7992 = vmatmul.mubr.msk.f32.gmra.mxu0 %vm1882_vm1, %v6823_v21  ;;  %8147 = vmatmul.mubr.msk.f32.gmra.mxu1 %vm1882_vm1, %v7020_v17 }
 0x265   : > { %10748 = vst [vmem:[#allocation51_spill] sm:$0xff] %v10231_v20  ;;  %v2828_v32 = vmax.f32 %v2708_v50, 0.0  ;;  %v3874_v30 = vmax.f32 %v3754_v31, 0.0  ;;  %v2723_v33 = vadd.f32 %v10236_v40, %v7686_v1  ;;  %v3769_v16 = vadd.f32 %v10236_v40, %v7841_v8  ;;  %7994 = vmatprep.mubr.msk.f32.mxu0 %vm1882_vm1, %v6824_v3  ;;  %8149 = vmatprep.mubr.msk.f32.mxu1 %vm1882_vm1, %v7021_v14  ;;  %v7023_v20 = vld [vmem:[%s9071_s10 + $0xc30] sm:$0xff] }
 0x266   : > { %v10252_v39 = vmax.f32 %v2829_v47, %v3875_v45  ;;  %v2717_v21 = vpop.f32.mrf.mxu0  ;;  %v3763_v17 = vpop.f32.mrf.mxu1 }
 0x267   : > { %v10256_v9 = vmax.f32 %v2828_v32, %v3874_v30  ;;  %v2831_v50 = vmax.f32 %v2723_v33, 0.0  ;;  %v3877_v31 = vmax.f32 %v3769_v16, 0.0  ;;  %v2718_v1 = vadd.f32 %v10236_v40, %v2717_v21  ;;  %v6827_v33 = vld [vmem:[%s9071_s10 + $0x928] sm:$0xff]  ;;  %v7024_v16 = vld [vmem:[%s9071_s10 + $0xc38] sm:$0xff] }
 0x268   : > { %10749 = vst [vmem:[#allocation52_spill] sm:$0xff] %v10252_v39  ;;  %v3764_v3 = vadd.f32 %v10236_v40, %v3763_v17  ;;  %v7689_v14 = vpop.f32.mrf.mxu0  ;;  %v7844_v8 = vpop.f32.mrf.mxu1  ;;  %7995 = vmatmul.mubr.msk.f32.gmra.mxu0 %vm1882_vm1, %v6825_v53  ;;  %8150 = vmatmul.mubr.msk.f32.gmra.mxu1 %vm1882_vm1, %v7022_v29 }
 0x269   : > { %10750 = vst [vmem:[#allocation53_spill] sm:$0xff] %v10256_v9  ;;  %v10263_v47 = vmax.f32 %v2831_v50, %v3877_v31  ;;  %v2830_v45 = vmax.f32 %v2718_v1, 0.0  ;;  %v2733_v32 = vadd.f32 %v10236_v40, %v7689_v14  ;;  %v3779_v30 = vadd.f32 %v10236_v40, %v7844_v8  ;;  %7997 = vmatprep.mubr.msk.f32.mxu0 %vm1882_vm1, %v6826_v18 }
 0x26a   : > { %8152 = vmatprep.mubr.msk.f32.mxu1 %vm1882_vm1, %v7023_v20  ;;  %v3876_v21 = vmax.f32 %v3764_v3, 0.0  ;;  %v2727_v53 = vpop.f32.mrf.mxu0  ;;  %v3773_v17 = vpop.f32.mrf.mxu1 }
 0x26b   : > { %10751 = vst [vmem:[#allocation54_spill] sm:$0xff] %v10263_v47  ;;  %v2833_v29 = vmax.f32 %v2733_v32, 0.0  ;;  %v3879_v9 = vmax.f32 %v3779_v30, 0.0  ;;  %v2728_v50 = vadd.f32 %v10236_v40, %v2727_v53  ;;  %v3774_v31 = vadd.f32 %v10236_v40, %v3773_v17 }
 0x26c   : > { %v10273_v1 = vmax.f32 %v2830_v45, %v3876_v21  ;;  %v7855_v14 = vpop.f32.mrf.mxu0  ;;  %7998 = vmatmul.mubr.msk.f32.gmra.mxu0 %vm1882_vm1, %v6827_v33  ;;  %v8010_v18 = vpop.f32.mrf.mxu1  ;;  %8153 = vmatmul.mubr.msk.f32.gmra.mxu1 %vm1882_vm1, %v7024_v16 }
 0x26d   : > { %v10280_v20 = vmax.f32 %v2833_v29, %v3879_v9  ;;  %v2832_v3 = vmax.f32 %v2728_v50, 0.0  ;;  %v3878_v8 = vmax.f32 %v3774_v31, 0.0  ;;  %v4443_v32 = vadd.f32 %v10236_v40, %v7855_v14 }
 0x26e   : > { %10752 = vst [vmem:[#allocation55_spill] sm:$0xff] %v10273_v1  ;;  %v5489_v30 = vadd.f32 %v10236_v40, %v8010_v18  ;;  %v4437_v53 = vpop.f32.mrf.mxu0  ;;  %v5483_v17 = vpop.f32.mrf.mxu1 }
 0x26f   : > { %10753 = vst [vmem:[#allocation56_spill] sm:$0xff] %v10280_v20  ;;  %v10284_v45 = vmax.f32 %v2832_v3, %v3878_v8  ;;  %v4927_v21 = vmax.f32 %v4443_v32, 0.0  ;;  %v4438_v33 = vadd.f32 %v10236_v40, %v4437_v53  ;;  %v5484_v1 = vadd.f32 %v10236_v40, %v5483_v17 }
 0x270   : > { %v5973_v47 = vmax.f32 %v5489_v30, 0.0  ;;  %v7858_v16 = vpop.f32.mrf.mxu0  ;;  %v8013_v9 = vpop.f32.mrf.mxu1 }
 0x271   : > { %v4926_v29 = vmax.f32 %v4438_v33, 0.0  ;;  %v5972_v50 = vmax.f32 %v5484_v1, 0.0  ;;  %v4453_v31 = vadd.f32 %v10236_v40, %v7858_v16  ;;  %v5499_v14 = vadd.f32 %v10236_v40, %v8013_v9 }
 0x272   : > { %v6071_v18 = vmax.f32 %v4927_v21, %v5973_v47  ;;  %v4447_v20 = vpop.f32.mrf.mxu0  ;;  %v5493_v39 = vpop.f32.mrf.mxu1 }
 0x273   : > { %v6070_v3 = vmax.f32 %v4926_v29, %v5972_v50  ;;  %v4929_v8 = vmax.f32 %v4453_v31, 0.0  ;;  %v5975_v32 = vmax.f32 %v5499_v14, 0.0  ;;  %v4448_v30 = vadd.f32 %v10236_v40, %v4447_v20 }
 0x274   : > { %v6169_v1 = vmax.f32 %v9496_v35, %v6071_v18  ;;  %v5494_v53 = vadd.f32 %v10236_v40, %v5493_v39  ;;  %v7861_v17 = vpop.f32.mrf.mxu0  ;;  %v8016_v47 = vpop.f32.mrf.mxu1 }
 0x275   : > { %v6168_v21 = vmax.f32 %v9506_v46, %v6070_v3  ;;  %v6073_v33 = vmax.f32 %v4929_v8, %v5975_v32  ;;  %v4928_v16 = vmax.f32 %v4448_v30, 0.0  ;;  %v4463_v9 = vadd.f32 %v10236_v40, %v7861_v17 }
 0x276   : > { %6267 = vst [vmem:[%s10293_s24 + $0x8] sm:$0xff] %v6169_v1  ;;  %v5974_v29 = vmax.f32 %v5494_v53, 0.0  ;;  %v5509_v50 = vadd.f32 %v10236_v40, %v8016_v47  ;;  %v4457_v31 = vpop.f32.mrf.mxu0  ;;  %v5503_v14 = vpop.f32.mrf.mxu1 }
 0x277   : > { %6266 = vst [vmem:[%s10293_s24] sm:$0xff] %v6168_v21  ;;  %v6171_v35 = vmax.f32 %v9518_v59, %v6073_v33  ;;  %v4931_v20 = vmax.f32 %v4463_v9, 0.0  ;;  %v4458_v39 = vadd.f32 %v10236_v40, %v4457_v31  ;;  %v5504_v18 = vadd.f32 %v10236_v40, %v5503_v14 }
 0x278   : > { %v6072_v46 = vmax.f32 %v4928_v16, %v5974_v29  ;;  %v5977_v3 = vmax.f32 %v5509_v50, 0.0  ;;  %v7864_v8 = vpop.f32.mrf.mxu0  ;;  %v8019_v32 = vpop.f32.mrf.mxu1 }
 0x279   : > { %6269 = vst [vmem:[%s10293_s24 + $0x18] sm:$0xff] %v6171_v35  ;;  %v4930_v30 = vmax.f32 %v4458_v39, 0.0  ;;  %v5976_v1 = vmax.f32 %v5504_v18, 0.0  ;;  %v4473_v53 = vadd.f32 %v10236_v40, %v7864_v8  ;;  %v5519_v17 = vadd.f32 %v10236_v40, %v8019_v32 }
 0x27a   : > { %v6170_v47 = vmax.f32 %v9522_v0, %v6072_v46  ;;  %v6075_v59 = vmax.f32 %v4931_v20, %v5977_v3  ;;  %v4467_v21 = vpop.f32.mrf.mxu0  ;;  %v5513_v33 = vpop.f32.mrf.mxu1 }
 0x27b   : > { %v6074_v9 = vmax.f32 %v4930_v30, %v5976_v1  ;;  %v4933_v31 = vmax.f32 %v4473_v53, 0.0  ;;  %v5979_v16 = vmax.f32 %v5519_v17, 0.0  ;;  %v4468_v29 = vadd.f32 %v10236_v40, %v4467_v21 }
 0x27c   : > { %6268 = vst [vmem:[%s10293_s24 + $0x10] sm:$0xff] %v6170_v47  ;;  %v6173_v50 = vmax.f32 %v9528_v7, %v6075_v59  ;;  %v5514_v14 = vadd.f32 %v10236_v40, %v5513_v33  ;;  %v7867_v35 = vpop.f32.mrf.mxu0  ;;  %v8022_v39 = vpop.f32.mrf.mxu1 }
 0x27d   : > { %v6172_v18 = vmax.f32 %v9540_v23, %v6074_v9  ;;  %v6077_v0 = vmax.f32 %v4933_v31, %v5979_v16  ;;  %v4932_v20 = vmax.f32 %v4468_v29, 0.0  ;;  %v4483_v46 = vadd.f32 %v10236_v40, %v7867_v35 }
 0x27e   : > { %6271 = vst [vmem:[%s10293_s24 + $0x28] sm:$0xff] %v6173_v50  ;;  %v5978_v3 = vmax.f32 %v5514_v14, 0.0  ;;  %v5529_v8 = vadd.f32 %v10236_v40, %v8022_v39  ;;  %v4477_v32 = vpop.f32.mrf.mxu0  ;;  %v5523_v30 = vpop.f32.mrf.mxu1 }
 0x27f   : > { %6270 = vst [vmem:[%s10293_s24 + $0x20] sm:$0xff] %v6172_v18  ;;  %v6175_v7 = vmax.f32 %v9544_v26, %v6077_v0  ;;  %v4935_v1 = vmax.f32 %v4483_v46, 0.0  ;;  %v4478_v53 = vadd.f32 %v10236_v40, %v4477_v32  ;;  %v5524_v17 = vadd.f32 %v10236_v40, %v5523_v30 }
 0x280   : > { %v6076_v23 = vmax.f32 %v4932_v20, %v5978_v3  ;;  %v5981_v47 = vmax.f32 %v5529_v8, 0.0  ;;  %v7870_v59 = vpop.f32.mrf.mxu0  ;;  %v8025_v21 = vpop.f32.mrf.mxu1 }
 0x281   : > { %6273 = vst [vmem:[%s10293_s24 + $0x38] sm:$0xff] %v6175_v7  ;;  %v4934_v33 = vmax.f32 %v4478_v53, 0.0  ;;  %v5980_v9 = vmax.f32 %v5524_v17, 0.0  ;;  %v4493_v31 = vadd.f32 %v10236_v40, %v7870_v59  ;;  %v5539_v16 = vadd.f32 %v10236_v40, %v8025_v21 }
 0x282   : > { %v6174_v29 = vmax.f32 %v9554_v38, %v6076_v23  ;;  %v6079_v26 = vmax.f32 %v4935_v1, %v5981_v47  ;;  %v4487_v50 = vpop.f32.mrf.mxu0  ;;  %v5533_v14 = vpop.f32.mrf.mxu1 }
 0x283   : > { %v6078_v35 = vmax.f32 %v4934_v33, %v5980_v9  ;;  %v4937_v39 = vmax.f32 %v4493_v31, 0.0  ;;  %v5983_v18 = vmax.f32 %v5539_v16, 0.0  ;;  %v4488_v0 = vadd.f32 %v10236_v40, %v4487_v50 }
 0x284   : > { %6272 = vst [vmem:[%s10293_s24 + $0x30] sm:$0xff] %v6174_v29  ;;  %v6177_v20 = vmax.f32 %v9566_v52, %v6079_v26  ;;  %v5534_v46 = vadd.f32 %v10236_v40, %v5533_v14  ;;  %v7873_v3 = vpop.f32.mrf.mxu0  ;;  %v8028_v8 = vpop.f32.mrf.mxu1 }
 0x285   : > { %v6176_v32 = vmax.f32 %v9570_v57, %v6078_v35  ;;  %v6081_v38 = vmax.f32 %v4937_v39, %v5983_v18  ;;  %v4936_v30 = vmax.f32 %v4488_v0, 0.0  ;;  %v4503_v7 = vadd.f32 %v10236_v40, %v7873_v3 }
 0x286   : > { %6275 = vst [vmem:[%s10293_s24 + $0x48] sm:$0xff] %v6177_v20  ;;  %v5982_v1 = vmax.f32 %v5534_v46, 0.0  ;;  %v5549_v53 = vadd.f32 %v10236_v40, %v8028_v8  ;;  %v4497_v17 = vpop.f32.mrf.mxu0  ;;  %v5543_v23 = vpop.f32.mrf.mxu1 }
 0x287   : > { %6274 = vst [vmem:[%s10293_s24 + $0x40] sm:$0xff] %v6176_v32  ;;  %v6179_v52 = vmax.f32 %v9576_v2, %v6081_v38  ;;  %v4939_v47 = vmax.f32 %v4503_v7, 0.0  ;;  %v4498_v59 = vadd.f32 %v10236_v40, %v4497_v17  ;;  %v5544_v21 = vadd.f32 %v10236_v40, %v5543_v23 }
 0x288   : > { %v6080_v57 = vmax.f32 %v4936_v30, %v5982_v1  ;;  %v5985_v33 = vmax.f32 %v5549_v53, 0.0  ;;  %v7876_v9 = vpop.f32.mrf.mxu0  ;;  %v8031_v31 = vpop.f32.mrf.mxu1 }
 0x289   : > { %6277 = vst [vmem:[%s10293_s24 + $0x58] sm:$0xff] %v6179_v52  ;;  %v4938_v16 = vmax.f32 %v4498_v59, 0.0  ;;  %v5984_v29 = vmax.f32 %v5544_v21, 0.0  ;;  %v4513_v26 = vadd.f32 %v10236_v40, %v7876_v9  ;;  %v5559_v50 = vadd.f32 %v10236_v40, %v8031_v31 }
 0x28a   : > { %v6178_v14 = vmax.f32 %v9588_v19, %v6080_v57  ;;  %v6083_v2 = vmax.f32 %v4939_v47, %v5985_v33  ;;  %v4507_v35 = vpop.f32.mrf.mxu0  ;;  %v5553_v39 = vpop.f32.mrf.mxu1 }
 0x28b   : > { %v6082_v18 = vmax.f32 %v4938_v16, %v5984_v29  ;;  %v4941_v0 = vmax.f32 %v4513_v26, 0.0  ;;  %v5987_v20 = vmax.f32 %v5559_v50, 0.0  ;;  %v4508_v46 = vadd.f32 %v10236_v40, %v4507_v35 }
 0x28c   : > { %6276 = vst [vmem:[%s10293_s24 + $0x50] sm:$0xff] %v6178_v14  ;;  %v6181_v3 = vmax.f32 %v9592_v22, %v6083_v2  ;;  %v5554_v8 = vadd.f32 %v10236_v40, %v5553_v39  ;;  %v7879_v32 = vpop.f32.mrf.mxu0  ;;  %v8034_v38 = vpop.f32.mrf.mxu1 }
 0x28d   : > { %v6180_v30 = vmax.f32 %v9602_v36, %v6082_v18  ;;  %v6085_v19 = vmax.f32 %v4941_v0, %v5987_v20  ;;  %v4940_v7 = vmax.f32 %v4508_v46, 0.0  ;;  %v4523_v1 = vadd.f32 %v10236_v40, %v7879_v32 }
 0x28e   : > { %6279 = vst [vmem:[%s10293_s24 + $0x68] sm:$0xff] %v6181_v3  ;;  %v5986_v53 = vmax.f32 %v5554_v8, 0.0  ;;  %v5569_v17 = vadd.f32 %v10236_v40, %v8034_v38  ;;  %v4517_v23 = vpop.f32.mrf.mxu0  ;;  %v5563_v52 = vpop.f32.mrf.mxu1 }
 0x28f   : > { %6278 = vst [vmem:[%s10293_s24 + $0x60] sm:$0xff] %v6180_v30  ;;  %v6183_v22 = vmax.f32 %v9614_v51, %v6085_v19  ;;  %v4943_v47 = vmax.f32 %v4523_v1, 0.0  ;;  %v4518_v59 = vadd.f32 %v10236_v40, %v4517_v23  ;;  %v5564_v21 = vadd.f32 %v10236_v40, %v5563_v52 }
 0x290   : > { %v6084_v36 = vmax.f32 %v4940_v7, %v5986_v53  ;;  %v5989_v57 = vmax.f32 %v5569_v17, 0.0  ;;  %v7882_v33 = vpop.f32.mrf.mxu0  ;;  %v8037_v9 = vpop.f32.mrf.mxu1 }
 0x291   : > { %6281 = vst [vmem:[%s10293_s24 + $0x78] sm:$0xff] %v6183_v22  ;;  %v4942_v31 = vmax.f32 %v4518_v59, 0.0  ;;  %v5988_v16 = vmax.f32 %v5564_v21, 0.0  ;;  %v4533_v29 = vadd.f32 %v10236_v40, %v7882_v33  ;;  %v5579_v26 = vadd.f32 %v10236_v40, %v8037_v9 }
 0x292   : > { %v6182_v50 = vmax.f32 %v9618_v58, %v6084_v36  ;;  %v6087_v51 = vmax.f32 %v4943_v47, %v5989_v57  ;;  %v4527_v14 = vpop.f32.mrf.mxu0  ;;  %v5573_v2 = vpop.f32.mrf.mxu1 }
 0x293   : > { %v6086_v35 = vmax.f32 %v4942_v31, %v5988_v16  ;;  %v4945_v39 = vmax.f32 %v4533_v29, 0.0  ;;  %v5991_v18 = vmax.f32 %v5579_v26, 0.0  ;;  %v4528_v0 = vadd.f32 %v10236_v40, %v4527_v14 }
 0x294   : > { %6280 = vst [vmem:[%s10293_s24 + $0x70] sm:$0xff] %v6182_v50  ;;  %v6185_v20 = vmax.f32 %v9624_v4, %v6087_v51  ;;  %v5574_v46 = vadd.f32 %v10236_v40, %v5573_v2  ;;  %v7885_v3 = vpop.f32.mrf.mxu0  ;;  %v8040_v8 = vpop.f32.mrf.mxu1 }
 0x295   : > { %v6184_v32 = vmax.f32 %v9636_v24, %v6086_v35  ;;  %v6089_v58 = vmax.f32 %v4945_v39, %v5991_v18  ;;  %v4944_v38 = vmax.f32 %v4528_v0, 0.0  ;;  %v4543_v30 = vadd.f32 %v10236_v40, %v7885_v3 }
 0x296   : > { %6283 = vst [vmem:[%s10293_s24 + $0x88] sm:$0xff] %v6185_v20  ;;  %v5990_v19 = vmax.f32 %v5574_v46, 0.0  ;;  %v5589_v7 = vadd.f32 %v10236_v40, %v8040_v8  ;;  %v4537_v1 = vpop.f32.mrf.mxu0  ;;  %v5583_v53 = vpop.f32.mrf.mxu1 }
 0x297   : > { %6282 = vst [vmem:[%s10293_s24 + $0x80] sm:$0xff] %v6184_v32  ;;  %v6187_v4 = vmax.f32 %v9640_v28, %v6089_v58  ;;  %v4947_v17 = vmax.f32 %v4543_v30, 0.0  ;;  %v4538_v23 = vadd.f32 %v10236_v40, %v4537_v1  ;;  %v5584_v52 = vadd.f32 %v10236_v40, %v5583_v53 }
 0x298   : > { %v6088_v24 = vmax.f32 %v4944_v38, %v5990_v19  ;;  %v5993_v22 = vmax.f32 %v5589_v7, 0.0  ;;  %v7888_v47 = vpop.f32.mrf.mxu0  ;;  %v8043_v59 = vpop.f32.mrf.mxu1 }
 0x299   : > { %6285 = vst [vmem:[%s10293_s24 + $0x98] sm:$0xff] %v6187_v4  ;;  %v4946_v21 = vmax.f32 %v4538_v23, 0.0  ;;  %v5992_v36 = vmax.f32 %v5584_v52, 0.0  ;;  %v4553_v57 = vadd.f32 %v10236_v40, %v7888_v47  ;;  %v5599_v33 = vadd.f32 %v10236_v40, %v8043_v59 }
 0x29a   : > { %v6186_v9 = vmax.f32 %v9650_v42, %v6088_v24  ;;  %v6091_v28 = vmax.f32 %v4947_v17, %v5993_v22  ;;  %v4547_v31 = vpop.f32.mrf.mxu0  ;;  %v5593_v16 = vpop.f32.mrf.mxu1 }
 0x29b   : > { %v6090_v29 = vmax.f32 %v4946_v21, %v5992_v36  ;;  %v4949_v26 = vmax.f32 %v4553_v57, 0.0  ;;  %v5995_v50 = vmax.f32 %v5599_v33, 0.0  ;;  %v4548_v51 = vadd.f32 %v10236_v40, %v4547_v31 }
 0x29c   : > { %6284 = vst [vmem:[%s10293_s24 + $0x90] sm:$0xff] %v6186_v9  ;;  %v6189_v14 = vmax.f32 %v9662_v61, %v6091_v28  ;;  %v5594_v2 = vadd.f32 %v10236_v40, %v5593_v16  ;;  %v7891_v35 = vpop.f32.mrf.mxu0  ;;  %v8046_v39 = vpop.f32.mrf.mxu1 }
 0x29d   : > { %v6188_v18 = vmax.f32 %v9666_v5, %v6090_v29  ;;  %v6093_v42 = vmax.f32 %v4949_v26, %v5995_v50  ;;  %v4948_v0 = vmax.f32 %v4548_v51, 0.0  ;;  %v4563_v20 = vadd.f32 %v10236_v40, %v7891_v35 }
 0x29e   : > { %6287 = vst [vmem:[%s10293_s24 + $0xa8] sm:$0xff] %v6189_v14  ;;  %v5994_v46 = vmax.f32 %v5594_v2, 0.0  ;;  %v5609_v3 = vadd.f32 %v10236_v40, %v8046_v39  ;;  %v4557_v8 = vpop.f32.mrf.mxu0  ;;  %v5603_v32 = vpop.f32.mrf.mxu1 }
 0x29f   : > { %6286 = vst [vmem:[%s10293_s24 + $0xa0] sm:$0xff] %v6188_v18  ;;  %v6191_v61 = vmax.f32 %v9672_v13, %v6093_v42  ;;  %v4951_v58 = vmax.f32 %v4563_v20, 0.0  ;;  %v4558_v38 = vadd.f32 %v10236_v40, %v4557_v8  ;;  %v5604_v30 = vadd.f32 %v10236_v40, %v5603_v32 }
 0x2a0   : > { %v6092_v5 = vmax.f32 %v4948_v0, %v5994_v46  ;;  %v5997_v19 = vmax.f32 %v5609_v3, 0.0  ;;  %v7894_v7 = vpop.f32.mrf.mxu0  ;;  %v8049_v1 = vpop.f32.mrf.mxu1 }
 0x2a1   : > { %6289 = vst [vmem:[%s10293_s24 + $0xb8] sm:$0xff] %v6191_v61  ;;  %v4950_v53 = vmax.f32 %v4558_v38, 0.0  ;;  %v5996_v4 = vmax.f32 %v5604_v30, 0.0  ;;  %v4573_v17 = vadd.f32 %v10236_v40, %v7894_v7  ;;  %v5619_v23 = vadd.f32 %v10236_v40, %v8049_v1 }
 0x2a2   : > { %v6190_v52 = vmax.f32 %v9684_v37, %v6092_v5  ;;  %v6095_v13 = vmax.f32 %v4951_v58, %v5997_v19  ;;  %v4567_v24 = vpop.f32.mrf.mxu0  ;;  %v5613_v22 = vpop.f32.mrf.mxu1 }
 0x2a3   : > { %v6094_v47 = vmax.f32 %v4950_v53, %v5996_v4  ;;  %v4953_v59 = vmax.f32 %v4573_v17, 0.0  ;;  %v5999_v21 = vmax.f32 %v5619_v23, 0.0  ;;  %v4568_v36 = vadd.f32 %v10236_v40, %v4567_v24 }
 0x2a4   : > { %6288 = vst [vmem:[%s10293_s24 + $0xb0] sm:$0xff] %v6190_v52  ;;  %v6193_v57 = vmax.f32 %v9688_v41, %v6095_v13  ;;  %v5614_v33 = vadd.f32 %v10236_v40, %v5613_v22  ;;  %v7897_v9 = vpop.f32.mrf.mxu0  ;;  %v8052_v28 = vpop.f32.mrf.mxu1 }
 0x2a5   : > { %v6192_v31 = vmax.f32 %v9698_v56, %v6094_v47  ;;  %v6097_v37 = vmax.f32 %v4953_v59, %v5999_v21  ;;  %v4952_v16 = vmax.f32 %v4568_v36, 0.0  ;;  %v4583_v29 = vadd.f32 %v10236_v40, %v7897_v9 }
 0x2a6   : > { %6291 = vst [vmem:[%s10293_s24 + $0xc8] sm:$0xff] %v6193_v57  ;;  %v5998_v26 = vmax.f32 %v5614_v33, 0.0  ;;  %v5629_v50 = vadd.f32 %v10236_v40, %v8052_v28  ;;  %v4577_v51 = vpop.f32.mrf.mxu0  ;;  %v5623_v14 = vpop.f32.mrf.mxu1 }
 0x2a7   : > { %6290 = vst [vmem:[%s10293_s24 + $0xc0] sm:$0xff] %v6192_v31  ;;  %v6195_v41 = vmax.f32 %v9710_v15, %v6097_v37  ;;  %v4955_v2 = vmax.f32 %v4583_v29, 0.0  ;;  %v4578_v35 = vadd.f32 %v10236_v40, %v4577_v51  ;;  %v5624_v39 = vadd.f32 %v10236_v40, %v5623_v14 }
 0x2a8   : > { %v6096_v56 = vmax.f32 %v4952_v16, %v5998_v26  ;;  %v6001_v18 = vmax.f32 %v5629_v50, 0.0  ;;  %v7900_v42 = vpop.f32.mrf.mxu0  ;;  %v8055_v0 = vpop.f32.mrf.mxu1 }
 0x2a9   : > { %6293 = vst [vmem:[%s10293_s24 + $0xd8] sm:$0xff] %v6195_v41  ;;  %v4954_v20 = vmax.f32 %v4578_v35, 0.0  ;;  %v6000_v46 = vmax.f32 %v5624_v39, 0.0  ;;  %v4593_v3 = vadd.f32 %v10236_v40, %v7900_v42  ;;  %v5639_v8 = vadd.f32 %v10236_v40, %v8055_v0 }
 0x2aa   : > { %v6194_v32 = vmax.f32 %v9714_v25, %v6096_v56  ;;  %v6099_v15 = vmax.f32 %v4955_v2, %v6001_v18  ;;  %v4587_v61 = vpop.f32.mrf.mxu0  ;;  %v5633_v58 = vpop.f32.mrf.mxu1 }
 0x2ab   : > { %v6098_v38 = vmax.f32 %v4954_v20, %v6000_v46  ;;  %v4957_v30 = vmax.f32 %v4593_v3, 0.0  ;;  %v6003_v5 = vmax.f32 %v5639_v8, 0.0  ;;  %v4588_v19 = vadd.f32 %v10236_v40, %v4587_v61 }
 0x2ac   : > { %6292 = vst [vmem:[%s10293_s24 + $0xd0] sm:$0xff] %v6194_v32  ;;  %v6197_v7 = vmax.f32 %v9720_v34, %v6099_v15  ;;  %v5634_v1 = vadd.f32 %v10236_v40, %v5633_v58  ;;  %v7903_v53 = vpop.f32.mrf.mxu0  ;;  %v8058_v4 = vpop.f32.mrf.mxu1 }
 0x2ad   : > { %v6196_v17 = vmax.f32 %v9732_v63, %v6098_v38  ;;  %v6101_v25 = vmax.f32 %v4957_v30, %v6003_v5  ;;  %v4956_v23 = vmax.f32 %v4588_v19, 0.0  ;;  %v4603_v52 = vadd.f32 %v10236_v40, %v7903_v53 }
 0x2ae   : > { %6295 = vst [vmem:[%s10293_s24 + $0xe8] sm:$0xff] %v6197_v7  ;;  %v6002_v13 = vmax.f32 %v5634_v1, 0.0  ;;  %v5649_v24 = vadd.f32 %v10236_v40, %v8058_v4  ;;  %v4597_v22 = vpop.f32.mrf.mxu0  ;;  %v5643_v47 = vpop.f32.mrf.mxu1 }
 0x2af   : > { %6294 = vst [vmem:[%s10293_s24 + $0xe0] sm:$0xff] %v6196_v17  ;;  %v6199_v34 = vmax.f32 %v9736_v6, %v6101_v25  ;;  %v4959_v59 = vmax.f32 %v4603_v52, 0.0  ;;  %v4598_v21 = vadd.f32 %v10236_v40, %v4597_v22  ;;  %v5644_v36 = vadd.f32 %v10236_v40, %v5643_v47 }
 0x2b0   : > { %v6100_v63 = vmax.f32 %v4956_v23, %v6002_v13  ;;  %v6005_v57 = vmax.f32 %v5649_v24, 0.0  ;;  %v7906_v33 = vpop.f32.mrf.mxu0  ;;  %v8061_v9 = vpop.f32.mrf.mxu1 }
 0x2b1   : > { %6297 = vst [vmem:[%s10293_s24 + $0xf8] sm:$0xff] %v6199_v34  ;;  %v4958_v28 = vmax.f32 %v4598_v21, 0.0  ;;  %v6004_v31 = vmax.f32 %v5644_v36, 0.0  ;;  %v4613_v37 = vadd.f32 %v10236_v40, %v7906_v33  ;;  %v5659_v16 = vadd.f32 %v10236_v40, %v8061_v9 }
 0x2b2   : > { %v6198_v29 = vmax.f32 %v9746_v27, %v6100_v63  ;;  %v6103_v6 = vmax.f32 %v4959_v59, %v6005_v57  ;;  %v4607_v26 = vpop.f32.mrf.mxu0  ;;  %v5653_v50 = vpop.f32.mrf.mxu1 }
 0x2b3   : > { %v6102_v51 = vmax.f32 %v4958_v28, %v6004_v31  ;;  %v4961_v14 = vmax.f32 %v4613_v37, 0.0  ;;  %v6007_v41 = vmax.f32 %v5659_v16, 0.0  ;;  %v4608_v2 = vadd.f32 %v10236_v40, %v4607_v26 }
 0x2b4   : > { %6296 = vst [vmem:[%s10293_s24 + $0xf0] sm:$0xff] %v6198_v29  ;;  %v6201_v35 = vmax.f32 %v9758_v49, %v6103_v6  ;;  %v5654_v39 = vadd.f32 %v10236_v40, %v5653_v50  ;;  %v7909_v56 = vpop.f32.mrf.mxu0  ;;  %v8064_v18 = vpop.f32.mrf.mxu1 }
 0x2b5   : > { %v6200_v42 = vmax.f32 %v9762_v60, %v6102_v51  ;;  %v6105_v27 = vmax.f32 %v4961_v14, %v6007_v41  ;;  %v4960_v0 = vmax.f32 %v4608_v2, 0.0  ;;  %v4623_v20 = vadd.f32 %v10236_v40, %v7909_v56 }
 0x2b6   : > { %6299 = vst [vmem:[%s10293_s24 + $0x108] sm:$0xff] %v6201_v35  ;;  %v6006_v46 = vmax.f32 %v5654_v39, 0.0  ;;  %v5669_v3 = vadd.f32 %v10236_v40, %v8064_v18  ;;  %v4617_v8 = vpop.f32.mrf.mxu0  ;;  %v5663_v32 = vpop.f32.mrf.mxu1 }
 0x2b7   : > { %6298 = vst [vmem:[%s10293_s24 + $0x100] sm:$0xff] %v6200_v42  ;;  %v6203_v49 = vmax.f32 %v9768_v11, %v6105_v27  ;;  %v4963_v15 = vmax.f32 %v4623_v20, 0.0  ;;  %v4618_v61 = vadd.f32 %v10236_v40, %v4617_v8  ;;  %v5664_v58 = vadd.f32 %v10236_v40, %v5663_v32 }
 0x2b8   : > { %v6104_v60 = vmax.f32 %v4960_v0, %v6006_v46  ;;  %v6009_v38 = vmax.f32 %v5669_v3, 0.0  ;;  %v7912_v30 = vpop.f32.mrf.mxu0  ;;  %v8067_v5 = vpop.f32.mrf.mxu1 }
 0x2b9   : > { %6301 = vst [vmem:[%s10293_s24 + $0x118] sm:$0xff] %v6203_v49  ;;  %v4962_v19 = vmax.f32 %v4618_v61, 0.0  ;;  %v6008_v7 = vmax.f32 %v5664_v58, 0.0  ;;  %v4633_v1 = vadd.f32 %v10236_v40, %v7912_v30  ;;  %v5679_v53 = vadd.f32 %v10236_v40, %v8067_v5 }
 0x2ba   : > { %v6202_v4 = vmax.f32 %v9780_v44, %v6104_v60  ;;  %v6107_v11 = vmax.f32 %v4963_v15, %v6009_v38  ;;  %v4627_v17 = vpop.f32.mrf.mxu0  ;;  %v5673_v25 = vpop.f32.mrf.mxu1 }
 0x2bb   : > { %v6106_v23 = vmax.f32 %v4962_v19, %v6008_v7  ;;  %v4965_v52 = vmax.f32 %v4633_v1, 0.0  ;;  %v6011_v13 = vmax.f32 %v5679_v53, 0.0  ;;  %v4628_v24 = vadd.f32 %v10236_v40, %v4627_v17 }
 0x2bc   : > { %6300 = vst [vmem:[%s10293_s24 + $0x110] sm:$0xff] %v6202_v4  ;;  %v6205_v22 = vmax.f32 %v9784_v48, %v6107_v11  ;;  %v5674_v47 = vadd.f32 %v10236_v40, %v5673_v25  ;;  %v7915_v34 = vpop.f32.mrf.mxu0  ;;  %v8070_v59 = vpop.f32.mrf.mxu1  ;;  %v10754_v25 = vld [vmem:[#allocation3_spill] sm:$0xff] }
 0x2bd   : > { %v6204_v21 = vmax.f32 %v9794_v12, %v6106_v23  ;;  %v6109_v44 = vmax.f32 %v4965_v52, %v6011_v13  ;;  %v4964_v36 = vmax.f32 %v4628_v24, 0.0  ;;  %v4643_v63 = vadd.f32 %v10236_v40, %v7915_v34 }
 0x2be   : > { %6303 = vst [vmem:[%s10293_s24 + $0x128] sm:$0xff] %v6205_v22  ;;  %v6010_v57 = vmax.f32 %v5674_v47, 0.0  ;;  %v5689_v33 = vadd.f32 %v10236_v40, %v8070_v59  ;;  %v4637_v9 = vpop.f32.mrf.mxu0  ;;  %v5683_v28 = vpop.f32.mrf.mxu1  ;;  %v10755_v59 = vld [vmem:[#allocation4_spill] sm:$0xff] }
 0x2bf   : > { %6302 = vst [vmem:[%s10293_s24 + $0x120] sm:$0xff] %v6204_v21  ;;  %v6207_v48 = vmax.f32 %v9806_v43, %v6109_v44  ;;  %v4967_v31 = vmax.f32 %v4643_v63, 0.0  ;;  %v4638_v37 = vadd.f32 %v10236_v40, %v4637_v9  ;;  %v5684_v16 = vadd.f32 %v10236_v40, %v5683_v28 }
 0x2c0   : > { %v6108_v12 = vmax.f32 %v4964_v36, %v6010_v57  ;;  %v6013_v29 = vmax.f32 %v5689_v33, 0.0  ;;  %v7918_v6 = vpop.f32.mrf.mxu0  ;;  %v8073_v26 = vpop.f32.mrf.mxu1  ;;  %v10756_v57 = vld [vmem:[#allocation5_spill] sm:$0xff] }
 0x2c1   : > { %6305 = vst [vmem:[%s10293_s24 + $0x138] sm:$0xff] %v6207_v48  ;;  %v4966_v50 = vmax.f32 %v4638_v37, 0.0  ;;  %v6012_v51 = vmax.f32 %v5684_v16, 0.0  ;;  %v4653_v14 = vadd.f32 %v10236_v40, %v7918_v6  ;;  %v5699_v41 = vadd.f32 %v10236_v40, %v8073_v26 }
 0x2c2   : > { %v6206_v2 = vmax.f32 %v9810_v54, %v6108_v12  ;;  %v6111_v43 = vmax.f32 %v4967_v31, %v6013_v29  ;;  %v4647_v35 = vpop.f32.mrf.mxu0  ;;  %v5693_v39 = vpop.f32.mrf.mxu1  ;;  %v10757_v29 = vld [vmem:[#allocation6_spill] sm:$0xff] }
 0x2c3   : > { %v6110_v56 = vmax.f32 %v4966_v50, %v6012_v51  ;;  %v4969_v18 = vmax.f32 %v4653_v14, 0.0  ;;  %v6015_v42 = vmax.f32 %v5699_v41, 0.0  ;;  %v4648_v27 = vadd.f32 %v10236_v40, %v4647_v35 }
 0x2c4   : > { %6304 = vst [vmem:[%s10293_s24 + $0x130] sm:$0xff] %v6206_v2  ;;  %v6209_v0 = vmax.f32 %v9816_v10, %v6111_v43  ;;  %v5694_v20 = vadd.f32 %v10236_v40, %v5693_v39  ;;  %v7921_v46 = vpop.f32.mrf.mxu0  ;;  %v8076_v3 = vpop.f32.mrf.mxu1 }
 0x2c5   : > { %v6208_v8 = vmax.f32 %v9828_v55, %v6110_v56  ;;  %v6113_v54 = vmax.f32 %v4969_v18, %v6015_v42  ;;  %v4968_v32 = vmax.f32 %v4648_v27, 0.0  ;;  %v4663_v49 = vadd.f32 %v10236_v40, %v7921_v46  ;;  %v10758_v42 = vld [vmem:[#allocation7_spill] sm:$0xff] }
 0x2c6   : > { %6307 = vst [vmem:[%s10293_s24 + $0x148] sm:$0xff] %v6209_v0  ;;  %v6014_v15 = vmax.f32 %v5694_v20, 0.0  ;;  %v5709_v61 = vadd.f32 %v10236_v40, %v8076_v3  ;;  %v4657_v58 = vpop.f32.mrf.mxu0  ;;  %v5703_v60 = vpop.f32.mrf.mxu1 }
 0x2c7   : > { %6306 = vst [vmem:[%s10293_s24 + $0x140] sm:$0xff] %v6208_v8  ;;  %v6211_v10 = vmax.f32 %v9832_v62, %v6113_v54  ;;  %v4971_v38 = vmax.f32 %v4663_v49, 0.0  ;;  %v4658_v30 = vadd.f32 %v10236_v40, %v4657_v58  ;;  %v5704_v5 = vadd.f32 %v10236_v40, %v5703_v60  ;;  %v10759_v49 = vld [vmem:[#allocation8_spill] sm:$0xff] }
 0x2c8   : > { %v6112_v55 = vmax.f32 %v4968_v32, %v6014_v15  ;;  %v6017_v19 = vmax.f32 %v5709_v61, 0.0  ;;  %v7924_v7 = vpop.f32.mrf.mxu0  ;;  %v8079_v1 = vpop.f32.mrf.mxu1  ;;  %v10492_v61 = vld [vmem:[%s10698_s2] ss:$0 sm:$0xff] }
 0x2c9   : > { %6309 = vst [vmem:[%s10293_s24 + $0x158] sm:$0xff] %v6211_v10  ;;  %v4970_v53 = vmax.f32 %v4658_v30, 0.0  ;;  %v6016_v4 = vmax.f32 %v5704_v5, 0.0  ;;  %v4673_v11 = vadd.f32 %v10236_v40, %v7924_v7  ;;  %v5719_v17 = vadd.f32 %v10236_v40, %v8079_v1 }
 0x2ca   : > { %v6210_v23 = vmax.f32 %v10754_v25, %v6112_v55  ;;  %v6115_v62 = vmax.f32 %v4971_v38, %v6017_v19  ;;  %v4667_v52 = vpop.f32.mrf.mxu0  ;;  %v5713_v13 = vpop.f32.mrf.mxu1  ;;  %v10760_v38 = vld [vmem:[#allocation9_spill] sm:$0xff] }
 0x2cb   : > { %v6114_v24 = vmax.f32 %v4970_v53, %v6016_v4  ;;  %v4973_v22 = vmax.f32 %v4673_v11, 0.0  ;;  %v6019_v47 = vmax.f32 %v5719_v17, 0.0  ;;  %v4668_v34 = vadd.f32 %v10236_v40, %v4667_v52  ;;  %v10761_v4 = vld [vmem:[#allocation10_spill] sm:$0xff] }
 0x2cc   : > { %6308 = vst [vmem:[%s10293_s24 + $0x150] sm:$0xff] %v6210_v23  ;;  %v6213_v21 = vmax.f32 %v10755_v59, %v6115_v62  ;;  %v5714_v44 = vadd.f32 %v10236_v40, %v5713_v13  ;;  %v7927_v36 = vpop.f32.mrf.mxu0  ;;  %v8082_v63 = vpop.f32.mrf.mxu1 }
 0x2cd   : > { %v6212_v33 = vmax.f32 %v10756_v57, %v6114_v24  ;;  %v6117_v9 = vmax.f32 %v4973_v22, %v6019_v47  ;;  %v4972_v28 = vmax.f32 %v4668_v34, 0.0  ;;  %v4683_v48 = vadd.f32 %v10236_v40, %v7927_v36 }
 0x2ce   : > { %6311 = vst [vmem:[%s10293_s24 + $0x168] sm:$0xff] %v6213_v21  ;;  %v6018_v31 = vmax.f32 %v5714_v44, 0.0  ;;  %v5729_v37 = vadd.f32 %v10236_v40, %v8082_v63  ;;  %v4677_v16 = vpop.f32.mrf.mxu0  ;;  %v5723_v12 = vpop.f32.mrf.mxu1  ;;  %v10762_v21 = vld [vmem:[#allocation11_spill] sm:$0xff] }
 0x2cf   : > { %6310 = vst [vmem:[%s10293_s24 + $0x160] sm:$0xff] %v6212_v33  ;;  %v6215_v6 = vmax.f32 %v10757_v29, %v6117_v9  ;;  %v4975_v26 = vmax.f32 %v4683_v48, 0.0  ;;  %v4678_v50 = vadd.f32 %v10236_v40, %v4677_v16  ;;  %v5724_v51 = vadd.f32 %v10236_v40, %v5723_v12 }
 0x2d0   : > { %v6116_v14 = vmax.f32 %v4972_v28, %v6018_v31  ;;  %v6021_v41 = vmax.f32 %v5729_v37, 0.0  ;;  %v7930_v2 = vpop.f32.mrf.mxu0  ;;  %v8085_v43 = vpop.f32.mrf.mxu1  ;;  %v10763_v31 = vld [vmem:[#allocation12_spill] sm:$0xff] }
 0x2d1   : > { %6313 = vst [vmem:[%s10293_s24 + $0x178] sm:$0xff] %v6215_v6  ;;  %v4974_v35 = vmax.f32 %v4678_v50, 0.0  ;;  %v6020_v39 = vmax.f32 %v5724_v51, 0.0  ;;  %v4693_v56 = vadd.f32 %v10236_v40, %v7930_v2  ;;  %v5739_v18 = vadd.f32 %v10236_v40, %v8085_v43  ;;  %v10764_v6 = vld [vmem:[#allocation13_spill] sm:$0xff] }
 0x2d2   : > { %v6214_v27 = vmax.f32 %v10758_v42, %v6116_v14  ;;  %v6119_v0 = vmax.f32 %v4975_v26, %v6021_v41  ;;  %v4687_v20 = vpop.f32.mrf.mxu0  ;;  %v5733_v46 = vpop.f32.mrf.mxu1 }
 0x2d3   : > { %v6118_v3 = vmax.f32 %v4974_v35, %v6020_v39  ;;  %v4977_v8 = vmax.f32 %v4693_v56, 0.0  ;;  %v6023_v54 = vmax.f32 %v5739_v18, 0.0  ;;  %v4688_v32 = vadd.f32 %v10236_v40, %v4687_v20  ;;  %v10765_v39 = vld [vmem:[#allocation14_spill] sm:$0xff] }
 0x2d4   : > { %6312 = vst [vmem:[%s10293_s24 + $0x170] sm:$0xff] %v6214_v27  ;;  %v6217_v15 = vmax.f32 %v10759_v49, %v6119_v0  ;;  %v5734_v58 = vadd.f32 %v10492_v61, %v5733_v46  ;;  %v7933_v60 = vpop.f32.mrf.mxu0  ;;  %v8088_v10 = vpop.f32.mrf.mxu1 }
 0x2d5   : > { %v6216_v30 = vmax.f32 %v10760_v38, %v6118_v3  ;;  %v6121_v5 = vmax.f32 %v4977_v8, %v6023_v54  ;;  %v4976_v55 = vmax.f32 %v4688_v32, 0.0  ;;  %v4703_v40 = vadd.f32 %v10492_v61, %v7933_v60 }
 0x2d6   : > { %6315 = vst [vmem:[%s10293_s24 + $0x188] sm:$0xff] %v6217_v15  ;;  %v6022_v19 = vmax.f32 %v5734_v58, 0.0  ;;  %v5749_v7 = vadd.f32 %v10492_v61, %v8088_v10  ;;  %v4697_v1 = vpop.f32.mrf.mxu0  ;;  %v5743_v53 = vpop.f32.mrf.mxu1  ;;  %v10766_v15 = vld [vmem:[#allocation15_spill] sm:$0xff] }
 0x2d7   : > { %6314 = vst [vmem:[%s10293_s24 + $0x180] sm:$0xff] %v6216_v30  ;;  %v6219_v11 = vmax.f32 %v10761_v4, %v6121_v5  ;;  %v4979_v17 = vmax.f32 %v4703_v40, 0.0  ;;  %v4698_v25 = vadd.f32 %v10492_v61, %v4697_v1  ;;  %v5744_v23 = vadd.f32 %v10492_v61, %v5743_v53 }
 0x2d8   : > { %v6120_v62 = vmax.f32 %v4976_v55, %v6022_v19  ;;  %v6025_v52 = vmax.f32 %v5749_v7, 0.0  ;;  %v7936_v13 = vpop.f32.mrf.mxu0  ;;  %v8091_v24 = vpop.f32.mrf.mxu1  ;;  %v10767_v19 = vld [vmem:[#allocation16_spill] sm:$0xff] }
 0x2d9   : > { %6317 = vst [vmem:[%s10293_s24 + $0x198] sm:$0xff] %v6219_v11  ;;  %v4978_v22 = vmax.f32 %v4698_v25, 0.0  ;;  %v6024_v47 = vmax.f32 %v5744_v23, 0.0  ;;  %v4713_v34 = vadd.f32 %v10492_v61, %v7936_v13  ;;  %v5759_v59 = vadd.f32 %v10492_v61, %v8091_v24  ;;  %v10768_v11 = vld [vmem:[#allocation17_spill] sm:$0xff] }
 0x2da   : > { %v6218_v44 = vmax.f32 %v10762_v21, %v6120_v62  ;;  %v6123_v36 = vmax.f32 %v4979_v17, %v6025_v52  ;;  %v4707_v63 = vpop.f32.mrf.mxu0  ;;  %v5753_v57 = vpop.f32.mrf.mxu1 }
 0x2db   : > { %v6122_v33 = vmax.f32 %v4978_v22, %v6024_v47  ;;  %v4981_v9 = vmax.f32 %v4713_v34, 0.0  ;;  %v6027_v28 = vmax.f32 %v5759_v59, 0.0  ;;  %v4708_v48 = vadd.f32 %v10492_v61, %v4707_v63  ;;  %v10769_v47 = vld [vmem:[#allocation18_spill] sm:$0xff] }
 0x2dc   : > { %6316 = vst [vmem:[%s10293_s24 + $0x190] sm:$0xff] %v6218_v44  ;;  %v6221_v37 = vmax.f32 %v10763_v31, %v6123_v36  ;;  %v5754_v16 = vadd.f32 %v10492_v61, %v5753_v57  ;;  %v7939_v12 = vpop.f32.mrf.mxu0  ;;  %v8094_v29 = vpop.f32.mrf.mxu1 }
 0x2dd   : > { %v6220_v26 = vmax.f32 %v10764_v6, %v6122_v33  ;;  %v6125_v50 = vmax.f32 %v4981_v9, %v6027_v28  ;;  %v4980_v51 = vmax.f32 %v4708_v48, 0.0  ;;  %v4723_v14 = vadd.f32 %v10492_v61, %v7939_v12 }
 0x2de   : > { %6319 = vst [vmem:[%s10293_s24 + $0x1a8] sm:$0xff] %v6221_v37  ;;  %v6026_v41 = vmax.f32 %v5754_v16, 0.0  ;;  %v5769_v2 = vadd.f32 %v10492_v61, %v8094_v29  ;;  %v4717_v43 = vpop.f32.mrf.mxu0  ;;  %v5763_v35 = vpop.f32.mrf.mxu1  ;;  %v10770_v37 = vld [vmem:[#allocation19_spill] sm:$0xff] }
 0x2df   : > { %6318 = vst [vmem:[%s10293_s24 + $0x1a0] sm:$0xff] %v6220_v26  ;;  %v6223_v56 = vmax.f32 %v10765_v39, %v6125_v50  ;;  %v4983_v18 = vmax.f32 %v4723_v14, 0.0  ;;  %v4718_v42 = vadd.f32 %v10492_v61, %v4717_v43  ;;  %v5764_v27 = vadd.f32 %v10492_v61, %v5763_v35 }
 0x2e0   : > { %v6124_v0 = vmax.f32 %v4980_v51, %v6026_v41  ;;  %v6029_v20 = vmax.f32 %v5769_v2, 0.0  ;;  %v7942_v46 = vpop.f32.mrf.mxu0  ;;  %v8097_v3 = vpop.f32.mrf.mxu1  ;;  %v10771_v41 = vld [vmem:[#allocation20_spill] sm:$0xff] }
 0x2e1   : > { %6321 = vst [vmem:[%s10293_s24 + $0x1b8] sm:$0xff] %v6223_v56  ;;  %v4982_v8 = vmax.f32 %v4718_v42, 0.0  ;;  %v6028_v54 = vmax.f32 %v5764_v27, 0.0  ;;  %v4733_v32 = vadd.f32 %v10492_v61, %v7942_v46  ;;  %v5779_v49 = vadd.f32 %v10492_v61, %v8097_v3  ;;  %v10772_v56 = vld [vmem:[#allocation21_spill] sm:$0xff] }
 0x2e2   : > { %v6222_v58 = vmax.f32 %v10766_v15, %v6124_v0  ;;  %v6127_v60 = vmax.f32 %v4983_v18, %v6029_v20  ;;  %v4727_v10 = vpop.f32.mrf.mxu0  ;;  %v5773_v38 = vpop.f32.mrf.mxu1 }
 0x2e3   : > { %v6126_v30 = vmax.f32 %v4982_v8, %v6028_v54  ;;  %v4985_v5 = vmax.f32 %v4733_v32, 0.0  ;;  %v6031_v55 = vmax.f32 %v5779_v49, 0.0  ;;  %v4728_v40 = vadd.f32 %v10492_v61, %v4727_v10  ;;  %v10773_v54 = vld [vmem:[#allocation22_spill] sm:$0xff] }
 0x2e4   : > { %6320 = vst [vmem:[%s10293_s24 + $0x1b0] sm:$0xff] %v6222_v58  ;;  %v6225_v7 = vmax.f32 %v10767_v19, %v6127_v60  ;;  %v5774_v1 = vadd.f32 %v10492_v61, %v5773_v38  ;;  %v7945_v53 = vpop.f32.mrf.mxu0  ;;  %v8100_v4 = vpop.f32.mrf.mxu1 }
 0x2e5   : > { %v6224_v17 = vmax.f32 %v10768_v11, %v6126_v30  ;;  %v6129_v25 = vmax.f32 %v4985_v5, %v6031_v55  ;;  %v4984_v23 = vmax.f32 %v4728_v40, 0.0  ;;  %v4743_v62 = vadd.f32 %v10492_v61, %v7945_v53 }
 0x2e6   : > { %6323 = vst [vmem:[%s10293_s24 + $0x1c8] sm:$0xff] %v6225_v7  ;;  %v6030_v52 = vmax.f32 %v5774_v1, 0.0  ;;  %v5789_v13 = vadd.f32 %v10492_v61, %v8100_v4  ;;  %v4737_v24 = vpop.f32.mrf.mxu0  ;;  %v5783_v22 = vpop.f32.mrf.mxu1  ;;  %v10774_v7 = vld [vmem:[#allocation23_spill] sm:$0xff] }
 0x2e7   : > { %6322 = vst [vmem:[%s10293_s24 + $0x1c0] sm:$0xff] %v6224_v17  ;;  %v6227_v34 = vmax.f32 %v10769_v47, %v6129_v25  ;;  %v4987_v59 = vmax.f32 %v4743_v62, 0.0  ;;  %v4738_v21 = vadd.f32 %v10492_v61, %v4737_v24  ;;  %v5784_v44 = vadd.f32 %v10492_v61, %v5783_v22 }
 0x2e8   : > { %v6128_v36 = vmax.f32 %v4984_v23, %v6030_v52  ;;  %v6033_v63 = vmax.f32 %v5789_v13, 0.0  ;;  %v7948_v57 = vpop.f32.mrf.mxu0  ;;  %v8103_v33 = vpop.f32.mrf.mxu1  ;;  %v10775_v52 = vld [vmem:[#allocation24_spill] sm:$0xff] }
 0x2e9   : > { %6325 = vst [vmem:[%s10293_s24 + $0x1d8] sm:$0xff] %v6227_v34  ;;  %v4986_v9 = vmax.f32 %v4738_v21, 0.0  ;;  %v6032_v28 = vmax.f32 %v5784_v44, 0.0  ;;  %v4753_v48 = vadd.f32 %v10492_v61, %v7948_v57  ;;  %v5799_v31 = vadd.f32 %v10492_v61, %v8103_v33  ;;  %v10776_v34 = vld [vmem:[#allocation25_spill] sm:$0xff] }
 0x2ea   : > { %v6226_v16 = vmax.f32 %v10770_v37, %v6128_v36  ;;  %v6131_v12 = vmax.f32 %v4987_v59, %v6033_v63  ;;  %v4747_v29 = vpop.f32.mrf.mxu0  ;;  %v5793_v6 = vpop.f32.mrf.mxu1 }
 0x2eb   : > { %v6130_v26 = vmax.f32 %v4986_v9, %v6032_v28  ;;  %v4989_v50 = vmax.f32 %v4753_v48, 0.0  ;;  %v6035_v51 = vmax.f32 %v5799_v31, 0.0  ;;  %v4748_v14 = vadd.f32 %v10492_v61, %v4747_v29  ;;  %v10777_v28 = vld [vmem:[#allocation26_spill] sm:$0xff] }
 0x2ec   : > { %6324 = vst [vmem:[%s10293_s24 + $0x1d0] sm:$0xff] %v6226_v16  ;;  %v6229_v2 = vmax.f32 %v10771_v41, %v6131_v12  ;;  %v5794_v43 = vadd.f32 %v10492_v61, %v5793_v6  ;;  %v7951_v35 = vpop.f32.mrf.mxu0  ;;  %v8106_v39 = vpop.f32.mrf.mxu1 }
 0x2ed   : > { %v6228_v18 = vmax.f32 %v10772_v56, %v6130_v26  ;;  %v6133_v42 = vmax.f32 %v4989_v50, %v6035_v51  ;;  %v4988_v27 = vmax.f32 %v4748_v14, 0.0  ;;  %v4763_v0 = vadd.f32 %v10492_v61, %v7951_v35 }
 0x2ee   : > { %6327 = vst [vmem:[%s10293_s24 + $0x1e8] sm:$0xff] %v6229_v2  ;;  %v6034_v20 = vmax.f32 %v5794_v43, 0.0  ;;  %v5809_v46 = vadd.f32 %v10492_v61, %v8106_v39  ;;  %v4757_v3 = vpop.f32.mrf.mxu0  ;;  %v5803_v8 = vpop.f32.mrf.mxu1  ;;  %v10778_v2 = vld [vmem:[#allocation27_spill] sm:$0xff] }
 0x2ef   : > { %6326 = vst [vmem:[%s10293_s24 + $0x1e0] sm:$0xff] %v6228_v18  ;;  %v6231_v32 = vmax.f32 %v10773_v54, %v6133_v42  ;;  %v4991_v49 = vmax.f32 %v4763_v0, 0.0  ;;  %v4758_v15 = vadd.f32 %v10492_v61, %v4757_v3  ;;  %v5804_v58 = vadd.f32 %v10492_v61, %v5803_v8 }
 0x2f0   : > { %v6132_v60 = vmax.f32 %v4988_v27, %v6034_v20  ;;  %v6037_v10 = vmax.f32 %v5809_v46, 0.0  ;;  %v7954_v38 = vpop.f32.mrf.mxu0  ;;  %v8109_v30 = vpop.f32.mrf.mxu1  ;;  %v10779_v20 = vld [vmem:[#allocation28_spill] sm:$0xff] }
 0x2f1   : > { %6329 = vst [vmem:[%s10293_s24 + $0x1f8] sm:$0xff] %v6231_v32  ;;  %v4990_v5 = vmax.f32 %v4758_v15, 0.0  ;;  %v6036_v55 = vmax.f32 %v5804_v58, 0.0  ;;  %v4773_v40 = vadd.f32 %v10492_v61, %v7954_v38  ;;  %v5819_v19 = vadd.f32 %v10492_v61, %v8109_v30  ;;  %v10780_v32 = vld [vmem:[#allocation29_spill] sm:$0xff] }
 0x2f2   : > { %v6230_v1 = vmax.f32 %v10774_v7, %v6132_v60  ;;  %v6135_v53 = vmax.f32 %v4991_v49, %v6037_v10  ;;  %v4767_v4 = vpop.f32.mrf.mxu0  ;;  %v5813_v11 = vpop.f32.mrf.mxu1 }
 0x2f3   : > { %v6134_v17 = vmax.f32 %v4990_v5, %v6036_v55  ;;  %v4993_v25 = vmax.f32 %v4773_v40, 0.0  ;;  %v6039_v23 = vmax.f32 %v5819_v19, 0.0  ;;  %v4768_v62 = vadd.f32 %v10492_v61, %v4767_v4  ;;  %v10781_v55 = vld [vmem:[#allocation30_spill] sm:$0xff] }
 0x2f4   : > { %6328 = vst [vmem:[%s10293_s24 + $0x1f0] sm:$0xff] %v6230_v1  ;;  %v6233_v13 = vmax.f32 %v10775_v52, %v6135_v53  ;;  %v5814_v24 = vadd.f32 %v10492_v61, %v5813_v11  ;;  %v7957_v22 = vpop.f32.mrf.mxu0  ;;  %v8112_v47 = vpop.f32.mrf.mxu1 }
 0x2f5   : > { %v6232_v59 = vmax.f32 %v10776_v34, %v6134_v17  ;;  %v6137_v21 = vmax.f32 %v4993_v25, %v6039_v23  ;;  %v4992_v44 = vmax.f32 %v4768_v62, 0.0  ;;  %v4783_v36 = vadd.f32 %v10492_v61, %v7957_v22 }
 0x2f6   : > { %6331 = vst [vmem:[%s10293_s24 + $0x208] sm:$0xff] %v6233_v13  ;;  %v6038_v63 = vmax.f32 %v5814_v24, 0.0  ;;  %v5829_v57 = vadd.f32 %v10492_v61, %v8112_v47  ;;  %v4777_v33 = vpop.f32.mrf.mxu0  ;;  %v5823_v9 = vpop.f32.mrf.mxu1  ;;  %v10782_v13 = vld [vmem:[#allocation31_spill] sm:$0xff] }
 0x2f7   : > { %6330 = vst [vmem:[%s10293_s24 + $0x200] sm:$0xff] %v6232_v59  ;;  %v6235_v48 = vmax.f32 %v10777_v28, %v6137_v21  ;;  %v4995_v31 = vmax.f32 %v4783_v36, 0.0  ;;  %v4778_v37 = vadd.f32 %v10492_v61, %v4777_v33  ;;  %v5824_v16 = vadd.f32 %v10492_v61, %v5823_v9 }
 0x2f8   : > { %v6136_v12 = vmax.f32 %v4992_v44, %v6038_v63  ;;  %v6041_v29 = vmax.f32 %v5829_v57, 0.0  ;;  %v7960_v6 = vpop.f32.mrf.mxu0  ;;  %v8115_v26 = vpop.f32.mrf.mxu1  ;;  %v10783_v63 = vld [vmem:[#allocation32_spill] sm:$0xff] }
 0x2f9   : > { %6333 = vst [vmem:[%s10293_s24 + $0x218] sm:$0xff] %v6235_v48  ;;  %v4994_v50 = vmax.f32 %v4778_v37, 0.0  ;;  %v6040_v51 = vmax.f32 %v5824_v16, 0.0  ;;  %v4793_v14 = vadd.f32 %v10492_v61, %v7960_v6  ;;  %v5839_v41 = vadd.f32 %v10492_v61, %v8115_v26  ;;  %v10784_v48 = vld [vmem:[#allocation33_spill] sm:$0xff] }
 0x2fa   : > { %v6234_v43 = vmax.f32 %v10778_v2, %v6136_v12  ;;  %v6139_v35 = vmax.f32 %v4995_v31, %v6041_v29  ;;  %v4787_v39 = vpop.f32.mrf.mxu0  ;;  %v5833_v56 = vpop.f32.mrf.mxu1 }
 0x2fb   : > { %v6138_v18 = vmax.f32 %v4994_v50, %v6040_v51  ;;  %v4997_v42 = vmax.f32 %v4793_v14, 0.0  ;;  %v6043_v27 = vmax.f32 %v5839_v41, 0.0  ;;  %v4788_v0 = vadd.f32 %v10492_v61, %v4787_v39  ;;  %v10785_v51 = vld [vmem:[#allocation34_spill] sm:$0xff] }
 0x2fc   : > { %6332 = vst [vmem:[%s10293_s24 + $0x210] sm:$0xff] %v6234_v43  ;;  %v6237_v46 = vmax.f32 %v10779_v20, %v6139_v35  ;;  %v5834_v3 = vadd.f32 %v10492_v61, %v5833_v56  ;;  %v7963_v8 = vpop.f32.mrf.mxu0  ;;  %v8118_v54 = vpop.f32.mrf.mxu1 }
 0x2fd   : > { %v6236_v49 = vmax.f32 %v10780_v32, %v6138_v18  ;;  %v6141_v15 = vmax.f32 %v4997_v42, %v6043_v27  ;;  %v4996_v58 = vmax.f32 %v4788_v0, 0.0  ;;  %v4803_v60 = vadd.f32 %v10492_v61, %v7963_v8 }
 0x2fe   : > { %6335 = vst [vmem:[%s10293_s24 + $0x228] sm:$0xff] %v6237_v46  ;;  %v6042_v10 = vmax.f32 %v5834_v3, 0.0  ;;  %v5849_v38 = vadd.f32 %v10492_v61, %v8118_v54  ;;  %v4797_v30 = vpop.f32.mrf.mxu0  ;;  %v5843_v5 = vpop.f32.mrf.mxu1  ;;  %v10786_v46 = vld [vmem:[#allocation35_spill] sm:$0xff] }
 0x2ff   : > { %6334 = vst [vmem:[%s10293_s24 + $0x220] sm:$0xff] %v6236_v49  ;;  %v6239_v40 = vmax.f32 %v10781_v55, %v6141_v15  ;;  %v4999_v19 = vmax.f32 %v4803_v60, 0.0  ;;  %v4798_v7 = vadd.f32 %v10492_v61, %v4797_v30  ;;  %v5844_v1 = vadd.f32 %v10492_v61, %v5843_v5 }
 0x300   : > { %v6140_v53 = vmax.f32 %v4996_v58, %v6042_v10  ;;  %v6045_v4 = vmax.f32 %v5849_v38, 0.0  ;;  %v7966_v11 = vpop.f32.mrf.mxu0  ;;  %v8121_v17 = vpop.f32.mrf.mxu1  ;;  %v10787_v10 = vld [vmem:[#allocation36_spill] sm:$0xff] }
 0x301   : > { %6337 = vst [vmem:[%s10293_s24 + $0x238] sm:$0xff] %v6239_v40  ;;  %v4998_v25 = vmax.f32 %v4798_v7, 0.0  ;;  %v6044_v23 = vmax.f32 %v5844_v1, 0.0  ;;  %v4813_v62 = vadd.f32 %v10492_v61, %v7966_v11  ;;  %v5859_v52 = vadd.f32 %v10492_v61, %v8121_v17  ;;  %v10788_v40 = vld [vmem:[#allocation37_spill] sm:$0xff] }
 0x302   : > { %v6238_v24 = vmax.f32 %v10782_v13, %v6140_v53  ;;  %v6143_v22 = vmax.f32 %v4999_v19, %v6045_v4  ;;  %v4807_v47 = vpop.f32.mrf.mxu0  ;;  %v5853_v34 = vpop.f32.mrf.mxu1 }
 0x303   : > { %v6142_v59 = vmax.f32 %v4998_v25, %v6044_v23  ;;  %v5001_v21 = vmax.f32 %v4813_v62, 0.0  ;;  %v6047_v44 = vmax.f32 %v5859_v52, 0.0  ;;  %v4808_v36 = vadd.f32 %v10492_v61, %v4807_v47  ;;  %v10789_v23 = vld [vmem:[#allocation38_spill] sm:$0xff] }
 0x304   : > { %6336 = vst [vmem:[%s10293_s24 + $0x230] sm:$0xff] %v6238_v24  ;;  %v6241_v57 = vmax.f32 %v10783_v63, %v6143_v22  ;;  %v5854_v33 = vadd.f32 %v10492_v61, %v5853_v34  ;;  %v7969_v9 = vpop.f32.mrf.mxu0  ;;  %v8124_v28 = vpop.f32.mrf.mxu1 }
 0x305   : > { %v6240_v31 = vmax.f32 %v10784_v48, %v6142_v59  ;;  %v6145_v37 = vmax.f32 %v5001_v21, %v6047_v44  ;;  %v5000_v16 = vmax.f32 %v4808_v36, 0.0  ;;  %v4823_v12 = vadd.f32 %v10492_v61, %v7969_v9 }
 0x306   : > { %6339 = vst [vmem:[%s10293_s24 + $0x248] sm:$0xff] %v6241_v57  ;;  %v6046_v29 = vmax.f32 %v5854_v33, 0.0  ;;  %v5869_v6 = vadd.f32 %v10492_v61, %v8124_v28  ;;  %v4817_v26 = vpop.f32.mrf.mxu0  ;;  %v5863_v50 = vpop.f32.mrf.mxu1  ;;  %v10790_v57 = vld [vmem:[#allocation39_spill] sm:$0xff] }
 0x307   : > { %6338 = vst [vmem:[%s10293_s24 + $0x240] sm:$0xff] %v6240_v31  ;;  %v6243_v14 = vmax.f32 %v10785_v51, %v6145_v37  ;;  %v5003_v41 = vmax.f32 %v4823_v12, 0.0  ;;  %v4818_v2 = vadd.f32 %v10492_v61, %v4817_v26  ;;  %v5864_v43 = vadd.f32 %v10492_v61, %v5863_v50 }
 0x308   : > { %v6144_v35 = vmax.f32 %v5000_v16, %v6046_v29  ;;  %v6049_v39 = vmax.f32 %v5869_v6, 0.0  ;;  %v7972_v56 = vpop.f32.mrf.mxu0  ;;  %v8127_v18 = vpop.f32.mrf.mxu1  ;;  %v10791_v29 = vld [vmem:[#allocation40_spill] sm:$0xff] }
 0x309   : > { %6341 = vst [vmem:[%s10293_s24 + $0x258] sm:$0xff] %v6243_v14  ;;  %v5002_v42 = vmax.f32 %v4818_v2, 0.0  ;;  %v6048_v27 = vmax.f32 %v5864_v43, 0.0  ;;  %v4833_v0 = vadd.f32 %v10492_v61, %v7972_v56  ;;  %v5879_v20 = vadd.f32 %v10492_v61, %v8127_v18  ;;  %v10792_v14 = vld [vmem:[#allocation41_spill] sm:$0xff] }
 0x30a   : > { %v6242_v3 = vmax.f32 %v10786_v46, %v6144_v35  ;;  %v6147_v8 = vmax.f32 %v5003_v41, %v6049_v39  ;;  %v4827_v54 = vpop.f32.mrf.mxu0  ;;  %v5873_v32 = vpop.f32.mrf.mxu1 }
 0x30b   : > { %v6146_v49 = vmax.f32 %v5002_v42, %v6048_v27  ;;  %v5005_v15 = vmax.f32 %v4833_v0, 0.0  ;;  %v6051_v58 = vmax.f32 %v5879_v20, 0.0  ;;  %v4828_v60 = vadd.f32 %v10492_v61, %v4827_v54  ;;  %v10793_v27 = vld [vmem:[#allocation42_spill] sm:$0xff] }
 0x30c   : > { %6340 = vst [vmem:[%s10293_s24 + $0x250] sm:$0xff] %v6242_v3  ;;  %v6245_v38 = vmax.f32 %v10787_v10, %v6147_v8  ;;  %v5874_v30 = vadd.f32 %v10492_v61, %v5873_v32  ;;  %v7975_v5 = vpop.f32.mrf.mxu0  ;;  %v8130_v55 = vpop.f32.mrf.mxu1 }
 0x30d   : > { %v6244_v19 = vmax.f32 %v10788_v40, %v6146_v49  ;;  %v6149_v7 = vmax.f32 %v5005_v15, %v6051_v58  ;;  %v5004_v1 = vmax.f32 %v4828_v60, 0.0  ;;  %v4843_v53 = vadd.f32 %v10492_v61, %v7975_v5 }
 0x30e   : > { %6343 = vst [vmem:[%s10293_s24 + $0x268] sm:$0xff] %v6245_v38  ;;  %v6050_v4 = vmax.f32 %v5874_v30, 0.0  ;;  %v5889_v11 = vadd.f32 %v10492_v61, %v8130_v55  ;;  %v4837_v17 = vpop.f32.mrf.mxu0  ;;  %v5883_v25 = vpop.f32.mrf.mxu1  ;;  %v10794_v38 = vld [vmem:[#allocation43_spill] sm:$0xff] }
 0x30f   : > { %6342 = vst [vmem:[%s10293_s24 + $0x260] sm:$0xff] %v6244_v19  ;;  %v6247_v62 = vmax.f32 %v10789_v23, %v6149_v7  ;;  %v5007_v52 = vmax.f32 %v4843_v53, 0.0  ;;  %v4838_v13 = vadd.f32 %v10492_v61, %v4837_v17  ;;  %v5884_v24 = vadd.f32 %v10492_v61, %v5883_v25 }
 0x310   : > { %v6148_v22 = vmax.f32 %v5004_v1, %v6050_v4  ;;  %v6053_v47 = vmax.f32 %v5889_v11, 0.0  ;;  %v7978_v34 = vpop.f32.mrf.mxu0  ;;  %v8133_v59 = vpop.f32.mrf.mxu1  ;;  %v10795_v4 = vld [vmem:[#allocation44_spill] sm:$0xff] }
 0x311   : > { %6345 = vst [vmem:[%s10293_s24 + $0x278] sm:$0xff] %v6247_v62  ;;  %v5006_v21 = vmax.f32 %v4838_v13, 0.0  ;;  %v6052_v44 = vmax.f32 %v5884_v24, 0.0  ;;  %v4853_v36 = vadd.f32 %v10492_v61, %v7978_v34  ;;  %v5899_v63 = vadd.f32 %v10492_v61, %v8133_v59  ;;  %v10796_v62 = vld [vmem:[#allocation45_spill] sm:$0xff] }
 0x312   : > { %v6246_v33 = vmax.f32 %v10790_v57, %v6148_v22  ;;  %v6151_v9 = vmax.f32 %v5007_v52, %v6053_v47  ;;  %v4847_v28 = vpop.f32.mrf.mxu0  ;;  %v5893_v48 = vpop.f32.mrf.mxu1 }
 0x313   : > { %v6150_v31 = vmax.f32 %v5006_v21, %v6052_v44  ;;  %v5009_v37 = vmax.f32 %v4853_v36, 0.0  ;;  %v6055_v16 = vmax.f32 %v5899_v63, 0.0  ;;  %v4848_v12 = vadd.f32 %v10492_v61, %v4847_v28  ;;  %v10797_v44 = vld [vmem:[#allocation46_spill] sm:$0xff] }
 0x314   : > { %6344 = vst [vmem:[%s10293_s24 + $0x270] sm:$0xff] %v6246_v33  ;;  %v6249_v6 = vmax.f32 %v10791_v29, %v6151_v9  ;;  %v5894_v26 = vadd.f32 %v10492_v61, %v5893_v48  ;;  %v7981_v50 = vpop.f32.mrf.mxu0  ;;  %v8136_v51 = vpop.f32.mrf.mxu1 }
 0x315   : > { %v6248_v41 = vmax.f32 %v10792_v14, %v6150_v31  ;;  %v6153_v2 = vmax.f32 %v5009_v37, %v6055_v16  ;;  %v5008_v43 = vmax.f32 %v4848_v12, 0.0  ;;  %v4863_v35 = vadd.f32 %v10492_v61, %v7981_v50 }
 0x316   : > { %6347 = vst [vmem:[%s10293_s24 + $0x288] sm:$0xff] %v6249_v6  ;;  %v6054_v39 = vmax.f32 %v5894_v26, 0.0  ;;  %v5909_v56 = vadd.f32 %v10492_v61, %v8136_v51  ;;  %v4857_v18 = vpop.f32.mrf.mxu0  ;;  %v5903_v42 = vpop.f32.mrf.mxu1  ;;  %v10798_v6 = vld [vmem:[#allocation47_spill] sm:$0xff] }
 0x317   : > { %6346 = vst [vmem:[%s10293_s24 + $0x280] sm:$0xff] %v6248_v41  ;;  %v6251_v0 = vmax.f32 %v10793_v27, %v6153_v2  ;;  %v5011_v20 = vmax.f32 %v4863_v35, 0.0  ;;  %v4858_v46 = vadd.f32 %v10492_v61, %v4857_v18  ;;  %v5904_v3 = vadd.f32 %v10492_v61, %v5903_v42 }
 0x318   : > { %v6152_v8 = vmax.f32 %v5008_v43, %v6054_v39  ;;  %v6057_v54 = vmax.f32 %v5909_v56, 0.0  ;;  %v7984_v32 = vpop.f32.mrf.mxu0  ;;  %v8139_v49 = vpop.f32.mrf.mxu1  ;;  %v10799_v39 = vld [vmem:[#allocation48_spill] sm:$0xff] }
 0x319   : > { %6349 = vst [vmem:[%s10293_s24 + $0x298] sm:$0xff] %v6251_v0  ;;  %v5010_v15 = vmax.f32 %v4858_v46, 0.0  ;;  %v6056_v58 = vmax.f32 %v5904_v3, 0.0  ;;  %v4873_v60 = vadd.f32 %v10492_v61, %v7984_v32  ;;  %v5919_v10 = vadd.f32 %v10492_v61, %v8139_v49  ;;  %v10800_v0 = vld [vmem:[#allocation49_spill] sm:$0xff] }
 0x31a   : > { %v6250_v30 = vmax.f32 %v10794_v38, %v6152_v8  ;;  %v6155_v5 = vmax.f32 %v5011_v20, %v6057_v54  ;;  %v4867_v55 = vpop.f32.mrf.mxu0  ;;  %v5913_v40 = vpop.f32.mrf.mxu1 }
 0x31b   : > { %v6154_v19 = vmax.f32 %v5010_v15, %v6056_v58  ;;  %v5013_v7 = vmax.f32 %v4873_v60, 0.0  ;;  %v6059_v1 = vmax.f32 %v5919_v10, 0.0  ;;  %v4868_v53 = vadd.f32 %v10492_v61, %v4867_v55  ;;  %v10801_v58 = vld [vmem:[#allocation50_spill] sm:$0xff] }
 0x31c   : > { %6348 = vst [vmem:[%s10293_s24 + $0x290] sm:$0xff] %v6250_v30  ;;  %v6253_v11 = vmax.f32 %v10795_v4, %v6155_v5  ;;  %v5914_v17 = vadd.f32 %v10492_v61, %v5913_v40  ;;  %v7987_v25 = vpop.f32.mrf.mxu0  ;;  %v8142_v23 = vpop.f32.mrf.mxu1 }
 0x31d   : > { %v6252_v52 = vmax.f32 %v10796_v62, %v6154_v19  ;;  %v6157_v13 = vmax.f32 %v5013_v7, %v6059_v1  ;;  %v5012_v24 = vmax.f32 %v4868_v53, 0.0  ;;  %v4883_v22 = vadd.f32 %v10492_v61, %v7987_v25 }
 0x31e   : > { %6351 = vst [vmem:[%s10293_s24 + $0x2a8] sm:$0xff] %v6253_v11  ;;  %v6058_v47 = vmax.f32 %v5914_v17, 0.0  ;;  %v5929_v34 = vadd.f32 %v10492_v61, %v8142_v23  ;;  %v4877_v59 = vpop.f32.mrf.mxu0  ;;  %v5923_v21 = vpop.f32.mrf.mxu1  ;;  %v10802_v11 = vld [vmem:[#allocation51_spill] sm:$0xff] }
 0x31f   : > { %6350 = vst [vmem:[%s10293_s24 + $0x2a0] sm:$0xff] %v6252_v52  ;;  %v6255_v36 = vmax.f32 %v10797_v44, %v6157_v13  ;;  %v5015_v63 = vmax.f32 %v4883_v22, 0.0  ;;  %v4878_v57 = vadd.f32 %v10492_v61, %v4877_v59  ;;  %v5924_v33 = vadd.f32 %v10492_v61, %v5923_v21 }
 0x320   : > { %v6156_v9 = vmax.f32 %v5012_v24, %v6058_v47  ;;  %v6061_v28 = vmax.f32 %v5929_v34, 0.0  ;;  %v7990_v48 = vpop.f32.mrf.mxu0  ;;  %v8145_v31 = vpop.f32.mrf.mxu1  ;;  %v10803_v47 = vld [vmem:[#allocation52_spill] sm:$0xff] }
 0x321   : > { %6353 = vst [vmem:[%s10293_s24 + $0x2b8] sm:$0xff] %v6255_v36  ;;  %v5014_v37 = vmax.f32 %v4878_v57, 0.0  ;;  %v6060_v16 = vmax.f32 %v5924_v33, 0.0  ;;  %v4893_v12 = vadd.f32 %v10492_v61, %v7990_v48  ;;  %v5939_v29 = vadd.f32 %v10492_v61, %v8145_v31  ;;  %v10804_v36 = vld [vmem:[#allocation53_spill] sm:$0xff] }
 0x322   : > { %v6254_v26 = vmax.f32 %v10798_v6, %v6156_v9  ;;  %v6159_v50 = vmax.f32 %v5015_v63, %v6061_v28  ;;  %v4887_v51 = vpop.f32.mrf.mxu0  ;;  %v5933_v14 = vpop.f32.mrf.mxu1 }
 0x323   : > { %v6158_v41 = vmax.f32 %v5014_v37, %v6060_v16  ;;  %v5017_v2 = vmax.f32 %v4893_v12, 0.0  ;;  %v6063_v43 = vmax.f32 %v5939_v29, 0.0  ;;  %v4888_v35 = vadd.f32 %v10492_v61, %v4887_v51  ;;  %v10805_v16 = vld [vmem:[#allocation54_spill] sm:$0xff] }
 0x324   : > { %6352 = vst [vmem:[%s10293_s24 + $0x2b0] sm:$0xff] %v6254_v26  ;;  %v6257_v56 = vmax.f32 %v10799_v39, %v6159_v50  ;;  %v5934_v18 = vadd.f32 %v10492_v61, %v5933_v14  ;;  %v7993_v42 = vpop.f32.mrf.mxu0  ;;  %v8148_v27 = vpop.f32.mrf.mxu1 }
 0x325   : > { %v6256_v20 = vmax.f32 %v10800_v0, %v6158_v41  ;;  %v6161_v46 = vmax.f32 %v5017_v2, %v6063_v43  ;;  %v5016_v3 = vmax.f32 %v4888_v35, 0.0  ;;  %v4903_v8 = vadd.f32 %v10492_v61, %v7993_v42  ;;  %v10806_v2 = vld [vmem:[#allocation55_spill] sm:$0xff] }
 0x326   : > { %6355 = vst [vmem:[%s10293_s24 + $0x2c8] sm:$0xff] %v6257_v56  ;;  %v6062_v54 = vmax.f32 %v5934_v18, 0.0  ;;  %v5949_v32 = vadd.f32 %v10492_v61, %v8148_v27  ;;  %v4897_v49 = vpop.f32.mrf.mxu0  ;;  %v5943_v15 = vpop.f32.mrf.mxu1  ;;  %v10807_v56 = vld [vmem:[#allocation56_spill] sm:$0xff] }
 0x327   : > { %6354 = vst [vmem:[%s10293_s24 + $0x2c0] sm:$0xff] %v6256_v20  ;;  %v6259_v60 = vmax.f32 %v10801_v58, %v6161_v46  ;;  %v5019_v10 = vmax.f32 %v4903_v8, 0.0  ;;  %v4898_v38 = vadd.f32 %v10492_v61, %v4897_v49  ;;  %v5944_v30 = vadd.f32 %v10492_v61, %v5943_v15 }
 0x328   : > { %v6160_v5 = vmax.f32 %v5016_v3, %v6062_v54  ;;  %v6065_v55 = vmax.f32 %v5949_v32, 0.0  ;;  %v7996_v40 = vpop.f32.mrf.mxu0  ;;  %v8151_v19 = vpop.f32.mrf.mxu1 }
 0x329   : > { %6357 = vst [vmem:[%s10293_s24 + $0x2d8] sm:$0xff] %v6259_v60  ;;  %v5018_v7 = vmax.f32 %v4898_v38, 0.0  ;;  %v6064_v1 = vmax.f32 %v5944_v30, 0.0  ;;  %v4913_v53 = vadd.f32 %v10492_v61, %v7996_v40  ;;  %v5959_v4 = vadd.f32 %v10492_v61, %v8151_v19 }
 0x32a   : > { %v6258_v17 = vmax.f32 %v10802_v11, %v6160_v5  ;;  %v6163_v25 = vmax.f32 %v5019_v10, %v6065_v55  ;;  %v4907_v23 = vpop.f32.mrf.mxu0  ;;  %v5953_v62 = vpop.f32.mrf.mxu1 }
 0x32b   : > { %v6162_v52 = vmax.f32 %v5018_v7, %v6064_v1  ;;  %v5021_v13 = vmax.f32 %v4913_v53, 0.0  ;;  %v6067_v24 = vmax.f32 %v5959_v4, 0.0  ;;  %v4908_v22 = vadd.f32 %v10492_v61, %v4907_v23 }
 0x32c   : > { %6356 = vst [vmem:[%s10293_s24 + $0x2d0] sm:$0xff] %v6258_v17  ;;  %v6261_v34 = vmax.f32 %v10803_v47, %v6163_v25  ;;  %v5954_v59 = vadd.f32 %v10492_v61, %v5953_v62  ;;  %v7999_v21 = vpop.f32.mrf.mxu0  ;;  %v8154_v44 = vpop.f32.mrf.mxu1 }
 0x32d   : > { %v6260_v63 = vmax.f32 %v10804_v36, %v6162_v52  ;;  %v6165_v57 = vmax.f32 %v5021_v13, %v6067_v24  ;;  %v5020_v33 = vmax.f32 %v4908_v22, 0.0  ;;  %v4923_v9 = vadd.f32 %v10492_v61, %v7999_v21 }
 0x32e   : > { %6359 = vst [vmem:[%s10293_s24 + $0x2e8] sm:$0xff] %v6261_v34  ;;  %v6066_v28 = vmax.f32 %v5954_v59, 0.0  ;;  %v5969_v48 = vadd.f32 %v10492_v61, %v8154_v44  ;;  %v4917_v31 = vpop.f32.mrf.mxu0  ;;  %v5963_v37 = vpop.f32.mrf.mxu1 }
 0x32f   : > { %6358 = vst [vmem:[%s10293_s24 + $0x2e0] sm:$0xff] %v6260_v63  ;;  %v6263_v12 = vmax.f32 %v10805_v16, %v6165_v57  ;;  %v5023_v29 = vmax.f32 %v4923_v9, 0.0  ;;  %v4918_v6 = vadd.f32 %v10492_v61, %v4917_v31  ;;  %v5964_v26 = vadd.f32 %v10492_v61, %v5963_v37 }
 0x330   : > { %v6164_v50 = vmax.f32 %v5020_v33, %v6066_v28  ;;  %v6069_v51 = vmax.f32 %v5969_v48, 0.0 }
 0x331   : > { %6361 = vst [vmem:[%s10293_s24 + $0x2f8] sm:$0xff] %v6263_v12  ;;  %v5022_v14 = vmax.f32 %v4918_v6, 0.0  ;;  %v6068_v41 = vmax.f32 %v5964_v26, 0.0 }
 0x332   : > { %v6262_v43 = vmax.f32 %v10806_v2, %v6164_v50  ;;  %v6167_v35 = vmax.f32 %v5023_v29, %v6069_v51 }
 0x333   : > { %v6166_v39 = vmax.f32 %v5022_v14, %v6068_v41 }
 0x334   : > { %6360 = vst [vmem:[%s10293_s24 + $0x2f0] sm:$0xff] %v6262_v43  ;;  %v6265_v18 = vmax.f32 %v10807_v56, %v6167_v35 }
 0x335   : > { %v6264_v42 = vmax.f32 %v10284_v45, %v6166_v39 }
 0x336   : > { %6363 = vst [vmem:[%s10293_s24 + $0x308] sm:$0xff] %v6265_v18 }
 0x337   : > { %6362 = vst [vmem:[%s10293_s24 + $0x300] sm:$0xff] %v6264_v42 }
 0x338 PF: > { %p10_p9 = scmp.ge.s32.totalorder %s8245_s16, 4   ;;  %s10808_s12 = smov %s8202_s13 }
 0x339   : > { %s10809_s13 = smov %s8254_s19  ;;  %s10810_s14 = smov %s8245_s16 }
 0x33a   :  { %12 = sbr.rel (!%p10_p9) target bundleno = 2 (0x2), region = 108 }

// kernel: lenet_forward.3
= control target key start
LH: loop header
LB: loop body
LE: loop exit
PB: predicated region body
PF: predicated region fallthrough
CT: control target
= control target key end

     0   :  { %vm191_vm0 = vcmask 1045504   ;;  %vm82_vm1 = vcmask 441344   ;;  %vm5341_vm2 = vmmov 0   ;;  %s8284_s1 = inlined_call_operand.vmem [shape: f32[54,128], index: 1, kind: input, shape index: {}]   ;;  %s8285_s0 = inlined_call_operand.vmem [shape: f32[4,288,54], index: 0, kind: input, shape index: {}]   ;;  %s8286_s3 = inlined_call_operand.vmem [shape: f32[4608,128], index: 3, kind: input, shape index: {}]   ;;  %s8287_s2 = inlined_call_operand.vmem [shape: f32[1,128], index: 2, kind: input, shape index: {}]   ;;  %s8288_s5 = inlined_call_operand.vmem [shape: f32[128,128], index: 5, kind: input, shape index: {}]   ;;  %s8289_s7 = inlined_call_operand.vmem [shape: f32[128,128], index: 7, kind: input, shape index: {}]   ;;  %s8290_s4 = inlined_call_operand.vmem [shape: f32[1,128], index: 4, kind: input, shape index: {}]   ;;  %s8291_s6 = inlined_call_operand.vmem [shape: f32[1,128], index: 6, kind: input, shape index: {}]   ;;  %s8292_s8 = inlined_call_operand.vmem [shape: f32[1,128], index: 8, kind: input, shape index: {}]   ;;  %s8293_s9 = inlined_call_operand.vmem [shape: f32[8,128], index: 9, kind: output, shape index: {}]  }
   0x1   :  { %v38_v0 = vld [vmem:[%s8284_s1 + $0x30] sm:$0x3f]  ;;  %v5398_v1 = vld [vmem:[%s8284_s1 + $0x28] sm:$0xff]  ;;  %v5407_v2 = vld [vmem:[%s8284_s1 + $0x20] sm:$0xff] }
   0x2   :  { %4994 = vmatprep.subr.msk.mxu0 %vm191_vm0, %v38_v0  ;;  %5062 = vmatprep.subr.msk.mxu1 %vm191_vm0, %v38_v0  ;;  %v5416_v3 = vld [vmem:[%s8284_s1 + $0x18] sm:$0xff]  ;;  %v5425_v4 = vld [vmem:[%s8284_s1 + $0x10] sm:$0xff]  ;;  %v5434_v5 = vld [vmem:[%s8284_s1 + $0x8] sm:$0xff] }
   0x3   :  { %4995 = vmatpush3.msk.msra.mxu0 %vm191_vm0, %v38_v0  ;;  %5063 = vmatpush3.msk.msra.mxu1 %vm191_vm0, %v38_v0  ;;  %v5443_v6 = vld [vmem:[%s8284_s1] sm:$0xff]  ;;  %v41_v9 = vld [vmem:[%s8285_s0 + $0x8] sm:$0xff]  ;;  %v42_v11 = vld [vmem:[%s8285_s0 + $0x10] sm:$0xff] }
   0x4   :  { %4996 = vmatprep.subr.mxu0 %v5398_v1  ;;  %5064 = vmatprep.subr.mxu1 %v5398_v1  ;;  %v40_v7 = vld [vmem:[%s8285_s0] sm:$0xff]  ;;  %v3937_v10 = vld [vmem:[%s8285_s0 + $0x128] sm:$0xff]  ;;  %v3938_v12 = vld [vmem:[%s8285_s0 + $0x130] sm:$0xff] }
   0x5   :  { %4997 = vmatpush3.msra.mxu0 %v5398_v1  ;;  %5065 = vmatpush3.msra.mxu1 %v5398_v1  ;;  %v3936_v8 = vld [vmem:[%s8285_s0 + $0x120] sm:$0xff]  ;;  %v43_v13 = vld [vmem:[%s8285_s0 + $0x18] sm:$0xff]  ;;  %v45_v17 = vld [vmem:[%s8285_s0 + $0x28] sm:$0xff] }
   0x6   :  { %4998 = vmatprep.subr.mxu0 %v5407_v2  ;;  %5066 = vmatprep.subr.mxu1 %v5407_v2  ;;  %v3939_v14 = vld [vmem:[%s8285_s0 + $0x138] sm:$0xff]  ;;  %v44_v15 = vld [vmem:[%s8285_s0 + $0x20] sm:$0xff]  ;;  %v3941_v18 = vld [vmem:[%s8285_s0 + $0x148] sm:$0xff] }
   0x7   :  { %4999 = vmatpush3.msra.mxu0 %v5407_v2  ;;  %5067 = vmatpush3.msra.mxu1 %v5407_v2  ;;  %v3940_v16 = vld [vmem:[%s8285_s0 + $0x140] sm:$0xff]  ;;  %v46_v19 = vld [vmem:[%s8285_s0 + $0x30] sm:$0xff]  ;;  %v47_v21 = vld [vmem:[%s8285_s0 + $0x38] sm:$0xff] }
   0x8   :  { %5000 = vmatprep.subr.mxu0 %v5416_v3  ;;  %5068 = vmatprep.subr.mxu1 %v5416_v3  ;;  %v3942_v20 = vld [vmem:[%s8285_s0 + $0x150] sm:$0xff]  ;;  %v3943_v22 = vld [vmem:[%s8285_s0 + $0x158] sm:$0xff]  ;;  %v48_v23 = vld [vmem:[%s8285_s0 + $0x40] sm:$0xff] }
   0x9   :  { %5001 = vmatpush3.msra.mxu0 %v5416_v3  ;;  %5069 = vmatpush3.msra.mxu1 %v5416_v3  ;;  %v3944_v24 = vld [vmem:[%s8285_s0 + $0x160] sm:$0xff]  ;;  %v49_v25 = vld [vmem:[%s8285_s0 + $0x48] sm:$0xff]  ;;  %v50_v27 = vld [vmem:[%s8285_s0 + $0x50] sm:$0xff] }
   0xa   :  { %5002 = vmatprep.subr.mxu0 %v5425_v4  ;;  %5070 = vmatprep.subr.mxu1 %v5425_v4  ;;  %v3945_v26 = vld [vmem:[%s8285_s0 + $0x168] sm:$0xff]  ;;  %v3946_v28 = vld [vmem:[%s8285_s0 + $0x170] sm:$0xff]  ;;  %v51_v29 = vld [vmem:[%s8285_s0 + $0x58] sm:$0xff] }
   0xb   :  { %5003 = vmatpush3.msra.mxu0 %v5425_v4  ;;  %5071 = vmatpush3.msra.mxu1 %v5425_v4  ;;  %v3947_v30 = vld [vmem:[%s8285_s0 + $0x178] sm:$0xff]  ;;  %v52_v31 = vld [vmem:[%s8285_s0 + $0x60] sm:$0xff]  ;;  %v53_v33 = vld [vmem:[%s8285_s0 + $0x68] sm:$0xff] }
   0xc   :  { %5004 = vmatprep.subr.mxu0 %v5434_v5  ;;  %5072 = vmatprep.subr.mxu1 %v5434_v5  ;;  %v3948_v32 = vld [vmem:[%s8285_s0 + $0x180] sm:$0xff]  ;;  %v3949_v34 = vld [vmem:[%s8285_s0 + $0x188] sm:$0xff]  ;;  %v54_v35 = vld [vmem:[%s8285_s0 + $0x70] sm:$0xff] }
   0xd   :  { %5005 = vmatpush3.msra.mxu0 %v5434_v5  ;;  %5073 = vmatpush3.msra.mxu1 %v5434_v5  ;;  %v3950_v36 = vld [vmem:[%s8285_s0 + $0x190] sm:$0xff]  ;;  %v55_v37 = vld [vmem:[%s8285_s0 + $0x78] sm:$0xff]  ;;  %v56_v39 = vld [vmem:[%s8285_s0 + $0x80] sm:$0xff] }
   0xe   :  { %5006 = vmatprep.subr.mxu0 %v5443_v6  ;;  %5074 = vmatprep.subr.mxu1 %v5443_v6  ;;  %v3951_v38 = vld [vmem:[%s8285_s0 + $0x198] sm:$0xff]  ;;  %v3952_v40 = vld [vmem:[%s8285_s0 + $0x1a0] sm:$0xff]  ;;  %v57_v41 = vld [vmem:[%s8285_s0 + $0x88] sm:$0xff] }
   0xf   :  { %5007 = vmatpush3.msra.mxu0 %v5443_v6  ;;  %5008 = vmatprep.mubr.msk.f32.mxu0 %vm82_vm1, %v40_v7  ;;  %v3953_v42 = vld [vmem:[%s8285_s0 + $0x1a8] sm:$0xff]  ;;  %v58_v43 = vld [vmem:[%s8285_s0 + $0x90] sm:$0xff]  ;;  %v59_v45 = vld [vmem:[%s8285_s0 + $0x98] sm:$0xff] }
  0x10   :  { %5075 = vmatpush3.msra.mxu1 %v5443_v6  ;;  %5076 = vmatprep.mubr.msk.f32.mxu1 %vm82_vm1, %v3936_v8  ;;  %v3954_v44 = vld [vmem:[%s8285_s0 + $0x1b0] sm:$0xff]  ;;  %v3955_v46 = vld [vmem:[%s8285_s0 + $0x1b8] sm:$0xff]  ;;  %v60_v47 = vld [vmem:[%s8285_s0 + $0xa0] sm:$0xff] }
  0x11   :  { %5009 = vmatmul.mubr.msk.f32.vlgmr.msra.gmra.mxu0 %vm82_vm1, %v41_v9  ;;  %5077 = vmatmul.mubr.msk.f32.vlgmr.msra.gmra.mxu1 %vm82_vm1, %v3937_v10  ;;  %v3956_v48 = vld [vmem:[%s8285_s0 + $0x1c0] sm:$0xff]  ;;  %v61_v49 = vld [vmem:[%s8285_s0 + $0xa8] sm:$0xff]  ;;  %v62_v51 = vld [vmem:[%s8285_s0 + $0xb0] sm:$0xff] }
  0x12   :  { %5130 = vmatprep.subr.msk.mxu0 %vm191_vm0, %v38_v0  ;;  %5198 = vmatprep.subr.msk.mxu1 %vm191_vm0, %v38_v0  ;;  %v3957_v50 = vld [vmem:[%s8285_s0 + $0x1c8] sm:$0xff]  ;;  %v3958_v52 = vld [vmem:[%s8285_s0 + $0x1d0] sm:$0xff]  ;;  %v63_v53 = vld [vmem:[%s8285_s0 + $0xb8] sm:$0xff] }
  0x13   :  { %5131 = vmatpush3.msk.msra.mxu0 %vm191_vm0, %v38_v0  ;;  %5199 = vmatpush3.msk.msra.mxu1 %vm191_vm0, %v38_v0  ;;  %v3959_v54 = vld [vmem:[%s8285_s0 + $0x1d8] sm:$0xff]  ;;  %v64_v55 = vld [vmem:[%s8285_s0 + $0xc0] sm:$0xff]  ;;  %v65_v57 = vld [vmem:[%s8285_s0 + $0xc8] sm:$0xff] }
  0x14   :  { %5011 = vmatprep.mubr.msk.f32.mxu0 %vm82_vm1, %v42_v11  ;;  %5079 = vmatprep.mubr.msk.f32.mxu1 %vm82_vm1, %v3938_v12  ;;  %v3960_v56 = vld [vmem:[%s8285_s0 + $0x1e0] sm:$0xff]  ;;  %v3961_v58 = vld [vmem:[%s8285_s0 + $0x1e8] sm:$0xff]  ;;  %v66_v59 = vld [vmem:[%s8285_s0 + $0xd0] sm:$0xff] }
  0x15   :  { %5012 = vmatmul.mubr.msk.f32.gmra.mxu0 %vm82_vm1, %v43_v13  ;;  %5080 = vmatmul.mubr.msk.f32.gmra.mxu1 %vm82_vm1, %v3939_v14  ;;  %v3962_v60 = vld [vmem:[%s8285_s0 + $0x1f0] sm:$0xff]  ;;  %v67_v61 = vld [vmem:[%s8285_s0 + $0xd8] sm:$0xff]  ;;  %v68_v63 = vld [vmem:[%s8285_s0 + $0xe0] sm:$0xff] }
  0x16   :  { %5014 = vmatprep.mubr.msk.f32.mxu0 %vm82_vm1, %v44_v15  ;;  %5082 = vmatprep.mubr.msk.f32.mxu1 %vm82_vm1, %v3940_v16  ;;  %v3963_v62 = vld [vmem:[%s8285_s0 + $0x1f8] sm:$0xff]  ;;  %v3964_v0 = vld [vmem:[%s8285_s0 + $0x200] sm:$0xff]  ;;  %v73_v9 = vld [vmem:[%s8285_s0 + $0x108] sm:$0xff] }
  0x17   :  { %5132 = vmatprep.subr.mxu0 %v5398_v1  ;;  %5200 = vmatprep.subr.mxu1 %v5398_v1  ;;  %v72_v7 = vld [vmem:[%s8285_s0 + $0x100] sm:$0xff]  ;;  %v3969_v10 = vld [vmem:[%s8285_s0 + $0x228] sm:$0xff]  ;;  %v74_v11 = vld [vmem:[%s8285_s0 + $0x110] sm:$0xff] }
  0x18   :  { %5133 = vmatpush3.msra.mxu0 %v5398_v1  ;;  %5201 = vmatpush3.msra.mxu1 %v5398_v1  ;;  %v69_v1 = vld [vmem:[%s8285_s0 + $0xe8] sm:$0xff]  ;;  %v3968_v8 = vld [vmem:[%s8285_s0 + $0x220] sm:$0xff]  ;;  %v3970_v12 = vld [vmem:[%s8285_s0 + $0x230] sm:$0xff] }
  0x19   :  { %5015 = vmatmul.mubr.msk.f32.gmra.mxu0 %vm82_vm1, %v45_v17  ;;  %5083 = vmatmul.mubr.msk.f32.gmra.mxu1 %vm82_vm1, %v3941_v18  ;;  %v75_v13 = vld [vmem:[%s8285_s0 + $0x118] sm:$0xff]  ;;  %v4009_v15 = vld [vmem:[%s8285_s0 + $0x240] sm:$0xff]  ;;  %v4010_v17 = vld [vmem:[%s8285_s0 + $0x248] sm:$0xff] }
  0x1a   :  { %5017 = vmatprep.mubr.msk.f32.mxu0 %vm82_vm1, %v46_v19  ;;  %5085 = vmatprep.mubr.msk.f32.mxu1 %vm82_vm1, %v3942_v20  ;;  %v3971_v14 = vld [vmem:[%s8285_s0 + $0x238] sm:$0xff]  ;;  %v4082_v16 = vld [vmem:[%s8285_s0 + $0x360] sm:$0xff]  ;;  %v4083_v18 = vld [vmem:[%s8285_s0 + $0x368] sm:$0xff] }
  0x1b   :  { %5134 = vmatprep.subr.mxu0 %v5407_v2  ;;  %5202 = vmatprep.subr.mxu1 %v5407_v2  ;;  %v4011_v19 = vld [vmem:[%s8285_s0 + $0x250] sm:$0xff] }
  0x1c   :  { %5135 = vmatpush3.msra.mxu0 %v5407_v2  ;;  %5203 = vmatpush3.msra.mxu1 %v5407_v2  ;;  %v3965_v2 = vld [vmem:[%s8285_s0 + $0x208] sm:$0xff]  ;;  %v4084_v20 = vld [vmem:[%s8285_s0 + $0x370] sm:$0xff] }
  0x1d   :  { %5018 = vmatmul.mubr.msk.f32.gmra.mxu0 %vm82_vm1, %v47_v21  ;;  %5086 = vmatmul.mubr.msk.f32.gmra.mxu1 %vm82_vm1, %v3943_v22  ;;  %v4012_v21 = vld [vmem:[%s8285_s0 + $0x258] sm:$0xff] }
  0x1e   :  { %5020 = vmatprep.mubr.msk.f32.mxu0 %vm82_vm1, %v48_v23  ;;  %5088 = vmatprep.mubr.msk.f32.mxu1 %vm82_vm1, %v3944_v24  ;;  %v4085_v22 = vld [vmem:[%s8285_s0 + $0x378] sm:$0xff]  ;;  %v4013_v23 = vld [vmem:[%s8285_s0 + $0x260] sm:$0xff] }
  0x1f   :  { %5136 = vmatprep.subr.mxu0 %v5416_v3  ;;  %5204 = vmatprep.subr.mxu1 %v5416_v3  ;;  %v4086_v24 = vld [vmem:[%s8285_s0 + $0x380] sm:$0xff] }
  0x20   :  { %5137 = vmatpush3.msra.mxu0 %v5416_v3  ;;  %5205 = vmatpush3.msra.mxu1 %v5416_v3  ;;  %v70_v3 = vld [vmem:[%s8285_s0 + $0xf0] sm:$0xff] }
  0x21   :  { %5021 = vmatmul.mubr.msk.f32.gmra.mxu0 %vm82_vm1, %v49_v25  ;;  %5089 = vmatmul.mubr.msk.f32.gmra.mxu1 %vm82_vm1, %v3945_v26  ;;  %v4014_v25 = vld [vmem:[%s8285_s0 + $0x268] sm:$0xff] }
  0x22   :  { %5023 = vmatprep.mubr.msk.f32.mxu0 %vm82_vm1, %v50_v27  ;;  %5091 = vmatprep.mubr.msk.f32.mxu1 %vm82_vm1, %v3946_v28  ;;  %v4087_v26 = vld [vmem:[%s8285_s0 + $0x388] sm:$0xff]  ;;  %v4015_v27 = vld [vmem:[%s8285_s0 + $0x270] sm:$0xff] }
  0x23   :  { %5138 = vmatprep.subr.mxu0 %v5425_v4  ;;  %5206 = vmatprep.subr.mxu1 %v5425_v4  ;;  %v4088_v28 = vld [vmem:[%s8285_s0 + $0x390] sm:$0xff] }
  0x24   :  { %5139 = vmatpush3.msra.mxu0 %v5425_v4  ;;  %5207 = vmatpush3.msra.mxu1 %v5425_v4  ;;  %v3966_v4 = vld [vmem:[%s8285_s0 + $0x210] sm:$0xff] }
  0x25   :  { %5024 = vmatmul.mubr.msk.f32.gmra.mxu0 %vm82_vm1, %v51_v29  ;;  %5092 = vmatmul.mubr.msk.f32.gmra.mxu1 %vm82_vm1, %v3947_v30  ;;  %v4016_v29 = vld [vmem:[%s8285_s0 + $0x278] sm:$0xff] }
  0x26   :  { %5026 = vmatprep.mubr.msk.f32.mxu0 %vm82_vm1, %v52_v31  ;;  %5094 = vmatprep.mubr.msk.f32.mxu1 %vm82_vm1, %v3948_v32  ;;  %v4089_v30 = vld [vmem:[%s8285_s0 + $0x398] sm:$0xff]  ;;  %v4017_v31 = vld [vmem:[%s8285_s0 + $0x280] sm:$0xff] }
  0x27   :  { %5140 = vmatprep.subr.mxu0 %v5434_v5  ;;  %5208 = vmatprep.subr.mxu1 %v5434_v5  ;;  %v4090_v32 = vld [vmem:[%s8285_s0 + $0x3a0] sm:$0xff] }
  0x28   :  { %5141 = vmatpush3.msra.mxu0 %v5434_v5  ;;  %5209 = vmatpush3.msra.mxu1 %v5434_v5  ;;  %v71_v5 = vld [vmem:[%s8285_s0 + $0xf8] sm:$0xff] }
  0x29   :  { %5027 = vmatmul.mubr.msk.f32.gmra.mxu0 %vm82_vm1, %v53_v33  ;;  %5095 = vmatmul.mubr.msk.f32.gmra.mxu1 %vm82_vm1, %v3949_v34  ;;  %v1893_v33 = vld [vmem:[%s8286_s3 + $0xf8] sm:$0xff] }
  0x2a   :  { %5029 = vmatprep.mubr.msk.f32.mxu0 %vm82_vm1, %v54_v35  ;;  %5097 = vmatprep.mubr.msk.f32.mxu1 %vm82_vm1, %v3950_v36  ;;  %v1877_v34 = vld [vmem:[%s8286_s3 + $0x78] sm:$0xff]  ;;  %v4018_v36 = vld [vmem:[%s8285_s0 + $0x288] sm:$0xff] }
  0x2b   :  { %5142 = vmatprep.subr.mxu0 %v5443_v6  ;;  %5210 = vmatprep.subr.mxu1 %v5443_v6  ;;  %v1925_v35 = vld [vmem:[%s8286_s3 + $0x1f8] sm:$0xff] }
  0x2c   :  { %5143 = vmatpush3.msra.mxu0 %v5443_v6  ;;  %5211 = vmatpush3.msra.mxu1 %v5443_v6  ;;  %v3967_v6 = vld [vmem:[%s8285_s0 + $0x218] sm:$0xff] }
  0x2d   :  { %5030 = vmatmul.mubr.msk.f32.gmra.mxu0 %vm82_vm1, %v55_v37  ;;  %5098 = vmatmul.mubr.msk.f32.gmra.mxu1 %vm82_vm1, %v3951_v38  ;;  %v4091_v37 = vld [vmem:[%s8285_s0 + $0x3a8] sm:$0xff]  ;;  %v4019_v38 = vld [vmem:[%s8285_s0 + $0x290] sm:$0xff] }
  0x2e   :  { %5032 = vmatprep.mubr.msk.f32.mxu0 %vm82_vm1, %v56_v39  ;;  %5100 = vmatprep.mubr.msk.f32.mxu1 %vm82_vm1, %v3952_v40  ;;  %v4092_v39 = vld [vmem:[%s8285_s0 + $0x3b0] sm:$0xff]  ;;  %v1909_v40 = vld [vmem:[%s8286_s3 + $0x178] sm:$0xff] }
  0x2f   :  { %4330 = vmatprep.subr.mxu0 %v1893_v33  ;;  %4365 = vmatprep.subr.mxu1 %v1925_v35  ;;  %v4107_v33 = vld [vmem:[%s8285_s0 + $0x428] sm:$0xff]  ;;  %v1885_v35 = vld [vmem:[%s8286_s3 + $0xb8] sm:$0xff] }
  0x31   :  { %5033 = vmatmul.mubr.msk.f32.gmra.mxu0 %vm82_vm1, %v57_v41  ;;  %5101 = vmatmul.mubr.msk.f32.gmra.mxu1 %vm82_vm1, %v3953_v42  ;;  %v1892_v41 = vld [vmem:[%s8286_s3 + $0xf0] sm:$0xff]  ;;  %v4020_v42 = vld [vmem:[%s8285_s0 + $0x298] sm:$0xff] }
  0x32   :  { %5035 = vmatprep.mubr.msk.f32.mxu0 %vm82_vm1, %v58_v43  ;;  %5103 = vmatprep.mubr.msk.f32.mxu1 %vm82_vm1, %v3954_v44  ;;  %v1876_v43 = vld [vmem:[%s8286_s3 + $0x70] sm:$0xff]  ;;  %v4093_v44 = vld [vmem:[%s8285_s0 + $0x3b8] sm:$0xff] }
  0x35   :  { %5036 = vmatmul.mubr.msk.f32.gmra.mxu0 %vm82_vm1, %v59_v45  ;;  %5104 = vmatmul.mubr.msk.f32.gmra.mxu1 %vm82_vm1, %v3955_v46  ;;  %v1924_v45 = vld [vmem:[%s8286_s3 + $0x1f0] sm:$0xff] }
  0x36   :  { %5038 = vmatprep.mubr.msk.f32.mxu0 %vm82_vm1, %v60_v47  ;;  %5106 = vmatprep.mubr.msk.f32.mxu1 %vm82_vm1, %v3956_v48  ;;  %v1908_v46 = vld [vmem:[%s8286_s3 + $0x170] sm:$0xff]  ;;  %v4021_v47 = vld [vmem:[%s8285_s0 + $0x2a0] sm:$0xff] }
  0x37   :  { %v4094_v48 = vld [vmem:[%s8285_s0 + $0x3c0] sm:$0xff] }
  0x39   :  { %5039 = vmatmul.mubr.msk.f32.gmra.mxu0 %vm82_vm1, %v61_v49  ;;  %5107 = vmatmul.mubr.msk.f32.gmra.mxu1 %vm82_vm1, %v3957_v50  ;;  %v4022_v49 = vld [vmem:[%s8285_s0 + $0x2a8] sm:$0xff] }
  0x3a   :  { %5041 = vmatprep.mubr.msk.f32.mxu0 %vm82_vm1, %v62_v51  ;;  %5109 = vmatprep.mubr.msk.f32.mxu1 %vm82_vm1, %v3958_v52  ;;  %v1891_v50 = vld [vmem:[%s8286_s3 + $0xe8] sm:$0xff] }
  0x3b   :  { %v1875_v51 = vld [vmem:[%s8286_s3 + $0x68] sm:$0xff] }
  0x3c   :  { %v4095_v52 = vld [vmem:[%s8285_s0 + $0x3c8] sm:$0xff] }
  0x3d   :  { %5042 = vmatmul.mubr.msk.f32.gmra.mxu0 %vm82_vm1, %v63_v53  ;;  %5110 = vmatmul.mubr.msk.f32.gmra.mxu1 %vm82_vm1, %v3959_v54  ;;  %v1923_v53 = vld [vmem:[%s8286_s3 + $0x1e8] sm:$0xff] }
  0x3e   :  { %5044 = vmatprep.mubr.msk.f32.mxu0 %vm82_vm1, %v64_v55  ;;  %5112 = vmatprep.mubr.msk.f32.mxu1 %vm82_vm1, %v3960_v56  ;;  %v1907_v54 = vld [vmem:[%s8286_s3 + $0x168] sm:$0xff]  ;;  %v4023_v55 = vld [vmem:[%s8285_s0 + $0x2b0] sm:$0xff] }
  0x3f   :  { %v4096_v56 = vld [vmem:[%s8285_s0 + $0x3d0] sm:$0xff] }
  0x41   :  { %5045 = vmatmul.mubr.msk.f32.gmra.mxu0 %vm82_vm1, %v65_v57  ;;  %5113 = vmatmul.mubr.msk.f32.gmra.mxu1 %vm82_vm1, %v3961_v58  ;;  %v1890_v57 = vld [vmem:[%s8286_s3 + $0xe0] sm:$0xff]  ;;  %v4024_v58 = vld [vmem:[%s8285_s0 + $0x2b8] sm:$0xff] }
  0x42   :  { %5047 = vmatprep.mubr.msk.f32.mxu0 %vm82_vm1, %v66_v59  ;;  %5115 = vmatprep.mubr.msk.f32.mxu1 %vm82_vm1, %v3962_v60  ;;  %v4097_v59 = vld [vmem:[%s8285_s0 + $0x3d8] sm:$0xff]  ;;  %v4025_v60 = vld [vmem:[%s8285_s0 + $0x2c0] sm:$0xff] }
  0x45   :  { %5048 = vmatmul.mubr.msk.f32.gmra.mxu0 %vm82_vm1, %v67_v61  ;;  %5116 = vmatmul.mubr.msk.f32.gmra.mxu1 %vm82_vm1, %v3963_v62  ;;  %v4098_v61 = vld [vmem:[%s8285_s0 + $0x3e0] sm:$0xff] }
  0x46   :  { %5050 = vmatprep.mubr.msk.f32.mxu0 %vm82_vm1, %v68_v63  ;;  %5118 = vmatprep.mubr.msk.f32.mxu1 %vm82_vm1, %v3964_v0  ;;  %v1874_v62 = vld [vmem:[%s8286_s3 + $0x60] sm:$0xff] }
  0x47   :  { %v1922_v63 = vld [vmem:[%s8286_s3 + $0x1e0] sm:$0xff] }
  0x48   :  { %v1906_v0 = vld [vmem:[%s8286_s3 + $0x160] sm:$0xff] }
  0x49   :  { %5051 = vmatmul.mubr.msk.f32.gmra.mxu0 %vm82_vm1, %v69_v1  ;;  %5119 = vmatmul.mubr.msk.f32.gmra.mxu1 %vm82_vm1, %v3965_v2  ;;  %v1889_v1 = vld [vmem:[%s8286_s3 + $0xd8] sm:$0xff]  ;;  %v4026_v2 = vld [vmem:[%s8285_s0 + $0x2c8] sm:$0xff] }
  0x4a   :  { %5053 = vmatprep.mubr.msk.f32.mxu0 %vm82_vm1, %v70_v3  ;;  %5121 = vmatprep.mubr.msk.f32.mxu1 %vm82_vm1, %v3966_v4  ;;  %v4099_v3 = vld [vmem:[%s8285_s0 + $0x3e8] sm:$0xff]  ;;  %v1873_v4 = vld [vmem:[%s8286_s3 + $0x58] sm:$0xff] }
  0x4d   :  { %5054 = vmatmul.mubr.msk.f32.gmra.mxu0 %vm82_vm1, %v71_v5  ;;  %5122 = vmatmul.mubr.msk.f32.gmra.mxu1 %vm82_vm1, %v3967_v6  ;;  %v1921_v5 = vld [vmem:[%s8286_s3 + $0x1d8] sm:$0xff]  ;;  %v4027_v6 = vld [vmem:[%s8285_s0 + $0x2d0] sm:$0xff] }
  0x4e   :  { %5056 = vmatprep.mubr.msk.f32.mxu0 %vm82_vm1, %v72_v7  ;;  %5124 = vmatprep.mubr.msk.f32.mxu1 %vm82_vm1, %v3968_v8  ;;  %v4100_v7 = vld [vmem:[%s8285_s0 + $0x3f0] sm:$0xff]  ;;  %v4028_v8 = vld [vmem:[%s8285_s0 + $0x2d8] sm:$0xff] }
  0x51   :  { %5057 = vmatmul.mubr.msk.f32.gmra.mxu0 %vm82_vm1, %v73_v9  ;;  %5125 = vmatmul.mubr.msk.f32.gmra.mxu1 %vm82_vm1, %v3969_v10  ;;  %v1905_v9 = vld [vmem:[%s8286_s3 + $0x158] sm:$0xff] }
  0x52   :  { %5059 = vmatprep.mubr.msk.f32.mxu0 %vm82_vm1, %v74_v11  ;;  %5127 = vmatprep.mubr.msk.f32.mxu1 %vm82_vm1, %v3970_v12  ;;  %v4101_v10 = vld [vmem:[%s8285_s0 + $0x3f8] sm:$0xff]  ;;  %v1888_v11 = vld [vmem:[%s8286_s3 + $0xd0] sm:$0xff] }
  0x53   :  { %v1872_v12 = vld [vmem:[%s8286_s3 + $0x50] sm:$0xff] }
  0x55   :  { %5060 = vmatmul.mubr.msk.f32.gmra.mxu0 %vm82_vm1, %v75_v13  ;;  %5128 = vmatmul.mubr.msk.f32.gmra.mxu1 %vm82_vm1, %v3971_v14  ;;  %v4029_v13 = vld [vmem:[%s8285_s0 + $0x2e0] sm:$0xff] }
  0x56   :  { %5144 = vmatprep.mubr.msk.f32.mxu0 %vm82_vm1, %v4009_v15  ;;  %5212 = vmatprep.mubr.msk.f32.mxu1 %vm82_vm1, %v4082_v16  ;;  %v4102_v14 = vld [vmem:[%s8285_s0 + $0x400] sm:$0xff]  ;;  %v1920_v15 = vld [vmem:[%s8286_s3 + $0x1d0] sm:$0xff] }
  0x57   :  { %v1904_v16 = vld [vmem:[%s8286_s3 + $0x150] sm:$0xff] }
  0x59   :  { %5145 = vmatmul.mubr.msk.f32.vlgmr.msra.gmra.mxu0 %vm82_vm1, %v4010_v17  ;;  %5213 = vmatmul.mubr.msk.f32.vlgmr.msra.gmra.mxu1 %vm82_vm1, %v4083_v18  ;;  %v4030_v17 = vld [vmem:[%s8285_s0 + $0x2e8] sm:$0xff] }
  0x5a   :  { %5147 = vmatprep.mubr.msk.f32.mxu0 %vm82_vm1, %v4011_v19  ;;  %5215 = vmatprep.mubr.msk.f32.mxu1 %vm82_vm1, %v4084_v20  ;;  %v4103_v18 = vld [vmem:[%s8285_s0 + $0x408] sm:$0xff]  ;;  %v4031_v19 = vld [vmem:[%s8285_s0 + $0x2f0] sm:$0xff] }
  0x5b   :  { %4331 = vmatpush3.msra.mxu0 %v1877_v34  ;;  %4366 = vmatpush3.msra.mxu1 %v1909_v40  ;;  %v4104_v20 = vld [vmem:[%s8285_s0 + $0x410] sm:$0xff]  ;;  %v1902_v34 = vld [vmem:[%s8286_s3 + $0x140] sm:$0xff]  ;;  %v4036_v40 = vld [vmem:[%s8285_s0 + $0x318] sm:$0xff] }
  0x5c   :  { %4332 = vmatprep.subr.mxu0 %v1892_v41  ;;  %4367 = vmatprep.subr.mxu1 %v1924_v45  ;;  %v4109_v41 = vld [vmem:[%s8285_s0 + $0x438] sm:$0xff]  ;;  %v1884_v45 = vld [vmem:[%s8286_s3 + $0xb0] sm:$0xff] }
  0x5d   :  { %5148 = vmatmul.mubr.msk.f32.gmra.mxu0 %vm82_vm1, %v4012_v21  ;;  %5216 = vmatmul.mubr.msk.f32.gmra.mxu1 %vm82_vm1, %v4085_v22  ;;  %v1887_v21 = vld [vmem:[%s8286_s3 + $0xc8] sm:$0xff] }
  0x5e   :  { %5150 = vmatprep.mubr.msk.f32.mxu0 %vm82_vm1, %v4013_v23  ;;  %5218 = vmatprep.mubr.msk.f32.mxu1 %vm82_vm1, %v4086_v24  ;;  %v1871_v22 = vld [vmem:[%s8286_s3 + $0x48] sm:$0xff] }
  0x5f   :  { %4333 = vmatpush3.msra.mxu0 %v1876_v43  ;;  %4368 = vmatpush3.msra.mxu1 %v1908_v46  ;;  %v1919_v23 = vld [vmem:[%s8286_s3 + $0x1c8] sm:$0xff]  ;;  %v4110_v43 = vld [vmem:[%s8285_s0 + $0x440] sm:$0xff] }
  0x60   :  { %4334 = vmatprep.subr.mxu0 %v1891_v50  ;;  %4369 = vmatprep.subr.mxu1 %v1923_v53  ;;  %v1903_v24 = vld [vmem:[%s8286_s3 + $0x148] sm:$0xff]  ;;  %v1900_v50 = vld [vmem:[%s8286_s3 + $0x130] sm:$0xff]  ;;  %v4040_v53 = vld [vmem:[%s8285_s0 + $0x338] sm:$0xff] }
  0x61   :  { %5151 = vmatmul.mubr.msk.f32.gmra.mxu0 %vm82_vm1, %v4014_v25  ;;  %5219 = vmatmul.mubr.msk.f32.gmra.mxu1 %vm82_vm1, %v4087_v26  ;;  %v4032_v25 = vld [vmem:[%s8285_s0 + $0x2f8] sm:$0xff]  ;;  %v4038_v46 = vld [vmem:[%s8285_s0 + $0x328] sm:$0xff] }
  0x62   :  { %5153 = vmatprep.mubr.msk.f32.mxu0 %vm82_vm1, %v4015_v27  ;;  %5221 = vmatprep.mubr.msk.f32.mxu1 %vm82_vm1, %v4088_v28  ;;  %v4105_v26 = vld [vmem:[%s8285_s0 + $0x418] sm:$0xff]  ;;  %v1886_v27 = vld [vmem:[%s8286_s3 + $0xc0] sm:$0xff] }
  0x63   :  { %4335 = vmatpush3.msra.mxu0 %v1875_v51  ;;  %4370 = vmatpush3.msra.mxu1 %v1907_v54  ;;  %v4033_v28 = vld [vmem:[%s8285_s0 + $0x300] sm:$0xff]  ;;  %v4039_v51 = vld [vmem:[%s8285_s0 + $0x330] sm:$0xff]  ;;  %v1883_v54 = vld [vmem:[%s8286_s3 + $0xa8] sm:$0xff] }
  0x64   :  { %4336 = vmatprep.subr.mxu0 %v1890_v57  ;;  %4371 = vmatprep.subr.mxu1 %v1922_v63  ;;  %v1915_v57 = vld [vmem:[%s8286_s3 + $0x1a8] sm:$0xff] }
  0x65   :  { %5154 = vmatmul.mubr.msk.f32.gmra.mxu0 %vm82_vm1, %v4016_v29  ;;  %5222 = vmatmul.mubr.msk.f32.gmra.mxu1 %vm82_vm1, %v4089_v30  ;;  %v4106_v29 = vld [vmem:[%s8285_s0 + $0x420] sm:$0xff]  ;;  %v4034_v30 = vld [vmem:[%s8285_s0 + $0x308] sm:$0xff] }
  0x66   :  { %5156 = vmatprep.mubr.msk.f32.mxu0 %vm82_vm1, %v4017_v31  ;;  %5224 = vmatprep.mubr.msk.f32.mxu1 %vm82_vm1, %v4090_v32  ;;  %v1870_v31 = vld [vmem:[%s8286_s3 + $0x40] sm:$0xff]  ;;  %v4115_v63 = vld [vmem:[%s8285_s0 + $0x468] sm:$0xff] }
  0x67   :  { %4337 = vmatpush3.msra.mxu0 %v1874_v62  ;;  %4372 = vmatpush3.msra.mxu1 %v1906_v0  ;;  %v1918_v32 = vld [vmem:[%s8286_s3 + $0x1c0] sm:$0xff]  ;;  %v4042_v62 = vld [vmem:[%s8285_s0 + $0x348] sm:$0xff]  ;;  %v4043_v0 = vld [vmem:[%s8285_s0 + $0x350] sm:$0xff] }
  0x68   :  { %4338 = vmatprep.subr.mxu0 %v1889_v1  ;;  %4373 = vmatprep.subr.mxu1 %v1921_v5  ;;  %v4116_v1 = vld [vmem:[%s8285_s0 + $0x470] sm:$0xff]  ;;  %v1881_v5 = vld [vmem:[%s8286_s3 + $0x98] sm:$0xff] }
  0x69   :  { %5157 = vmatmul.mubr.msk.f32.gmra.mxu0 %vm82_vm1, %v4018_v36  ;;  %5225 = vmatmul.mubr.msk.f32.gmra.mxu1 %vm82_vm1, %v4091_v37  ;;  %v4035_v36 = vld [vmem:[%s8285_s0 + $0x310] sm:$0xff] }
  0x6a   :  { %5159 = vmatprep.mubr.msk.f32.mxu0 %vm82_vm1, %v4019_v38  ;;  %5227 = vmatprep.mubr.msk.f32.mxu1 %vm82_vm1, %v4092_v39  ;;  %v4108_v37 = vld [vmem:[%s8285_s0 + $0x430] sm:$0xff]  ;;  %v1869_v38 = vld [vmem:[%s8286_s3 + $0x38] sm:$0xff] }
  0x6b   :  { %4339 = vmatpush3.msra.mxu0 %v1873_v4  ;;  %4374 = vmatpush3.msra.mxu1 %v1905_v9  ;;  %v1917_v39 = vld [vmem:[%s8286_s3 + $0x1b8] sm:$0xff]  ;;  %v1898_v4 = vld [vmem:[%s8286_s3 + $0x120] sm:$0xff] }
  0x6c   :  { %4340 = vmatprep.subr.mxu0 %v1888_v11  ;;  %4375 = vmatprep.subr.mxu1 %v1920_v15  ;;  %v1913_v9 = vld [vmem:[%s8286_s3 + $0x198] sm:$0xff]  ;;  %v1880_v11 = vld [vmem:[%s8286_s3 + $0x90] sm:$0xff] }
  0x6d   :  { %5160 = vmatmul.mubr.msk.f32.gmra.mxu0 %vm82_vm1, %v4020_v42  ;;  %5228 = vmatmul.mubr.msk.f32.gmra.mxu1 %vm82_vm1, %v4093_v44  ;;  %v4037_v42 = vld [vmem:[%s8285_s0 + $0x320] sm:$0xff]  ;;  %v1901_v44 = vld [vmem:[%s8286_s3 + $0x138] sm:$0xff]  ;;  %v1912_v15 = vld [vmem:[%s8286_s3 + $0x190] sm:$0xff] }
  0x6e   :  { %5162 = vmatprep.mubr.msk.f32.mxu0 %vm82_vm1, %v4021_v47  ;;  %5230 = vmatprep.mubr.msk.f32.mxu1 %vm82_vm1, %v4094_v48  ;;  %v1868_v47 = vld [vmem:[%s8286_s3 + $0x30] sm:$0xff]  ;;  %v4111_v48 = vld [vmem:[%s8285_s0 + $0x448] sm:$0xff] }
  0x6f   :  { %4341 = vmatpush3.msra.mxu0 %v1872_v12  ;;  %4376 = vmatpush3.msra.mxu1 %v1904_v16  ;;  %v1864_v12 = vld [vmem:[%s8286_s3 + $0x10] sm:$0xff]  ;;  %v1878_v16 = vld [vmem:[%s8286_s3 + $0x80] sm:$0xff] }
  0x70   :  { %4342 = vmatprep.subr.mxu0 %v1887_v21  ;;  %4377 = vmatprep.subr.mxu1 %v1919_v23  ;;  %v1895_v21 = vld [vmem:[%s8286_s3 + $0x108] sm:$0xff]  ;;  %v1894_v23 = vld [vmem:[%s8286_s3 + $0x100] sm:$0xff] }
  0x71   :  { %5163 = vmatmul.mubr.msk.f32.gmra.mxu0 %vm82_vm1, %v4022_v49  ;;  %5231 = vmatmul.mubr.msk.f32.gmra.mxu1 %vm82_vm1, %v4095_v52  ;;  %v1916_v49 = vld [vmem:[%s8286_s3 + $0x1b0] sm:$0xff] }
  0x72   :  { %5165 = vmatprep.mubr.msk.f32.mxu0 %vm82_vm1, %v4023_v55  ;;  %5233 = vmatprep.mubr.msk.f32.mxu1 %vm82_vm1, %v4096_v56  ;;  %v4112_v52 = vld [vmem:[%s8285_s0 + $0x450] sm:$0xff]  ;;  %v1867_v55 = vld [vmem:[%s8286_s3 + $0x28] sm:$0xff]  ;;  %v4113_v56 = vld [vmem:[%s8285_s0 + $0x458] sm:$0xff] }
  0x73   :  { %4343 = vmatpush3.msra.mxu0 %v1871_v22  ;;  %4378 = vmatpush3.msra.mxu1 %v1903_v24  ;;  %v1910_v22 = vld [vmem:[%s8286_s3 + $0x180] sm:$0xff]  ;;  %v1989_v24 = vld [vmem:[%s8286_s3 + $0x3f8] sm:$0xff] }
  0x74   :  { %4344 = vmatprep.subr.mxu0 %v1886_v27  ;;  %4379 = vmatprep.subr.mxu1 %v1918_v32 }
  0x75   :  { %5166 = vmatmul.mubr.msk.f32.gmra.mxu0 %vm82_vm1, %v4024_v58  ;;  %5234 = vmatmul.mubr.msk.f32.gmra.mxu1 %vm82_vm1, %v4097_v59  ;;  %v1899_v58 = vld [vmem:[%s8286_s3 + $0x128] sm:$0xff]  ;;  %v4041_v59 = vld [vmem:[%s8285_s0 + $0x340] sm:$0xff] }
  0x76   :  { %5168 = vmatprep.mubr.msk.f32.mxu0 %vm82_vm1, %v4025_v60  ;;  %5236 = vmatprep.mubr.msk.f32.mxu1 %vm82_vm1, %v4098_v61  ;;  %v4114_v60 = vld [vmem:[%s8285_s0 + $0x460] sm:$0xff] }
  0x77   :  { %4345 = vmatpush3.msra.mxu0 %v1870_v31  ;;  %4380 = vmatpush3.msra.mxu1 %v1902_v34  ;;  %v1882_v61 = vld [vmem:[%s8286_s3 + $0xa0] sm:$0xff] }
  0x78   :  { %4346 = vmatprep.subr.mxu0 %v1885_v35  ;;  %4381 = vmatprep.subr.mxu1 %v1917_v39 }
  0x79   :  { %5169 = vmatmul.mubr.msk.f32.gmra.mxu0 %vm82_vm1, %v4026_v2  ;;  %5237 = vmatmul.mubr.msk.f32.gmra.mxu1 %vm82_vm1, %v4099_v3  ;;  %v1866_v2 = vld [vmem:[%s8286_s3 + $0x20] sm:$0xff] }
  0x7a   :  { %5171 = vmatprep.mubr.msk.f32.mxu0 %vm82_vm1, %v4027_v6  ;;  %5239 = vmatprep.mubr.msk.f32.mxu1 %vm82_vm1, %v4100_v7  ;;  %v1914_v3 = vld [vmem:[%s8286_s3 + $0x1a0] sm:$0xff]  ;;  %v4044_v6 = vld [vmem:[%s8285_s0 + $0x358] sm:$0xff] }
  0x7b   :  { %4347 = vmatpush3.msra.mxu0 %v1869_v38  ;;  %4382 = vmatpush3.msra.mxu1 %v1901_v44  ;;  %v4117_v7 = vld [vmem:[%s8285_s0 + $0x478] sm:$0xff] }
  0x7c   :  { %4348 = vmatprep.subr.mxu0 %v1884_v45  ;;  %4383 = vmatprep.subr.mxu1 %v1916_v49 }
  0x7d   :  { %5172 = vmatmul.mubr.msk.f32.gmra.mxu0 %vm82_vm1, %v4028_v8  ;;  %5240 = vmatmul.mubr.msk.f32.gmra.mxu1 %vm82_vm1, %v4101_v10  ;;  %v1865_v8 = vld [vmem:[%s8286_s3 + $0x18] sm:$0xff] }
  0x7e   :  { %5174 = vmatprep.mubr.msk.f32.mxu0 %vm82_vm1, %v4029_v13  ;;  %5242 = vmatprep.mubr.msk.f32.mxu1 %vm82_vm1, %v4102_v14  ;;  %v1897_v10 = vld [vmem:[%s8286_s3 + $0x118] sm:$0xff]  ;;  %v1879_v13 = vld [vmem:[%s8286_s3 + $0x88] sm:$0xff] }
  0x7f   :  { %4349 = vmatpush3.msra.mxu0 %v1868_v47  ;;  %4384 = vmatpush3.msra.mxu1 %v1900_v50  ;;  %v1863_v14 = vld [vmem:[%s8286_s3 + $0x8] sm:$0xff] }
  0x80   :  { %4350 = vmatprep.subr.mxu0 %v1883_v54  ;;  %4385 = vmatprep.subr.mxu1 %v1915_v57 }
  0x81   :  { %5175 = vmatmul.mubr.msk.f32.gmra.mxu0 %vm82_vm1, %v4030_v17  ;;  %5243 = vmatmul.mubr.msk.f32.gmra.mxu1 %vm82_vm1, %v4103_v18  ;;  %v1896_v17 = vld [vmem:[%s8286_s3 + $0x110] sm:$0xff]  ;;  %v1862_v18 = vld [vmem:[%s8286_s3] sm:$0xff] }
  0x82   :  { %5177 = vmatprep.mubr.msk.f32.mxu0 %vm82_vm1, %v4031_v19  ;;  %5245 = vmatprep.mubr.msk.f32.mxu1 %vm82_vm1, %v4104_v20  ;;  %v1911_v19 = vld [vmem:[%s8286_s3 + $0x188] sm:$0xff]  ;;  %v1957_v20 = vld [vmem:[%s8286_s3 + $0x2f8] sm:$0xff] }
  0x83   :  { %4351 = vmatpush3.msra.mxu0 %v1867_v55  ;;  %4386 = vmatpush3.msra.mxu1 %v1899_v58 }
  0x84   :  { %4352 = vmatprep.subr.mxu0 %v1882_v61  ;;  %4387 = vmatprep.subr.mxu1 %v1914_v3 }
  0x85   :  { %5178 = vmatmul.mubr.msk.f32.gmra.mxu0 %vm82_vm1, %v4032_v25  ;;  %5246 = vmatmul.mubr.msk.f32.gmra.mxu1 %vm82_vm1, %v4105_v26  ;;  %v6258_v25 = vld [vmem:[%s8287_s2] ss:$0 sm:$0xff] }
  0x86   :  { %5180 = vmatprep.mubr.msk.f32.mxu0 %vm82_vm1, %v4033_v28  ;;  %5248 = vmatprep.mubr.msk.f32.mxu1 %vm82_vm1, %v4106_v29 }
  0x87   :  { %4353 = vmatpush3.msra.mxu0 %v1866_v2  ;;  %4388 = vmatpush3.msra.mxu1 %v1898_v4 }
  0x88   :  { %4354 = vmatprep.subr.mxu0 %v1881_v5  ;;  %4389 = vmatprep.subr.mxu1 %v1913_v9 }
  0x89   :  { %5181 = vmatmul.mubr.msk.f32.gmra.mxu0 %vm82_vm1, %v4034_v30  ;;  %5249 = vmatmul.mubr.msk.f32.gmra.mxu1 %vm82_vm1, %v4107_v33 }
  0x8a   :  { %5183 = vmatprep.mubr.msk.f32.mxu0 %vm82_vm1, %v4035_v36  ;;  %5251 = vmatprep.mubr.msk.f32.mxu1 %vm82_vm1, %v4108_v37 }
  0x8b   :  { %4355 = vmatpush3.msra.mxu0 %v1865_v8  ;;  %4390 = vmatpush3.msra.mxu1 %v1897_v10 }
  0x8c   :  { %4356 = vmatprep.subr.mxu0 %v1880_v11  ;;  %4391 = vmatprep.subr.mxu1 %v1912_v15 }
  0x8d   :  { %5184 = vmatmul.mubr.msk.f32.gmra.mxu0 %vm82_vm1, %v4036_v40  ;;  %5252 = vmatmul.mubr.msk.f32.gmra.mxu1 %vm82_vm1, %v4109_v41 }
  0x8e   :  { %5186 = vmatprep.mubr.msk.f32.mxu0 %vm82_vm1, %v4037_v42  ;;  %5254 = vmatprep.mubr.msk.f32.mxu1 %vm82_vm1, %v4110_v43 }
  0x8f   :  { %4357 = vmatpush3.msra.mxu0 %v1864_v12  ;;  %4392 = vmatpush3.msra.mxu1 %v1896_v17 }
  0x90   :  { %4358 = vmatprep.subr.mxu0 %v1879_v13  ;;  %4393 = vmatprep.subr.mxu1 %v1911_v19 }
  0x91   :  { %5187 = vmatmul.mubr.msk.f32.gmra.mxu0 %vm82_vm1, %v4038_v46  ;;  %5255 = vmatmul.mubr.msk.f32.gmra.mxu1 %vm82_vm1, %v4111_v48 }
  0x92   :  { %5189 = vmatprep.mubr.msk.f32.mxu0 %vm82_vm1, %v4039_v51  ;;  %5257 = vmatprep.mubr.msk.f32.mxu1 %vm82_vm1, %v4112_v52 }
  0x93   :  { %4359 = vmatpush3.msra.mxu0 %v1863_v14  ;;  %4394 = vmatpush3.msra.mxu1 %v1895_v21 }
  0x94   :  { %4360 = vmatprep.subr.mxu0 %v1878_v16  ;;  %4395 = vmatprep.subr.mxu1 %v1910_v22 }
  0x95   :  { %5190 = vmatmul.mubr.msk.f32.gmra.mxu0 %vm82_vm1, %v4040_v53  ;;  %5258 = vmatmul.mubr.msk.f32.gmra.mxu1 %vm82_vm1, %v4113_v56 }
  0x96   :  { %5192 = vmatprep.mubr.msk.f32.mxu0 %vm82_vm1, %v4041_v59  ;;  %5260 = vmatprep.mubr.msk.f32.mxu1 %vm82_vm1, %v4114_v60 }
  0x97   :  { %4361 = vmatpush3.msra.mxu0 %v1862_v18  ;;  %4396 = vmatpush3.msra.mxu1 %v1894_v23 }
  0x98   :  { %4400 = vmatprep.subr.mxu0 %v1957_v20  ;;  %4435 = vmatprep.subr.mxu1 %v1989_v24 }
  0x99   :  { %5193 = vmatmul.mubr.msk.f32.gmra.mxu0 %vm82_vm1, %v4042_v62  ;;  %5261 = vmatmul.mubr.msk.f32.gmra.mxu1 %vm82_vm1, %v4115_v63 }
  0x9a   :  { %5195 = vmatprep.mubr.msk.f32.mxu0 %vm82_vm1, %v4043_v0  ;;  %5263 = vmatprep.mubr.msk.f32.mxu1 %vm82_vm1, %v4116_v1 }
  0x9d   :  { %5196 = vmatmul.mubr.msk.f32.gmra.mxu0 %vm82_vm1, %v4044_v6  ;;  %5264 = vmatmul.mubr.msk.f32.gmra.mxu1 %vm82_vm1, %v4117_v7 }
  0xd1   :  { %v5010_v26 = vpop.f32.mrf.mxu0  ;;  %v5078_v27 = vpop.f32.mrf.mxu1 }
  0xd2   :  { %v267_v28 = vadd.f32 %v5010_v26, %v6258_v25  ;;  %v693_v29 = vadd.f32 %v5078_v27, %v6258_v25 }
  0xd3   :  { %v261_v30 = vpop.f32.mrf.mxu0  ;;  %v687_v31 = vpop.f32.mrf.mxu1 }
  0xd4   :  { %v441_v32 = vmax.f32 %v267_v28, 0.0  ;;  %v867_v33 = vmax.f32 %v693_v29, 0.0  ;;  %v262_v34 = vadd.f32 %v6258_v25, %v261_v30  ;;  %v688_v35 = vadd.f32 %v6258_v25, %v687_v31 }
  0xd5   :  { %v5013_v36 = vpop.f32.mrf.mxu0  ;;  %v5081_v37 = vpop.f32.mrf.mxu1 }
  0xd6   :  { %v6264_v38 = vmax.f32 %v441_v32, %v867_v33  ;;  %v440_v39 = vmax.f32 %v262_v34, 0.0  ;;  %v866_v40 = vmax.f32 %v688_v35, 0.0  ;;  %v277_v41 = vadd.f32 %v5013_v36, %v6258_v25 }
  0xd7   :  { %v703_v42 = vadd.f32 %v5081_v37, %v6258_v25  ;;  %v271_v43 = vpop.f32.mrf.mxu0  ;;  %v697_v44 = vpop.f32.mrf.mxu1 }
  0xd8   :  { %v6268_v45 = vmax.f32 %v440_v39, %v866_v40  ;;  %v443_v46 = vmax.f32 %v277_v41, 0.0  ;;  %v272_v47 = vadd.f32 %v6258_v25, %v271_v43  ;;  %v698_v48 = vadd.f32 %v6258_v25, %v697_v44 }
  0xd9   :  { %v869_v49 = vmax.f32 %v703_v42, 0.0  ;;  %v5016_v50 = vpop.f32.mrf.mxu0  ;;  %v5084_v51 = vpop.f32.mrf.mxu1 }
  0xda   :  { %v442_v52 = vmax.f32 %v272_v47, 0.0  ;;  %v868_v53 = vmax.f32 %v698_v48, 0.0  ;;  %v287_v54 = vadd.f32 %v5016_v50, %v6258_v25  ;;  %v713_v55 = vadd.f32 %v5084_v51, %v6258_v25 }
  0xdb   :  { %v6274_v56 = vmax.f32 %v443_v46, %v869_v49  ;;  %v281_v57 = vpop.f32.mrf.mxu0  ;;  %v707_v58 = vpop.f32.mrf.mxu1 }
  0xdc   :  { %v6276_v59 = vmax.f32 %v442_v52, %v868_v53  ;;  %v445_v60 = vmax.f32 %v287_v54, 0.0  ;;  %v871_v61 = vmax.f32 %v713_v55, 0.0  ;;  %v282_v62 = vadd.f32 %v6258_v25, %v281_v57 }
  0xdd   :  { %v708_v63 = vadd.f32 %v6258_v25, %v707_v58  ;;  %v5019_v0 = vpop.f32.mrf.mxu0  ;;  %v5087_v1 = vpop.f32.mrf.mxu1 }
  0xde   :  { %v6280_v2 = vmax.f32 %v445_v60, %v871_v61  ;;  %v444_v3 = vmax.f32 %v282_v62, 0.0  ;;  %v297_v4 = vadd.f32 %v5019_v0, %v6258_v25  ;;  %v723_v5 = vadd.f32 %v5087_v1, %v6258_v25 }
  0xdf   :  { %v870_v6 = vmax.f32 %v708_v63, 0.0  ;;  %v291_v7 = vpop.f32.mrf.mxu0  ;;  %v717_v8 = vpop.f32.mrf.mxu1 }
  0xe0   :  { %v447_v9 = vmax.f32 %v297_v4, 0.0  ;;  %v873_v10 = vmax.f32 %v723_v5, 0.0  ;;  %v292_v11 = vadd.f32 %v6258_v25, %v291_v7  ;;  %v718_v12 = vadd.f32 %v6258_v25, %v717_v8 }
  0xe1   :  { %v6286_v13 = vmax.f32 %v444_v3, %v870_v6  ;;  %v5022_v14 = vpop.f32.mrf.mxu0  ;;  %v5090_v15 = vpop.f32.mrf.mxu1 }
  0xe2   :  { %v6288_v16 = vmax.f32 %v447_v9, %v873_v10  ;;  %v446_v17 = vmax.f32 %v292_v11, 0.0  ;;  %v872_v18 = vmax.f32 %v718_v12, 0.0  ;;  %v307_v19 = vadd.f32 %v5022_v14, %v6258_v25 }
  0xe3   :  { %v733_v20 = vadd.f32 %v5090_v15, %v6258_v25  ;;  %v301_v21 = vpop.f32.mrf.mxu0  ;;  %v727_v22 = vpop.f32.mrf.mxu1 }
  0xe4   :  { %v6292_v23 = vmax.f32 %v446_v17, %v872_v18  ;;  %v449_v24 = vmax.f32 %v307_v19, 0.0  ;;  %v302_v26 = vadd.f32 %v6258_v25, %v301_v21  ;;  %v728_v27 = vadd.f32 %v6258_v25, %v727_v22 }
  0xe5   :  { %v875_v28 = vmax.f32 %v733_v20, 0.0  ;;  %v5025_v29 = vpop.f32.mrf.mxu0  ;;  %v5093_v30 = vpop.f32.mrf.mxu1 }
  0xe6   :  { %v448_v31 = vmax.f32 %v302_v26, 0.0  ;;  %v874_v32 = vmax.f32 %v728_v27, 0.0  ;;  %v317_v33 = vadd.f32 %v5025_v29, %v6258_v25  ;;  %v743_v34 = vadd.f32 %v5093_v30, %v6258_v25 }
  0xe7   :  { %v6298_v35 = vmax.f32 %v449_v24, %v875_v28  ;;  %v311_v36 = vpop.f32.mrf.mxu0  ;;  %v737_v37 = vpop.f32.mrf.mxu1 }
  0xe8   :  { %v6300_v39 = vmax.f32 %v448_v31, %v874_v32  ;;  %v451_v40 = vmax.f32 %v317_v33, 0.0  ;;  %v877_v41 = vmax.f32 %v743_v34, 0.0  ;;  %v312_v42 = vadd.f32 %v6258_v25, %v311_v36 }
  0xe9   :  { %v738_v43 = vadd.f32 %v6258_v25, %v737_v37  ;;  %v5028_v44 = vpop.f32.mrf.mxu0  ;;  %v5096_v46 = vpop.f32.mrf.mxu1 }
  0xea   :  { %v6304_v47 = vmax.f32 %v451_v40, %v877_v41  ;;  %v450_v48 = vmax.f32 %v312_v42, 0.0  ;;  %v327_v49 = vadd.f32 %v5028_v44, %v6258_v25  ;;  %v753_v50 = vadd.f32 %v5096_v46, %v6258_v25 }
  0xeb   :  { %v876_v51 = vmax.f32 %v738_v43, 0.0  ;;  %v321_v52 = vpop.f32.mrf.mxu0  ;;  %v747_v53 = vpop.f32.mrf.mxu1 }
  0xec   :  { %v453_v54 = vmax.f32 %v327_v49, 0.0  ;;  %v879_v55 = vmax.f32 %v753_v50, 0.0  ;;  %v322_v57 = vadd.f32 %v6258_v25, %v321_v52  ;;  %v748_v58 = vadd.f32 %v6258_v25, %v747_v53 }
  0xed   :  { %v6310_v60 = vmax.f32 %v450_v48, %v876_v51  ;;  %v5031_v61 = vpop.f32.mrf.mxu0  ;;  %v5099_v62 = vpop.f32.mrf.mxu1 }
  0xee   :  { %v6312_v63 = vmax.f32 %v453_v54, %v879_v55  ;;  %v452_v0 = vmax.f32 %v322_v57, 0.0  ;;  %v878_v1 = vmax.f32 %v748_v58, 0.0  ;;  %v337_v3 = vadd.f32 %v5031_v61, %v6258_v25 }
  0xef   :  { %v763_v4 = vadd.f32 %v5099_v62, %v6258_v25  ;;  %v331_v5 = vpop.f32.mrf.mxu0  ;;  %v757_v6 = vpop.f32.mrf.mxu1 }
  0xf0   :  { %v6316_v7 = vmax.f32 %v452_v0, %v878_v1  ;;  %v455_v8 = vmax.f32 %v337_v3, 0.0  ;;  %v332_v9 = vadd.f32 %v6258_v25, %v331_v5  ;;  %v758_v10 = vadd.f32 %v6258_v25, %v757_v6 }
  0xf1   :  { %v881_v11 = vmax.f32 %v763_v4, 0.0  ;;  %v5034_v12 = vpop.f32.mrf.mxu0  ;;  %v5102_v14 = vpop.f32.mrf.mxu1 }
  0xf2   :  { %v454_v15 = vmax.f32 %v332_v9, 0.0  ;;  %v880_v17 = vmax.f32 %v758_v10, 0.0  ;;  %v347_v18 = vadd.f32 %v5034_v12, %v6258_v25  ;;  %v773_v19 = vadd.f32 %v5102_v14, %v6258_v25 }
  0xf3   :  { %v6322_v20 = vmax.f32 %v455_v8, %v881_v11  ;;  %v341_v21 = vpop.f32.mrf.mxu0  ;;  %v767_v22 = vpop.f32.mrf.mxu1 }
  0xf4   :  { %v6324_v24 = vmax.f32 %v454_v15, %v880_v17  ;;  %v457_v26 = vmax.f32 %v347_v18, 0.0  ;;  %v883_v27 = vmax.f32 %v773_v19, 0.0  ;;  %v342_v28 = vadd.f32 %v6258_v25, %v341_v21 }
  0xf5   :  { %v768_v29 = vadd.f32 %v6258_v25, %v767_v22  ;;  %v5037_v30 = vpop.f32.mrf.mxu0  ;;  %v5105_v31 = vpop.f32.mrf.mxu1 }
  0xf6   :  { %v6328_v32 = vmax.f32 %v457_v26, %v883_v27  ;;  %v456_v33 = vmax.f32 %v342_v28, 0.0  ;;  %v357_v34 = vadd.f32 %v5037_v30, %v6258_v25  ;;  %v783_v36 = vadd.f32 %v5105_v31, %v6258_v25 }
  0xf7   :  { %v882_v37 = vmax.f32 %v768_v29, 0.0  ;;  %v351_v40 = vpop.f32.mrf.mxu0  ;;  %v777_v41 = vpop.f32.mrf.mxu1 }
  0xf8   :  { %v459_v42 = vmax.f32 %v357_v34, 0.0  ;;  %v885_v43 = vmax.f32 %v783_v36, 0.0  ;;  %v352_v44 = vadd.f32 %v6258_v25, %v351_v40  ;;  %v778_v46 = vadd.f32 %v6258_v25, %v777_v41 }
  0xf9   :  { %v6334_v48 = vmax.f32 %v456_v33, %v882_v37  ;;  %v5040_v49 = vpop.f32.mrf.mxu0  ;;  %v5108_v50 = vpop.f32.mrf.mxu1 }
  0xfa   :  { %v6336_v51 = vmax.f32 %v459_v42, %v885_v43  ;;  %v458_v52 = vmax.f32 %v352_v44, 0.0  ;;  %v884_v53 = vmax.f32 %v778_v46, 0.0  ;;  %v367_v54 = vadd.f32 %v5040_v49, %v6258_v25 }
  0xfb   :  { %v793_v55 = vadd.f32 %v5108_v50, %v6258_v25  ;;  %v361_v57 = vpop.f32.mrf.mxu0  ;;  %v787_v58 = vpop.f32.mrf.mxu1 }
  0xfc   :  { %v6340_v61 = vmax.f32 %v458_v52, %v884_v53  ;;  %v461_v62 = vmax.f32 %v367_v54, 0.0  ;;  %v362_v0 = vadd.f32 %v6258_v25, %v361_v57  ;;  %v788_v1 = vadd.f32 %v6258_v25, %v787_v58 }
  0xfd   :  { %v887_v3 = vmax.f32 %v793_v55, 0.0  ;;  %v5043_v4 = vpop.f32.mrf.mxu0  ;;  %v5111_v5 = vpop.f32.mrf.mxu1 }
  0xfe   :  { %v460_v6 = vmax.f32 %v362_v0, 0.0  ;;  %v886_v8 = vmax.f32 %v788_v1, 0.0  ;;  %v377_v9 = vadd.f32 %v5043_v4, %v6258_v25  ;;  %v803_v10 = vadd.f32 %v5111_v5, %v6258_v25 }
  0xff   :  { %v6346_v11 = vmax.f32 %v461_v62, %v887_v3  ;;  %v371_v12 = vpop.f32.mrf.mxu0  ;;  %v797_v14 = vpop.f32.mrf.mxu1 }
 0x100   :  { %v6348_v15 = vmax.f32 %v460_v6, %v886_v8  ;;  %v463_v17 = vmax.f32 %v377_v9, 0.0  ;;  %v889_v18 = vmax.f32 %v803_v10, 0.0  ;;  %v372_v19 = vadd.f32 %v6258_v25, %v371_v12 }
 0x101   :  { %v798_v21 = vadd.f32 %v6258_v25, %v797_v14  ;;  %v5046_v22 = vpop.f32.mrf.mxu0  ;;  %v5114_v26 = vpop.f32.mrf.mxu1 }
 0x102   :  { %v6352_v27 = vmax.f32 %v463_v17, %v889_v18  ;;  %v462_v28 = vmax.f32 %v372_v19, 0.0  ;;  %v387_v29 = vadd.f32 %v5046_v22, %v6258_v25  ;;  %v813_v30 = vadd.f32 %v5114_v26, %v6258_v25 }
 0x103   :  { %v888_v31 = vmax.f32 %v798_v21, 0.0  ;;  %v381_v33 = vpop.f32.mrf.mxu0  ;;  %v807_v34 = vpop.f32.mrf.mxu1 }
 0x104   :  { %v465_v36 = vmax.f32 %v387_v29, 0.0  ;;  %v891_v37 = vmax.f32 %v813_v30, 0.0  ;;  %v382_v40 = vadd.f32 %v6258_v25, %v381_v33  ;;  %v808_v41 = vadd.f32 %v6258_v25, %v807_v34 }
 0x105   :  { %v6358_v42 = vmax.f32 %v462_v28, %v888_v31  ;;  %v5049_v43 = vpop.f32.mrf.mxu0  ;;  %v5117_v44 = vpop.f32.mrf.mxu1 }
 0x106   :  { %v6360_v46 = vmax.f32 %v465_v36, %v891_v37  ;;  %v464_v49 = vmax.f32 %v382_v40, 0.0  ;;  %v890_v50 = vmax.f32 %v808_v41, 0.0  ;;  %v397_v52 = vadd.f32 %v5049_v43, %v6258_v25 }
 0x107   :  { %v823_v53 = vadd.f32 %v5117_v44, %v6258_v25  ;;  %v391_v54 = vpop.f32.mrf.mxu0  ;;  %v817_v55 = vpop.f32.mrf.mxu1 }
 0x108   :  { %v6364_v57 = vmax.f32 %v464_v49, %v890_v50  ;;  %v467_v58 = vmax.f32 %v397_v52, 0.0  ;;  %v392_v62 = vadd.f32 %v6258_v25, %v391_v54  ;;  %v818_v0 = vadd.f32 %v6258_v25, %v817_v55 }
 0x109   :  { %v893_v1 = vmax.f32 %v823_v53, 0.0  ;;  %v5052_v3 = vpop.f32.mrf.mxu0  ;;  %v5120_v4 = vpop.f32.mrf.mxu1 }
 0x10a   :  { %v466_v5 = vmax.f32 %v392_v62, 0.0  ;;  %v892_v6 = vmax.f32 %v818_v0, 0.0  ;;  %v407_v8 = vadd.f32 %v5052_v3, %v6258_v25  ;;  %v833_v9 = vadd.f32 %v5120_v4, %v6258_v25 }
 0x10b   :  { %v6370_v10 = vmax.f32 %v467_v58, %v893_v1  ;;  %v401_v12 = vpop.f32.mrf.mxu0  ;;  %v827_v14 = vpop.f32.mrf.mxu1 }
 0x10c   :  { %v6372_v17 = vmax.f32 %v466_v5, %v892_v6  ;;  %v469_v18 = vmax.f32 %v407_v8, 0.0  ;;  %v895_v19 = vmax.f32 %v833_v9, 0.0  ;;  %v402_v21 = vadd.f32 %v6258_v25, %v401_v12 }
 0x10d   :  { %v828_v22 = vadd.f32 %v6258_v25, %v827_v14  ;;  %v5055_v26 = vpop.f32.mrf.mxu0  ;;  %v5123_v28 = vpop.f32.mrf.mxu1 }
 0x10e   :  { %v6376_v29 = vmax.f32 %v469_v18, %v895_v19  ;;  %v468_v30 = vmax.f32 %v402_v21, 0.0  ;;  %v417_v31 = vadd.f32 %v5055_v26, %v6258_v25  ;;  %v843_v33 = vadd.f32 %v5123_v28, %v6258_v25 }
 0x10f   :  { %v894_v34 = vmax.f32 %v828_v22, 0.0  ;;  %v411_v36 = vpop.f32.mrf.mxu0  ;;  %v837_v37 = vpop.f32.mrf.mxu1 }
 0x110   :  { %v471_v40 = vmax.f32 %v417_v31, 0.0  ;;  %v897_v41 = vmax.f32 %v843_v33, 0.0  ;;  %v412_v43 = vadd.f32 %v6258_v25, %v411_v36  ;;  %v838_v44 = vadd.f32 %v6258_v25, %v837_v37 }
 0x111   :  { %v6382_v49 = vmax.f32 %v468_v30, %v894_v34  ;;  %v5058_v50 = vpop.f32.mrf.mxu0  ;;  %v5126_v52 = vpop.f32.mrf.mxu1 }
 0x112   :  { %v6384_v53 = vmax.f32 %v471_v40, %v897_v41  ;;  %v470_v54 = vmax.f32 %v412_v43, 0.0  ;;  %v896_v55 = vmax.f32 %v838_v44, 0.0  ;;  %v427_v58 = vadd.f32 %v5058_v50, %v6258_v25 }
 0x113   :  { %v853_v62 = vadd.f32 %v5126_v52, %v6258_v25  ;;  %v421_v0 = vpop.f32.mrf.mxu0  ;;  %v847_v1 = vpop.f32.mrf.mxu1 }
 0x114   :  { %v6388_v3 = vmax.f32 %v470_v54, %v896_v55  ;;  %v473_v4 = vmax.f32 %v427_v58, 0.0  ;;  %v422_v5 = vadd.f32 %v6258_v25, %v421_v0  ;;  %v848_v6 = vadd.f32 %v6258_v25, %v847_v1 }
 0x115   :  { %v899_v8 = vmax.f32 %v853_v62, 0.0  ;;  %v5061_v9 = vpop.f32.mrf.mxu0  ;;  %v5129_v12 = vpop.f32.mrf.mxu1 }
 0x116   :  { %v472_v14 = vmax.f32 %v422_v5, 0.0  ;;  %v898_v18 = vmax.f32 %v848_v6, 0.0  ;;  %v437_v19 = vadd.f32 %v5061_v9, %v6258_v25  ;;  %v863_v21 = vadd.f32 %v5129_v12, %v6258_v25 }
 0x117   :  { %v6394_v22 = vmax.f32 %v473_v4, %v899_v8  ;;  %v431_v26 = vpop.f32.mrf.mxu0  ;;  %v857_v28 = vpop.f32.mrf.mxu1 }
 0x118   :  { %v6396_v30 = vmax.f32 %v472_v14, %v898_v18  ;;  %v475_v31 = vmax.f32 %v437_v19, 0.0  ;;  %v901_v33 = vmax.f32 %v863_v21, 0.0  ;;  %v432_v34 = vadd.f32 %v6258_v25, %v431_v26 }
 0x119   :  { %v858_v36 = vadd.f32 %v6258_v25, %v857_v28  ;;  %v5146_v37 = vpop.f32.mrf.mxu0  ;;  %v5214_v40 = vpop.f32.mrf.mxu1 }
 0x11a   :  { %v6400_v41 = vmax.f32 %v475_v31, %v901_v33  ;;  %v474_v43 = vmax.f32 %v432_v34, 0.0  ;;  %v1155_v44 = vadd.f32 %v5146_v37, %v6258_v25  ;;  %v1581_v50 = vadd.f32 %v5214_v40, %v6258_v25 }
 0x11b   :  { %v900_v52 = vmax.f32 %v858_v36, 0.0  ;;  %v1149_v54 = vpop.f32.mrf.mxu0  ;;  %v1575_v55 = vpop.f32.mrf.mxu1 }
 0x11c   :  { %v1329_v58 = vmax.f32 %v1155_v44, 0.0  ;;  %v1755_v62 = vmax.f32 %v1581_v50, 0.0  ;;  %v1150_v0 = vadd.f32 %v6258_v25, %v1149_v54  ;;  %v1576_v1 = vadd.f32 %v6258_v25, %v1575_v55  ;;  %v1941_v54 = vld [vmem:[%s8286_s3 + $0x278] sm:$0xff] }
 0x11d   :  { %v6406_v4 = vmax.f32 %v474_v43, %v900_v52  ;;  %v5149_v5 = vpop.f32.mrf.mxu0  ;;  %v5217_v6 = vpop.f32.mrf.mxu1 }
 0x11e   :  { %v1791_v8 = vmax.f32 %v1329_v58, %v1755_v62  ;;  %v1328_v9 = vmax.f32 %v1150_v0, 0.0  ;;  %v1754_v12 = vmax.f32 %v1576_v1, 0.0  ;;  %v1165_v14 = vadd.f32 %v5149_v5, %v6258_v25  ;;  %v1940_v5 = vld [vmem:[%s8286_s3 + $0x270] sm:$0xff] }
 0x11f   :  { %v1591_v18 = vadd.f32 %v5217_v6, %v6258_v25  ;;  %v1159_v19 = vpop.f32.mrf.mxu0  ;;  %v1585_v21 = vpop.f32.mrf.mxu1 }
 0x120   :  { %v1790_v26 = vmax.f32 %v1328_v9, %v1754_v12  ;;  %v1331_v28 = vmax.f32 %v1165_v14, 0.0  ;;  %v1160_v31 = vadd.f32 %v6258_v25, %v1159_v19  ;;  %v1586_v33 = vadd.f32 %v6258_v25, %v1585_v21  ;;  %v1955_v14 = vld [vmem:[%s8286_s3 + $0x2e8] sm:$0xff] }
 0x121   :  { %v1757_v34 = vmax.f32 %v1591_v18, 0.0  ;;  %v5152_v36 = vpop.f32.mrf.mxu0  ;;  %v5220_v37 = vpop.f32.mrf.mxu1  ;;  %v1827_v40 = vmax.f32 %v6264_v38, %v1791_v8  ;;  %v1956_v38 = vld [vmem:[%s8286_s3 + $0x2f0] sm:$0xff]  ;;  %v1939_v21 = vld [vmem:[%s8286_s3 + $0x268] sm:$0xff] }
 0x122   :  { %v1826_v43 = vmax.f32 %v6268_v45, %v1790_v26  ;;  %v1330_v44 = vmax.f32 %v1160_v31, 0.0  ;;  %v1756_v50 = vmax.f32 %v1586_v33, 0.0  ;;  %v1175_v52 = vadd.f32 %v5152_v36, %v6258_v25  ;;  %v1973_v26 = vld [vmem:[%s8286_s3 + $0x378] sm:$0xff]  ;;  %v1988_v31 = vld [vmem:[%s8286_s3 + $0x3f0] sm:$0xff] }
 0x123   :  { %v1793_v55 = vmax.f32 %v1331_v28, %v1757_v34  ;;  %v1601_v58 = vadd.f32 %v5220_v37, %v6258_v25  ;;  %2509 = vmatprep.mubr.f32.mxu0 %v1827_v40  ;;  %v6419_v62 = vpop.f32.mrf.mxu0  ;;  %v6421_v0 = vpop.f32.mrf.mxu1  ;;  %v1938_v34 = vld [vmem:[%s8286_s3 + $0x260] sm:$0xff]  ;;  %v1972_v40 = vld [vmem:[%s8286_s3 + $0x370] sm:$0xff] }
 0x124   :  { %v1792_v45 = vmax.f32 %v1330_v44, %v1756_v50  ;;  %v1333_v1 = vmax.f32 %v1175_v52, 0.0  ;;  %2510 = vmatmul.mubr.f32.vlgmr.msra.gmra.mxu0 %v1826_v43  ;;  %v1953_v43 = vld [vmem:[%s8286_s3 + $0x2d8] sm:$0xff]  ;;  %v1987_v44 = vld [vmem:[%s8286_s3 + $0x3e8] sm:$0xff] }
 0x125   :  { %v1759_v6 = vmax.f32 %v1601_v58, 0.0  ;;  %4401 = vmatpush3.msra.mxu0 %v1941_v54  ;;  %v5155_v8 = vpop.f32.mrf.mxu0  ;;  %v5223_v9 = vpop.f32.mrf.mxu1  ;;  %v1829_v12 = vmax.f32 %v6274_v56, %v1793_v55  ;;  %v1937_v50 = vld [vmem:[%s8286_s3 + $0x258] sm:$0xff]  ;;  %v1952_v54 = vld [vmem:[%s8286_s3 + $0x2d0] sm:$0xff]  ;;  %v1986_v55 = vld [vmem:[%s8286_s3 + $0x3e0] sm:$0xff] }
 0x126   :  { %v1828_v18 = vmax.f32 %v6276_v59, %v1792_v45  ;;  %v1185_v19 = vadd.f32 %v5155_v8, %v6258_v25  ;;  %4402 = vmatprep.subr.mxu0 %v1956_v38  ;;  %v1611_v56 = vadd.f32 %v5223_v9, %v6258_v25  ;;  %v1954_v59 = vld [vmem:[%s8286_s3 + $0x2e0] sm:$0xff]  ;;  %v1936_v58 = vld [vmem:[%s8286_s3 + $0x250] sm:$0xff]  ;;  %v1969_v9 = vld [vmem:[%s8286_s3 + $0x358] sm:$0xff] }
 0x127   :  { %v1795_v28 = vmax.f32 %v1333_v1, %v1759_v6  ;;  %2579 = vmatprep.mubr.f32.mxu1 %v1829_v12  ;;  %4403 = vmatpush3.msra.mxu0 %v1940_v5  ;;  %v1970_v38 = vld [vmem:[%s8286_s3 + $0x360] sm:$0xff]  ;;  %v1951_v1 = vld [vmem:[%s8286_s3 + $0x2c8] sm:$0xff]  ;;  %v1985_v5 = vld [vmem:[%s8286_s3 + $0x3d8] sm:$0xff]  ;;  %v6486_v6 = vpop.f32.mrf.mxu0  ;;  %v6488_v8 = vpop.f32.mrf.mxu1 }
 0x128   :  { %v1335_v33 = vmax.f32 %v1185_v19, 0.0  ;;  %4404 = vmatprep.subr.mxu0 %v1955_v14  ;;  %2580 = vmatmul.mubr.f32.vlgmr.msra.gmra.mxu1 %v1828_v18  ;;  %v1761_v36 = vmax.f32 %v1611_v56, 0.0  ;;  %v1950_v12 = vld [vmem:[%s8286_s3 + $0x2c0] sm:$0xff]  ;;  %v1984_v14 = vld [vmem:[%s8286_s3 + $0x3d0] sm:$0xff] }
 0x129   :  { %4405 = vmatpush3.msra.mxu0 %v1939_v21  ;;  %4436 = vmatpush3.msra.mxu1 %v1973_v26  ;;  %v1831_v37 = vmax.f32 %v6280_v2, %v1795_v28  ;;  %v1971_v2 = vld [vmem:[%s8286_s3 + $0x368] sm:$0xff]  ;;  %v1934_v18 = vld [vmem:[%s8286_s3 + $0x240] sm:$0xff]  ;;  %v1968_v19 = vld [vmem:[%s8286_s3 + $0x350] sm:$0xff]  ;;  %v5158_v28 = vpop.f32.mrf.mxu0  ;;  %v5226_v56 = vpop.f32.mrf.mxu1 }
 0x12a   :  { %4406 = vmatprep.subr.mxu0 %v1954_v59  ;;  %4437 = vmatprep.subr.mxu1 %v1988_v31  ;;  %v1797_v52 = vmax.f32 %v1335_v33, %v1761_v36  ;;  %v1949_v21 = vld [vmem:[%s8286_s3 + $0x2b8] sm:$0xff]  ;;  %v1983_v26 = vld [vmem:[%s8286_s3 + $0x3c8] sm:$0xff]  ;;  %v1948_v33 = vld [vmem:[%s8286_s3 + $0x2b0] sm:$0xff] }
 0x12b   :  { %4407 = vmatpush3.msra.mxu0 %v1938_v34  ;;  %2649 = vmatprep.mubr.f32.mxu0 %v1831_v37  ;;  %v1933_v59 = vld [vmem:[%s8286_s3 + $0x238] sm:$0xff]  ;;  %v1967_v31 = vld [vmem:[%s8286_s3 + $0x348] sm:$0xff]  ;;  %v1982_v34 = vld [vmem:[%s8286_s3 + $0x3c0] sm:$0xff] }
 0x12c   :  { %4438 = vmatpush3.msra.mxu1 %v1972_v40  ;;  %4408 = vmatprep.subr.mxu0 %v1953_v43  ;;  %v1833_v45 = vmax.f32 %v6288_v16, %v1797_v52  ;;  %v1935_v16 = vld [vmem:[%s8286_s3 + $0x248] sm:$0xff]  ;;  %v1932_v36 = vld [vmem:[%s8286_s3 + $0x230] sm:$0xff]  ;;  %v1966_v37 = vld [vmem:[%s8286_s3 + $0x340] sm:$0xff]  ;;  %v6542_v52 = vpop.f32.mrf.mxu0 }
 0x12d   :  { %4439 = vmatprep.subr.mxu1 %v1987_v44  ;;  %4409 = vmatpush3.msra.mxu0 %v1937_v50  ;;  %v1947_v40 = vld [vmem:[%s8286_s3 + $0x2a8] sm:$0xff]  ;;  %v1981_v43 = vld [vmem:[%s8286_s3 + $0x3b8] sm:$0xff]  ;;  %v1170_v44 = vadd.f32 %v6258_v25, %v6419_v62  ;;  %v1596_v50 = vadd.f32 %v6258_v25, %v6421_v0  ;;  %v1946_v62 = vld [vmem:[%s8286_s3 + $0x2a0] sm:$0xff] }
 0x12e   :  { %4440 = vmatpush3.msra.mxu1 %v1971_v2  ;;  %4410 = vmatprep.subr.mxu0 %v1952_v54  ;;  %v6544_v2 = vpop.f32.mrf.mxu1  ;;  %v1931_v54 = vld [vmem:[%s8286_s3 + $0x228] sm:$0xff]  ;;  %v1980_v0 = vld [vmem:[%s8286_s3 + $0x3b0] sm:$0xff] }
 0x12f   :  { %4441 = vmatprep.subr.mxu1 %v1986_v55  ;;  %4411 = vmatpush3.msra.mxu0 %v1936_v58  ;;  %v1965_v55 = vld [vmem:[%s8286_s3 + $0x338] sm:$0xff]  ;;  %v1195_v58 = vadd.f32 %v5158_v28, %v6258_v25  ;;  %v1606_v28 = vadd.f32 %v6258_v25, %v6488_v8  ;;  %v1962_v8 = vld [vmem:[%s8286_s3 + $0x320] sm:$0xff] }
 0x130   :  { %4442 = vmatpush3.msra.mxu1 %v1970_v38  ;;  %2719 = vmatprep.mubr.f32.mxu1 %v1833_v45  ;;  %v1621_v38 = vadd.f32 %v5226_v56, %v6258_v25  ;;  %v1930_v45 = vld [vmem:[%s8286_s3 + $0x220] sm:$0xff]  ;;  %v1944_v56 = vld [vmem:[%s8286_s3 + $0x290] sm:$0xff] }
 0x131   :  { %4412 = vmatprep.subr.mxu0 %v1951_v1  ;;  %4443 = vmatprep.subr.mxu1 %v1985_v5  ;;  %v1964_v1 = vld [vmem:[%s8286_s3 + $0x330] sm:$0xff]  ;;  %v1945_v5 = vld [vmem:[%s8286_s3 + $0x298] sm:$0xff] }
 0x132   :  { %4413 = vmatpush3.msra.mxu0 %v1935_v16  ;;  %4444 = vmatpush3.msra.mxu1 %v1969_v9  ;;  %v1979_v16 = vld [vmem:[%s8286_s3 + $0x3a8] sm:$0xff]  ;;  %v1332_v9 = vmax.f32 %v1170_v44, 0.0 }
 0x133   :  { %4414 = vmatprep.subr.mxu0 %v1950_v12  ;;  %4445 = vmatprep.subr.mxu1 %v1984_v14  ;;  %v1758_v12 = vmax.f32 %v1596_v50, 0.0  ;;  %v5161_v14 = vpop.f32.mrf.mxu0  ;;  %v1927_v44 = vld [vmem:[%s8286_s3 + $0x208] sm:$0xff] }
 0x134   :  { %4415 = vmatpush3.msra.mxu0 %v1934_v18  ;;  %4446 = vmatpush3.msra.mxu1 %v1968_v19  ;;  %v5229_v18 = vpop.f32.mrf.mxu1  ;;  %v1929_v19 = vld [vmem:[%s8286_s3 + $0x218] sm:$0xff] }
 0x135   :  { %4416 = vmatprep.subr.mxu0 %v1949_v21  ;;  %4447 = vmatprep.subr.mxu1 %v1983_v26  ;;  %v1963_v21 = vld [vmem:[%s8286_s3 + $0x328] sm:$0xff]  ;;  %v1180_v26 = vadd.f32 %v6258_v25, %v6486_v6  ;;  %v1928_v6 = vld [vmem:[%s8286_s3 + $0x210] sm:$0xff] }
 0x136   :  { %4417 = vmatpush3.msra.mxu0 %v1933_v59  ;;  %4448 = vmatpush3.msra.mxu1 %v1967_v31  ;;  %v1978_v59 = vld [vmem:[%s8286_s3 + $0x3a0] sm:$0xff]  ;;  %v1337_v31 = vmax.f32 %v1195_v58, 0.0 }
 0x137   :  { %4418 = vmatprep.subr.mxu0 %v1948_v33  ;;  %4449 = vmatprep.subr.mxu1 %v1982_v34  ;;  %v1763_v33 = vmax.f32 %v1621_v38, 0.0  ;;  %v1205_v34 = vadd.f32 %v5161_v14, %v6258_v25  ;;  %v1334_v50 = vmax.f32 %v1180_v26, 0.0  ;;  %v1926_v58 = vld [vmem:[%s8286_s3 + $0x200] sm:$0xff]  ;;  %v1960_v38 = vld [vmem:[%s8286_s3 + $0x310] sm:$0xff] }
 0x138   :  { %4419 = vmatpush3.msra.mxu0 %v1932_v36  ;;  %4450 = vmatpush3.msra.mxu1 %v1966_v37  ;;  %v1631_v36 = vadd.f32 %v5229_v18, %v6258_v25  ;;  %v1943_v37 = vld [vmem:[%s8286_s3 + $0x288] sm:$0xff]  ;;  %v1961_v25 = vld [vmem:[%s8286_s3 + $0x318] sm:$0xff] }
 0x139   :  { %4420 = vmatprep.subr.mxu0 %v1947_v40  ;;  %4451 = vmatprep.subr.mxu1 %v1981_v43  ;;  %v1977_v40 = vld [vmem:[%s8286_s3 + $0x398] sm:$0xff]  ;;  %v1794_v43 = vmax.f32 %v1332_v9, %v1758_v12  ;;  %v1959_v12 = vld [vmem:[%s8286_s3 + $0x308] sm:$0xff] }
 0x13a   :  { %4421 = vmatpush3.msra.mxu0 %v1931_v54  ;;  %4452 = vmatpush3.msra.mxu1 %v1965_v55  ;;  %v1760_v54 = vmax.f32 %v1606_v28, 0.0  ;;  %v1942_v55 = vld [vmem:[%s8286_s3 + $0x280] sm:$0xff]  ;;  %v2021_v9 = vld [vmem:[%s8286_s3 + $0x4f8] sm:$0xff] }
 0x13b   :  { %4422 = vmatprep.subr.mxu0 %v1946_v62  ;;  %4453 = vmatprep.subr.mxu1 %v1980_v0  ;;  %v1976_v62 = vld [vmem:[%s8286_s3 + $0x390] sm:$0xff]  ;;  %v1799_v0 = vmax.f32 %v1337_v31, %v1763_v33  ;;  %v2005_v18 = vld [vmem:[%s8286_s3 + $0x478] sm:$0xff]  ;;  %v1958_v28 = vld [vmem:[%s8286_s3 + $0x300] sm:$0xff] }
 0x13c   :  { %4423 = vmatpush3.msra.mxu0 %v1930_v45  ;;  %4454 = vmatpush3.msra.mxu1 %v1964_v1  ;;  %v1339_v45 = vmax.f32 %v1205_v34, 0.0  ;;  %v1765_v1 = vmax.f32 %v1631_v36, 0.0  ;;  %v1796_v14 = vmax.f32 %v1334_v50, %v1760_v54  ;;  %v2053_v31 = vld [vmem:[%s8286_s3 + $0x5f8] sm:$0xff]  ;;  %v2003_v33 = vld [vmem:[%s8286_s3 + $0x468] sm:$0xff]  ;;  %v2052_v34 = vld [vmem:[%s8286_s3 + $0x5f0] sm:$0xff] }
 0x13d   :  { %4424 = vmatprep.subr.mxu0 %v1945_v5  ;;  %4455 = vmatprep.subr.mxu1 %v1979_v16  ;;  %v1975_v5 = vld [vmem:[%s8286_s3 + $0x388] sm:$0xff]  ;;  %v1830_v16 = vmax.f32 %v6286_v13, %v1794_v43  ;;  %v1835_v13 = vmax.f32 %v6298_v35, %v1799_v0  ;;  %v2002_v36 = vld [vmem:[%s8286_s3 + $0x460] sm:$0xff]  ;;  %v2001_v43 = vld [vmem:[%s8286_s3 + $0x458] sm:$0xff] }
 0x13e   :  { %4425 = vmatpush3.msra.mxu0 %v1929_v19  ;;  %4456 = vmatpush3.msra.mxu1 %v1963_v21  ;;  %v1974_v19 = vld [vmem:[%s8286_s3 + $0x380] sm:$0xff]  ;;  %v2020_v21 = vld [vmem:[%s8286_s3 + $0x4f0] sm:$0xff]  ;;  %v1801_v26 = vmax.f32 %v1339_v45, %v1765_v1  ;;  %v2019_v35 = vld [vmem:[%s8286_s3 + $0x4e8] sm:$0xff] }
 0x13f   :  { %4426 = vmatprep.subr.mxu0 %v1944_v56  ;;  %4457 = vmatprep.subr.mxu1 %v1978_v59  ;;  %v2004_v56 = vld [vmem:[%s8286_s3 + $0x470] sm:$0xff]  ;;  %v1832_v59 = vmax.f32 %v6292_v23, %v1796_v14  ;;  %v2050_v50 = vld [vmem:[%s8286_s3 + $0x5e0] sm:$0xff]  ;;  %v2049_v0 = vld [vmem:[%s8286_s3 + $0x5d8] sm:$0xff] }
 0x140   :  { %4427 = vmatpush3.msra.mxu0 %v1928_v6  ;;  %4458 = vmatpush3.msra.mxu1 %v1962_v8  ;;  %v2037_v6 = vld [vmem:[%s8286_s3 + $0x578] sm:$0xff]  ;;  %v1837_v23 = vmax.f32 %v6304_v47, %v1801_v26  ;;  %v2018_v8 = vld [vmem:[%s8286_s3 + $0x4e0] sm:$0xff]  ;;  %v2000_v54 = vld [vmem:[%s8286_s3 + $0x450] sm:$0xff] }
 0x141   :  { %4428 = vmatprep.subr.mxu0 %v1943_v37  ;;  %4459 = vmatprep.subr.mxu1 %v1977_v40  ;;  %v2036_v37 = vld [vmem:[%s8286_s3 + $0x570] sm:$0xff]  ;;  %v2017_v47 = vld [vmem:[%s8286_s3 + $0x4d8] sm:$0xff]  ;;  %v2051_v40 = vld [vmem:[%s8286_s3 + $0x5e8] sm:$0xff] }
 0x142   :  { %4429 = vmatpush3.msra.mxu0 %v1927_v44  ;;  %4460 = vmatpush3.msra.mxu1 %v1961_v25  ;;  %v2035_v44 = vld [vmem:[%s8286_s3 + $0x568] sm:$0xff]  ;;  %v2016_v25 = vld [vmem:[%s8286_s3 + $0x4d0] sm:$0xff]  ;;  %v2033_v1 = vld [vmem:[%s8286_s3 + $0x558] sm:$0xff] }
 0x143   :  { %4430 = vmatprep.subr.mxu0 %v1942_v55  ;;  %4461 = vmatprep.subr.mxu1 %v1976_v62  ;;  %v2034_v55 = vld [vmem:[%s8286_s3 + $0x560] sm:$0xff]  ;;  %v2015_v62 = vld [vmem:[%s8286_s3 + $0x4c8] sm:$0xff]  ;;  %v2013_v14 = vld [vmem:[%s8286_s3 + $0x4b8] sm:$0xff] }
 0x144   :  { %4431 = vmatpush3.msra.mxu0 %v1926_v58  ;;  %4462 = vmatpush3.msra.mxu1 %v1960_v38  ;;  %v6702_v58 = vpop.f32.mrf.mxu0  ;;  %v6704_v38 = vpop.f32.mrf.mxu1  ;;  %v1999_v45 = vld [vmem:[%s8286_s3 + $0x448] sm:$0xff] }
 0x145   :  { %2650 = vmatmul.mubr.f32.vlgmr.msra.gmra.mxu0 %v1830_v16  ;;  %4463 = vmatprep.subr.mxu1 %v1975_v5  ;;  %v2014_v5 = vld [vmem:[%s8286_s3 + $0x4c0] sm:$0xff]  ;;  %v2048_v16 = vld [vmem:[%s8286_s3 + $0x5d0] sm:$0xff]  ;;  %v2031_v26 = vld [vmem:[%s8286_s3 + $0x548] sm:$0xff] }
 0x146   :  { %4470 = vmatprep.subr.mxu0 %v2021_v9  ;;  %4464 = vmatpush3.msra.mxu1 %v1959_v12  ;;  %v1998_v9 = vld [vmem:[%s8286_s3 + $0x440] sm:$0xff]  ;;  %v2032_v12 = vld [vmem:[%s8286_s3 + $0x550] sm:$0xff] }
 0x147   :  { %4471 = vmatpush3.msra.mxu0 %v2005_v18  ;;  %2789 = vmatprep.mubr.f32.mxu0 %v1835_v13  ;;  %v2047_v18 = vld [vmem:[%s8286_s3 + $0x5c8] sm:$0xff]  ;;  %v5164_v13 = vpop.f32.mrf.mxu0 }
 0x148   :  { %4465 = vmatprep.subr.mxu1 %v1974_v19  ;;  %4472 = vmatprep.subr.mxu0 %v2020_v21  ;;  %v5232_v19 = vpop.f32.mrf.mxu1  ;;  %v1997_v21 = vld [vmem:[%s8286_s3 + $0x438] sm:$0xff] }
 0x149   :  { %4466 = vmatpush3.msra.mxu1 %v1958_v28  ;;  %4473 = vmatpush3.msra.mxu0 %v2004_v56  ;;  %v2012_v28 = vld [vmem:[%s8286_s3 + $0x4b0] sm:$0xff]  ;;  %v2046_v56 = vld [vmem:[%s8286_s3 + $0x5c0] sm:$0xff] }
 0x14a   :  { %2720 = vmatmul.mubr.f32.vlgmr.msra.gmra.mxu1 %v1832_v59  ;;  %4474 = vmatprep.subr.mxu0 %v2019_v35  ;;  %v1996_v35 = vld [vmem:[%s8286_s3 + $0x430] sm:$0xff]  ;;  %v2030_v59 = vld [vmem:[%s8286_s3 + $0x540] sm:$0xff] }
 0x14b   :  { %4505 = vmatprep.subr.mxu1 %v2053_v31  ;;  %4475 = vmatpush3.msra.mxu0 %v2003_v33  ;;  %v2011_v31 = vld [vmem:[%s8286_s3 + $0x4a8] sm:$0xff]  ;;  %v2045_v33 = vld [vmem:[%s8286_s3 + $0x5b8] sm:$0xff] }
 0x14c   :  { %4506 = vmatpush3.msra.mxu1 %v2037_v6  ;;  %2859 = vmatprep.mubr.f32.mxu1 %v1837_v23  ;;  %v6757_v6 = vld [vmem:[%s8287_s2] ss:$0 sm:$0xff] }
 0x14d   :  { %4476 = vmatprep.subr.mxu0 %v2018_v8  ;;  %4507 = vmatprep.subr.mxu1 %v2052_v34  ;;  %v1190_v23 = vadd.f32 %v6757_v6, %v6542_v52  ;;  %v1616_v8 = vadd.f32 %v6757_v6, %v6544_v2  ;;  %v6763_v34 = vpop.f32.mrf.mxu0  ;;  %v2010_v52 = vld [vmem:[%s8286_s3 + $0x4a0] sm:$0xff]  ;;  %v2044_v2 = vld [vmem:[%s8286_s3 + $0x5b0] sm:$0xff] }
 0x14e   :  { %4477 = vmatpush3.msra.mxu0 %v2002_v36  ;;  %4508 = vmatpush3.msra.mxu1 %v2036_v37  ;;  %v6765_v36 = vpop.f32.mrf.mxu1  ;;  %v1995_v37 = vld [vmem:[%s8286_s3 + $0x428] sm:$0xff] }
 0x14f   :  { %4478 = vmatprep.subr.mxu0 %v2017_v47  ;;  %4509 = vmatprep.subr.mxu1 %v2051_v40  ;;  %v2029_v47 = vld [vmem:[%s8286_s3 + $0x538] sm:$0xff]  ;;  %v1215_v40 = vadd.f32 %v6757_v6, %v5164_v13 }
 0x150   :  { %4479 = vmatpush3.msra.mxu0 %v2001_v43  ;;  %4510 = vmatpush3.msra.mxu1 %v2035_v44  ;;  %v1641_v43 = vadd.f32 %v6757_v6, %v5232_v19  ;;  %v1994_v44 = vld [vmem:[%s8286_s3 + $0x420] sm:$0xff] }
 0x151   :  { %4480 = vmatprep.subr.mxu0 %v2016_v25  ;;  %4511 = vmatprep.subr.mxu1 %v2050_v50  ;;  %v2028_v25 = vld [vmem:[%s8286_s3 + $0x530] sm:$0xff]  ;;  %v2009_v50 = vld [vmem:[%s8286_s3 + $0x498] sm:$0xff] }
 0x152   :  { %4481 = vmatpush3.msra.mxu0 %v2000_v54  ;;  %4512 = vmatpush3.msra.mxu1 %v2034_v55  ;;  %v2043_v54 = vld [vmem:[%s8286_s3 + $0x5a8] sm:$0xff]  ;;  %v1336_v55 = vmax.f32 %v1190_v23, 0.0  ;;  %v1767_v13 = vmax.f32 %v1641_v43, 0.0  ;;  %v2006_v23 = vld [vmem:[%s8286_s3 + $0x480] sm:$0xff] }
 0x153   :  { %4482 = vmatprep.subr.mxu0 %v2015_v62  ;;  %4513 = vmatprep.subr.mxu1 %v2049_v0  ;;  %v1762_v62 = vmax.f32 %v1616_v8, 0.0  ;;  %v5167_v0 = vpop.f32.mrf.mxu0  ;;  %v2040_v8 = vld [vmem:[%s8286_s3 + $0x590] sm:$0xff]  ;;  %v2039_v43 = vld [vmem:[%s8286_s3 + $0x588] sm:$0xff] }
 0x154   :  { %4483 = vmatpush3.msra.mxu0 %v1999_v45  ;;  %4514 = vmatpush3.msra.mxu1 %v2033_v1  ;;  %v5235_v45 = vpop.f32.mrf.mxu1  ;;  %v1993_v1 = vld [vmem:[%s8286_s3 + $0x418] sm:$0xff]  ;;  %v1225_v19 = vadd.f32 %v6757_v6, %v5167_v0  ;;  %v2084_v0 = vld [vmem:[%s8286_s3 + $0x6f0] sm:$0xff] }
 0x155   :  { %4484 = vmatprep.subr.mxu0 %v2014_v5  ;;  %4515 = vmatprep.subr.mxu1 %v2048_v16  ;;  %v2027_v5 = vld [vmem:[%s8286_s3 + $0x528] sm:$0xff]  ;;  %v1200_v16 = vadd.f32 %v6757_v6, %v6702_v58  ;;  %v1992_v58 = vld [vmem:[%s8286_s3 + $0x410] sm:$0xff] }
 0x156   :  { %4485 = vmatpush3.msra.mxu0 %v1998_v9  ;;  %4516 = vmatpush3.msra.mxu1 %v2032_v12  ;;  %v1626_v9 = vadd.f32 %v6757_v6, %v6704_v38  ;;  %v2008_v12 = vld [vmem:[%s8286_s3 + $0x490] sm:$0xff]  ;;  %v2026_v38 = vld [vmem:[%s8286_s3 + $0x520] sm:$0xff] }
 0x157   :  { %4486 = vmatprep.subr.mxu0 %v2013_v14  ;;  %4517 = vmatprep.subr.mxu1 %v2047_v18  ;;  %v2042_v14 = vld [vmem:[%s8286_s3 + $0x5a0] sm:$0xff]  ;;  %v1341_v18 = vmax.f32 %v1215_v40, 0.0 }
 0x158   :  { %4487 = vmatpush3.msra.mxu0 %v1997_v21  ;;  %4518 = vmatpush3.msra.mxu1 %v2031_v26  ;;  %v1651_v21 = vadd.f32 %v6757_v6, %v5235_v45  ;;  %v2007_v26 = vld [vmem:[%s8286_s3 + $0x488] sm:$0xff] }
 0x159   :  { %4488 = vmatprep.subr.mxu0 %v2012_v28  ;;  %4519 = vmatprep.subr.mxu1 %v2046_v56  ;;  %v2041_v28 = vld [vmem:[%s8286_s3 + $0x598] sm:$0xff]  ;;  %v1798_v56 = vmax.f32 %v1336_v55, %v1762_v62  ;;  %v2038_v62 = vld [vmem:[%s8286_s3 + $0x580] sm:$0xff] }
 0x15a   :  { %4489 = vmatpush3.msra.mxu0 %v1996_v35  ;;  %4520 = vmatpush3.msra.mxu1 %v2030_v59  ;;  %v1991_v35 = vld [vmem:[%s8286_s3 + $0x408] sm:$0xff]  ;;  %v2025_v59 = vld [vmem:[%s8286_s3 + $0x518] sm:$0xff]  ;;  %v1769_v40 = vmax.f32 %v1651_v21, 0.0 }
 0x15b   :  { %4490 = vmatprep.subr.mxu0 %v2011_v31  ;;  %4521 = vmatprep.subr.mxu1 %v2045_v33  ;;  %v1338_v31 = vmax.f32 %v1200_v16, 0.0  ;;  %v1764_v33 = vmax.f32 %v1626_v9, 0.0  ;;  %v2069_v55 = vld [vmem:[%s8286_s3 + $0x678] sm:$0xff] }
 0x15c   :  { %4491 = vmatpush3.msra.mxu0 %v1995_v37  ;;  %4522 = vmatpush3.msra.mxu1 %v2029_v47  ;;  %v1803_v37 = vmax.f32 %v1341_v18, %v1767_v13  ;;  %v1990_v47 = vld [vmem:[%s8286_s3 + $0x400] sm:$0xff]  ;;  %v2117_v9 = vld [vmem:[%s8286_s3 + $0x7f8] sm:$0xff]  ;;  %v2116_v13 = vld [vmem:[%s8286_s3 + $0x7f0] sm:$0xff] }
 0x15d   :  { %4492 = vmatprep.subr.mxu0 %v2010_v52  ;;  %4523 = vmatprep.subr.mxu1 %v2044_v2  ;;  %v2024_v52 = vld [vmem:[%s8286_s3 + $0x510] sm:$0xff]  ;;  %v1343_v2 = vmax.f32 %v1225_v19, 0.0  ;;  %v2082_v18 = vld [vmem:[%s8286_s3 + $0x6e0] sm:$0xff]  ;;  %v2115_v19 = vld [vmem:[%s8286_s3 + $0x7e8] sm:$0xff] }
 0x15e   :  { %4493 = vmatpush3.msra.mxu0 %v1994_v44  ;;  %4524 = vmatpush3.msra.mxu1 %v2028_v25  ;;  %v1834_v44 = vmax.f32 %v6300_v39, %v1798_v56  ;;  %v2085_v25 = vld [vmem:[%s8286_s3 + $0x6f8] sm:$0xff]  ;;  %v1839_v39 = vmax.f32 %v6312_v63, %v1803_v37  ;;  %v2083_v63 = vld [vmem:[%s8286_s3 + $0x6e8] sm:$0xff]  ;;  %v2114_v56 = vld [vmem:[%s8286_s3 + $0x7e0] sm:$0xff] }
 0x15f   :  { %4494 = vmatprep.subr.mxu0 %v2009_v50  ;;  %4525 = vmatprep.subr.mxu1 %v2043_v54  ;;  %v2023_v50 = vld [vmem:[%s8286_s3 + $0x508] sm:$0xff]  ;;  %v1800_v54 = vmax.f32 %v1338_v31, %v1764_v33  ;;  %v1805_v45 = vmax.f32 %v1343_v2, %v1769_v40  ;;  %v2065_v21 = vld [vmem:[%s8286_s3 + $0x658] sm:$0xff]  ;;  %v2112_v2 = vld [vmem:[%s8286_s3 + $0x7d0] sm:$0xff] }
 0x160   :  { %4495 = vmatpush3.msra.mxu0 %v1993_v1  ;;  %4526 = vmatpush3.msra.mxu1 %v2027_v5  ;;  %v2022_v1 = vld [vmem:[%s8286_s3 + $0x500] sm:$0xff]  ;;  %v2068_v5 = vld [vmem:[%s8286_s3 + $0x670] sm:$0xff]  ;;  %v2079_v31 = vld [vmem:[%s8286_s3 + $0x6c8] sm:$0xff] }
 0x161   :  { %4496 = vmatprep.subr.mxu0 %v2008_v12  ;;  %4527 = vmatprep.subr.mxu1 %v2042_v14  ;;  %v1836_v16 = vmax.f32 %v6310_v60, %v1800_v54  ;;  %v2067_v12 = vld [vmem:[%s8286_s3 + $0x668] sm:$0xff]  ;;  %v2101_v14 = vld [vmem:[%s8286_s3 + $0x778] sm:$0xff]  ;;  %v1841_v60 = vmax.f32 %v6322_v20, %v1805_v45  ;;  %v2062_v40 = vld [vmem:[%s8286_s3 + $0x640] sm:$0xff] }
 0x162   :  { %4497 = vmatpush3.msra.mxu0 %v1992_v58  ;;  %4528 = vmatpush3.msra.mxu1 %v2026_v38  ;;  %v2066_v58 = vld [vmem:[%s8286_s3 + $0x660] sm:$0xff]  ;;  %v2100_v38 = vld [vmem:[%s8286_s3 + $0x770] sm:$0xff]  ;;  %v2081_v20 = vld [vmem:[%s8286_s3 + $0x6d8] sm:$0xff] }
 0x163   :  { %4498 = vmatprep.subr.mxu0 %v2007_v26  ;;  %4529 = vmatprep.subr.mxu1 %v2041_v28  ;;  %v2099_v26 = vld [vmem:[%s8286_s3 + $0x768] sm:$0xff]  ;;  %v2080_v28 = vld [vmem:[%s8286_s3 + $0x6d0] sm:$0xff]  ;;  %v2113_v33 = vld [vmem:[%s8286_s3 + $0x7d8] sm:$0xff] }
 0x164   :  { %4499 = vmatpush3.msra.mxu0 %v1991_v35  ;;  %4530 = vmatpush3.msra.mxu1 %v2025_v59  ;;  %v2064_v35 = vld [vmem:[%s8286_s3 + $0x650] sm:$0xff]  ;;  %v2098_v59 = vld [vmem:[%s8286_s3 + $0x760] sm:$0xff]  ;;  %v2063_v37 = vld [vmem:[%s8286_s3 + $0x648] sm:$0xff] }
 0x165   :  { %4500 = vmatprep.subr.mxu0 %v2006_v23  ;;  %4531 = vmatprep.subr.mxu1 %v2040_v8  ;;  %v6923_v23 = vpop.f32.mrf.mxu0  ;;  %v6925_v8 = vpop.f32.mrf.mxu1  ;;  %v2060_v45 = vld [vmem:[%s8286_s3 + $0x630] sm:$0xff] }
 0x166   :  { %4501 = vmatpush3.msra.mxu0 %v1990_v47  ;;  %4532 = vmatpush3.msra.mxu1 %v2024_v52  ;;  %v2097_v47 = vld [vmem:[%s8286_s3 + $0x758] sm:$0xff]  ;;  %v2078_v52 = vld [vmem:[%s8286_s3 + $0x6c0] sm:$0xff] }
 0x167   :  { %2790 = vmatmul.mubr.f32.vlgmr.msra.gmra.mxu0 %v1834_v44  ;;  %4533 = vmatprep.subr.mxu1 %v2039_v43  ;;  %v2096_v43 = vld [vmem:[%s8286_s3 + $0x750] sm:$0xff]  ;;  %v2077_v44 = vld [vmem:[%s8286_s3 + $0x6b8] sm:$0xff]  ;;  %v5238_v54 = vpop.f32.mrf.mxu1 }
 0x168   :  { %4540 = vmatprep.subr.mxu0 %v2085_v25  ;;  %4534 = vmatpush3.msra.mxu1 %v2023_v50  ;;  %v2111_v25 = vld [vmem:[%s8286_s3 + $0x7c8] sm:$0xff]  ;;  %v5170_v50 = vpop.f32.mrf.mxu0 }
 0x169   :  { %4541 = vmatpush3.msra.mxu0 %v2069_v55  ;;  %2929 = vmatprep.mubr.f32.mxu0 %v1839_v39  ;;  %v2061_v55 = vld [vmem:[%s8286_s3 + $0x638] sm:$0xff]  ;;  %v2095_v39 = vld [vmem:[%s8286_s3 + $0x748] sm:$0xff] }
 0x16a   :  { %4535 = vmatprep.subr.mxu1 %v2038_v62  ;;  %4542 = vmatprep.subr.mxu0 %v2084_v0  ;;  %v2076_v62 = vld [vmem:[%s8286_s3 + $0x6b0] sm:$0xff]  ;;  %v2110_v0 = vld [vmem:[%s8286_s3 + $0x7c0] sm:$0xff] }
 0x16b   :  { %4536 = vmatpush3.msra.mxu1 %v2022_v1  ;;  %4543 = vmatpush3.msra.mxu0 %v2068_v5  ;;  %v2094_v1 = vld [vmem:[%s8286_s3 + $0x740] sm:$0xff]  ;;  %v2075_v5 = vld [vmem:[%s8286_s3 + $0x6a8] sm:$0xff] }
 0x16c   :  { %2860 = vmatmul.mubr.f32.vlgmr.msra.gmra.mxu1 %v1836_v16  ;;  %4544 = vmatprep.subr.mxu0 %v2083_v63  ;;  %v2109_v63 = vld [vmem:[%s8286_s3 + $0x7b8] sm:$0xff]  ;;  %v1210_v16 = vadd.f32 %v6757_v6, %v6763_v34  ;;  %v2074_v34 = vld [vmem:[%s8286_s3 + $0x6a0] sm:$0xff] }
 0x16d   :  { %4575 = vmatprep.subr.mxu1 %v2117_v9  ;;  %4545 = vmatpush3.msra.mxu0 %v2067_v12  ;;  %v1636_v9 = vadd.f32 %v6757_v6, %v6765_v36  ;;  %v6979_v12 = vpop.f32.mrf.mxu0  ;;  %v2108_v36 = vld [vmem:[%s8286_s3 + $0x7b0] sm:$0xff] }
 0x16e   :  { %4576 = vmatpush3.msra.mxu1 %v2101_v14  ;;  %2999 = vmatprep.mubr.f32.mxu1 %v1841_v60  ;;  %v6981_v14 = vpop.f32.mrf.mxu1  ;;  %v2059_v60 = vld [vmem:[%s8286_s3 + $0x628] sm:$0xff] }
 0x16f   :  { %4546 = vmatprep.subr.mxu0 %v2082_v18  ;;  %4577 = vmatprep.subr.mxu1 %v2116_v13  ;;  %v2093_v18 = vld [vmem:[%s8286_s3 + $0x738] sm:$0xff]  ;;  %v1235_v13 = vadd.f32 %v6757_v6, %v5170_v50 }
 0x170   :  { %4547 = vmatpush3.msra.mxu0 %v2066_v58  ;;  %4578 = vmatpush3.msra.mxu1 %v2100_v38  ;;  %v1661_v58 = vadd.f32 %v6757_v6, %v5238_v54  ;;  %v2058_v38 = vld [vmem:[%s8286_s3 + $0x620] sm:$0xff]  ;;  %v2105_v50 = vld [vmem:[%s8286_s3 + $0x798] sm:$0xff] }
 0x171   :  { %4548 = vmatprep.subr.mxu0 %v2081_v20  ;;  %4579 = vmatprep.subr.mxu1 %v2115_v19  ;;  %v2092_v20 = vld [vmem:[%s8286_s3 + $0x730] sm:$0xff]  ;;  %v2073_v19 = vld [vmem:[%s8286_s3 + $0x698] sm:$0xff] }
 0x172   :  { %4549 = vmatpush3.msra.mxu0 %v2065_v21  ;;  %4580 = vmatpush3.msra.mxu1 %v2099_v26  ;;  %v2107_v21 = vld [vmem:[%s8286_s3 + $0x7a8] sm:$0xff]  ;;  %v1340_v26 = vmax.f32 %v1210_v16, 0.0  ;;  %v2088_v16 = vld [vmem:[%s8286_s3 + $0x710] sm:$0xff] }
 0x173   :  { %4550 = vmatprep.subr.mxu0 %v2080_v28  ;;  %4581 = vmatprep.subr.mxu1 %v2114_v56  ;;  %v1766_v28 = vmax.f32 %v1636_v9, 0.0  ;;  %v5173_v56 = vpop.f32.mrf.mxu0 }
 0x174   :  { %4551 = vmatpush3.msra.mxu0 %v2064_v35  ;;  %4582 = vmatpush3.msra.mxu1 %v2098_v59  ;;  %v5241_v35 = vpop.f32.mrf.mxu1  ;;  %v2057_v59 = vld [vmem:[%s8286_s3 + $0x618] sm:$0xff] }
 0x175   :  { %4552 = vmatprep.subr.mxu0 %v2079_v31  ;;  %4583 = vmatprep.subr.mxu1 %v2113_v33  ;;  %v2091_v31 = vld [vmem:[%s8286_s3 + $0x728] sm:$0xff]  ;;  %v1220_v33 = vadd.f32 %v6757_v6, %v6923_v23  ;;  %v2056_v23 = vld [vmem:[%s8286_s3 + $0x610] sm:$0xff]  ;;  %v1802_v54 = vmax.f32 %v1340_v26, %v1766_v28  ;;  %v2086_v26 = vld [vmem:[%s8286_s3 + $0x700] sm:$0xff] }
 0x176   :  { %4553 = vmatpush3.msra.mxu0 %v2063_v37  ;;  %4584 = vmatpush3.msra.mxu1 %v2097_v47  ;;  %v1646_v37 = vadd.f32 %v6757_v6, %v6925_v8  ;;  %v2072_v47 = vld [vmem:[%s8286_s3 + $0x690] sm:$0xff]  ;;  %v2090_v8 = vld [vmem:[%s8286_s3 + $0x720] sm:$0xff] }
 0x177   :  { %4554 = vmatprep.subr.mxu0 %v2078_v52  ;;  %4585 = vmatprep.subr.mxu1 %v2112_v2  ;;  %v2106_v52 = vld [vmem:[%s8286_s3 + $0x7a0] sm:$0xff]  ;;  %v1345_v2 = vmax.f32 %v1235_v13, 0.0  ;;  %v2087_v13 = vld [vmem:[%s8286_s3 + $0x708] sm:$0xff]  ;;  %v2132_v28 = vld [vmem:[%s8286_s3 + $0x870] sm:$0xff] }
 0x178   :  { %4555 = vmatpush3.msra.mxu0 %v2062_v40  ;;  %4586 = vmatpush3.msra.mxu1 %v2096_v43  ;;  %v1771_v40 = vmax.f32 %v1661_v58, 0.0  ;;  %v1245_v43 = vadd.f32 %v6757_v6, %v5173_v56 }
 0x179   :  { %4556 = vmatprep.subr.mxu0 %v2077_v44  ;;  %4587 = vmatprep.subr.mxu1 %v2111_v25  ;;  %v1671_v44 = vadd.f32 %v6757_v6, %v5241_v35  ;;  %v2071_v25 = vld [vmem:[%s8286_s3 + $0x688] sm:$0xff]  ;;  %v2181_v35 = vld [vmem:[%s8286_s3 + $0x9f8] sm:$0xff] }
 0x17a   :  { %4557 = vmatpush3.msra.mxu0 %v2061_v55  ;;  %4588 = vmatpush3.msra.mxu1 %v2095_v39  ;;  %v2055_v55 = vld [vmem:[%s8286_s3 + $0x608] sm:$0xff]  ;;  %v2089_v39 = vld [vmem:[%s8286_s3 + $0x718] sm:$0xff]  ;;  %v1347_v9 = vmax.f32 %v1245_v43, 0.0  ;;  %v2178_v43 = vld [vmem:[%s8286_s3 + $0x9e0] sm:$0xff] }
 0x17b   :  { %4558 = vmatprep.subr.mxu0 %v2076_v62  ;;  %4589 = vmatprep.subr.mxu1 %v2110_v0  ;;  %v1342_v62 = vmax.f32 %v1220_v33, 0.0  ;;  %v1768_v0 = vmax.f32 %v1646_v37, 0.0  ;;  %v2146_v33 = vld [vmem:[%s8286_s3 + $0x8e0] sm:$0xff]  ;;  %v2180_v37 = vld [vmem:[%s8286_s3 + $0x9f0] sm:$0xff] }
 0x17c   :  { %4559 = vmatpush3.msra.mxu0 %v2060_v45  ;;  %4590 = vmatpush3.msra.mxu1 %v2094_v1  ;;  %v2070_v45 = vld [vmem:[%s8286_s3 + $0x680] sm:$0xff]  ;;  %v2104_v1 = vld [vmem:[%s8286_s3 + $0x790] sm:$0xff] }
 0x17d   :  { %4560 = vmatprep.subr.mxu0 %v2075_v5  ;;  %4591 = vmatprep.subr.mxu1 %v2109_v63  ;;  %v1807_v5 = vmax.f32 %v1345_v2, %v1771_v40  ;;  %v2054_v63 = vld [vmem:[%s8286_s3 + $0x600] sm:$0xff]  ;;  %v1804_v58 = vmax.f32 %v1342_v62, %v1768_v0  ;;  %v2179_v2 = vld [vmem:[%s8286_s3 + $0x9e8] sm:$0xff]  ;;  %v2129_v40 = vld [vmem:[%s8286_s3 + $0x858] sm:$0xff] }
 0x17e   :  { %4561 = vmatpush3.msra.mxu0 %v2059_v60  ;;  %4592 = vmatpush3.msra.mxu1 %v2093_v18  ;;  %v1773_v60 = vmax.f32 %v1671_v44, 0.0  ;;  %v2103_v18 = vld [vmem:[%s8286_s3 + $0x788] sm:$0xff]  ;;  %v2128_v44 = vld [vmem:[%s8286_s3 + $0x850] sm:$0xff]  ;;  %v2161_v0 = vld [vmem:[%s8286_s3 + $0x958] sm:$0xff] }
 0x17f   :  { %4562 = vmatprep.subr.mxu0 %v2074_v34  ;;  %4593 = vmatprep.subr.mxu1 %v2108_v36  ;;  %v1838_v34 = vmax.f32 %v6316_v7, %v1802_v54  ;;  %v2149_v36 = vld [vmem:[%s8286_s3 + $0x8f8] sm:$0xff]  ;;  %v1843_v7 = vmax.f32 %v6328_v32, %v1807_v5  ;;  %v2147_v32 = vld [vmem:[%s8286_s3 + $0x8e8] sm:$0xff]  ;;  %v1840_v56 = vmax.f32 %v6324_v24, %v1804_v58  ;;  %v2126_v5 = vld [vmem:[%s8286_s3 + $0x840] sm:$0xff] }
 0x180   :  { %4563 = vmatpush3.msra.mxu0 %v2058_v38  ;;  %4594 = vmatpush3.msra.mxu1 %v2092_v20  ;;  %v2133_v38 = vld [vmem:[%s8286_s3 + $0x878] sm:$0xff]  ;;  %v2102_v20 = vld [vmem:[%s8286_s3 + $0x780] sm:$0xff]  ;;  %v2127_v62 = vld [vmem:[%s8286_s3 + $0x848] sm:$0xff] }
 0x181   :  { %4564 = vmatprep.subr.mxu0 %v2073_v19  ;;  %4595 = vmatprep.subr.mxu1 %v2107_v21  ;;  %v2148_v19 = vld [vmem:[%s8286_s3 + $0x8f0] sm:$0xff]  ;;  %v1809_v21 = vmax.f32 %v1347_v9, %v1773_v60  ;;  %v2177_v54 = vld [vmem:[%s8286_s3 + $0x9d8] sm:$0xff]  ;;  %v2175_v9 = vld [vmem:[%s8286_s3 + $0x9c8] sm:$0xff] }
 0x182   :  { %4565 = vmatpush3.msra.mxu0 %v2057_v59  ;;  %4596 = vmatpush3.msra.mxu1 %v2091_v31  ;;  %v2131_v59 = vld [vmem:[%s8286_s3 + $0x868] sm:$0xff]  ;;  %v2165_v31 = vld [vmem:[%s8286_s3 + $0x978] sm:$0xff]  ;;  %v2174_v58 = vld [vmem:[%s8286_s3 + $0x9c0] sm:$0xff] }
 0x183   :  { %4566 = vmatprep.subr.mxu0 %v2072_v47  ;;  %4597 = vmatprep.subr.mxu1 %v2106_v52  ;;  %v1845_v24 = vmax.f32 %v6336_v51, %v1809_v21  ;;  %v2130_v47 = vld [vmem:[%s8286_s3 + $0x860] sm:$0xff]  ;;  %v2164_v52 = vld [vmem:[%s8286_s3 + $0x970] sm:$0xff]  ;;  %v2145_v51 = vld [vmem:[%s8286_s3 + $0x8d8] sm:$0xff]  ;;  %v1230_v21 = vadd.f32 %v6757_v6, %v6979_v12 }
 0x184   :  { %4567 = vmatpush3.msra.mxu0 %v2056_v23  ;;  %4598 = vmatpush3.msra.mxu1 %v2090_v8  ;;  %v2163_v23 = vld [vmem:[%s8286_s3 + $0x968] sm:$0xff]  ;;  %v2144_v8 = vld [vmem:[%s8286_s3 + $0x8d0] sm:$0xff]  ;;  %v2138_v12 = vld [vmem:[%s8286_s3 + $0x8a0] sm:$0xff] }
 0x185   :  { %4568 = vmatprep.subr.mxu0 %v2071_v25  ;;  %4599 = vmatprep.subr.mxu1 %v2105_v50  ;;  %v2162_v25 = vld [vmem:[%s8286_s3 + $0x960] sm:$0xff]  ;;  %v2143_v50 = vld [vmem:[%s8286_s3 + $0x8c8] sm:$0xff] }
 0x186   :  { %4569 = vmatpush3.msra.mxu0 %v2055_v55  ;;  %4600 = vmatpush3.msra.mxu1 %v2089_v39  ;;  %v7139_v55 = vpop.f32.mrf.mxu0  ;;  %v7141_v39 = vpop.f32.mrf.mxu1 }
 0x187   :  { %4570 = vmatprep.subr.mxu0 %v2070_v45  ;;  %4601 = vmatprep.subr.mxu1 %v2104_v1  ;;  %v2142_v45 = vld [vmem:[%s8286_s3 + $0x8c0] sm:$0xff]  ;;  %v2176_v1 = vld [vmem:[%s8286_s3 + $0x9d0] sm:$0xff] }
 0x188   :  { %4571 = vmatpush3.msra.mxu0 %v2054_v63  ;;  %4602 = vmatpush3.msra.mxu1 %v2088_v16  ;;  %v2160_v63 = vld [vmem:[%s8286_s3 + $0x950] sm:$0xff]  ;;  %v2141_v16 = vld [vmem:[%s8286_s3 + $0x8b8] sm:$0xff]  ;;  %v5176_v60 = vpop.f32.mrf.mxu0 }
 0x189   :  { %2930 = vmatmul.mubr.f32.vlgmr.msra.gmra.mxu0 %v1838_v34  ;;  %4603 = vmatprep.subr.mxu1 %v2103_v18  ;;  %v5244_v18 = vpop.f32.mrf.mxu1  ;;  %v2125_v34 = vld [vmem:[%s8286_s3 + $0x838] sm:$0xff] }
 0x18a   :  { %4610 = vmatprep.subr.mxu0 %v2149_v36  ;;  %4604 = vmatpush3.msra.mxu1 %v2087_v13  ;;  %v2159_v36 = vld [vmem:[%s8286_s3 + $0x948] sm:$0xff]  ;;  %v2140_v13 = vld [vmem:[%s8286_s3 + $0x8b0] sm:$0xff] }
 0x18b   :  { %4611 = vmatpush3.msra.mxu0 %v2133_v38  ;;  %3069 = vmatprep.mubr.f32.mxu0 %v1843_v7  ;;  %v2124_v38 = vld [vmem:[%s8286_s3 + $0x830] sm:$0xff]  ;;  %v2158_v7 = vld [vmem:[%s8286_s3 + $0x940] sm:$0xff] }
 0x18c   :  { %4605 = vmatprep.subr.mxu1 %v2102_v20  ;;  %4612 = vmatprep.subr.mxu0 %v2148_v19  ;;  %v2139_v20 = vld [vmem:[%s8286_s3 + $0x8a8] sm:$0xff]  ;;  %v2173_v19 = vld [vmem:[%s8286_s3 + $0x9b8] sm:$0xff] }
 0x18d   :  { %4606 = vmatpush3.msra.mxu1 %v2086_v26  ;;  %4613 = vmatpush3.msra.mxu0 %v2132_v28  ;;  %v1656_v26 = vadd.f32 %v6757_v6, %v6981_v14  ;;  %v7195_v28 = vpop.f32.mrf.mxu0  ;;  %v2172_v14 = vld [vmem:[%s8286_s3 + $0x9b0] sm:$0xff] }
 0x18e   :  { %3000 = vmatmul.mubr.f32.vlgmr.msra.gmra.mxu1 %v1840_v56  ;;  %4614 = vmatprep.subr.mxu0 %v2147_v32  ;;  %v7197_v32 = vpop.f32.mrf.mxu1  ;;  %v2123_v56 = vld [vmem:[%s8286_s3 + $0x828] sm:$0xff] }
 0x18f   :  { %4645 = vmatprep.subr.mxu1 %v2181_v35  ;;  %4615 = vmatpush3.msra.mxu0 %v2131_v59  ;;  %v2157_v35 = vld [vmem:[%s8286_s3 + $0x938] sm:$0xff]  ;;  %v1255_v59 = vadd.f32 %v6757_v6, %v5176_v60 }
 0x190   :  { %4646 = vmatpush3.msra.mxu1 %v2165_v31  ;;  %3139 = vmatprep.mubr.f32.mxu1 %v1845_v24  ;;  %v1681_v31 = vadd.f32 %v6757_v6, %v5244_v18  ;;  %v2122_v24 = vld [vmem:[%s8286_s3 + $0x820] sm:$0xff] }
 0x191   :  { %4616 = vmatprep.subr.mxu0 %v2146_v33  ;;  %4647 = vmatprep.subr.mxu1 %v2180_v37  ;;  %v2156_v33 = vld [vmem:[%s8286_s3 + $0x930] sm:$0xff]  ;;  %v2137_v37 = vld [vmem:[%s8286_s3 + $0x898] sm:$0xff] }
 0x192   :  { %4617 = vmatpush3.msra.mxu0 %v2130_v47  ;;  %4648 = vmatpush3.msra.mxu1 %v2164_v52  ;;  %v2171_v47 = vld [vmem:[%s8286_s3 + $0x9a8] sm:$0xff]  ;;  %v1344_v52 = vmax.f32 %v1230_v21, 0.0 }
 0x193   :  { %4618 = vmatprep.subr.mxu0 %v2145_v51  ;;  %4649 = vmatprep.subr.mxu1 %v2179_v2  ;;  %v1770_v51 = vmax.f32 %v1656_v26, 0.0  ;;  %v5179_v2 = vpop.f32.mrf.mxu0  ;;  %v2213_v26 = vld [vmem:[%s8286_s3 + $0xaf8] sm:$0xff] }
 0x194   :  { %4619 = vmatpush3.msra.mxu0 %v2129_v40  ;;  %4650 = vmatpush3.msra.mxu1 %v2163_v23  ;;  %v5247_v40 = vpop.f32.mrf.mxu1  ;;  %v2121_v23 = vld [vmem:[%s8286_s3 + $0x818] sm:$0xff] }
 0x195   :  { %4620 = vmatprep.subr.mxu0 %v2144_v8  ;;  %4651 = vmatprep.subr.mxu1 %v2178_v43  ;;  %v2155_v8 = vld [vmem:[%s8286_s3 + $0x928] sm:$0xff]  ;;  %v1240_v43 = vadd.f32 %v6757_v6, %v7139_v55  ;;  %v2120_v55 = vld [vmem:[%s8286_s3 + $0x810] sm:$0xff] }
 0x196   :  { %4621 = vmatpush3.msra.mxu0 %v2128_v44  ;;  %4652 = vmatpush3.msra.mxu1 %v2162_v25  ;;  %v1666_v44 = vadd.f32 %v6757_v6, %v7141_v39  ;;  %v2136_v25 = vld [vmem:[%s8286_s3 + $0x890] sm:$0xff]  ;;  %v2154_v39 = vld [vmem:[%s8286_s3 + $0x920] sm:$0xff] }
 0x197   :  { %4622 = vmatprep.subr.mxu0 %v2143_v50  ;;  %4653 = vmatprep.subr.mxu1 %v2177_v54  ;;  %v2170_v50 = vld [vmem:[%s8286_s3 + $0x9a0] sm:$0xff]  ;;  %v1349_v54 = vmax.f32 %v1255_v59, 0.0  ;;  %v1346_v60 = vmax.f32 %v1240_v43, 0.0  ;;  %v2212_v59 = vld [vmem:[%s8286_s3 + $0xaf0] sm:$0xff]  ;;  %v2243_v43 = vld [vmem:[%s8286_s3 + $0xbe8] sm:$0xff] }
 0x198   :  { %4623 = vmatpush3.msra.mxu0 %v2127_v62  ;;  %4654 = vmatpush3.msra.mxu1 %v2161_v0  ;;  %v1775_v62 = vmax.f32 %v1681_v31, 0.0  ;;  %v1265_v0 = vadd.f32 %v6757_v6, %v5179_v2  ;;  %v1772_v18 = vmax.f32 %v1666_v44, 0.0  ;;  %v2210_v2 = vld [vmem:[%s8286_s3 + $0xae0] sm:$0xff]  ;;  %v2193_v44 = vld [vmem:[%s8286_s3 + $0xa58] sm:$0xff] }
 0x199   :  { %4624 = vmatprep.subr.mxu0 %v2142_v45  ;;  %4655 = vmatprep.subr.mxu1 %v2176_v1  ;;  %v1691_v45 = vadd.f32 %v6757_v6, %v5247_v40  ;;  %v2135_v1 = vld [vmem:[%s8286_s3 + $0x888] sm:$0xff]  ;;  %v2244_v40 = vld [vmem:[%s8286_s3 + $0xbf0] sm:$0xff] }
 0x19a   :  { %4625 = vmatpush3.msra.mxu0 %v2126_v5  ;;  %4656 = vmatpush3.msra.mxu1 %v2160_v63  ;;  %v2169_v5 = vld [vmem:[%s8286_s3 + $0x998] sm:$0xff]  ;;  %v1806_v63 = vmax.f32 %v1344_v52, %v1770_v51  ;;  %v2195_v52 = vld [vmem:[%s8286_s3 + $0xa68] sm:$0xff] }
 0x19b   :  { %4626 = vmatprep.subr.mxu0 %v2141_v16  ;;  %4657 = vmatprep.subr.mxu1 %v2175_v9  ;;  %v2119_v16 = vld [vmem:[%s8286_s3 + $0x808] sm:$0xff]  ;;  %v2153_v9 = vld [vmem:[%s8286_s3 + $0x918] sm:$0xff] }
 0x19c   :  { %4627 = vmatpush3.msra.mxu0 %v2125_v34  ;;  %4658 = vmatpush3.msra.mxu1 %v2159_v36  ;;  %v2134_v34 = vld [vmem:[%s8286_s3 + $0x880] sm:$0xff]  ;;  %v2168_v36 = vld [vmem:[%s8286_s3 + $0x990] sm:$0xff]  ;;  %v1842_v21 = vmax.f32 %v6334_v48, %v1806_v63  ;;  %v2229_v51 = vld [vmem:[%s8286_s3 + $0xb78] sm:$0xff] }
 0x19d   :  { %4628 = vmatprep.subr.mxu0 %v2140_v13  ;;  %4659 = vmatprep.subr.mxu1 %v2174_v58  ;;  %v1811_v13 = vmax.f32 %v1349_v54, %v1775_v62  ;;  %v2118_v58 = vld [vmem:[%s8286_s3 + $0x800] sm:$0xff]  ;;  %v2192_v62 = vld [vmem:[%s8286_s3 + $0xa50] sm:$0xff]  ;;  %v2225_v63 = vld [vmem:[%s8286_s3 + $0xb58] sm:$0xff] }
 0x19e   :  { %4629 = vmatpush3.msra.mxu0 %v2124_v38  ;;  %4660 = vmatpush3.msra.mxu1 %v2158_v7  ;;  %v2152_v38 = vld [vmem:[%s8286_s3 + $0x910] sm:$0xff]  ;;  %v1351_v7 = vmax.f32 %v1265_v0, 0.0  ;;  %v2242_v54 = vld [vmem:[%s8286_s3 + $0xbe0] sm:$0xff]  ;;  %v2241_v0 = vld [vmem:[%s8286_s3 + $0xbd8] sm:$0xff] }
 0x19f   :  { %4630 = vmatprep.subr.mxu0 %v2139_v20  ;;  %4661 = vmatprep.subr.mxu1 %v2173_v19  ;;  %v1777_v20 = vmax.f32 %v1691_v45, 0.0  ;;  %v2167_v19 = vld [vmem:[%s8286_s3 + $0x988] sm:$0xff]  ;;  %v1847_v48 = vmax.f32 %v6346_v11, %v1811_v13  ;;  %v7355_v45 = vpop.f32.mrf.mxu0 }
 0x1a0   :  { %4631 = vmatpush3.msra.mxu0 %v2123_v56  ;;  %4662 = vmatpush3.msra.mxu1 %v2157_v35  ;;  %v2151_v56 = vld [vmem:[%s8286_s3 + $0x908] sm:$0xff]  ;;  %v1808_v35 = vmax.f32 %v1346_v60, %v1772_v18  ;;  %v2190_v60 = vld [vmem:[%s8286_s3 + $0xa40] sm:$0xff]  ;;  %v2224_v18 = vld [vmem:[%s8286_s3 + $0xb50] sm:$0xff] }
 0x1a1   :  { %4632 = vmatprep.subr.mxu0 %v2138_v12  ;;  %4663 = vmatprep.subr.mxu1 %v2172_v14  ;;  %v2197_v12 = vld [vmem:[%s8286_s3 + $0xa78] sm:$0xff]  ;;  %v2166_v14 = vld [vmem:[%s8286_s3 + $0x980] sm:$0xff]  ;;  %v1813_v31 = vmax.f32 %v1351_v7, %v1777_v20  ;;  %v2211_v11 = vld [vmem:[%s8286_s3 + $0xae8] sm:$0xff]  ;;  %v5182_v13 = vpop.f32.mrf.mxu0 }
 0x1a2   :  { %4633 = vmatpush3.msra.mxu0 %v2122_v24  ;;  %4664 = vmatpush3.msra.mxu1 %v2156_v33  ;;  %v2150_v24 = vld [vmem:[%s8286_s3 + $0x900] sm:$0xff]  ;;  %v2196_v33 = vld [vmem:[%s8286_s3 + $0xa70] sm:$0xff]  ;;  %v2223_v7 = vld [vmem:[%s8286_s3 + $0xb48] sm:$0xff] }
 0x1a3   :  { %4634 = vmatprep.subr.mxu0 %v2137_v37  ;;  %4665 = vmatprep.subr.mxu1 %v2171_v47  ;;  %v1844_v37 = vmax.f32 %v6340_v61, %v1808_v35  ;;  %v2245_v47 = vld [vmem:[%s8286_s3 + $0xbf8] sm:$0xff]  ;;  %v1849_v61 = vmax.f32 %v6352_v27, %v1813_v31  ;;  %v2204_v20 = vld [vmem:[%s8286_s3 + $0xab0] sm:$0xff]  ;;  %v2187_v31 = vld [vmem:[%s8286_s3 + $0xa28] sm:$0xff] }
 0x1a4   :  { %4635 = vmatpush3.msra.mxu0 %v2121_v23  ;;  %4666 = vmatpush3.msra.mxu1 %v2155_v8  ;;  %v2194_v23 = vld [vmem:[%s8286_s3 + $0xa60] sm:$0xff]  ;;  %v2228_v8 = vld [vmem:[%s8286_s3 + $0xb70] sm:$0xff]  ;;  %v2209_v27 = vld [vmem:[%s8286_s3 + $0xad8] sm:$0xff] }
 0x1a5   :  { %4636 = vmatprep.subr.mxu0 %v2136_v25  ;;  %4667 = vmatprep.subr.mxu1 %v2170_v50  ;;  %v2227_v25 = vld [vmem:[%s8286_s3 + $0xb68] sm:$0xff]  ;;  %v2208_v50 = vld [vmem:[%s8286_s3 + $0xad0] sm:$0xff]  ;;  %v2237_v35 = vld [vmem:[%s8286_s3 + $0xbb8] sm:$0xff] }
 0x1a6   :  { %4637 = vmatpush3.msra.mxu0 %v2120_v55  ;;  %4668 = vmatpush3.msra.mxu1 %v2154_v39  ;;  %v2226_v55 = vld [vmem:[%s8286_s3 + $0xb60] sm:$0xff]  ;;  %v2207_v39 = vld [vmem:[%s8286_s3 + $0xac8] sm:$0xff] }
 0x1a7   :  { %4638 = vmatprep.subr.mxu0 %v2135_v1  ;;  %4669 = vmatprep.subr.mxu1 %v2169_v5  ;;  %v7357_v1 = vpop.f32.mrf.mxu1  ;;  %v2191_v5 = vld [vmem:[%s8286_s3 + $0xa48] sm:$0xff] }
 0x1a8   :  { %4639 = vmatpush3.msra.mxu0 %v2119_v16  ;;  %4670 = vmatpush3.msra.mxu1 %v2153_v9  ;;  %v2206_v16 = vld [vmem:[%s8286_s3 + $0xac0] sm:$0xff]  ;;  %v2240_v9 = vld [vmem:[%s8286_s3 + $0xbd0] sm:$0xff] }
 0x1a9   :  { %4640 = vmatprep.subr.mxu0 %v2134_v34  ;;  %4671 = vmatprep.subr.mxu1 %v2168_v36  ;;  %v2205_v34 = vld [vmem:[%s8286_s3 + $0xab8] sm:$0xff]  ;;  %v2239_v36 = vld [vmem:[%s8286_s3 + $0xbc8] sm:$0xff] }
 0x1aa   :  { %4641 = vmatpush3.msra.mxu0 %v2118_v58  ;;  %4672 = vmatpush3.msra.mxu1 %v2152_v38  ;;  %v5250_v58 = vpop.f32.mrf.mxu1  ;;  %v2189_v38 = vld [vmem:[%s8286_s3 + $0xa38] sm:$0xff] }
 0x1ab   :  { %3070 = vmatmul.mubr.f32.vlgmr.msra.gmra.mxu0 %v1842_v21  ;;  %4673 = vmatprep.subr.mxu1 %v2167_v19  ;;  %v2238_v19 = vld [vmem:[%s8286_s3 + $0xbc0] sm:$0xff]  ;;  %v2188_v21 = vld [vmem:[%s8286_s3 + $0xa30] sm:$0xff] }
 0x1ac   :  { %4680 = vmatprep.subr.mxu0 %v2213_v26  ;;  %4674 = vmatpush3.msra.mxu1 %v2151_v56  ;;  %v2222_v26 = vld [vmem:[%s8286_s3 + $0xb40] sm:$0xff]  ;;  %v2203_v56 = vld [vmem:[%s8286_s3 + $0xaa8] sm:$0xff] }
 0x1ad   :  { %4681 = vmatpush3.msra.mxu0 %v2197_v12  ;;  %3209 = vmatprep.mubr.f32.mxu0 %v1847_v48  ;;  %v1250_v12 = vadd.f32 %v6757_v6, %v7195_v28  ;;  %v1676_v48 = vadd.f32 %v6757_v6, %v7197_v32  ;;  %v2202_v28 = vld [vmem:[%s8286_s3 + $0xaa0] sm:$0xff]  ;;  %v2236_v32 = vld [vmem:[%s8286_s3 + $0xbb0] sm:$0xff] }
 0x1ae   :  { %4675 = vmatprep.subr.mxu1 %v2166_v14  ;;  %4682 = vmatprep.subr.mxu0 %v2212_v59  ;;  %v7411_v14 = vpop.f32.mrf.mxu0  ;;  %v7413_v59 = vpop.f32.mrf.mxu1 }
 0x1af   :  { %4676 = vmatpush3.msra.mxu1 %v2150_v24  ;;  %4683 = vmatpush3.msra.mxu0 %v2196_v33  ;;  %v2221_v24 = vld [vmem:[%s8286_s3 + $0xb38] sm:$0xff]  ;;  %v1275_v33 = vadd.f32 %v6757_v6, %v5182_v13 }
 0x1b0   :  { %3140 = vmatmul.mubr.f32.vlgmr.msra.gmra.mxu1 %v1844_v37  ;;  %4684 = vmatprep.subr.mxu0 %v2211_v11  ;;  %v1701_v11 = vadd.f32 %v6757_v6, %v5250_v58  ;;  %v2186_v37 = vld [vmem:[%s8286_s3 + $0xa20] sm:$0xff]  ;;  %v2235_v6 = vld [vmem:[%s8286_s3 + $0xba8] sm:$0xff] }
 0x1b1   :  { %4715 = vmatprep.subr.mxu1 %v2245_v47  ;;  %4685 = vmatpush3.msra.mxu0 %v2195_v52  ;;  %v2220_v47 = vld [vmem:[%s8286_s3 + $0xb30] sm:$0xff]  ;;  %v2201_v52 = vld [vmem:[%s8286_s3 + $0xa98] sm:$0xff]  ;;  %v2182_v58 = vld [vmem:[%s8286_s3 + $0xa00] sm:$0xff] }
 0x1b2   :  { %4716 = vmatpush3.msra.mxu1 %v2229_v51  ;;  %3279 = vmatprep.mubr.f32.mxu1 %v1849_v61  ;;  %v1348_v51 = vmax.f32 %v1250_v12, 0.0  ;;  %v1774_v61 = vmax.f32 %v1676_v48, 0.0  ;;  %v2261_v12 = vld [vmem:[%s8286_s3 + $0xc78] sm:$0xff]  ;;  %v2230_v48 = vld [vmem:[%s8286_s3 + $0xb80] sm:$0xff] }
 0x1b3   :  { %4686 = vmatprep.subr.mxu0 %v2210_v2  ;;  %4717 = vmatprep.subr.mxu1 %v2244_v40  ;;  %v5185_v2 = vpop.f32.mrf.mxu0  ;;  %v5253_v40 = vpop.f32.mrf.mxu1 }
 0x1b4   :  { %4687 = vmatpush3.msra.mxu0 %v2194_v23  ;;  %4718 = vmatpush3.msra.mxu1 %v2228_v8  ;;  %v2185_v23 = vld [vmem:[%s8286_s3 + $0xa18] sm:$0xff]  ;;  %v2219_v8 = vld [vmem:[%s8286_s3 + $0xb28] sm:$0xff] }
 0x1b5   :  { %4688 = vmatprep.subr.mxu0 %v2209_v27  ;;  %4719 = vmatprep.subr.mxu1 %v2243_v43  ;;  %v7450_v27 = vld [vmem:[%s8287_s2] ss:$0 sm:$0xff] }
 0x1b6   :  { %4689 = vmatpush3.msra.mxu0 %v2193_v44  ;;  %4720 = vmatpush3.msra.mxu1 %v2227_v25  ;;  %v1260_v43 = vadd.f32 %v7450_v27, %v7355_v45  ;;  %v1686_v44 = vadd.f32 %v7450_v27, %v7357_v1  ;;  %v2200_v25 = vld [vmem:[%s8286_s3 + $0xa90] sm:$0xff]  ;;  %v1711_v45 = vadd.f32 %v7450_v27, %v5253_v40  ;;  %v2199_v1 = vld [vmem:[%s8286_s3 + $0xa88] sm:$0xff]  ;;  %v2257_v40 = vld [vmem:[%s8286_s3 + $0xc58] sm:$0xff] }
 0x1b7   :  { %4690 = vmatprep.subr.mxu0 %v2208_v50  ;;  %4721 = vmatprep.subr.mxu1 %v2242_v54  ;;  %v2234_v50 = vld [vmem:[%s8286_s3 + $0xba0] sm:$0xff]  ;;  %v1353_v54 = vmax.f32 %v1275_v33, 0.0 }
 0x1b8   :  { %4691 = vmatpush3.msra.mxu0 %v2192_v62  ;;  %4722 = vmatpush3.msra.mxu1 %v2226_v55  ;;  %v1779_v62 = vmax.f32 %v1701_v11, 0.0  ;;  %v2184_v55 = vld [vmem:[%s8286_s3 + $0xa10] sm:$0xff]  ;;  %v2309_v11 = vld [vmem:[%s8286_s3 + $0xdf8] sm:$0xff] }
 0x1b9   :  { %4692 = vmatprep.subr.mxu0 %v2207_v39  ;;  %4723 = vmatprep.subr.mxu1 %v2241_v0  ;;  %v2218_v39 = vld [vmem:[%s8286_s3 + $0xb20] sm:$0xff]  ;;  %v1285_v0 = vadd.f32 %v7450_v27, %v5185_v2  ;;  %v2307_v2 = vld [vmem:[%s8286_s3 + $0xde8] sm:$0xff] }
 0x1ba   :  { %4693 = vmatpush3.msra.mxu0 %v2191_v5  ;;  %4724 = vmatpush3.msra.mxu1 %v2225_v63  ;;  %v2233_v5 = vld [vmem:[%s8286_s3 + $0xb98] sm:$0xff]  ;;  %v1810_v63 = vmax.f32 %v1348_v51, %v1774_v61  ;;  %v1815_v13 = vmax.f32 %v1353_v54, %v1779_v62  ;;  %v2258_v51 = vld [vmem:[%s8286_s3 + $0xc60] sm:$0xff]  ;;  %v2292_v61 = vld [vmem:[%s8286_s3 + $0xd70] sm:$0xff]  ;;  %v7576_v62 = vpop.f32.mrf.mxu0 }
 0x1bb   :  { %4694 = vmatprep.subr.mxu0 %v2206_v16  ;;  %4725 = vmatprep.subr.mxu1 %v2240_v9  ;;  %v2183_v16 = vld [vmem:[%s8286_s3 + $0xa08] sm:$0xff]  ;;  %v2217_v9 = vld [vmem:[%s8286_s3 + $0xb18] sm:$0xff] }
 0x1bc   :  { %4695 = vmatpush3.msra.mxu0 %v2190_v60  ;;  %4726 = vmatpush3.msra.mxu1 %v2224_v18  ;;  %v1350_v60 = vmax.f32 %v1260_v43, 0.0  ;;  %v1776_v18 = vmax.f32 %v1686_v44, 0.0  ;;  %v2306_v43 = vld [vmem:[%s8286_s3 + $0xde0] sm:$0xff]  ;;  %v2256_v44 = vld [vmem:[%s8286_s3 + $0xc50] sm:$0xff]  ;;  %v2305_v54 = vld [vmem:[%s8286_s3 + $0xdd8] sm:$0xff] }
 0x1bd   :  { %4696 = vmatprep.subr.mxu0 %v2205_v34  ;;  %4727 = vmatprep.subr.mxu1 %v2239_v36  ;;  %v2198_v34 = vld [vmem:[%s8286_s3 + $0xa80] sm:$0xff]  ;;  %v2232_v36 = vld [vmem:[%s8286_s3 + $0xb90] sm:$0xff] }
 0x1be   :  { %4697 = vmatpush3.msra.mxu0 %v2189_v38  ;;  %4728 = vmatpush3.msra.mxu1 %v2223_v7  ;;  %v2216_v38 = vld [vmem:[%s8286_s3 + $0xb10] sm:$0xff]  ;;  %v1355_v7 = vmax.f32 %v1285_v0, 0.0  ;;  %v2289_v0 = vld [vmem:[%s8286_s3 + $0xd58] sm:$0xff] }
 0x1bf   :  { %4698 = vmatprep.subr.mxu0 %v2204_v20  ;;  %4729 = vmatprep.subr.mxu1 %v2238_v19  ;;  %v1781_v20 = vmax.f32 %v1711_v45, 0.0  ;;  %v2231_v19 = vld [vmem:[%s8286_s3 + $0xb88] sm:$0xff]  ;;  %v2270_v45 = vld [vmem:[%s8286_s3 + $0xcc0] sm:$0xff] }
 0x1c0   :  { %4699 = vmatpush3.msra.mxu0 %v2188_v21  ;;  %4730 = vmatpush3.msra.mxu1 %v2222_v26  ;;  %v1846_v21 = vmax.f32 %v6348_v15, %v1810_v63  ;;  %v2277_v26 = vld [vmem:[%s8286_s3 + $0xcf8] sm:$0xff]  ;;  %v1851_v15 = vmax.f32 %v6360_v46, %v1815_v13  ;;  %v2275_v46 = vld [vmem:[%s8286_s3 + $0xce8] sm:$0xff]  ;;  %v2288_v63 = vld [vmem:[%s8286_s3 + $0xd50] sm:$0xff] }
 0x1c1   :  { %4700 = vmatprep.subr.mxu0 %v2203_v56  ;;  %4731 = vmatprep.subr.mxu1 %v2237_v35  ;;  %v2215_v56 = vld [vmem:[%s8286_s3 + $0xb08] sm:$0xff]  ;;  %v1812_v35 = vmax.f32 %v1350_v60, %v1776_v18  ;;  %v5188_v60 = vpop.f32.mrf.mxu0  ;;  %v2268_v13 = vld [vmem:[%s8286_s3 + $0xcb0] sm:$0xff] }
 0x1c2   :  { %4701 = vmatpush3.msra.mxu0 %v2187_v31  ;;  %4732 = vmatpush3.msra.mxu1 %v2221_v24  ;;  %v2276_v31 = vld [vmem:[%s8286_s3 + $0xcf0] sm:$0xff]  ;;  %v1817_v24 = vmax.f32 %v1355_v7, %v1781_v20  ;;  %v2286_v7 = vld [vmem:[%s8286_s3 + $0xd40] sm:$0xff]  ;;  %v2267_v20 = vld [vmem:[%s8286_s3 + $0xca8] sm:$0xff] }
 0x1c3   :  { %4702 = vmatprep.subr.mxu0 %v2202_v28  ;;  %4733 = vmatprep.subr.mxu1 %v2236_v32  ;;  %v2214_v28 = vld [vmem:[%s8286_s3 + $0xb00] sm:$0xff]  ;;  %v2260_v32 = vld [vmem:[%s8286_s3 + $0xc70] sm:$0xff]  ;;  %v1848_v33 = vmax.f32 %v6358_v42, %v1812_v35 }
 0x1c4   :  { %4703 = vmatpush3.msra.mxu0 %v2186_v37  ;;  %4734 = vmatpush3.msra.mxu1 %v2220_v47  ;;  %v2259_v37 = vld [vmem:[%s8286_s3 + $0xc68] sm:$0xff]  ;;  %v2293_v47 = vld [vmem:[%s8286_s3 + $0xd78] sm:$0xff]  ;;  %v1853_v42 = vmax.f32 %v6370_v10, %v1817_v24  ;;  %v2250_v24 = vld [vmem:[%s8286_s3 + $0xc20] sm:$0xff] }
 0x1c5   :  { %4704 = vmatprep.subr.mxu0 %v2201_v52  ;;  %4735 = vmatprep.subr.mxu1 %v2235_v6  ;;  %v2274_v52 = vld [vmem:[%s8286_s3 + $0xce0] sm:$0xff]  ;;  %v2308_v6 = vld [vmem:[%s8286_s3 + $0xdf0] sm:$0xff]  ;;  %v2273_v10 = vld [vmem:[%s8286_s3 + $0xcd8] sm:$0xff] }
 0x1c6   :  { %4705 = vmatpush3.msra.mxu0 %v2185_v23  ;;  %4736 = vmatpush3.msra.mxu1 %v2219_v8  ;;  %v2291_v23 = vld [vmem:[%s8286_s3 + $0xd68] sm:$0xff]  ;;  %v2272_v8 = vld [vmem:[%s8286_s3 + $0xcd0] sm:$0xff] }
 0x1c7   :  { %4706 = vmatprep.subr.mxu0 %v2200_v25  ;;  %4737 = vmatprep.subr.mxu1 %v2234_v50  ;;  %v2290_v25 = vld [vmem:[%s8286_s3 + $0xd60] sm:$0xff]  ;;  %v2271_v50 = vld [vmem:[%s8286_s3 + $0xcc8] sm:$0xff] }
 0x1c8   :  { %4707 = vmatpush3.msra.mxu0 %v2184_v55  ;;  %4738 = vmatpush3.msra.mxu1 %v2218_v39  ;;  %v7578_v55 = vpop.f32.mrf.mxu1  ;;  %v2255_v39 = vld [vmem:[%s8286_s3 + $0xc48] sm:$0xff] }
 0x1c9   :  { %4708 = vmatprep.subr.mxu0 %v2199_v1  ;;  %4739 = vmatprep.subr.mxu1 %v2233_v5  ;;  %v2304_v1 = vld [vmem:[%s8286_s3 + $0xdd0] sm:$0xff]  ;;  %v2254_v5 = vld [vmem:[%s8286_s3 + $0xc40] sm:$0xff] }
 0x1ca   :  { %4709 = vmatpush3.msra.mxu0 %v2183_v16  ;;  %4740 = vmatpush3.msra.mxu1 %v2217_v9  ;;  %v2269_v16 = vld [vmem:[%s8286_s3 + $0xcb8] sm:$0xff]  ;;  %v2303_v9 = vld [vmem:[%s8286_s3 + $0xdc8] sm:$0xff]  ;;  %v5256_v18 = vpop.f32.mrf.mxu1 }
 0x1cb   :  { %4710 = vmatprep.subr.mxu0 %v2198_v34  ;;  %4741 = vmatprep.subr.mxu1 %v2232_v36  ;;  %v2253_v34 = vld [vmem:[%s8286_s3 + $0xc38] sm:$0xff]  ;;  %v2287_v36 = vld [vmem:[%s8286_s3 + $0xd48] sm:$0xff] }
 0x1cc   :  { %4711 = vmatpush3.msra.mxu0 %v2182_v58  ;;  %4742 = vmatpush3.msra.mxu1 %v2216_v38  ;;  %v2302_v58 = vld [vmem:[%s8286_s3 + $0xdc0] sm:$0xff]  ;;  %v2252_v38 = vld [vmem:[%s8286_s3 + $0xc30] sm:$0xff]  ;;  %v7634_v35 = vpop.f32.mrf.mxu1 }
 0x1cd   :  { %3210 = vmatmul.mubr.f32.vlgmr.msra.gmra.mxu0 %v1846_v21  ;;  %4743 = vmatprep.subr.mxu1 %v2231_v19  ;;  %v2301_v19 = vld [vmem:[%s8286_s3 + $0xdb8] sm:$0xff]  ;;  %v1270_v21 = vadd.f32 %v7450_v27, %v7411_v14  ;;  %v2266_v14 = vld [vmem:[%s8286_s3 + $0xca0] sm:$0xff] }
 0x1ce   :  { %4750 = vmatprep.subr.mxu0 %v2277_v26  ;;  %4744 = vmatpush3.msra.mxu1 %v2215_v56  ;;  %v1696_v26 = vadd.f32 %v7450_v27, %v7413_v59  ;;  %v7632_v56 = vpop.f32.mrf.mxu0  ;;  %v2300_v59 = vld [vmem:[%s8286_s3 + $0xdb0] sm:$0xff] }
 0x1cf   :  { %4751 = vmatpush3.msra.mxu0 %v2261_v12  ;;  %3349 = vmatprep.mubr.f32.mxu0 %v1851_v15  ;;  %v2251_v12 = vld [vmem:[%s8286_s3 + $0xc28] sm:$0xff]  ;;  %v2285_v15 = vld [vmem:[%s8286_s3 + $0xd38] sm:$0xff] }
 0x1d0   :  { %4745 = vmatprep.subr.mxu1 %v2230_v48  ;;  %4752 = vmatprep.subr.mxu0 %v2276_v31  ;;  %v1295_v48 = vadd.f32 %v7450_v27, %v5188_v60  ;;  %v1721_v31 = vadd.f32 %v7450_v27, %v5256_v18  ;;  %v2295_v18 = vld [vmem:[%s8286_s3 + $0xd88] sm:$0xff] }
 0x1d1   :  { %4746 = vmatpush3.msra.mxu1 %v2214_v28  ;;  %4753 = vmatpush3.msra.mxu0 %v2260_v32  ;;  %v2284_v28 = vld [vmem:[%s8286_s3 + $0xd30] sm:$0xff]  ;;  %v2265_v32 = vld [vmem:[%s8286_s3 + $0xc98] sm:$0xff] }
 0x1d2   :  { %3280 = vmatmul.mubr.f32.vlgmr.msra.gmra.mxu1 %v1848_v33  ;;  %4754 = vmatprep.subr.mxu0 %v2275_v46  ;;  %v2299_v46 = vld [vmem:[%s8286_s3 + $0xda8] sm:$0xff]  ;;  %v1352_v33 = vmax.f32 %v1270_v21, 0.0  ;;  %v2278_v21 = vld [vmem:[%s8286_s3 + $0xd00] sm:$0xff] }
 0x1d3   :  { %4785 = vmatprep.subr.mxu1 %v2309_v11  ;;  %4755 = vmatpush3.msra.mxu0 %v2259_v37  ;;  %v1778_v11 = vmax.f32 %v1696_v26, 0.0  ;;  %v5191_v37 = vpop.f32.mrf.mxu0  ;;  %v2324_v26 = vld [vmem:[%s8286_s3 + $0xe70] sm:$0xff] }
 0x1d4   :  { %4786 = vmatpush3.msra.mxu1 %v2293_v47  ;;  %3419 = vmatprep.mubr.f32.mxu1 %v1853_v42  ;;  %v5259_v47 = vpop.f32.mrf.mxu1  ;;  %v2249_v42 = vld [vmem:[%s8286_s3 + $0xc18] sm:$0xff] }
 0x1d5   :  { %4756 = vmatprep.subr.mxu0 %v2274_v52  ;;  %4787 = vmatprep.subr.mxu1 %v2308_v6  ;;  %v2283_v52 = vld [vmem:[%s8286_s3 + $0xd28] sm:$0xff]  ;;  %v1280_v6 = vadd.f32 %v7450_v27, %v7576_v62 }
 0x1d6   :  { %4757 = vmatpush3.msra.mxu0 %v2258_v51  ;;  %4788 = vmatpush3.msra.mxu1 %v2292_v61  ;;  %v1706_v51 = vadd.f32 %v7450_v27, %v7578_v55  ;;  %v2264_v61 = vld [vmem:[%s8286_s3 + $0xc90] sm:$0xff]  ;;  %v2247_v62 = vld [vmem:[%s8286_s3 + $0xc08] sm:$0xff]  ;;  %v2281_v55 = vld [vmem:[%s8286_s3 + $0xd18] sm:$0xff] }
 0x1d7   :  { %4758 = vmatprep.subr.mxu0 %v2273_v10  ;;  %4789 = vmatprep.subr.mxu1 %v2307_v2  ;;  %v2298_v10 = vld [vmem:[%s8286_s3 + $0xda0] sm:$0xff]  ;;  %v1357_v2 = vmax.f32 %v1295_v48, 0.0 }
 0x1d8   :  { %4759 = vmatpush3.msra.mxu0 %v2257_v40  ;;  %4790 = vmatpush3.msra.mxu1 %v2291_v23  ;;  %v1783_v40 = vmax.f32 %v1721_v31, 0.0  ;;  %v2248_v23 = vld [vmem:[%s8286_s3 + $0xc10] sm:$0xff]  ;;  %v2338_v48 = vld [vmem:[%s8286_s3 + $0xee0] sm:$0xff] }
 0x1d9   :  { %4760 = vmatprep.subr.mxu0 %v2272_v8  ;;  %4791 = vmatprep.subr.mxu1 %v2306_v43  ;;  %v2282_v8 = vld [vmem:[%s8286_s3 + $0xd20] sm:$0xff]  ;;  %v1305_v43 = vadd.f32 %v7450_v27, %v5191_v37  ;;  %v2372_v31 = vld [vmem:[%s8286_s3 + $0xff0] sm:$0xff] }
 0x1da   :  { %4761 = vmatpush3.msra.mxu0 %v2256_v44  ;;  %4792 = vmatpush3.msra.mxu1 %v2290_v25  ;;  %v1731_v44 = vadd.f32 %v7450_v27, %v5259_v47  ;;  %v2263_v25 = vld [vmem:[%s8286_s3 + $0xc88] sm:$0xff]  ;;  %v2370_v37 = vld [vmem:[%s8286_s3 + $0xfe0] sm:$0xff]  ;;  %v2320_v47 = vld [vmem:[%s8286_s3 + $0xe50] sm:$0xff] }
 0x1db   :  { %4762 = vmatprep.subr.mxu0 %v2271_v50  ;;  %4793 = vmatprep.subr.mxu1 %v2305_v54  ;;  %v2297_v50 = vld [vmem:[%s8286_s3 + $0xd98] sm:$0xff]  ;;  %v1814_v54 = vmax.f32 %v1352_v33, %v1778_v11  ;;  %v2355_v33 = vld [vmem:[%s8286_s3 + $0xf68] sm:$0xff]  ;;  %v2336_v11 = vld [vmem:[%s8286_s3 + $0xed0] sm:$0xff] }
 0x1dc   :  { %4763 = vmatpush3.msra.mxu0 %v2255_v39  ;;  %4794 = vmatpush3.msra.mxu1 %v2289_v0  ;;  %v1354_v39 = vmax.f32 %v1280_v6, 0.0  ;;  %v1780_v0 = vmax.f32 %v1706_v51, 0.0  ;;  %v1785_v60 = vmax.f32 %v1731_v44, 0.0  ;;  %v2369_v6 = vld [vmem:[%s8286_s3 + $0xfd8] sm:$0xff]  ;;  %v7792_v51 = vpop.f32.mrf.mxu0 }
 0x1dd   :  { %4764 = vmatprep.subr.mxu0 %v2270_v45  ;;  %4795 = vmatprep.subr.mxu1 %v2304_v1  ;;  %v2262_v45 = vld [vmem:[%s8286_s3 + $0xc80] sm:$0xff]  ;;  %v2296_v1 = vld [vmem:[%s8286_s3 + $0xd90] sm:$0xff]  ;;  %v2333_v44 = vld [vmem:[%s8286_s3 + $0xeb8] sm:$0xff] }
 0x1de   :  { %4765 = vmatpush3.msra.mxu0 %v2254_v5  ;;  %4796 = vmatpush3.msra.mxu1 %v2288_v63  ;;  %v1819_v5 = vmax.f32 %v1357_v2, %v1783_v40  ;;  %v2246_v63 = vld [vmem:[%s8286_s3 + $0xc00] sm:$0xff]  ;;  %v2353_v2 = vld [vmem:[%s8286_s3 + $0xf58] sm:$0xff] }
 0x1df   :  { %4766 = vmatprep.subr.mxu0 %v2269_v16  ;;  %4797 = vmatprep.subr.mxu1 %v2303_v9  ;;  %v2280_v16 = vld [vmem:[%s8286_s3 + $0xd10] sm:$0xff]  ;;  %v1359_v9 = vmax.f32 %v1305_v43, 0.0  ;;  %v2334_v40 = vld [vmem:[%s8286_s3 + $0xec0] sm:$0xff] }
 0x1e0   :  { %4767 = vmatpush3.msra.mxu0 %v2253_v34  ;;  %4798 = vmatpush3.msra.mxu1 %v2287_v36  ;;  %v1850_v34 = vmax.f32 %v6364_v57, %v1814_v54  ;;  %v2341_v36 = vld [vmem:[%s8286_s3 + $0xef8] sm:$0xff]  ;;  %v1855_v57 = vmax.f32 %v6376_v29, %v1819_v5  ;;  %v2339_v29 = vld [vmem:[%s8286_s3 + $0xee8] sm:$0xff]  ;;  %v2352_v43 = vld [vmem:[%s8286_s3 + $0xf50] sm:$0xff] }
 0x1e1   :  { %4768 = vmatprep.subr.mxu0 %v2268_v13  ;;  %4799 = vmatprep.subr.mxu1 %v2302_v58  ;;  %v2279_v13 = vld [vmem:[%s8286_s3 + $0xd08] sm:$0xff]  ;;  %v1816_v58 = vmax.f32 %v1354_v39, %v1780_v0  ;;  %v2332_v39 = vld [vmem:[%s8286_s3 + $0xeb0] sm:$0xff]  ;;  %v2366_v0 = vld [vmem:[%s8286_s3 + $0xfc0] sm:$0xff] }
 0x1e2   :  { %4769 = vmatpush3.msra.mxu0 %v2252_v38  ;;  %4800 = vmatpush3.msra.mxu1 %v2286_v7  ;;  %v2325_v38 = vld [vmem:[%s8286_s3 + $0xe78] sm:$0xff]  ;;  %v2294_v7 = vld [vmem:[%s8286_s3 + $0xd80] sm:$0xff]  ;;  %v2331_v5 = vld [vmem:[%s8286_s3 + $0xea8] sm:$0xff] }
 0x1e3   :  { %4770 = vmatprep.subr.mxu0 %v2267_v20  ;;  %4801 = vmatprep.subr.mxu1 %v2301_v19  ;;  %v2340_v20 = vld [vmem:[%s8286_s3 + $0xef0] sm:$0xff]  ;;  %v1821_v19 = vmax.f32 %v1359_v9, %v1785_v60  ;;  %v1716_v9 = vadd.f32 %v7450_v27, %v7634_v35 }
 0x1e4   :  { %4771 = vmatpush3.msra.mxu0 %v2251_v12  ;;  %4802 = vmatpush3.msra.mxu1 %v2285_v15  ;;  %v1852_v12 = vmax.f32 %v6372_v17, %v1816_v58  ;;  %v2373_v15 = vld [vmem:[%s8286_s3 + $0xff8] sm:$0xff]  ;;  %v2364_v35 = vld [vmem:[%s8286_s3 + $0xfb0] sm:$0xff] }
 0x1e5   :  { %4772 = vmatprep.subr.mxu0 %v2266_v14  ;;  %4803 = vmatprep.subr.mxu1 %v2300_v59  ;;  %v2323_v14 = vld [vmem:[%s8286_s3 + $0xe68] sm:$0xff]  ;;  %v2357_v59 = vld [vmem:[%s8286_s3 + $0xf78] sm:$0xff]  ;;  %v1857_v17 = vmax.f32 %v6384_v53, %v1821_v19 }
 0x1e6   :  { %4773 = vmatpush3.msra.mxu0 %v2250_v24  ;;  %4804 = vmatpush3.msra.mxu1 %v2284_v28  ;;  %v2322_v24 = vld [vmem:[%s8286_s3 + $0xe60] sm:$0xff]  ;;  %v2356_v28 = vld [vmem:[%s8286_s3 + $0xf70] sm:$0xff]  ;;  %v2337_v53 = vld [vmem:[%s8286_s3 + $0xed8] sm:$0xff] }
 0x1e7   :  { %4774 = vmatprep.subr.mxu0 %v2265_v32  ;;  %4805 = vmatprep.subr.mxu1 %v2299_v46  ;;  %v2371_v32 = vld [vmem:[%s8286_s3 + $0xfe8] sm:$0xff]  ;;  %v2321_v46 = vld [vmem:[%s8286_s3 + $0xe58] sm:$0xff] }
 0x1e8   :  { %4775 = vmatpush3.msra.mxu0 %v2249_v42  ;;  %4806 = vmatpush3.msra.mxu1 %v2283_v52  ;;  %v2354_v42 = vld [vmem:[%s8286_s3 + $0xf60] sm:$0xff]  ;;  %v2335_v52 = vld [vmem:[%s8286_s3 + $0xec8] sm:$0xff] }
 0x1e9   :  { %4776 = vmatprep.subr.mxu0 %v2264_v61  ;;  %4807 = vmatprep.subr.mxu1 %v2298_v10  ;;  %v7794_v61 = vpop.f32.mrf.mxu1  ;;  %v2319_v10 = vld [vmem:[%s8286_s3 + $0xe48] sm:$0xff] }
 0x1ea   :  { %4777 = vmatpush3.msra.mxu0 %v2248_v23  ;;  %4808 = vmatpush3.msra.mxu1 %v2282_v8  ;;  %v2368_v23 = vld [vmem:[%s8286_s3 + $0xfd0] sm:$0xff]  ;;  %v2318_v8 = vld [vmem:[%s8286_s3 + $0xe40] sm:$0xff] }
 0x1eb   :  { %4778 = vmatprep.subr.mxu0 %v2263_v25  ;;  %4809 = vmatprep.subr.mxu1 %v2297_v50  ;;  %v2367_v25 = vld [vmem:[%s8286_s3 + $0xfc8] sm:$0xff]  ;;  %v5194_v50 = vpop.f32.mrf.mxu0  ;;  %v5262_v54 = vpop.f32.mrf.mxu1 }
 0x1ec   :  { %4779 = vmatpush3.msra.mxu0 %v2247_v62  ;;  %4810 = vmatpush3.msra.mxu1 %v2281_v55  ;;  %v2317_v62 = vld [vmem:[%s8286_s3 + $0xe38] sm:$0xff]  ;;  %v2351_v55 = vld [vmem:[%s8286_s3 + $0xf48] sm:$0xff]  ;;  %v1741_v58 = vadd.f32 %v7450_v27, %v5262_v54 }
 0x1ed   :  { %4780 = vmatprep.subr.mxu0 %v2262_v45  ;;  %4811 = vmatprep.subr.mxu1 %v2296_v1  ;;  %v2316_v45 = vld [vmem:[%s8286_s3 + $0xe30] sm:$0xff]  ;;  %v2350_v1 = vld [vmem:[%s8286_s3 + $0xf40] sm:$0xff]  ;;  %v7848_v60 = vpop.f32.mrf.mxu0 }
 0x1ee   :  { %4781 = vmatpush3.msra.mxu0 %v2246_v63  ;;  %4812 = vmatpush3.msra.mxu1 %v2280_v16  ;;  %v2365_v63 = vld [vmem:[%s8286_s3 + $0xfb8] sm:$0xff]  ;;  %v1290_v16 = vadd.f32 %v7450_v27, %v7632_v56  ;;  %v2330_v56 = vld [vmem:[%s8286_s3 + $0xea0] sm:$0xff] }
 0x1ef   :  { %3350 = vmatmul.mubr.f32.vlgmr.msra.gmra.mxu0 %v1850_v34  ;;  %4813 = vmatprep.subr.mxu1 %v2295_v18  ;;  %v7850_v18 = vpop.f32.mrf.mxu1  ;;  %v2315_v34 = vld [vmem:[%s8286_s3 + $0xe28] sm:$0xff] }
 0x1f0   :  { %4820 = vmatprep.subr.mxu0 %v2341_v36  ;;  %4814 = vmatpush3.msra.mxu1 %v2279_v13  ;;  %v2349_v36 = vld [vmem:[%s8286_s3 + $0xf38] sm:$0xff]  ;;  %v1315_v13 = vadd.f32 %v7450_v27, %v5194_v50  ;;  %v1356_v19 = vmax.f32 %v1290_v16, 0.0  ;;  %v2343_v50 = vld [vmem:[%s8286_s3 + $0xf08] sm:$0xff] }
 0x1f1   :  { %4821 = vmatpush3.msra.mxu0 %v2325_v38  ;;  %3489 = vmatprep.mubr.f32.mxu0 %v1855_v57  ;;  %v2314_v38 = vld [vmem:[%s8286_s3 + $0xe20] sm:$0xff]  ;;  %v2348_v57 = vld [vmem:[%s8286_s3 + $0xf30] sm:$0xff]  ;;  %v2387_v16 = vld [vmem:[%s8286_s3 + $0x1068] sm:$0xff] }
 0x1f2   :  { %4815 = vmatprep.subr.mxu1 %v2294_v7  ;;  %4822 = vmatprep.subr.mxu0 %v2340_v20  ;;  %v2329_v7 = vld [vmem:[%s8286_s3 + $0xe98] sm:$0xff]  ;;  %v2363_v20 = vld [vmem:[%s8286_s3 + $0xfa8] sm:$0xff] }
 0x1f3   :  { %4816 = vmatpush3.msra.mxu1 %v2278_v21  ;;  %4823 = vmatpush3.msra.mxu0 %v2324_v26  ;;  %v1782_v21 = vmax.f32 %v1716_v9, 0.0  ;;  %v5197_v26 = vpop.f32.mrf.mxu0  ;;  %v2421_v9 = vld [vmem:[%s8286_s3 + $0x1178] sm:$0xff] }
 0x1f4   :  { %3420 = vmatmul.mubr.f32.vlgmr.msra.gmra.mxu1 %v1852_v12  ;;  %4824 = vmatprep.subr.mxu0 %v2339_v29  ;;  %v5265_v29 = vpop.f32.mrf.mxu1  ;;  %v2313_v12 = vld [vmem:[%s8286_s3 + $0xe18] sm:$0xff] }
 0x1f5   :  { %4855 = vmatprep.subr.mxu1 %v2373_v15  ;;  %4825 = vmatpush3.msra.mxu0 %v2323_v14  ;;  %v2347_v15 = vld [vmem:[%s8286_s3 + $0xf28] sm:$0xff]  ;;  %v1300_v14 = vadd.f32 %v7450_v27, %v7792_v51  ;;  %v2326_v51 = vld [vmem:[%s8286_s3 + $0xe80] sm:$0xff] }
 0x1f6   :  { %4856 = vmatpush3.msra.mxu1 %v2357_v59  ;;  %3559 = vmatprep.mubr.f32.mxu1 %v1857_v17  ;;  %v1726_v59 = vadd.f32 %v7450_v27, %v7794_v61  ;;  %v2328_v17 = vld [vmem:[%s8286_s3 + $0xe90] sm:$0xff] }
 0x1f7   :  { %4826 = vmatprep.subr.mxu0 %v2338_v48  ;;  %4857 = vmatprep.subr.mxu1 %v2372_v31  ;;  %v2362_v48 = vld [vmem:[%s8286_s3 + $0xfa0] sm:$0xff]  ;;  %v1361_v31 = vmax.f32 %v1315_v13, 0.0  ;;  %v2360_v61 = vld [vmem:[%s8286_s3 + $0xf90] sm:$0xff]  ;;  %v2435_v13 = vld [vmem:[%s8286_s3 + $0x11e8] sm:$0xff] }
 0x1f8   :  { %4827 = vmatpush3.msra.mxu0 %v2322_v24  ;;  %4858 = vmatpush3.msra.mxu1 %v2356_v28  ;;  %v1787_v24 = vmax.f32 %v1741_v58, 0.0  ;;  %v2312_v28 = vld [vmem:[%s8286_s3 + $0xe10] sm:$0xff]  ;;  %v2385_v58 = vld [vmem:[%s8286_s3 + $0x1058] sm:$0xff] }
 0x1f9   :  { %4828 = vmatprep.subr.mxu0 %v2337_v53  ;;  %4859 = vmatprep.subr.mxu1 %v2371_v32  ;;  %v2346_v53 = vld [vmem:[%s8286_s3 + $0xf20] sm:$0xff]  ;;  %v1325_v32 = vadd.f32 %v7450_v27, %v5197_v26  ;;  %v2433_v26 = vld [vmem:[%s8286_s3 + $0x11d8] sm:$0xff] }
 0x1fa   :  { %4829 = vmatpush3.msra.mxu0 %v2321_v46  ;;  %4860 = vmatpush3.msra.mxu1 %v2355_v33  ;;  %v1751_v46 = vadd.f32 %v7450_v27, %v5265_v29  ;;  %v2327_v33 = vld [vmem:[%s8286_s3 + $0xe88] sm:$0xff] }
 0x1fb   :  { %4830 = vmatprep.subr.mxu0 %v2336_v11  ;;  %4861 = vmatprep.subr.mxu1 %v2370_v37  ;;  %v2361_v11 = vld [vmem:[%s8286_s3 + $0xf98] sm:$0xff]  ;;  %v1818_v37 = vmax.f32 %v1356_v19, %v1782_v21  ;;  %v2418_v19 = vld [vmem:[%s8286_s3 + $0x1160] sm:$0xff]  ;;  %v2399_v21 = vld [vmem:[%s8286_s3 + $0x10c8] sm:$0xff] }
 0x1fc   :  { %4831 = vmatpush3.msra.mxu0 %v2320_v47  ;;  %4862 = vmatpush3.msra.mxu1 %v2354_v42  ;;  %v2311_v47 = vld [vmem:[%s8286_s3 + $0xe08] sm:$0xff]  ;;  %v2345_v42 = vld [vmem:[%s8286_s3 + $0xf18] sm:$0xff] }
 0x1fd   :  { %4832 = vmatprep.subr.mxu0 %v2335_v52  ;;  %4863 = vmatprep.subr.mxu1 %v2369_v6  ;;  %v1358_v52 = vmax.f32 %v1300_v14, 0.0  ;;  %v1784_v6 = vmax.f32 %v1726_v59, 0.0  ;;  %v2383_v29 = vld [vmem:[%s8286_s3 + $0x1048] sm:$0xff]  ;;  %v2432_v14 = vld [vmem:[%s8286_s3 + $0x11d0] sm:$0xff]  ;;  %v2382_v59 = vld [vmem:[%s8286_s3 + $0x1040] sm:$0xff] }
 0x1fe   :  { %4833 = vmatpush3.msra.mxu0 %v2319_v10  ;;  %4864 = vmatpush3.msra.mxu1 %v2353_v2  ;;  %v1823_v10 = vmax.f32 %v1361_v31, %v1787_v24  ;;  %v2310_v2 = vld [vmem:[%s8286_s3 + $0xe00] sm:$0xff]  ;;  %v2431_v31 = vld [vmem:[%s8286_s3 + $0x11c8] sm:$0xff]  ;;  %v2381_v24 = vld [vmem:[%s8286_s3 + $0x1038] sm:$0xff] }
 0x1ff   :  { %4834 = vmatprep.subr.mxu0 %v2334_v40  ;;  %4865 = vmatprep.subr.mxu1 %v2368_v23  ;;  %v2344_v40 = vld [vmem:[%s8286_s3 + $0xf10] sm:$0xff]  ;;  %v1363_v23 = vmax.f32 %v1325_v32, 0.0  ;;  %v1820_v54 = vmax.f32 %v1358_v52, %v1784_v6  ;;  %v2430_v32 = vld [vmem:[%s8286_s3 + $0x11c0] sm:$0xff]  ;;  %v2379_v52 = vld [vmem:[%s8286_s3 + $0x1028] sm:$0xff] }
 0x200   :  { %4835 = vmatpush3.msra.mxu0 %v2318_v8  ;;  %4866 = vmatpush3.msra.mxu1 %v2352_v43  ;;  %v1789_v8 = vmax.f32 %v1751_v46, 0.0  ;;  %v2359_v43 = vld [vmem:[%s8286_s3 + $0xf88] sm:$0xff]  ;;  %v2380_v46 = vld [vmem:[%s8286_s3 + $0x1030] sm:$0xff]  ;;  %v2413_v6 = vld [vmem:[%s8286_s3 + $0x1138] sm:$0xff] }
 0x201   :  { %4836 = vmatprep.subr.mxu0 %v2333_v44  ;;  %4867 = vmatprep.subr.mxu1 %v2367_v25  ;;  %v1854_v44 = vmax.f32 %v6382_v49, %v1818_v37  ;;  %v2405_v25 = vld [vmem:[%s8286_s3 + $0x10f8] sm:$0xff]  ;;  %v1859_v49 = vmax.f32 %v6394_v22, %v1823_v10  ;;  %v2403_v22 = vld [vmem:[%s8286_s3 + $0x10e8] sm:$0xff]  ;;  %v2378_v10 = vld [vmem:[%s8286_s3 + $0x1020] sm:$0xff] }
 0x202   :  { %4837 = vmatpush3.msra.mxu0 %v2317_v62  ;;  %4868 = vmatpush3.msra.mxu1 %v2351_v55  ;;  %v2389_v62 = vld [vmem:[%s8286_s3 + $0x1078] sm:$0xff]  ;;  %v2358_v55 = vld [vmem:[%s8286_s3 + $0xf80] sm:$0xff] }
 0x203   :  { %4838 = vmatprep.subr.mxu0 %v2332_v39  ;;  %4869 = vmatprep.subr.mxu1 %v2366_v0  ;;  %v2404_v39 = vld [vmem:[%s8286_s3 + $0x10f0] sm:$0xff]  ;;  %v1825_v0 = vmax.f32 %v1363_v23, %v1789_v8  ;;  %v2429_v37 = vld [vmem:[%s8286_s3 + $0x11b8] sm:$0xff]  ;;  %v2427_v23 = vld [vmem:[%s8286_s3 + $0x11a8] sm:$0xff] }
 0x204   :  { %4839 = vmatpush3.msra.mxu0 %v2316_v45  ;;  %4870 = vmatpush3.msra.mxu1 %v2350_v1  ;;  %v2342_v45 = vld [vmem:[%s8286_s3 + $0xf00] sm:$0xff]  ;;  %v2388_v1 = vld [vmem:[%s8286_s3 + $0x1070] sm:$0xff] }
 0x205   :  { %4840 = vmatprep.subr.mxu0 %v2331_v5  ;;  %4871 = vmatprep.subr.mxu1 %v2365_v63  ;;  %v1856_v5 = vmax.f32 %v6388_v3, %v1820_v54  ;;  %v2437_v63 = vld [vmem:[%s8286_s3 + $0x11f8] sm:$0xff]  ;;  %v1861_v3 = vmax.f32 %v6400_v41, %v1825_v0  ;;  %v2411_v54 = vld [vmem:[%s8286_s3 + $0x1128] sm:$0xff] }
 0x206   :  { %4841 = vmatpush3.msra.mxu0 %v2315_v34  ;;  %4872 = vmatpush3.msra.mxu1 %v2349_v36  ;;  %v2402_v34 = vld [vmem:[%s8286_s3 + $0x10e0] sm:$0xff]  ;;  %v2436_v36 = vld [vmem:[%s8286_s3 + $0x11f0] sm:$0xff]  ;;  %v2401_v41 = vld [vmem:[%s8286_s3 + $0x10d8] sm:$0xff] }
 0x207   :  { %4842 = vmatprep.subr.mxu0 %v2330_v56  ;;  %4873 = vmatprep.subr.mxu1 %v2364_v35  ;;  %v2386_v56 = vld [vmem:[%s8286_s3 + $0x1060] sm:$0xff]  ;;  %v2420_v35 = vld [vmem:[%s8286_s3 + $0x1170] sm:$0xff]  ;;  %v2425_v0 = vld [vmem:[%s8286_s3 + $0x1198] sm:$0xff] }
 0x208   :  { %4843 = vmatpush3.msra.mxu0 %v2314_v38  ;;  %4874 = vmatpush3.msra.mxu1 %v2348_v57  ;;  %v2419_v38 = vld [vmem:[%s8286_s3 + $0x1168] sm:$0xff]  ;;  %v2400_v57 = vld [vmem:[%s8286_s3 + $0x10d0] sm:$0xff] }
 0x209   :  { %4844 = vmatprep.subr.mxu0 %v2329_v7  ;;  %4875 = vmatprep.subr.mxu1 %v2363_v20  ;;  %v2434_v7 = vld [vmem:[%s8286_s3 + $0x11e0] sm:$0xff]  ;;  %v2384_v20 = vld [vmem:[%s8286_s3 + $0x1050] sm:$0xff] }
 0x20a   :  { %4845 = vmatpush3.msra.mxu0 %v2313_v12  ;;  %4876 = vmatpush3.msra.mxu1 %v2347_v15  ;;  %v2417_v12 = vld [vmem:[%s8286_s3 + $0x1158] sm:$0xff]  ;;  %v2398_v15 = vld [vmem:[%s8286_s3 + $0x10c0] sm:$0xff] }
 0x20b   :  { %4846 = vmatprep.subr.mxu0 %v2328_v17  ;;  %4877 = vmatprep.subr.mxu1 %v2362_v48  ;;  %v2416_v17 = vld [vmem:[%s8286_s3 + $0x1150] sm:$0xff]  ;;  %v2397_v48 = vld [vmem:[%s8286_s3 + $0x10b8] sm:$0xff] }
 0x20c   :  { %4847 = vmatpush3.msra.mxu0 %v2312_v28  ;;  %4878 = vmatpush3.msra.mxu1 %v2346_v53  ;;  %v2415_v28 = vld [vmem:[%s8286_s3 + $0x1148] sm:$0xff]  ;;  %v2396_v53 = vld [vmem:[%s8286_s3 + $0x10b0] sm:$0xff] }
 0x20d   :  { %4848 = vmatprep.subr.mxu0 %v2327_v33  ;;  %4879 = vmatprep.subr.mxu1 %v2361_v11  ;;  %v2414_v33 = vld [vmem:[%s8286_s3 + $0x1140] sm:$0xff]  ;;  %v2395_v11 = vld [vmem:[%s8286_s3 + $0x10a8] sm:$0xff] }
 0x20e   :  { %4849 = vmatpush3.msra.mxu0 %v2311_v47  ;;  %4880 = vmatpush3.msra.mxu1 %v2345_v42  ;;  %v1310_v47 = vadd.f32 %v7450_v27, %v7848_v60  ;;  %v1736_v42 = vadd.f32 %v7450_v27, %v7850_v18  ;;  %v2394_v60 = vld [vmem:[%s8286_s3 + $0x10a0] sm:$0xff]  ;;  %v2428_v18 = vld [vmem:[%s8286_s3 + $0x11b0] sm:$0xff] }
 0x20f   :  { %4850 = vmatprep.subr.mxu0 %v2326_v51  ;;  %4881 = vmatprep.subr.mxu1 %v2360_v61  ;;  %v1319_v51 = vpop.f32.mrf.mxu0  ;;  %v1745_v61 = vpop.f32.mrf.mxu1 }
 0x210   :  { %4851 = vmatpush3.msra.mxu0 %v2310_v2  ;;  %4882 = vmatpush3.msra.mxu1 %v2344_v40  ;;  %v2412_v2 = vld [vmem:[%s8286_s3 + $0x1130] sm:$0xff]  ;;  %v2393_v40 = vld [vmem:[%s8286_s3 + $0x1098] sm:$0xff]  ;;  %v1360_v8 = vmax.f32 %v1310_v47, 0.0  ;;  %v3808_v47 = vld [vmem:[%s8289_s7 + $0x40] sm:$0xff] }
 0x211   :  { %3490 = vmatmul.mubr.f32.vlgmr.msra.gmra.mxu0 %v1854_v44  ;;  %4883 = vmatprep.subr.mxu1 %v2359_v43  ;;  %v1786_v43 = vmax.f32 %v1736_v42, 0.0  ;;  %v1320_v44 = vadd.f32 %v7450_v27, %v1319_v51  ;;  %v3807_v42 = vld [vmem:[%s8289_s7 + $0x38] sm:$0xff]  ;;  %v3804_v51 = vld [vmem:[%s8289_s7 + $0x20] sm:$0xff] }
 0x212   :  { %4890 = vmatprep.subr.mxu0 %v2405_v25  ;;  %4884 = vmatpush3.msra.mxu1 %v2343_v50  ;;  %v1746_v25 = vadd.f32 %v7450_v27, %v1745_v61  ;;  %v2377_v50 = vld [vmem:[%s8286_s3 + $0x1018] sm:$0xff]  ;;  %v2426_v27 = vld [vmem:[%s8286_s3 + $0x11a0] sm:$0xff] }
 0x213   :  { %4891 = vmatpush3.msra.mxu0 %v2389_v62  ;;  %3629 = vmatprep.mubr.f32.mxu0 %v1859_v49  ;;  %v2392_v62 = vld [vmem:[%s8286_s3 + $0x1090] sm:$0xff]  ;;  %v3803_v61 = vld [vmem:[%s8289_s7 + $0x18] sm:$0xff] }
 0x214   :  { %4885 = vmatprep.subr.mxu1 %v2358_v55  ;;  %4892 = vmatprep.subr.mxu0 %v2404_v39  ;;  %v2376_v49 = vld [vmem:[%s8286_s3 + $0x1010] sm:$0xff]  ;;  %v2410_v55 = vld [vmem:[%s8286_s3 + $0x1120] sm:$0xff]  ;;  %v2391_v39 = vld [vmem:[%s8286_s3 + $0x1088] sm:$0xff] }
 0x215   :  { %4886 = vmatpush3.msra.mxu1 %v2342_v45  ;;  %4893 = vmatpush3.msra.mxu0 %v2388_v1  ;;  %v1822_v45 = vmax.f32 %v1360_v8, %v1786_v43  ;;  %v1362_v1 = vmax.f32 %v1320_v44, 0.0 }
 0x216   :  { %3560 = vmatmul.mubr.f32.vlgmr.msra.gmra.mxu1 %v1856_v5  ;;  %4894 = vmatprep.subr.mxu0 %v2403_v22  ;;  %v1788_v22 = vmax.f32 %v1746_v25, 0.0  ;;  %v2375_v5 = vld [vmem:[%s8286_s3 + $0x1008] sm:$0xff] }
 0x217   :  { %4925 = vmatprep.subr.mxu1 %v2437_v63  ;;  %4895 = vmatpush3.msra.mxu0 %v2387_v16  ;;  %v2409_v63 = vld [vmem:[%s8286_s3 + $0x1118] sm:$0xff]  ;;  %v2390_v16 = vld [vmem:[%s8286_s3 + $0x1080] sm:$0xff] }
 0x218   :  { %4926 = vmatpush3.msra.mxu1 %v2421_v9  ;;  %3699 = vmatprep.mubr.f32.mxu1 %v1861_v3  ;;  %v2424_v9 = vld [vmem:[%s8286_s3 + $0x1190] sm:$0xff]  ;;  %v2374_v3 = vld [vmem:[%s8286_s3 + $0x1000] sm:$0xff] }
 0x219   :  { %4896 = vmatprep.subr.mxu0 %v2402_v34  ;;  %4927 = vmatprep.subr.mxu1 %v2436_v36  ;;  %v2408_v34 = vld [vmem:[%s8286_s3 + $0x1110] sm:$0xff]  ;;  %v2423_v36 = vld [vmem:[%s8286_s3 + $0x1188] sm:$0xff] }
 0x21a   :  { %4897 = vmatpush3.msra.mxu0 %v2386_v56  ;;  %4928 = vmatpush3.msra.mxu1 %v2420_v35  ;;  %v1858_v56 = vmax.f32 %v6396_v30, %v1822_v45  ;;  %v1824_v35 = vmax.f32 %v1362_v1, %v1788_v22 }
 0x21b   :  { %4898 = vmatprep.subr.mxu0 %v2401_v41  ;;  %4929 = vmatprep.subr.mxu1 %v2435_v13  ;;  %v2407_v41 = vld [vmem:[%s8286_s3 + $0x1108] sm:$0xff]  ;;  %v2422_v13 = vld [vmem:[%s8286_s3 + $0x1180] sm:$0xff] }
 0x21c   :  { %4899 = vmatpush3.msra.mxu0 %v2385_v58  ;;  %4930 = vmatpush3.msra.mxu1 %v2419_v38  ;;  %v2406_v58 = vld [vmem:[%s8286_s3 + $0x1100] sm:$0xff]  ;;  %v1860_v30 = vmax.f32 %v6406_v4, %v1824_v35  ;;  %v5340_v38 = vmov 0.0   ;;  %v3719_v4 = vld [vmem:[%s8288_s5 + $0x68] sm:$0xff] }
 0x21d   :  { %4900 = vmatprep.subr.mxu0 %v2400_v57  ;;  %4931 = vmatprep.subr.mxu1 %v2434_v7  ;;  %v3721_v57 = vld [vmem:[%s8288_s5 + $0x78] sm:$0xff]  ;;  %v3720_v7 = vld [vmem:[%s8288_s5 + $0x70] sm:$0xff] }
 0x21e   :  { %4901 = vmatpush3.msra.mxu0 %v2384_v20  ;;  %4932 = vmatpush3.msra.mxu1 %v2418_v19  ;;  %v3718_v20 = vld [vmem:[%s8288_s5 + $0x60] sm:$0xff]  ;;  %v3717_v19 = vld [vmem:[%s8288_s5 + $0x58] sm:$0xff] }
 0x21f   :  { %4902 = vmatprep.subr.mxu0 %v2399_v21  ;;  %4933 = vmatprep.subr.mxu1 %v2433_v26  ;;  %v3716_v21 = vld [vmem:[%s8288_s5 + $0x50] sm:$0xff]  ;;  %v3715_v26 = vld [vmem:[%s8288_s5 + $0x48] sm:$0xff] }
 0x220   :  { %4903 = vmatpush3.msra.mxu0 %v2383_v29  ;;  %4934 = vmatpush3.msra.mxu1 %v2417_v12  ;;  %v3714_v29 = vld [vmem:[%s8288_s5 + $0x40] sm:$0xff]  ;;  %v3713_v12 = vld [vmem:[%s8288_s5 + $0x38] sm:$0xff] }
 0x221   :  { %4904 = vmatprep.subr.mxu0 %v2398_v15  ;;  %4935 = vmatprep.subr.mxu1 %v2432_v14  ;;  %v3712_v15 = vld [vmem:[%s8288_s5 + $0x30] sm:$0xff]  ;;  %v3711_v14 = vld [vmem:[%s8288_s5 + $0x28] sm:$0xff] }
 0x222   :  { %4905 = vmatpush3.msra.mxu0 %v2382_v59  ;;  %4936 = vmatpush3.msra.mxu1 %v2416_v17  ;;  %v3710_v59 = vld [vmem:[%s8288_s5 + $0x20] sm:$0xff]  ;;  %v3709_v17 = vld [vmem:[%s8288_s5 + $0x18] sm:$0xff] }
 0x223   :  { %4906 = vmatprep.subr.mxu0 %v2397_v48  ;;  %4937 = vmatprep.subr.mxu1 %v2431_v31  ;;  %v3708_v48 = vld [vmem:[%s8288_s5 + $0x10] sm:$0xff]  ;;  %v3707_v31 = vld [vmem:[%s8288_s5 + $0x8] sm:$0xff] }
 0x224   :  { %4907 = vmatpush3.msra.mxu0 %v2381_v24  ;;  %4938 = vmatpush3.msra.mxu1 %v2415_v28  ;;  %v3706_v24 = vld [vmem:[%s8288_s5] sm:$0xff]  ;;  %v3815_v28 = vld [vmem:[%s8289_s7 + $0x78] sm:$0xff] }
 0x225   :  { %4908 = vmatprep.subr.mxu0 %v2396_v53  ;;  %4939 = vmatprep.subr.mxu1 %v2430_v32  ;;  %v3814_v53 = vld [vmem:[%s8289_s7 + $0x70] sm:$0xff]  ;;  %v3813_v32 = vld [vmem:[%s8289_s7 + $0x68] sm:$0xff] }
 0x226   :  { %4909 = vmatpush3.msra.mxu0 %v2380_v46  ;;  %4940 = vmatpush3.msra.mxu1 %v2414_v33  ;;  %v3812_v46 = vld [vmem:[%s8289_s7 + $0x60] sm:$0xff]  ;;  %v3811_v33 = vld [vmem:[%s8289_s7 + $0x58] sm:$0xff] }
 0x227   :  { %4910 = vmatprep.subr.mxu0 %v2395_v11  ;;  %4941 = vmatprep.subr.mxu1 %v2429_v37  ;;  %v3810_v11 = vld [vmem:[%s8289_s7 + $0x50] sm:$0xff]  ;;  %v3809_v37 = vld [vmem:[%s8289_s7 + $0x48] sm:$0xff] }
 0x228   :  { %4911 = vmatpush3.msra.mxu0 %v2379_v52  ;;  %4942 = vmatpush3.msra.mxu1 %v2413_v6  ;;  %v3806_v52 = vld [vmem:[%s8289_s7 + $0x30] sm:$0xff]  ;;  %v3805_v6 = vld [vmem:[%s8289_s7 + $0x28] sm:$0xff] }
 0x229   :  { %4912 = vmatprep.subr.mxu0 %v2394_v60  ;;  %4943 = vmatprep.subr.mxu1 %v2428_v18  ;;  %v4362_v60 = vpop.f32.mrf.mxu0  ;;  %v4397_v18 = vpop.f32.mrf.mxu1 }
 0x22a   :  { %4913 = vmatpush3.msra.mxu0 %v2378_v10  ;;  %4944 = vmatpush3.msra.mxu1 %v2412_v2 }
 0x22b   :  { %4914 = vmatprep.subr.mxu0 %v2393_v40  ;;  %4945 = vmatprep.subr.mxu1 %v2427_v23  ;;  %v4363_v10 = vpop.f32.mrf.mxu0  ;;  %v4398_v2 = vpop.f32.mrf.mxu1 }
 0x22c   :  { %4915 = vmatpush3.msra.mxu0 %v2377_v50  ;;  %4946 = vmatpush3.msra.mxu1 %v2411_v54 }
 0x22d   :  { %4916 = vmatprep.subr.mxu0 %v2392_v62  ;;  %4947 = vmatprep.subr.mxu1 %v2426_v27  ;;  %v4432_v40 = vpop.f32.mrf.mxu0  ;;  %v4467_v23 = vpop.f32.mrf.mxu1 }
 0x22e   :  { %4917 = vmatpush3.msra.mxu0 %v2376_v49  ;;  %4948 = vmatpush3.msra.mxu1 %v2410_v55  ;;  %v4364_v49 = vadd.f32 %v4363_v10, %v4362_v60  ;;  %v4155_v55 = vld [vmem:[%s8290_s4] ss:$0 sm:$0xff] }
 0x22f   :  { %4918 = vmatprep.subr.mxu0 %v2391_v39  ;;  %4949 = vmatprep.subr.mxu1 %v2425_v0  ;;  %v4433_v8 = vpop.f32.mrf.mxu0  ;;  %v4468_v43 = vpop.f32.mrf.mxu1  ;;  %v4399_v0 = vadd.f32 %v4398_v2, %v4397_v18 }
 0x230   :  { %4919 = vmatpush3.msra.mxu0 %v2375_v5  ;;  %4950 = vmatpush3.msra.mxu1 %v2409_v63  ;;  %v2512_v22 = vadd.f32 %v4364_v49, %v4155_v55  ;;  %v4434_v5 = vadd.f32 %v4433_v8, %v4432_v40  ;;  %v4156_v49 = vld [vmem:[%s8291_s6] ss:$0 sm:$0xff] }
 0x231   :  { %4920 = vmatprep.subr.mxu0 %v2390_v16  ;;  %4951 = vmatprep.subr.mxu1 %v2424_v9  ;;  %v4502_v44 = vpop.f32.mrf.mxu0  ;;  %v4537_v25 = vpop.f32.mrf.mxu1  ;;  %v4469_v9 = vadd.f32 %v4468_v43, %v4467_v23 }
 0x232   :  { %4921 = vmatpush3.msra.mxu0 %v2374_v3  ;;  %4952 = vmatpush3.msra.mxu1 %v2408_v34  ;;  %v2582_v16 = vadd.f32 %v4399_v0, %v2512_v22 }
 0x233   :  { %3630 = vmatmul.mubr.f32.vlgmr.msra.gmra.mxu0 %v1858_v56  ;;  %4953 = vmatprep.subr.mxu1 %v2423_v36  ;;  %v4503_v50 = vpop.f32.mrf.mxu0  ;;  %v4538_v54 = vpop.f32.mrf.mxu1 }
 0x234   :  { %4954 = vmatpush3.msra.mxu1 %v2407_v41  ;;  %5266 = vmatprep.subr.mxu0 %v5340_v38  ;;  %v2652_v34 = vadd.f32 %v4434_v5, %v2582_v16  ;;  %v4504_v36 = vadd.f32 %v4503_v50, %v4502_v44 }
 0x235   :  { %4955 = vmatprep.subr.mxu1 %v2422_v13  ;;  %5267 = vmatpush3.msra.mxu0 %v3721_v57  ;;  %v4539_v13 = vadd.f32 %v4538_v54, %v4537_v25  ;;  %v3802_v54 = vld [vmem:[%s8289_s7 + $0x10] sm:$0xff] }
 0x236   :  { %4956 = vmatpush3.msra.mxu1 %v2406_v58  ;;  %5268 = vmatprep.subr.mxu0 %v5340_v38  ;;  %v2722_v41 = vadd.f32 %v4469_v9, %v2652_v34 }
 0x237   :  { %3700 = vmatmul.mubr.f32.vlgmr.msra.gmra.mxu1 %v1860_v30  ;;  %5301 = vmatprep.subr.mxu1 %v5340_v38 }
 0x238   :  { %5269 = vmatpush3.msra.mxu0 %v3720_v7  ;;  %5298 = vmatprep.mubr.msk.f32.mxu0 %vm5341_vm2, %v5340_v38  ;;  %v2792_v30 = vadd.f32 %v4504_v36, %v2722_v41 }
 0x239   :  { %5270 = vmatprep.subr.mxu0 %v5340_v38  ;;  %5333 = vmatprep.mubr.msk.f32.mxu1 %vm5341_vm2, %v5340_v38 }
 0x23a   :  { %5271 = vmatpush3.msra.mxu0 %v3719_v4  ;;  %5302 = vmatpush3.msra.mxu1 %v3815_v28  ;;  %v2862_v4 = vadd.f32 %v4539_v13, %v2792_v30 }
 0x23b   :  { %5272 = vmatprep.subr.mxu0 %v5340_v38  ;;  %5303 = vmatprep.subr.mxu1 %v5340_v38 }
 0x23c   :  { %5273 = vmatpush3.msra.mxu0 %v3718_v20  ;;  %5304 = vmatpush3.msra.mxu1 %v3814_v53 }
 0x23d   :  { %5274 = vmatprep.subr.mxu0 %v5340_v38  ;;  %5305 = vmatprep.subr.mxu1 %v5340_v38 }
 0x23e   :  { %5275 = vmatpush3.msra.mxu0 %v3717_v19  ;;  %5306 = vmatpush3.msra.mxu1 %v3813_v32 }
 0x23f   :  { %5276 = vmatprep.subr.mxu0 %v5340_v38  ;;  %5307 = vmatprep.subr.mxu1 %v5340_v38 }
 0x240   :  { %5277 = vmatpush3.msra.mxu0 %v3716_v21  ;;  %5308 = vmatpush3.msra.mxu1 %v3812_v46 }
 0x241   :  { %5278 = vmatprep.subr.mxu0 %v5340_v38  ;;  %5309 = vmatprep.subr.mxu1 %v5340_v38 }
 0x242   :  { %5279 = vmatpush3.msra.mxu0 %v3715_v26  ;;  %5310 = vmatpush3.msra.mxu1 %v3811_v33 }
 0x243   :  { %5280 = vmatprep.subr.mxu0 %v5340_v38  ;;  %5311 = vmatprep.subr.mxu1 %v5340_v38 }
 0x244   :  { %5281 = vmatpush3.msra.mxu0 %v3714_v29  ;;  %5312 = vmatpush3.msra.mxu1 %v3810_v11 }
 0x245   :  { %5282 = vmatprep.subr.mxu0 %v5340_v38  ;;  %5313 = vmatprep.subr.mxu1 %v5340_v38 }
 0x246   :  { %5283 = vmatpush3.msra.mxu0 %v3713_v12  ;;  %5314 = vmatpush3.msra.mxu1 %v3809_v37 }
 0x247   :  { %5284 = vmatprep.subr.mxu0 %v5340_v38  ;;  %5315 = vmatprep.subr.mxu1 %v5340_v38 }
 0x248   :  { %5285 = vmatpush3.msra.mxu0 %v3712_v15  ;;  %5316 = vmatpush3.msra.mxu1 %v3808_v47 }
 0x249   :  { %5286 = vmatprep.subr.mxu0 %v5340_v38  ;;  %5317 = vmatprep.subr.mxu1 %v5340_v38  ;;  %v4572_v62 = vpop.f32.mrf.mxu0 }
 0x24a   :  { %5287 = vmatpush3.msra.mxu0 %v3711_v14  ;;  %5318 = vmatpush3.msra.mxu1 %v3807_v42 }
 0x24b   :  { %5288 = vmatprep.subr.mxu0 %v5340_v38  ;;  %5319 = vmatprep.subr.mxu1 %v5340_v38  ;;  %v4573_v39 = vpop.f32.mrf.mxu0 }
 0x24c   :  { %5289 = vmatpush3.msra.mxu0 %v3710_v59  ;;  %5320 = vmatpush3.msra.mxu1 %v3806_v52  ;;  %v4574_v57 = vadd.f32 %v4573_v39, %v4572_v62  ;;  %v3801_v62 = vld [vmem:[%s8289_s7 + $0x8] sm:$0xff] }
 0x24d   :  { %5290 = vmatprep.subr.mxu0 %v5340_v38  ;;  %5321 = vmatprep.subr.mxu1 %v5340_v38 }
 0x24e   :  { %5291 = vmatpush3.msra.mxu0 %v3709_v17  ;;  %5322 = vmatpush3.msra.mxu1 %v3805_v6  ;;  %v4607_v27 = vpop.f32.mrf.mxu1  ;;  %v2932_v26 = vadd.f32 %v4574_v57, %v2862_v4 }
 0x24f   :  { %5292 = vmatprep.subr.mxu0 %v5340_v38  ;;  %5323 = vmatprep.subr.mxu1 %v5340_v38 }
 0x250   :  { %5293 = vmatpush3.msra.mxu0 %v3708_v48  ;;  %5324 = vmatpush3.msra.mxu1 %v3804_v51  ;;  %v4608_v45 = vpop.f32.mrf.mxu1 }
 0x251   :  { %5294 = vmatprep.subr.mxu0 %v5340_v38  ;;  %5325 = vmatprep.subr.mxu1 %v5340_v38  ;;  %v4609_v20 = vadd.f32 %v4608_v45, %v4607_v27  ;;  %v3800_v27 = vld [vmem:[%s8289_s7] sm:$0xff] }
 0x252   :  { %5295 = vmatpush3.msra.mxu0 %v3707_v31  ;;  %5326 = vmatpush3.msra.mxu1 %v3803_v61 }
 0x253   :  { %5296 = vmatprep.subr.mxu0 %v5340_v38  ;;  %5327 = vmatprep.subr.mxu1 %v5340_v38  ;;  %v3002_v15 = vadd.f32 %v4609_v20, %v2932_v26 }
 0x254   :  { %5297 = vmatpush3.msra.mxu0 %v3706_v24  ;;  %5328 = vmatpush3.msra.mxu1 %v3802_v54 }
 0x255   :  { %5329 = vmatprep.subr.mxu1 %v5340_v38 }
 0x256   :  { %5330 = vmatpush3.msra.mxu1 %v3801_v62 }
 0x257   :  { %5331 = vmatprep.subr.mxu1 %v5340_v38 }
 0x258   :  { %5332 = vmatpush3.msra.mxu1 %v3800_v27 }
 0x26b   :  { %v4642_v1 = vpop.f32.mrf.mxu0 }
 0x26d   :  { %v4643_v3 = vpop.f32.mrf.mxu0 }
 0x26e   :  { %v4644_v29 = vadd.f32 %v4643_v3, %v4642_v1  ;;  %v4157_v1 = vld [vmem:[%s8292_s8] ss:$0 sm:$0xff] }
 0x270   :  { %v4677_v63 = vpop.f32.mrf.mxu1  ;;  %v3072_v17 = vadd.f32 %v4644_v29, %v3002_v15 }
 0x272   :  { %v4678_v56 = vpop.f32.mrf.mxu1 }
 0x273   :  { %v4679_v14 = vadd.f32 %v4678_v56, %v4677_v63 }
 0x275   :  { %v3142_v28 = vadd.f32 %v4679_v14, %v3072_v17 }
 0x28d   :  { %v4712_v35 = vpop.f32.mrf.mxu0 }
 0x28f   :  { %v4713_v7 = vpop.f32.mrf.mxu0 }
 0x290   :  { %v4714_v48 = vadd.f32 %v4713_v7, %v4712_v35 }
 0x292   :  { %v4747_v58 = vpop.f32.mrf.mxu1  ;;  %v3212_v46 = vadd.f32 %v4714_v48, %v3142_v28 }
 0x294   :  { %v4748_v19 = vpop.f32.mrf.mxu1 }
 0x295   :  { %v4749_v53 = vadd.f32 %v4748_v19, %v4747_v58 }
 0x297   :  { %v3282_v37 = vadd.f32 %v4749_v53, %v3212_v46 }
 0x2af   :  { %v4782_v21 = vpop.f32.mrf.mxu0 }
 0x2b1   :  { %v4783_v59 = vpop.f32.mrf.mxu0 }
 0x2b2   :  { %v4784_v33 = vadd.f32 %v4783_v59, %v4782_v21 }
 0x2b4   :  { %v4817_v12 = vpop.f32.mrf.mxu1  ;;  %v3352_v52 = vadd.f32 %v4784_v33, %v3282_v37 }
 0x2b6   :  { %v4818_v31 = vpop.f32.mrf.mxu1 }
 0x2b7   :  { %v4819_v47 = vadd.f32 %v4818_v31, %v4817_v12 }
 0x2b9   :  { %v3422_v61 = vadd.f32 %v4819_v47, %v3352_v52 }
 0x2d1   :  { %v4852_v24 = vpop.f32.mrf.mxu0 }
 0x2d3   :  { %v4853_v11 = vpop.f32.mrf.mxu0 }
 0x2d4   :  { %v4854_v6 = vadd.f32 %v4853_v11, %v4852_v24 }
 0x2d6   :  { %v4887_v32 = vpop.f32.mrf.mxu1  ;;  %v3492_v10 = vadd.f32 %v4854_v6, %v3422_v61 }
 0x2d8   :  { %v4888_v42 = vpop.f32.mrf.mxu1 }
 0x2d9   :  { %v4889_v60 = vadd.f32 %v4888_v42, %v4887_v32 }
 0x2db   :  { %v3562_v23 = vadd.f32 %v4889_v60, %v3492_v10 }
 0x2f3   :  { %v4922_v51 = vpop.f32.mrf.mxu0 }
 0x2f5   :  { %v4923_v18 = vpop.f32.mrf.mxu0 }
 0x2f6   :  { %v4924_v2 = vadd.f32 %v4923_v18, %v4922_v51 }
 0x2f7   :  { %v4957_v40 = vpop.f32.mrf.mxu1 }
 0x2f8   :  { %v3632_v43 = vadd.f32 %v4924_v2, %v3562_v23 }
 0x2f9   :  { %v4958_v8 = vpop.f32.mrf.mxu1 }
 0x2fa   :  { %v4959_v44 = vadd.f32 %v4958_v8, %v4957_v40 }
 0x2fc   :  { %v3702_v25 = vadd.f32 %v4959_v44, %v3632_v43 }
 0x2fe   :  { %v3705_v50 = vmax.f32 %v3702_v25, 0.0 }
 0x300   :  { %5299 = vmatmul.mubr.f32.vlgmr.msra.gmra.mxu0 %v3705_v50 }
 0x3c0   :  { %v3795_v55 = vpop.f32.mrf.mxu0 }
 0x3c1   :  { %v3796_v39 = vadd.f32 %v4156_v49, %v3795_v55 }
 0x3c2   :  { %v5300_v0 = vpop.f32.mrf.mxu0 }
 0x3c3   :  { %v3799_v45 = vmax.f32 %v3796_v39, 0.0 }
 0x3c5   :  { %5334 = vmatmul.mubr.f32.vlgmr.msra.gmra.mxu1 %v3799_v45 }
 0x485   :  { %v3889_v22 = vpop.f32.mrf.mxu1 }
 0x486   :  { %v3890_v38 = vadd.f32 %v4157_v1, %v3889_v22 }
 0x487   :  { %v5335_v5 = vpop.f32.mrf.mxu1 }
 0x488   :  { %3893 = vst [vmem:[%s8293_s9] sm:$0xff] %v3890_v38 }

</bundles_post_ra>
